<compile_context>
chip_gen: v7x
topology: tpu7x:2x2x1
jax: 0.10.0
libtpu: 0.0.40
codegen_flags: <defaults>
</compile_context>

<pallas_src>
import math

import jax
import jax.numpy as jnp
from jax.experimental import pallas as pl
from jax.experimental.pallas import tpu as pltpu

_EPS = 1e-16  # DropNorm eps


def make_forward(H=16, W=16, num_classes=10):
    assert H % 4 == 0 and W % 4 == 0

    # ---- static geometry of the padded "row layout" (row = hp*Wp + wp) ----
    Wp1 = W + 2
    rows1 = (H + 2) * Wp1            # padded input rows (e.g. 324)
    base1 = Wp1 + 1                  # first interior row
    L1 = (H - 1) * Wp1 + W           # contiguous row span covering all outputs

    H2, W2 = H // 2, W // 2          # after pool1
    Wp2 = W2 + 2
    rows2 = (H2 + 2) * Wp2
    base2 = Wp2 + 1
    L2 = (H2 - 1) * Wp2 + W2

    H3, W3 = H2 // 2, W2 // 2        # after pool2
    Wp3 = W3 + 2
    rows3 = (H3 + 2) * Wp3
    base3 = Wp3 + 1
    L3 = (H3 - 1) * Wp3 + W3

    S3 = H3 * W3                     # spatial positions entering the classifier
    n_dn1 = H2 * W2 * 32
    n_dn2 = S3 * 64
    n_dn3 = S3 * 128

    def _dropnorm(v, g, b, nfeat):
        # eval-mode DropNorm: per-sample mean / biased variance over ALL features
        mu = jnp.sum(jnp.sum(v, axis=1, keepdims=True), axis=0, keepdims=True) / nfeat
        d = v - mu
        var = jnp.sum(jnp.sum(d * d, axis=1, keepdims=True),
                      axis=0, keepdims=True) / nfeat
        return g * (d * jax.lax.rsqrt(var + _EPS)) + b

    def kernel(x_ref, w1_ref, b1_ref, g1_ref, be1_ref,
               w2_ref, b2_ref, g2_ref, be2_ref,
               w3_ref, b3_ref, g3_ref, be3_ref,
               fw1_ref, fb1_ref, fg_ref, fbe_ref, fw2_ref, fb2_ref,
               o_ref,
               s1, p1, s2, s2o, p2, s3, s3o, p3):
        # conv2 / conv3 padded inputs: padding rows must stay zero.
        s2[...] = jnp.zeros_like(s2)
        s3[...] = jnp.zeros_like(s3)

        # ---- conv1 (1 -> 32) + ReLU: 9 shifted VPU broadcast-FMAs ----------
        acc = None
        for t in range(9):
            ky, kx = t // 3, t % 3
            off = base1 + (ky - 1) * Wp1 + (kx - 1)
            tap = x_ref[pl.ds(off, L1), :]               # (L1, 1)
            contrib = tap * w1_ref[pl.ds(t, 1), :]       # (L1, 32)
            acc = contrib if acc is None else acc + contrib
        s1[pl.ds(0, L1), :] = jnp.maximum(acc + b1_ref[...], 0.0)

        # ---- maxpool 2x2 -> p1 (H2*W2, 32), rows ordered (i, j) ------------
        for i in range(H2):
            r = 2 * i * Wp1
            t00 = s1[pl.ds(r, W2, stride=2), :]
            t01 = s1[pl.ds(r + 1, W2, stride=2), :]
            t10 = s1[pl.ds(r + Wp1, W2, stride=2), :]
            t11 = s1[pl.ds(r + Wp1 + 1, W2, stride=2), :]
            p1[pl.ds(i * W2, W2), :] = jnp.maximum(jnp.maximum(t00, t01),
                                                   jnp.maximum(t10, t11))

        # ---- DropNorm 1 (eval), scatter into padded conv2 input ------------
        p1[...] = _dropnorm(p1[...], g1_ref[...], be1_ref[...], float(n_dn1))
        for i in range(H2):
            s2[pl.ds((i + 1) * Wp2 + 1, W2), :] = p1[pl.ds(i * W2, W2), :]

        # ---- conv2 (32 -> 64) + ReLU: 9 shifted MXU matmuls (K=32) ---------
        acc = None
        for t in range(9):
            ky, kx = t // 3, t % 3
            off = base2 + (ky - 1) * Wp2 + (kx - 1)
            c = jnp.dot(s2[pl.ds(off, L2), :], w2_ref[pl.ds(32 * t, 32), :],
                        preferred_element_type=jnp.float32)
            acc = c if acc is None else acc + c
        s2o[pl.ds(0, L2), :] = jnp.maximum(acc + b2_ref[...], 0.0)

        # ---- maxpool 2x2 -> p2 (H3*W3, 64) ----------------------------------
        for i in range(H3):
            r = 2 * i * Wp2
            t00 = s2o[pl.ds(r, W3, stride=2), :]
            t01 = s2o[pl.ds(r + 1, W3, stride=2), :]
            t10 = s2o[pl.ds(r + Wp2, W3, stride=2), :]
            t11 = s2o[pl.ds(r + Wp2 + 1, W3, stride=2), :]
            p2[pl.ds(i * W3, W3), :] = jnp.maximum(jnp.maximum(t00, t01),
                                                   jnp.maximum(t10, t11))

        # ---- DropNorm 2, scatter into padded conv3 input --------------------
        p2[...] = _dropnorm(p2[...], g2_ref[...], be2_ref[...], float(n_dn2))
        for i in range(H3):
            s3[pl.ds((i + 1) * Wp3 + 1, W3), :] = p2[pl.ds(i * W3, W3), :]

        # ---- conv3 (64 -> 128) + ReLU: 9 shifted MXU matmuls (K=64) ---------
        acc = None
        for t in range(9):
            ky, kx = t // 3, t % 3
            off = base3 + (ky - 1) * Wp3 + (kx - 1)
            c = jnp.dot(s3[pl.ds(off, L3), :], w3_ref[pl.ds(64 * t, 64), :],
                        preferred_element_type=jnp.float32)
            acc = c if acc is None else acc + c
        s3o[pl.ds(0, L3), :] = jnp.maximum(acc + b3_ref[...], 0.0)

        # gather the H3 x W3 valid rows (NHWC order) -> p3 (S3, 128)
        for h in range(H3):
            p3[pl.ds(h * W3, W3), :] = s3o[pl.ds(h * Wp3, W3), :]

        # ---- DropNorm 3 ------------------------------------------------------
        p3[...] = _dropnorm(p3[...], g3_ref[...], be3_ref[...], float(n_dn3))

        # ---- classifier: fc1 (S3*128 -> 256) as S3 accumulated matmuls ------
        # fw1 rows are pre-permuted to NHWC flatten order (s*128 + c), so no
        # runtime transpose / flatten relayout is needed.
        acc = None
        for s in range(S3):
            c = jnp.dot(p3[pl.ds(s, 1), :], fw1_ref[pl.ds(128 * s, 128), :],
                        preferred_element_type=jnp.float32)
            acc = c if acc is None else acc + c
        h1 = jnp.maximum(acc + fb1_ref[...], 0.0)                     # (1, 256)
        h1 = _dropnorm(h1, fg_ref[...], fbe_ref[...], 256.0)
        o_ref[...] = (jnp.dot(h1, fw2_ref[...], preferred_element_type=jnp.float32)
                      + fb2_ref[...])

    def full(shape):
        # whole (small) parameter array resident in VMEM, same block every step
        return pl.BlockSpec(shape, lambda b: (0,) * len(shape))

    in_specs = [
        pl.BlockSpec((None, rows1, 1), lambda b: (b, 0, 0)),   # padded input (per sample)
        full((9, 32)), full((1, 32)),
        full((H2 * W2, 32)), full((H2 * W2, 32)),
        full((9 * 32, 64)), full((1, 64)),
        full((S3, 64)), full((S3, 64)),
        full((9 * 64, 128)), full((1, 128)),
        full((S3, 128)), full((S3, 128)),
        full((S3 * 128, 256)), full((1, 256)),
        full((1, 256)), full((1, 256)),
        full((256, num_classes)), full((1, num_classes)),
    ]

    scratch = [
        pltpu.VMEM((L1 + 2, 32), jnp.float32),    # s1 : conv1 output (row layout)
        pltpu.VMEM((H2 * W2, 32), jnp.float32),   # p1 : pooled1 / DropNorm1
        pltpu.VMEM((rows2, 32), jnp.float32),     # s2 : padded conv2 input
        pltpu.VMEM((L2 + 2, 64), jnp.float32),    # s2o: conv2 output
        pltpu.VMEM((S3, 64), jnp.float32),        # p2 : pooled2 / DropNorm2
        pltpu.VMEM((rows3, 64), jnp.float32),     # s3 : padded conv3 input
        pltpu.VMEM((L3 + 2, 128), jnp.float32),   # s3o: conv3 output
        pltpu.VMEM((S3, 128), jnp.float32),       # p3 : conv3 valid rows / DropNorm3
    ]

    @jax.jit
    def forward(params, x_nchw):
        N, cin = x_nchw.shape[0], x_nchw.shape[1]
        assert cin == 1
        x = x_nchw.reshape(N, H, W)
        xpad = jnp.pad(x, ((0, 0), (1, 1), (1, 1))).reshape(N, rows1, 1)
        out = pl.pallas_call(
            kernel,
            out_shape=jax.ShapeDtypeStruct((N, 1, num_classes), jnp.float32),
            grid=(N,),
            in_specs=in_specs,
            out_specs=pl.BlockSpec((None, 1, num_classes), lambda b: (b, 0, 0)),
            scratch_shapes=scratch,
            compiler_params=pltpu.CompilerParams(
                dimension_semantics=("parallel",)),
        )(xpad, params["w1"], params["b1"], params["g1"], params["be1"],
          params["w2"], params["b2"], params["g2"], params["be2"],
          params["w3"], params["b3"], params["g3"], params["be3"],
          params["fw1"], params["fb1"], params["fg"], params["fbe"],
          params["fw2"], params["fb2"])
        return out.reshape(N, num_classes)

    return forward


def init_params(key, input_hw=(16, 16), num_classes=10):
    H, W = input_hw
    H2, W2, H3, W3 = H // 2, W // 2, H // 4, W // 4
    ks = jax.random.split(key, 5)

    def conv_w(k, cin, cout):
        # Rows ordered (ky, kx, cin) -- matches the kernel's 9 shifted taps.
        # (Equivalent to torch conv weight.permute(2, 3, 1, 0).reshape(9*cin, cout).)
        w = jax.random.normal(k, (3, 3, cin, cout), jnp.float32) / math.sqrt(9 * cin)
        return w.reshape(9 * cin, cout)

    def lin_w(k, fin, fout):
        return jax.random.normal(k, (fin, fout), jnp.float32) / math.sqrt(fin)

    return {
        "w1": conv_w(ks[0], 1, 32), "b1": jnp.zeros((1, 32), jnp.float32),
        # DropNorm gamma/beta stored pre-permuted to the kernel's (H*W, C)
        # layout (torch keeps (C, H, W); permute once at init, never at runtime).
        "g1": jnp.ones((H2 * W2, 32), jnp.float32),
        "be1": jnp.zeros((H2 * W2, 32), jnp.float32),
        "w2": conv_w(ks[1], 32, 64), "b2": jnp.zeros((1, 64), jnp.float32),
        "g2": jnp.ones((H3 * W3, 64), jnp.float32),
        "be2": jnp.zeros((H3 * W3, 64), jnp.float32),
        "w3": conv_w(ks[2], 64, 128), "b3": jnp.zeros((1, 128), jnp.float32),
        "g3": jnp.ones((H3 * W3, 128), jnp.float32),
        "be3": jnp.zeros((H3 * W3, 128), jnp.float32),
        # fc1 rows pre-permuted to NHWC flatten order ((h*W3 + w)*128 + c);
        # equivalent to permuting torch's NCHW-flatten rows once at init.
        "fw1": lin_w(ks[3], H3 * W3 * 128, 256),
        "fb1": jnp.zeros((1, 256), jnp.float32),
        "fg": jnp.ones((1, 256), jnp.float32),
        "fbe": jnp.zeros((1, 256), jnp.float32),
        "fw2": lin_w(ks[4], 256, num_classes),
        "fb2": jnp.zeros((1, num_classes), jnp.float32),
    }


if __name__ == "__main__":
    key = jax.random.PRNGKey(0)
    k_x, k_p = jax.random.split(key)
    # MNIST-like small shapes: batch=2, 1 channel, 16x16 spatial (16 -> 8 -> 4).
    x = jax.random.normal(k_x, (2, 1, 16, 16), jnp.float32)
    params = init_params(k_p, input_hw=(16, 16), num_classes=10)

    forward = make_forward(H=16, W=16, num_classes=10)
    out = jax.block_until_ready(forward(params, x))

    assert out.shape == (2, 10), out.shape
    assert bool(jnp.all(jnp.isfinite(out)))
    print("KERNEL_OK")
</pallas_src>

<mosaic_0001>
module attributes {stable_mosaic.version = 11 : i64} {
  func.func @kernel(%arg0: i32, %arg1: memref<1x324x1xf32, #tpu.memory_space<vmem>>, %arg2: memref<9x32xf32, #tpu.memory_space<vmem>>, %arg3: memref<1x32xf32, #tpu.memory_space<vmem>>, %arg4: memref<64x32xf32, #tpu.memory_space<vmem>>, %arg5: memref<64x32xf32, #tpu.memory_space<vmem>>, %arg6: memref<288x64xf32, #tpu.memory_space<vmem>>, %arg7: memref<1x64xf32, #tpu.memory_space<vmem>>, %arg8: memref<16x64xf32, #tpu.memory_space<vmem>>, %arg9: memref<16x64xf32, #tpu.memory_space<vmem>>, %arg10: memref<576x128xf32, #tpu.memory_space<vmem>>, %arg11: memref<1x128xf32, #tpu.memory_space<vmem>>, %arg12: memref<16x128xf32, #tpu.memory_space<vmem>>, %arg13: memref<16x128xf32, #tpu.memory_space<vmem>>, %arg14: memref<2048x256xf32, #tpu.memory_space<vmem>>, %arg15: memref<1x256xf32, #tpu.memory_space<vmem>>, %arg16: memref<1x256xf32, #tpu.memory_space<vmem>>, %arg17: memref<1x256xf32, #tpu.memory_space<vmem>>, %arg18: memref<256x10xf32, #tpu.memory_space<vmem>>, %arg19: memref<1x10xf32, #tpu.memory_space<vmem>>, %arg20: memref<1x1x10xf32, #tpu.memory_space<vmem>>, %arg21: memref<288x32xf32, #tpu.memory_space<vmem>>, %arg22: memref<64x32xf32, #tpu.memory_space<vmem>>, %arg23: memref<100x32xf32, #tpu.memory_space<vmem>>, %arg24: memref<80x64xf32, #tpu.memory_space<vmem>>, %arg25: memref<16x64xf32, #tpu.memory_space<vmem>>, %arg26: memref<36x64xf32, #tpu.memory_space<vmem>>, %arg27: memref<24x128xf32, #tpu.memory_space<vmem>>, %arg28: memref<16x128xf32, #tpu.memory_space<vmem>>) attributes {dimension_semantics = [#tpu.dimension_semantics<parallel>], iteration_bounds = array<i64: 2>, scalar_prefetch = 0 : i64, scratch_operands = 8 : i64, tpu.core_type = #tpu.core_type<tc>, window_params = [{transform_indices = @transform_0, window_bounds = array<i64: 1, 324, 1>}, {pipeline_mode = #tpu.pipeline_mode<synchronous>, transform_indices = @transform_1, window_bounds = array<i64: 9, 32>}, {pipeline_mode = #tpu.pipeline_mode<synchronous>, transform_indices = @transform_2, window_bounds = array<i64: 1, 32>}, {pipeline_mode = #tpu.pipeline_mode<synchronous>, transform_indices = @transform_3, window_bounds = array<i64: 64, 32>}, {pipeline_mode = #tpu.pipeline_mode<synchronous>, transform_indices = @transform_4, window_bounds = array<i64: 64, 32>}, {pipeline_mode = #tpu.pipeline_mode<synchronous>, transform_indices = @transform_5, window_bounds = array<i64: 288, 64>}, {pipeline_mode = #tpu.pipeline_mode<synchronous>, transform_indices = @transform_6, window_bounds = array<i64: 1, 64>}, {pipeline_mode = #tpu.pipeline_mode<synchronous>, transform_indices = @transform_7, window_bounds = array<i64: 16, 64>}, {pipeline_mode = #tpu.pipeline_mode<synchronous>, transform_indices = @transform_8, window_bounds = array<i64: 16, 64>}, {pipeline_mode = #tpu.pipeline_mode<synchronous>, transform_indices = @transform_9, window_bounds = array<i64: 576, 128>}, {pipeline_mode = #tpu.pipeline_mode<synchronous>, transform_indices = @transform_10, window_bounds = array<i64: 1, 128>}, {pipeline_mode = #tpu.pipeline_mode<synchronous>, transform_indices = @transform_11, window_bounds = array<i64: 16, 128>}, {pipeline_mode = #tpu.pipeline_mode<synchronous>, transform_indices = @transform_12, window_bounds = array<i64: 16, 128>}, {pipeline_mode = #tpu.pipeline_mode<synchronous>, transform_indices = @transform_13, window_bounds = array<i64: 2048, 256>}, {pipeline_mode = #tpu.pipeline_mode<synchronous>, transform_indices = @transform_14, window_bounds = array<i64: 1, 256>}, {pipeline_mode = #tpu.pipeline_mode<synchronous>, transform_indices = @transform_15, window_bounds = array<i64: 1, 256>}, {pipeline_mode = #tpu.pipeline_mode<synchronous>, transform_indices = @transform_16, window_bounds = array<i64: 1, 256>}, {pipeline_mode = #tpu.pipeline_mode<synchronous>, transform_indices = @transform_17, window_bounds = array<i64: 256, 10>}, {pipeline_mode = #tpu.pipeline_mode<synchronous>, transform_indices = @transform_18, window_bounds = array<i64: 1, 10>}, {transform_indices = @transform_19, window_bounds = array<i64: 1, 1, 10>}]} {
    %cst = arith.constant 0.000000e+00 : f32
    %0 = vector.broadcast %cst : f32 to vector<100x32xf32>
    %c0 = arith.constant 0 : index
    %c0_0 = arith.constant 0 : index
    %1 = vector.load %arg23[%c0, %c0_0] : memref<100x32xf32, #tpu.memory_space<vmem>>, vector<100x32xf32>
    tpu.vector_store %arg23[%c0, %c0_0], %0 {strides = array<i32>} : memref<100x32xf32, #tpu.memory_space<vmem>>, vector<100x32xf32>,
    %cst_1 = arith.constant 0.000000e+00 : f32
    %2 = vector.broadcast %cst_1 : f32 to vector<36x64xf32>
    %c0_2 = arith.constant 0 : index
    %c0_3 = arith.constant 0 : index
    %3 = vector.load %arg26[%c0_2, %c0_3] : memref<36x64xf32, #tpu.memory_space<vmem>>, vector<36x64xf32>
    tpu.vector_store %arg26[%c0_2, %c0_3], %2 {strides = array<i32>} : memref<36x64xf32, #tpu.memory_space<vmem>>, vector<36x64xf32>,
    %c0_4 = arith.constant 0 : index
    %c0_5 = arith.constant 0 : index
    %c0_6 = arith.constant 0 : index
    %4 = vector.load %arg1[%c0_4, %c0_5, %c0_6] : memref<1x324x1xf32, #tpu.memory_space<vmem>>, vector<1x286x1xf32>
    %5 = vector.shape_cast %4 : vector<1x286x1xf32> to vector<286x1xf32>
    %c0_7 = arith.constant 0 : index
    %c0_8 = arith.constant 0 : index
    %6 = vector.load %arg2[%c0_7, %c0_8] : memref<9x32xf32, #tpu.memory_space<vmem>>, vector<1x32xf32>
    %7 = vector.broadcast %5 : vector<286x1xf32> to vector<286x32xf32>
    %8 = vector.broadcast %6 : vector<1x32xf32> to vector<286x32xf32>
    %9 = arith.mulf %7, %8 : vector<286x32xf32>
    %c0_9 = arith.constant 0 : index
    %c1 = arith.constant 1 : index
    %c0_10 = arith.constant 0 : index
    %10 = vector.load %arg1[%c0_9, %c1, %c0_10] : memref<1x324x1xf32, #tpu.memory_space<vmem>>, vector<1x286x1xf32>
    %11 = vector.shape_cast %10 : vector<1x286x1xf32> to vector<286x1xf32>
    %c1_11 = arith.constant 1 : index
    %c0_12 = arith.constant 0 : index
    %12 = vector.load %arg2[%c1_11, %c0_12] : memref<9x32xf32, #tpu.memory_space<vmem>>, vector<1x32xf32>
    %13 = vector.broadcast %11 : vector<286x1xf32> to vector<286x32xf32>
    %14 = vector.broadcast %12 : vector<1x32xf32> to vector<286x32xf32>
    %15 = arith.mulf %13, %14 : vector<286x32xf32>
    %16 = arith.addf %9, %15 : vector<286x32xf32>
    %c0_13 = arith.constant 0 : index
    %c2 = arith.constant 2 : index
    %c0_14 = arith.constant 0 : index
    %17 = vector.load %arg1[%c0_13, %c2, %c0_14] : memref<1x324x1xf32, #tpu.memory_space<vmem>>, vector<1x286x1xf32>
    %18 = vector.shape_cast %17 : vector<1x286x1xf32> to vector<286x1xf32>
    %c2_15 = arith.constant 2 : index
    %c0_16 = arith.constant 0 : index
    %19 = vector.load %arg2[%c2_15, %c0_16] : memref<9x32xf32, #tpu.memory_space<vmem>>, vector<1x32xf32>
    %20 = vector.broadcast %18 : vector<286x1xf32> to vector<286x32xf32>
    %21 = vector.broadcast %19 : vector<1x32xf32> to vector<286x32xf32>
    %22 = arith.mulf %20, %21 : vector<286x32xf32>
    %23 = arith.addf %16, %22 : vector<286x32xf32>
    %c0_17 = arith.constant 0 : index
    %c18 = arith.constant 18 : index
    %c0_18 = arith.constant 0 : index
    %24 = vector.load %arg1[%c0_17, %c18, %c0_18] : memref<1x324x1xf32, #tpu.memory_space<vmem>>, vector<1x286x1xf32>
    %25 = vector.shape_cast %24 : vector<1x286x1xf32> to vector<286x1xf32>
    %c3 = arith.constant 3 : index
    %c0_19 = arith.constant 0 : index
    %26 = vector.load %arg2[%c3, %c0_19] : memref<9x32xf32, #tpu.memory_space<vmem>>, vector<1x32xf32>
    %27 = vector.broadcast %25 : vector<286x1xf32> to vector<286x32xf32>
    %28 = vector.broadcast %26 : vector<1x32xf32> to vector<286x32xf32>
    %29 = arith.mulf %27, %28 : vector<286x32xf32>
    %30 = arith.addf %23, %29 : vector<286x32xf32>
    %c0_20 = arith.constant 0 : index
    %c19 = arith.constant 19 : index
    %c0_21 = arith.constant 0 : index
    %31 = vector.load %arg1[%c0_20, %c19, %c0_21] : memref<1x324x1xf32, #tpu.memory_space<vmem>>, vector<1x286x1xf32>
    %32 = vector.shape_cast %31 : vector<1x286x1xf32> to vector<286x1xf32>
    %c4 = arith.constant 4 : index
    %c0_22 = arith.constant 0 : index
    %33 = vector.load %arg2[%c4, %c0_22] : memref<9x32xf32, #tpu.memory_space<vmem>>, vector<1x32xf32>
    %34 = vector.broadcast %32 : vector<286x1xf32> to vector<286x32xf32>
    %35 = vector.broadcast %33 : vector<1x32xf32> to vector<286x32xf32>
    %36 = arith.mulf %34, %35 : vector<286x32xf32>
    %37 = arith.addf %30, %36 : vector<286x32xf32>
    %c0_23 = arith.constant 0 : index
    %c20 = arith.constant 20 : index
    %c0_24 = arith.constant 0 : index
    %38 = vector.load %arg1[%c0_23, %c20, %c0_24] : memref<1x324x1xf32, #tpu.memory_space<vmem>>, vector<1x286x1xf32>
    %39 = vector.shape_cast %38 : vector<1x286x1xf32> to vector<286x1xf32>
    %c5 = arith.constant 5 : index
    %c0_25 = arith.constant 0 : index
    %40 = vector.load %arg2[%c5, %c0_25] : memref<9x32xf32, #tpu.memory_space<vmem>>, vector<1x32xf32>
    %41 = vector.broadcast %39 : vector<286x1xf32> to vector<286x32xf32>
    %42 = vector.broadcast %40 : vector<1x32xf32> to vector<286x32xf32>
    %43 = arith.mulf %41, %42 : vector<286x32xf32>
    %44 = arith.addf %37, %43 : vector<286x32xf32>
    %c0_26 = arith.constant 0 : index
    %c36 = arith.constant 36 : index
    %c0_27 = arith.constant 0 : index
    %45 = vector.load %arg1[%c0_26, %c36, %c0_27] : memref<1x324x1xf32, #tpu.memory_space<vmem>>, vector<1x286x1xf32>
    %46 = vector.shape_cast %45 : vector<1x286x1xf32> to vector<286x1xf32>
    %c6 = arith.constant 6 : index
    %c0_28 = arith.constant 0 : index
    %47 = vector.load %arg2[%c6, %c0_28] : memref<9x32xf32, #tpu.memory_space<vmem>>, vector<1x32xf32>
    %48 = vector.broadcast %46 : vector<286x1xf32> to vector<286x32xf32>
    %49 = vector.broadcast %47 : vector<1x32xf32> to vector<286x32xf32>
    %50 = arith.mulf %48, %49 : vector<286x32xf32>
    %51 = arith.addf %44, %50 : vector<286x32xf32>
    %c0_29 = arith.constant 0 : index
    %c37 = arith.constant 37 : index
    %c0_30 = arith.constant 0 : index
    %52 = vector.load %arg1[%c0_29, %c37, %c0_30] : memref<1x324x1xf32, #tpu.memory_space<vmem>>, vector<1x286x1xf32>
    %53 = vector.shape_cast %52 : vector<1x286x1xf32> to vector<286x1xf32>
    %c7 = arith.constant 7 : index
    %c0_31 = arith.constant 0 : index
    %54 = vector.load %arg2[%c7, %c0_31] : memref<9x32xf32, #tpu.memory_space<vmem>>, vector<1x32xf32>
    %55 = vector.broadcast %53 : vector<286x1xf32> to vector<286x32xf32>
    %56 = vector.broadcast %54 : vector<1x32xf32> to vector<286x32xf32>
    %57 = arith.mulf %55, %56 : vector<286x32xf32>
    %58 = arith.addf %51, %57 : vector<286x32xf32>
    %c0_32 = arith.constant 0 : index
    %c38 = arith.constant 38 : index
    %c0_33 = arith.constant 0 : index
    %59 = vector.load %arg1[%c0_32, %c38, %c0_33] : memref<1x324x1xf32, #tpu.memory_space<vmem>>, vector<1x286x1xf32>
    %60 = vector.shape_cast %59 : vector<1x286x1xf32> to vector<286x1xf32>
    %c8 = arith.constant 8 : index
    %c0_34 = arith.constant 0 : index
    %61 = vector.load %arg2[%c8, %c0_34] : memref<9x32xf32, #tpu.memory_space<vmem>>, vector<1x32xf32>
    %62 = vector.broadcast %60 : vector<286x1xf32> to vector<286x32xf32>
    %63 = vector.broadcast %61 : vector<1x32xf32> to vector<286x32xf32>
    %64 = arith.mulf %62, %63 : vector<286x32xf32>
    %65 = arith.addf %58, %64 : vector<286x32xf32>
    %c0_35 = arith.constant 0 : index
    %c0_36 = arith.constant 0 : index
    %66 = vector.load %arg3[%c0_35, %c0_36] : memref<1x32xf32, #tpu.memory_space<vmem>>, vector<1x32xf32>
    %67 = vector.broadcast %66 : vector<1x32xf32> to vector<286x32xf32>
    %68 = arith.addf %65, %67 : vector<286x32xf32>
    %cst_37 = arith.constant 0.000000e+00 : f32
    %69 = vector.broadcast %cst_37 : f32 to vector<286x32xf32>
    %70 = arith.maximumf %68, %69 : vector<286x32xf32>
    %c0_38 = arith.constant 0 : index
    %c0_39 = arith.constant 0 : index
    %71 = vector.load %arg21[%c0_38, %c0_39] : memref<288x32xf32, #tpu.memory_space<vmem>>, vector<286x32xf32>
    tpu.vector_store %arg21[%c0_38, %c0_39], %70 {strides = array<i32>} : memref<288x32xf32, #tpu.memory_space<vmem>>, vector<286x32xf32>,
    %c0_40 = arith.constant 0 : index
    %c0_41 = arith.constant 0 : index
    %72 = tpu.strided_load %arg21[%c0_40, %c0_41] {strides = array<i32: 2, 1>} : memref<288x32xf32, #tpu.memory_space<vmem>>, vector<8x32xf32>
    %c1_42 = arith.constant 1 : index
    %c0_43 = arith.constant 0 : index
    %73 = tpu.strided_load %arg21[%c1_42, %c0_43] {strides = array<i32: 2, 1>} : memref<288x32xf32, #tpu.memory_space<vmem>>, vector<8x32xf32>
    %c18_44 = arith.constant 18 : index
    %c0_45 = arith.constant 0 : index
    %74 = tpu.strided_load %arg21[%c18_44, %c0_45] {strides = array<i32: 2, 1>} : memref<288x32xf32, #tpu.memory_space<vmem>>, vector<8x32xf32>
    %c19_46 = arith.constant 19 : index
    %c0_47 = arith.constant 0 : index
    %75 = tpu.strided_load %arg21[%c19_46, %c0_47] {strides = array<i32: 2, 1>} : memref<288x32xf32, #tpu.memory_space<vmem>>, vector<8x32xf32>
    %76 = arith.maximumf %72, %73 : vector<8x32xf32>
    %77 = arith.maximumf %74, %75 : vector<8x32xf32>
    %78 = arith.maximumf %76, %77 : vector<8x32xf32>
    %c0_48 = arith.constant 0 : index
    %c0_49 = arith.constant 0 : index
    %79 = vector.load %arg22[%c0_48, %c0_49] : memref<64x32xf32, #tpu.memory_space<vmem>>, vector<8x32xf32>
    tpu.vector_store %arg22[%c0_48, %c0_49], %78 {strides = array<i32>} : memref<64x32xf32, #tpu.memory_space<vmem>>, vector<8x32xf32>,
    %c36_50 = arith.constant 36 : index
    %c0_51 = arith.constant 0 : index
    %80 = tpu.strided_load %arg21[%c36_50, %c0_51] {strides = array<i32: 2, 1>} : memref<288x32xf32, #tpu.memory_space<vmem>>, vector<8x32xf32>
    %c37_52 = arith.constant 37 : index
    %c0_53 = arith.constant 0 : index
    %81 = tpu.strided_load %arg21[%c37_52, %c0_53] {strides = array<i32: 2, 1>} : memref<288x32xf32, #tpu.memory_space<vmem>>, vector<8x32xf32>
    %c54 = arith.constant 54 : index
    %c0_54 = arith.constant 0 : index
    %82 = tpu.strided_load %arg21[%c54, %c0_54] {strides = array<i32: 2, 1>} : memref<288x32xf32, #tpu.memory_space<vmem>>, vector<8x32xf32>
    %c55 = arith.constant 55 : index
    %c0_55 = arith.constant 0 : index
    %83 = tpu.strided_load %arg21[%c55, %c0_55] {strides = array<i32: 2, 1>} : memref<288x32xf32, #tpu.memory_space<vmem>>, vector<8x32xf32>
    %84 = arith.maximumf %80, %81 : vector<8x32xf32>
    %85 = arith.maximumf %82, %83 : vector<8x32xf32>
    %86 = arith.maximumf %84, %85 : vector<8x32xf32>
    %c8_56 = arith.constant 8 : index
    %c0_57 = arith.constant 0 : index
    %87 = vector.load %arg22[%c8_56, %c0_57] : memref<64x32xf32, #tpu.memory_space<vmem>>, vector<8x32xf32>
    tpu.vector_store %arg22[%c8_56, %c0_57], %86 {strides = array<i32>} : memref<64x32xf32, #tpu.memory_space<vmem>>, vector<8x32xf32>,
    %c72 = arith.constant 72 : index
    %c0_58 = arith.constant 0 : index
    %88 = tpu.strided_load %arg21[%c72, %c0_58] {strides = array<i32: 2, 1>} : memref<288x32xf32, #tpu.memory_space<vmem>>, vector<8x32xf32>
    %c73 = arith.constant 73 : index
    %c0_59 = arith.constant 0 : index
    %89 = tpu.strided_load %arg21[%c73, %c0_59] {strides = array<i32: 2, 1>} : memref<288x32xf32, #tpu.memory_space<vmem>>, vector<8x32xf32>
    %c90 = arith.constant 90 : index
    %c0_60 = arith.constant 0 : index
    %90 = tpu.strided_load %arg21[%c90, %c0_60] {strides = array<i32: 2, 1>} : memref<288x32xf32, #tpu.memory_space<vmem>>, vector<8x32xf32>
    %c91 = arith.constant 91 : index
    %c0_61 = arith.constant 0 : index
    %91 = tpu.strided_load %arg21[%c91, %c0_61] {strides = array<i32: 2, 1>} : memref<288x32xf32, #tpu.memory_space<vmem>>, vector<8x32xf32>
    %92 = arith.maximumf %88, %89 : vector<8x32xf32>
    %93 = arith.maximumf %90, %91 : vector<8x32xf32>
    %94 = arith.maximumf %92, %93 : vector<8x32xf32>
    %c16 = arith.constant 16 : index
    %c0_62 = arith.constant 0 : index
    %95 = vector.load %arg22[%c16, %c0_62] : memref<64x32xf32, #tpu.memory_space<vmem>>, vector<8x32xf32>
    tpu.vector_store %arg22[%c16, %c0_62], %94 {strides = array<i32>} : memref<64x32xf32, #tpu.memory_space<vmem>>, vector<8x32xf32>,
    %c108 = arith.constant 108 : index
    %c0_63 = arith.constant 0 : index
    %96 = tpu.strided_load %arg21[%c108, %c0_63] {strides = array<i32: 2, 1>} : memref<288x32xf32, #tpu.memory_space<vmem>>, vector<8x32xf32>
    %c109 = arith.constant 109 : index
    %c0_64 = arith.constant 0 : index
    %97 = tpu.strided_load %arg21[%c109, %c0_64] {strides = array<i32: 2, 1>} : memref<288x32xf32, #tpu.memory_space<vmem>>, vector<8x32xf32>
    %c126 = arith.constant 126 : index
    %c0_65 = arith.constant 0 : index
    %98 = tpu.strided_load %arg21[%c126, %c0_65] {strides = array<i32: 2, 1>} : memref<288x32xf32, #tpu.memory_space<vmem>>, vector<8x32xf32>
    %c127 = arith.constant 127 : index
    %c0_66 = arith.constant 0 : index
    %99 = tpu.strided_load %arg21[%c127, %c0_66] {strides = array<i32: 2, 1>} : memref<288x32xf32, #tpu.memory_space<vmem>>, vector<8x32xf32>
    %100 = arith.maximumf %96, %97 : vector<8x32xf32>
    %101 = arith.maximumf %98, %99 : vector<8x32xf32>
    %102 = arith.maximumf %100, %101 : vector<8x32xf32>
    %c24 = arith.constant 24 : index
    %c0_67 = arith.constant 0 : index
    %103 = vector.load %arg22[%c24, %c0_67] : memref<64x32xf32, #tpu.memory_space<vmem>>, vector<8x32xf32>
    tpu.vector_store %arg22[%c24, %c0_67], %102 {strides = array<i32>} : memref<64x32xf32, #tpu.memory_space<vmem>>, vector<8x32xf32>,
    %c144 = arith.constant 144 : index
    %c0_68 = arith.constant 0 : index
    %104 = tpu.strided_load %arg21[%c144, %c0_68] {strides = array<i32: 2, 1>} : memref<288x32xf32, #tpu.memory_space<vmem>>, vector<8x32xf32>
    %c145 = arith.constant 145 : index
    %c0_69 = arith.constant 0 : index
    %105 = tpu.strided_load %arg21[%c145, %c0_69] {strides = array<i32: 2, 1>} : memref<288x32xf32, #tpu.memory_space<vmem>>, vector<8x32xf32>
    %c162 = arith.constant 162 : index
    %c0_70 = arith.constant 0 : index
    %106 = tpu.strided_load %arg21[%c162, %c0_70] {strides = array<i32: 2, 1>} : memref<288x32xf32, #tpu.memory_space<vmem>>, vector<8x32xf32>
    %c163 = arith.constant 163 : index
    %c0_71 = arith.constant 0 : index
    %107 = tpu.strided_load %arg21[%c163, %c0_71] {strides = array<i32: 2, 1>} : memref<288x32xf32, #tpu.memory_space<vmem>>, vector<8x32xf32>
    %108 = arith.maximumf %104, %105 : vector<8x32xf32>
    %109 = arith.maximumf %106, %107 : vector<8x32xf32>
    %110 = arith.maximumf %108, %109 : vector<8x32xf32>
    %c32 = arith.constant 32 : index
    %c0_72 = arith.constant 0 : index
    %111 = vector.load %arg22[%c32, %c0_72] : memref<64x32xf32, #tpu.memory_space<vmem>>, vector<8x32xf32>
    tpu.vector_store %arg22[%c32, %c0_72], %110 {strides = array<i32>} : memref<64x32xf32, #tpu.memory_space<vmem>>, vector<8x32xf32>,
    %c180 = arith.constant 180 : index
    %c0_73 = arith.constant 0 : index
    %112 = tpu.strided_load %arg21[%c180, %c0_73] {strides = array<i32: 2, 1>} : memref<288x32xf32, #tpu.memory_space<vmem>>, vector<8x32xf32>
    %c181 = arith.constant 181 : index
    %c0_74 = arith.constant 0 : index
    %113 = tpu.strided_load %arg21[%c181, %c0_74] {strides = array<i32: 2, 1>} : memref<288x32xf32, #tpu.memory_space<vmem>>, vector<8x32xf32>
    %c198 = arith.constant 198 : index
    %c0_75 = arith.constant 0 : index
    %114 = tpu.strided_load %arg21[%c198, %c0_75] {strides = array<i32: 2, 1>} : memref<288x32xf32, #tpu.memory_space<vmem>>, vector<8x32xf32>
    %c199 = arith.constant 199 : index
    %c0_76 = arith.constant 0 : index
    %115 = tpu.strided_load %arg21[%c199, %c0_76] {strides = array<i32: 2, 1>} : memref<288x32xf32, #tpu.memory_space<vmem>>, vector<8x32xf32>
    %116 = arith.maximumf %112, %113 : vector<8x32xf32>
    %117 = arith.maximumf %114, %115 : vector<8x32xf32>
    %118 = arith.maximumf %116, %117 : vector<8x32xf32>
    %c40 = arith.constant 40 : index
    %c0_77 = arith.constant 0 : index
    %119 = vector.load %arg22[%c40, %c0_77] : memref<64x32xf32, #tpu.memory_space<vmem>>, vector<8x32xf32>
    tpu.vector_store %arg22[%c40, %c0_77], %118 {strides = array<i32>} : memref<64x32xf32, #tpu.memory_space<vmem>>, vector<8x32xf32>,
    %c216 = arith.constant 216 : index
    %c0_78 = arith.constant 0 : index
    %120 = tpu.strided_load %arg21[%c216, %c0_78] {strides = array<i32: 2, 1>} : memref<288x32xf32, #tpu.memory_space<vmem>>, vector<8x32xf32>
    %c217 = arith.constant 217 : index
    %c0_79 = arith.constant 0 : index
    %121 = tpu.strided_load %arg21[%c217, %c0_79] {strides = array<i32: 2, 1>} : memref<288x32xf32, #tpu.memory_space<vmem>>, vector<8x32xf32>
    %c234 = arith.constant 234 : index
    %c0_80 = arith.constant 0 : index
    %122 = tpu.strided_load %arg21[%c234, %c0_80] {strides = array<i32: 2, 1>} : memref<288x32xf32, #tpu.memory_space<vmem>>, vector<8x32xf32>
    %c235 = arith.constant 235 : index
    %c0_81 = arith.constant 0 : index
    %123 = tpu.strided_load %arg21[%c235, %c0_81] {strides = array<i32: 2, 1>} : memref<288x32xf32, #tpu.memory_space<vmem>>, vector<8x32xf32>
    %124 = arith.maximumf %120, %121 : vector<8x32xf32>
    %125 = arith.maximumf %122, %123 : vector<8x32xf32>
    %126 = arith.maximumf %124, %125 : vector<8x32xf32>
    %c48 = arith.constant 48 : index
    %c0_82 = arith.constant 0 : index
    %127 = vector.load %arg22[%c48, %c0_82] : memref<64x32xf32, #tpu.memory_space<vmem>>, vector<8x32xf32>
    tpu.vector_store %arg22[%c48, %c0_82], %126 {strides = array<i32>} : memref<64x32xf32, #tpu.memory_space<vmem>>, vector<8x32xf32>,
    %c252 = arith.constant 252 : index
    %c0_83 = arith.constant 0 : index
    %128 = tpu.strided_load %arg21[%c252, %c0_83] {strides = array<i32: 2, 1>} : memref<288x32xf32, #tpu.memory_space<vmem>>, vector<8x32xf32>
    %c253 = arith.constant 253 : index
    %c0_84 = arith.constant 0 : index
    %129 = tpu.strided_load %arg21[%c253, %c0_84] {strides = array<i32: 2, 1>} : memref<288x32xf32, #tpu.memory_space<vmem>>, vector<8x32xf32>
    %c270 = arith.constant 270 : index
    %c0_85 = arith.constant 0 : index
    %130 = tpu.strided_load %arg21[%c270, %c0_85] {strides = array<i32: 2, 1>} : memref<288x32xf32, #tpu.memory_space<vmem>>, vector<8x32xf32>
    %c271 = arith.constant 271 : index
    %c0_86 = arith.constant 0 : index
    %131 = tpu.strided_load %arg21[%c271, %c0_86] {strides = array<i32: 2, 1>} : memref<288x32xf32, #tpu.memory_space<vmem>>, vector<8x32xf32>
    %132 = arith.maximumf %128, %129 : vector<8x32xf32>
    %133 = arith.maximumf %130, %131 : vector<8x32xf32>
    %134 = arith.maximumf %132, %133 : vector<8x32xf32>
    %c56 = arith.constant 56 : index
    %c0_87 = arith.constant 0 : index
    %135 = vector.load %arg22[%c56, %c0_87] : memref<64x32xf32, #tpu.memory_space<vmem>>, vector<8x32xf32>
    tpu.vector_store %arg22[%c56, %c0_87], %134 {strides = array<i32>} : memref<64x32xf32, #tpu.memory_space<vmem>>, vector<8x32xf32>,
    %c0_88 = arith.constant 0 : index
    %c0_89 = arith.constant 0 : index
    %136 = vector.load %arg22[%c0_88, %c0_89] : memref<64x32xf32, #tpu.memory_space<vmem>>, vector<64x32xf32>
    %c0_90 = arith.constant 0 : index
    %c0_91 = arith.constant 0 : index
    %137 = vector.load %arg4[%c0_90, %c0_91] : memref<64x32xf32, #tpu.memory_space<vmem>>, vector<64x32xf32>
    %c0_92 = arith.constant 0 : index
    %c0_93 = arith.constant 0 : index
    %138 = vector.load %arg5[%c0_92, %c0_93] : memref<64x32xf32, #tpu.memory_space<vmem>>, vector<64x32xf32>
    %cst_94 = arith.constant dense<0.000000e+00> : vector<64xf32>
    %139 = vector.multi_reduction <add>, %136, %cst_94 [1] : vector<64x32xf32> to vector<64xf32>
    %140 = vector.shape_cast %139 : vector<64xf32> to vector<64x1xf32>
    %cst_95 = arith.constant dense<0.000000e+00> : vector<1xf32>
    %141 = vector.multi_reduction <add>, %140, %cst_95 [0] : vector<64x1xf32> to vector<1xf32>
    %142 = vector.shape_cast %141 : vector<1xf32> to vector<1x1xf32>
    %cst_96 = arith.constant 2.048000e+03 : f32
    %143 = vector.broadcast %cst_96 : f32 to vector<1x1xf32>
    %144 = arith.divf %142, %143 : vector<1x1xf32>
    %145 = vector.broadcast %144 : vector<1x1xf32> to vector<64x32xf32>
    %146 = arith.subf %136, %145 : vector<64x32xf32>
    %147 = arith.mulf %146, %146 : vector<64x32xf32>
    %cst_97 = arith.constant dense<0.000000e+00> : vector<64xf32>
    %148 = vector.multi_reduction <add>, %147, %cst_97 [1] : vector<64x32xf32> to vector<64xf32>
    %149 = vector.shape_cast %148 : vector<64xf32> to vector<64x1xf32>
    %cst_98 = arith.constant dense<0.000000e+00> : vector<1xf32>
    %150 = vector.multi_reduction <add>, %149, %cst_98 [0] : vector<64x1xf32> to vector<1xf32>
    %151 = vector.shape_cast %150 : vector<1xf32> to vector<1x1xf32>
    %cst_99 = arith.constant 2.048000e+03 : f32
    %152 = vector.broadcast %cst_99 : f32 to vector<1x1xf32>
    %153 = arith.divf %151, %152 : vector<1x1xf32>
    %cst_100 = arith.constant 1.000000e-16 : f32
    %154 = vector.broadcast %cst_100 : f32 to vector<1x1xf32>
    %155 = arith.addf %153, %154 : vector<1x1xf32>
    %156 = math.rsqrt %155 : vector<1x1xf32>
    %157 = vector.broadcast %156 : vector<1x1xf32> to vector<64x32xf32>
    %158 = arith.mulf %146, %157 : vector<64x32xf32>
    %159 = arith.mulf %137, %158 : vector<64x32xf32>
    %160 = arith.addf %159, %138 : vector<64x32xf32>
    %c0_101 = arith.constant 0 : index
    %c0_102 = arith.constant 0 : index
    %161 = vector.load %arg22[%c0_101, %c0_102] : memref<64x32xf32, #tpu.memory_space<vmem>>, vector<64x32xf32>
    tpu.vector_store %arg22[%c0_101, %c0_102], %160 {strides = array<i32>} : memref<64x32xf32, #tpu.memory_space<vmem>>, vector<64x32xf32>,
    %c0_103 = arith.constant 0 : index
    %c0_104 = arith.constant 0 : index
    %162 = vector.load %arg22[%c0_103, %c0_104] : memref<64x32xf32, #tpu.memory_space<vmem>>, vector<8x32xf32>
    %c11 = arith.constant 11 : index
    %c0_105 = arith.constant 0 : index
    %163 = vector.load %arg23[%c11, %c0_105] : memref<100x32xf32, #tpu.memory_space<vmem>>, vector<8x32xf32>
    tpu.vector_store %arg23[%c11, %c0_105], %162 {strides = array<i32>} : memref<100x32xf32, #tpu.memory_space<vmem>>, vector<8x32xf32>,
    %c8_106 = arith.constant 8 : index
    %c0_107 = arith.constant 0 : index
    %164 = vector.load %arg22[%c8_106, %c0_107] : memref<64x32xf32, #tpu.memory_space<vmem>>, vector<8x32xf32>
    %c21 = arith.constant 21 : index
    %c0_108 = arith.constant 0 : index
    %165 = vector.load %arg23[%c21, %c0_108] : memref<100x32xf32, #tpu.memory_space<vmem>>, vector<8x32xf32>
    tpu.vector_store %arg23[%c21, %c0_108], %164 {strides = array<i32>} : memref<100x32xf32, #tpu.memory_space<vmem>>, vector<8x32xf32>,
    %c16_109 = arith.constant 16 : index
    %c0_110 = arith.constant 0 : index
    %166 = vector.load %arg22[%c16_109, %c0_110] : memref<64x32xf32, #tpu.memory_space<vmem>>, vector<8x32xf32>
    %c31 = arith.constant 31 : index
    %c0_111 = arith.constant 0 : index
    %167 = vector.load %arg23[%c31, %c0_111] : memref<100x32xf32, #tpu.memory_space<vmem>>, vector<8x32xf32>
    tpu.vector_store %arg23[%c31, %c0_111], %166 {strides = array<i32>} : memref<100x32xf32, #tpu.memory_space<vmem>>, vector<8x32xf32>,
    %c24_112 = arith.constant 24 : index
    %c0_113 = arith.constant 0 : index
    %168 = vector.load %arg22[%c24_112, %c0_113] : memref<64x32xf32, #tpu.memory_space<vmem>>, vector<8x32xf32>
    %c41 = arith.constant 41 : index
    %c0_114 = arith.constant 0 : index
    %169 = vector.load %arg23[%c41, %c0_114] : memref<100x32xf32, #tpu.memory_space<vmem>>, vector<8x32xf32>
    tpu.vector_store %arg23[%c41, %c0_114], %168 {strides = array<i32>} : memref<100x32xf32, #tpu.memory_space<vmem>>, vector<8x32xf32>,
    %c32_115 = arith.constant 32 : index
    %c0_116 = arith.constant 0 : index
    %170 = vector.load %arg22[%c32_115, %c0_116] : memref<64x32xf32, #tpu.memory_space<vmem>>, vector<8x32xf32>
    %c51 = arith.constant 51 : index
    %c0_117 = arith.constant 0 : index
    %171 = vector.load %arg23[%c51, %c0_117] : memref<100x32xf32, #tpu.memory_space<vmem>>, vector<8x32xf32>
    tpu.vector_store %arg23[%c51, %c0_117], %170 {strides = array<i32>} : memref<100x32xf32, #tpu.memory_space<vmem>>, vector<8x32xf32>,
    %c40_118 = arith.constant 40 : index
    %c0_119 = arith.constant 0 : index
    %172 = vector.load %arg22[%c40_118, %c0_119] : memref<64x32xf32, #tpu.memory_space<vmem>>, vector<8x32xf32>
    %c61 = arith.constant 61 : index
    %c0_120 = arith.constant 0 : index
    %173 = vector.load %arg23[%c61, %c0_120] : memref<100x32xf32, #tpu.memory_space<vmem>>, vector<8x32xf32>
    tpu.vector_store %arg23[%c61, %c0_120], %172 {strides = array<i32>} : memref<100x32xf32, #tpu.memory_space<vmem>>, vector<8x32xf32>,
    %c48_121 = arith.constant 48 : index
    %c0_122 = arith.constant 0 : index
    %174 = vector.load %arg22[%c48_121, %c0_122] : memref<64x32xf32, #tpu.memory_space<vmem>>, vector<8x32xf32>
    %c71 = arith.constant 71 : index
    %c0_123 = arith.constant 0 : index
    %175 = vector.load %arg23[%c71, %c0_123] : memref<100x32xf32, #tpu.memory_space<vmem>>, vector<8x32xf32>
    tpu.vector_store %arg23[%c71, %c0_123], %174 {strides = array<i32>} : memref<100x32xf32, #tpu.memory_space<vmem>>, vector<8x32xf32>,
    %c56_124 = arith.constant 56 : index
    %c0_125 = arith.constant 0 : index
    %176 = vector.load %arg22[%c56_124, %c0_125] : memref<64x32xf32, #tpu.memory_space<vmem>>, vector<8x32xf32>
    %c81 = arith.constant 81 : index
    %c0_126 = arith.constant 0 : index
    %177 = vector.load %arg23[%c81, %c0_126] : memref<100x32xf32, #tpu.memory_space<vmem>>, vector<8x32xf32>
    tpu.vector_store %arg23[%c81, %c0_126], %176 {strides = array<i32>} : memref<100x32xf32, #tpu.memory_space<vmem>>, vector<8x32xf32>,
    %c0_127 = arith.constant 0 : index
    %c0_128 = arith.constant 0 : index
    %178 = vector.load %arg23[%c0_127, %c0_128] : memref<100x32xf32, #tpu.memory_space<vmem>>, vector<78x32xf32>
    %c0_129 = arith.constant 0 : index
    %c0_130 = arith.constant 0 : index
    %179 = vector.load %arg6[%c0_129, %c0_130] : memref<288x64xf32, #tpu.memory_space<vmem>>, vector<32x64xf32>
    %cst_131 = arith.constant dense<0.000000e+00> : vector<78x64xf32>
    %180 = tpu.matmul %178, %179, %cst_131 {dimension_numbers = #tpu.dot_dimension_numbers<[1], [0], [0], [1], [0, 0, 1, 1], [], []>} : vector<78x32xf32>, vector<32x64xf32>, vector<78x64xf32> -> vector<78x64xf32>
    %c1_132 = arith.constant 1 : index
    %c0_133 = arith.constant 0 : index
    %181 = vector.load %arg23[%c1_132, %c0_133] : memref<100x32xf32, #tpu.memory_space<vmem>>, vector<78x32xf32>
    %c32_134 = arith.constant 32 : index
    %c0_135 = arith.constant 0 : index
    %182 = vector.load %arg6[%c32_134, %c0_135] : memref<288x64xf32, #tpu.memory_space<vmem>>, vector<32x64xf32>
    %cst_136 = arith.constant dense<0.000000e+00> : vector<78x64xf32>
    %183 = tpu.matmul %181, %182, %cst_136 {dimension_numbers = #tpu.dot_dimension_numbers<[1], [0], [0], [1], [0, 0, 1, 1], [], []>} : vector<78x32xf32>, vector<32x64xf32>, vector<78x64xf32> -> vector<78x64xf32>
    %184 = arith.addf %180, %183 : vector<78x64xf32>
    %c2_137 = arith.constant 2 : index
    %c0_138 = arith.constant 0 : index
    %185 = vector.load %arg23[%c2_137, %c0_138] : memref<100x32xf32, #tpu.memory_space<vmem>>, vector<78x32xf32>
    %c64 = arith.constant 64 : index
    %c0_139 = arith.constant 0 : index
    %186 = vector.load %arg6[%c64, %c0_139] : memref<288x64xf32, #tpu.memory_space<vmem>>, vector<32x64xf32>
    %cst_140 = arith.constant dense<0.000000e+00> : vector<78x64xf32>
    %187 = tpu.matmul %185, %186, %cst_140 {dimension_numbers = #tpu.dot_dimension_numbers<[1], [0], [0], [1], [0, 0, 1, 1], [], []>} : vector<78x32xf32>, vector<32x64xf32>, vector<78x64xf32> -> vector<78x64xf32>
    %188 = arith.addf %184, %187 : vector<78x64xf32>
    %c10 = arith.constant 10 : index
    %c0_141 = arith.constant 0 : index
    %189 = vector.load %arg23[%c10, %c0_141] : memref<100x32xf32, #tpu.memory_space<vmem>>, vector<78x32xf32>
    %c96 = arith.constant 96 : index
    %c0_142 = arith.constant 0 : index
    %190 = vector.load %arg6[%c96, %c0_142] : memref<288x64xf32, #tpu.memory_space<vmem>>, vector<32x64xf32>
    %cst_143 = arith.constant dense<0.000000e+00> : vector<78x64xf32>
    %191 = tpu.matmul %189, %190, %cst_143 {dimension_numbers = #tpu.dot_dimension_numbers<[1], [0], [0], [1], [0, 0, 1, 1], [], []>} : vector<78x32xf32>, vector<32x64xf32>, vector<78x64xf32> -> vector<78x64xf32>
    %192 = arith.addf %188, %191 : vector<78x64xf32>
    %c11_144 = arith.constant 11 : index
    %c0_145 = arith.constant 0 : index
    %193 = vector.load %arg23[%c11_144, %c0_145] : memref<100x32xf32, #tpu.memory_space<vmem>>, vector<78x32xf32>
    %c128 = arith.constant 128 : index
    %c0_146 = arith.constant 0 : index
    %194 = vector.load %arg6[%c128, %c0_146] : memref<288x64xf32, #tpu.memory_space<vmem>>, vector<32x64xf32>
    %cst_147 = arith.constant dense<0.000000e+00> : vector<78x64xf32>
    %195 = tpu.matmul %193, %194, %cst_147 {dimension_numbers = #tpu.dot_dimension_numbers<[1], [0], [0], [1], [0, 0, 1, 1], [], []>} : vector<78x32xf32>, vector<32x64xf32>, vector<78x64xf32> -> vector<78x64xf32>
    %196 = arith.addf %192, %195 : vector<78x64xf32>
    %c12 = arith.constant 12 : index
    %c0_148 = arith.constant 0 : index
    %197 = vector.load %arg23[%c12, %c0_148] : memref<100x32xf32, #tpu.memory_space<vmem>>, vector<78x32xf32>
    %c160 = arith.constant 160 : index
    %c0_149 = arith.constant 0 : index
    %198 = vector.load %arg6[%c160, %c0_149] : memref<288x64xf32, #tpu.memory_space<vmem>>, vector<32x64xf32>
    %cst_150 = arith.constant dense<0.000000e+00> : vector<78x64xf32>
    %199 = tpu.matmul %197, %198, %cst_150 {dimension_numbers = #tpu.dot_dimension_numbers<[1], [0], [0], [1], [0, 0, 1, 1], [], []>} : vector<78x32xf32>, vector<32x64xf32>, vector<78x64xf32> -> vector<78x64xf32>
    %200 = arith.addf %196, %199 : vector<78x64xf32>
    %c20_151 = arith.constant 20 : index
    %c0_152 = arith.constant 0 : index
    %201 = vector.load %arg23[%c20_151, %c0_152] : memref<100x32xf32, #tpu.memory_space<vmem>>, vector<78x32xf32>
    %c192 = arith.constant 192 : index
    %c0_153 = arith.constant 0 : index
    %202 = vector.load %arg6[%c192, %c0_153] : memref<288x64xf32, #tpu.memory_space<vmem>>, vector<32x64xf32>
    %cst_154 = arith.constant dense<0.000000e+00> : vector<78x64xf32>
    %203 = tpu.matmul %201, %202, %cst_154 {dimension_numbers = #tpu.dot_dimension_numbers<[1], [0], [0], [1], [0, 0, 1, 1], [], []>} : vector<78x32xf32>, vector<32x64xf32>, vector<78x64xf32> -> vector<78x64xf32>
    %204 = arith.addf %200, %203 : vector<78x64xf32>
    %c21_155 = arith.constant 21 : index
    %c0_156 = arith.constant 0 : index
    %205 = vector.load %arg23[%c21_155, %c0_156] : memref<100x32xf32, #tpu.memory_space<vmem>>, vector<78x32xf32>
    %c224 = arith.constant 224 : index
    %c0_157 = arith.constant 0 : index
    %206 = vector.load %arg6[%c224, %c0_157] : memref<288x64xf32, #tpu.memory_space<vmem>>, vector<32x64xf32>
    %cst_158 = arith.constant dense<0.000000e+00> : vector<78x64xf32>
    %207 = tpu.matmul %205, %206, %cst_158 {dimension_numbers = #tpu.dot_dimension_numbers<[1], [0], [0], [1], [0, 0, 1, 1], [], []>} : vector<78x32xf32>, vector<32x64xf32>, vector<78x64xf32> -> vector<78x64xf32>
    %208 = arith.addf %204, %207 : vector<78x64xf32>
    %c22 = arith.constant 22 : index
    %c0_159 = arith.constant 0 : index
    %209 = vector.load %arg23[%c22, %c0_159] : memref<100x32xf32, #tpu.memory_space<vmem>>, vector<78x32xf32>
    %c256 = arith.constant 256 : index
    %c0_160 = arith.constant 0 : index
    %210 = vector.load %arg6[%c256, %c0_160] : memref<288x64xf32, #tpu.memory_space<vmem>>, vector<32x64xf32>
    %cst_161 = arith.constant dense<0.000000e+00> : vector<78x64xf32>
    %211 = tpu.matmul %209, %210, %cst_161 {dimension_numbers = #tpu.dot_dimension_numbers<[1], [0], [0], [1], [0, 0, 1, 1], [], []>} : vector<78x32xf32>, vector<32x64xf32>, vector<78x64xf32> -> vector<78x64xf32>
    %212 = arith.addf %208, %211 : vector<78x64xf32>
    %c0_162 = arith.constant 0 : index
    %c0_163 = arith.constant 0 : index
    %213 = vector.load %arg7[%c0_162, %c0_163] : memref<1x64xf32, #tpu.memory_space<vmem>>, vector<1x64xf32>
    %214 = vector.broadcast %213 : vector<1x64xf32> to vector<78x64xf32>
    %215 = arith.addf %212, %214 : vector<78x64xf32>
    %cst_164 = arith.constant 0.000000e+00 : f32
    %216 = vector.broadcast %cst_164 : f32 to vector<78x64xf32>
    %217 = arith.maximumf %215, %216 : vector<78x64xf32>
    %c0_165 = arith.constant 0 : index
    %c0_166 = arith.constant 0 : index
    %218 = vector.load %arg24[%c0_165, %c0_166] : memref<80x64xf32, #tpu.memory_space<vmem>>, vector<78x64xf32>
    tpu.vector_store %arg24[%c0_165, %c0_166], %217 {strides = array<i32>} : memref<80x64xf32, #tpu.memory_space<vmem>>, vector<78x64xf32>,
    %c0_167 = arith.constant 0 : index
    %c0_168 = arith.constant 0 : index
    %219 = tpu.strided_load %arg24[%c0_167, %c0_168] {strides = array<i32: 2, 1>} : memref<80x64xf32, #tpu.memory_space<vmem>>, vector<4x64xf32>
    %c1_169 = arith.constant 1 : index
    %c0_170 = arith.constant 0 : index
    %220 = tpu.strided_load %arg24[%c1_169, %c0_170] {strides = array<i32: 2, 1>} : memref<80x64xf32, #tpu.memory_space<vmem>>, vector<4x64xf32>
    %c10_171 = arith.constant 10 : index
    %c0_172 = arith.constant 0 : index
    %221 = tpu.strided_load %arg24[%c10_171, %c0_172] {strides = array<i32: 2, 1>} : memref<80x64xf32, #tpu.memory_space<vmem>>, vector<4x64xf32>
    %c11_173 = arith.constant 11 : index
    %c0_174 = arith.constant 0 : index
    %222 = tpu.strided_load %arg24[%c11_173, %c0_174] {strides = array<i32: 2, 1>} : memref<80x64xf32, #tpu.memory_space<vmem>>, vector<4x64xf32>
    %223 = arith.maximumf %219, %220 : vector<4x64xf32>
    %224 = arith.maximumf %221, %222 : vector<4x64xf32>
    %225 = arith.maximumf %223, %224 : vector<4x64xf32>
    %c0_175 = arith.constant 0 : index
    %c0_176 = arith.constant 0 : index
    %226 = vector.load %arg25[%c0_175, %c0_176] : memref<16x64xf32, #tpu.memory_space<vmem>>, vector<4x64xf32>
    tpu.vector_store %arg25[%c0_175, %c0_176], %225 {strides = array<i32>} : memref<16x64xf32, #tpu.memory_space<vmem>>, vector<4x64xf32>,
    %c20_177 = arith.constant 20 : index
    %c0_178 = arith.constant 0 : index
    %227 = tpu.strided_load %arg24[%c20_177, %c0_178] {strides = array<i32: 2, 1>} : memref<80x64xf32, #tpu.memory_space<vmem>>, vector<4x64xf32>
    %c21_179 = arith.constant 21 : index
    %c0_180 = arith.constant 0 : index
    %228 = tpu.strided_load %arg24[%c21_179, %c0_180] {strides = array<i32: 2, 1>} : memref<80x64xf32, #tpu.memory_space<vmem>>, vector<4x64xf32>
    %c30 = arith.constant 30 : index
    %c0_181 = arith.constant 0 : index
    %229 = tpu.strided_load %arg24[%c30, %c0_181] {strides = array<i32: 2, 1>} : memref<80x64xf32, #tpu.memory_space<vmem>>, vector<4x64xf32>
    %c31_182 = arith.constant 31 : index
    %c0_183 = arith.constant 0 : index
    %230 = tpu.strided_load %arg24[%c31_182, %c0_183] {strides = array<i32: 2, 1>} : memref<80x64xf32, #tpu.memory_space<vmem>>, vector<4x64xf32>
    %231 = arith.maximumf %227, %228 : vector<4x64xf32>
    %232 = arith.maximumf %229, %230 : vector<4x64xf32>
    %233 = arith.maximumf %231, %232 : vector<4x64xf32>
    %c4_184 = arith.constant 4 : index
    %c0_185 = arith.constant 0 : index
    %234 = vector.load %arg25[%c4_184, %c0_185] : memref<16x64xf32, #tpu.memory_space<vmem>>, vector<4x64xf32>
    tpu.vector_store %arg25[%c4_184, %c0_185], %233 {strides = array<i32>} : memref<16x64xf32, #tpu.memory_space<vmem>>, vector<4x64xf32>,
    %c40_186 = arith.constant 40 : index
    %c0_187 = arith.constant 0 : index
    %235 = tpu.strided_load %arg24[%c40_186, %c0_187] {strides = array<i32: 2, 1>} : memref<80x64xf32, #tpu.memory_space<vmem>>, vector<4x64xf32>
    %c41_188 = arith.constant 41 : index
    %c0_189 = arith.constant 0 : index
    %236 = tpu.strided_load %arg24[%c41_188, %c0_189] {strides = array<i32: 2, 1>} : memref<80x64xf32, #tpu.memory_space<vmem>>, vector<4x64xf32>
    %c50 = arith.constant 50 : index
    %c0_190 = arith.constant 0 : index
    %237 = tpu.strided_load %arg24[%c50, %c0_190] {strides = array<i32: 2, 1>} : memref<80x64xf32, #tpu.memory_space<vmem>>, vector<4x64xf32>
    %c51_191 = arith.constant 51 : index
    %c0_192 = arith.constant 0 : index
    %238 = tpu.strided_load %arg24[%c51_191, %c0_192] {strides = array<i32: 2, 1>} : memref<80x64xf32, #tpu.memory_space<vmem>>, vector<4x64xf32>
    %239 = arith.maximumf %235, %236 : vector<4x64xf32>
    %240 = arith.maximumf %237, %238 : vector<4x64xf32>
    %241 = arith.maximumf %239, %240 : vector<4x64xf32>
    %c8_193 = arith.constant 8 : index
    %c0_194 = arith.constant 0 : index
    %242 = vector.load %arg25[%c8_193, %c0_194] : memref<16x64xf32, #tpu.memory_space<vmem>>, vector<4x64xf32>
    tpu.vector_store %arg25[%c8_193, %c0_194], %241 {strides = array<i32>} : memref<16x64xf32, #tpu.memory_space<vmem>>, vector<4x64xf32>,
    %c60 = arith.constant 60 : index
    %c0_195 = arith.constant 0 : index
    %243 = tpu.strided_load %arg24[%c60, %c0_195] {strides = array<i32: 2, 1>} : memref<80x64xf32, #tpu.memory_space<vmem>>, vector<4x64xf32>
    %c61_196 = arith.constant 61 : index
    %c0_197 = arith.constant 0 : index
    %244 = tpu.strided_load %arg24[%c61_196, %c0_197] {strides = array<i32: 2, 1>} : memref<80x64xf32, #tpu.memory_space<vmem>>, vector<4x64xf32>
    %c70 = arith.constant 70 : index
    %c0_198 = arith.constant 0 : index
    %245 = tpu.strided_load %arg24[%c70, %c0_198] {strides = array<i32: 2, 1>} : memref<80x64xf32, #tpu.memory_space<vmem>>, vector<4x64xf32>
    %c71_199 = arith.constant 71 : index
    %c0_200 = arith.constant 0 : index
    %246 = tpu.strided_load %arg24[%c71_199, %c0_200] {strides = array<i32: 2, 1>} : memref<80x64xf32, #tpu.memory_space<vmem>>, vector<4x64xf32>
    %247 = arith.maximumf %243, %244 : vector<4x64xf32>
    %248 = arith.maximumf %245, %246 : vector<4x64xf32>
    %249 = arith.maximumf %247, %248 : vector<4x64xf32>
    %c12_201 = arith.constant 12 : index
    %c0_202 = arith.constant 0 : index
    %250 = vector.load %arg25[%c12_201, %c0_202] : memref<16x64xf32, #tpu.memory_space<vmem>>, vector<4x64xf32>
    tpu.vector_store %arg25[%c12_201, %c0_202], %249 {strides = array<i32>} : memref<16x64xf32, #tpu.memory_space<vmem>>, vector<4x64xf32>,
    %c0_203 = arith.constant 0 : index
    %c0_204 = arith.constant 0 : index
    %251 = vector.load %arg25[%c0_203, %c0_204] : memref<16x64xf32, #tpu.memory_space<vmem>>, vector<16x64xf32>
    %c0_205 = arith.constant 0 : index
    %c0_206 = arith.constant 0 : index
    %252 = vector.load %arg8[%c0_205, %c0_206] : memref<16x64xf32, #tpu.memory_space<vmem>>, vector<16x64xf32>
    %c0_207 = arith.constant 0 : index
    %c0_208 = arith.constant 0 : index
    %253 = vector.load %arg9[%c0_207, %c0_208] : memref<16x64xf32, #tpu.memory_space<vmem>>, vector<16x64xf32>
    %cst_209 = arith.constant dense<0.000000e+00> : vector<16xf32>
    %254 = vector.multi_reduction <add>, %251, %cst_209 [1] : vector<16x64xf32> to vector<16xf32>
    %255 = vector.shape_cast %254 : vector<16xf32> to vector<16x1xf32>
    %cst_210 = arith.constant dense<0.000000e+00> : vector<1xf32>
    %256 = vector.multi_reduction <add>, %255, %cst_210 [0] : vector<16x1xf32> to vector<1xf32>
    %257 = vector.shape_cast %256 : vector<1xf32> to vector<1x1xf32>
    %cst_211 = arith.constant 1.024000e+03 : f32
    %258 = vector.broadcast %cst_211 : f32 to vector<1x1xf32>
    %259 = arith.divf %257, %258 : vector<1x1xf32>
    %260 = vector.broadcast %259 : vector<1x1xf32> to vector<16x64xf32>
    %261 = arith.subf %251, %260 : vector<16x64xf32>
    %262 = arith.mulf %261, %261 : vector<16x64xf32>
    %cst_212 = arith.constant dense<0.000000e+00> : vector<16xf32>
    %263 = vector.multi_reduction <add>, %262, %cst_212 [1] : vector<16x64xf32> to vector<16xf32>
    %264 = vector.shape_cast %263 : vector<16xf32> to vector<16x1xf32>
    %cst_213 = arith.constant dense<0.000000e+00> : vector<1xf32>
    %265 = vector.multi_reduction <add>, %264, %cst_213 [0] : vector<16x1xf32> to vector<1xf32>
    %266 = vector.shape_cast %265 : vector<1xf32> to vector<1x1xf32>
    %cst_214 = arith.constant 1.024000e+03 : f32
    %267 = vector.broadcast %cst_214 : f32 to vector<1x1xf32>
    %268 = arith.divf %266, %267 : vector<1x1xf32>
    %cst_215 = arith.constant 1.000000e-16 : f32
    %269 = vector.broadcast %cst_215 : f32 to vector<1x1xf32>
    %270 = arith.addf %268, %269 : vector<1x1xf32>
    %271 = math.rsqrt %270 : vector<1x1xf32>
    %272 = vector.broadcast %271 : vector<1x1xf32> to vector<16x64xf32>
    %273 = arith.mulf %261, %272 : vector<16x64xf32>
    %274 = arith.mulf %252, %273 : vector<16x64xf32>
    %275 = arith.addf %274, %253 : vector<16x64xf32>
    %c0_216 = arith.constant 0 : index
    %c0_217 = arith.constant 0 : index
    %276 = vector.load %arg25[%c0_216, %c0_217] : memref<16x64xf32, #tpu.memory_space<vmem>>, vector<16x64xf32>
    tpu.vector_store %arg25[%c0_216, %c0_217], %275 {strides = array<i32>} : memref<16x64xf32, #tpu.memory_space<vmem>>, vector<16x64xf32>,
    %c0_218 = arith.constant 0 : index
    %c0_219 = arith.constant 0 : index
    %277 = vector.load %arg25[%c0_218, %c0_219] : memref<16x64xf32, #tpu.memory_space<vmem>>, vector<4x64xf32>
    %c7_220 = arith.constant 7 : index
    %c0_221 = arith.constant 0 : index
    %278 = vector.load %arg26[%c7_220, %c0_221] : memref<36x64xf32, #tpu.memory_space<vmem>>, vector<4x64xf32>
    tpu.vector_store %arg26[%c7_220, %c0_221], %277 {strides = array<i32>} : memref<36x64xf32, #tpu.memory_space<vmem>>, vector<4x64xf32>,
    %c4_222 = arith.constant 4 : index
    %c0_223 = arith.constant 0 : index
    %279 = vector.load %arg25[%c4_222, %c0_223] : memref<16x64xf32, #tpu.memory_space<vmem>>, vector<4x64xf32>
    %c13 = arith.constant 13 : index
    %c0_224 = arith.constant 0 : index
    %280 = vector.load %arg26[%c13, %c0_224] : memref<36x64xf32, #tpu.memory_space<vmem>>, vector<4x64xf32>
    tpu.vector_store %arg26[%c13, %c0_224], %279 {strides = array<i32>} : memref<36x64xf32, #tpu.memory_space<vmem>>, vector<4x64xf32>,
    %c8_225 = arith.constant 8 : index
    %c0_226 = arith.constant 0 : index
    %281 = vector.load %arg25[%c8_225, %c0_226] : memref<16x64xf32, #tpu.memory_space<vmem>>, vector<4x64xf32>
    %c19_227 = arith.constant 19 : index
    %c0_228 = arith.constant 0 : index
    %282 = vector.load %arg26[%c19_227, %c0_228] : memref<36x64xf32, #tpu.memory_space<vmem>>, vector<4x64xf32>
    tpu.vector_store %arg26[%c19_227, %c0_228], %281 {strides = array<i32>} : memref<36x64xf32, #tpu.memory_space<vmem>>, vector<4x64xf32>,
    %c12_229 = arith.constant 12 : index
    %c0_230 = arith.constant 0 : index
    %283 = vector.load %arg25[%c12_229, %c0_230] : memref<16x64xf32, #tpu.memory_space<vmem>>, vector<4x64xf32>
    %c25 = arith.constant 25 : index
    %c0_231 = arith.constant 0 : index
    %284 = vector.load %arg26[%c25, %c0_231] : memref<36x64xf32, #tpu.memory_space<vmem>>, vector<4x64xf32>
    tpu.vector_store %arg26[%c25, %c0_231], %283 {strides = array<i32>} : memref<36x64xf32, #tpu.memory_space<vmem>>, vector<4x64xf32>,
    %c0_232 = arith.constant 0 : index
    %c0_233 = arith.constant 0 : index
    %285 = vector.load %arg26[%c0_232, %c0_233] : memref<36x64xf32, #tpu.memory_space<vmem>>, vector<22x64xf32>
    %c0_234 = arith.constant 0 : index
    %c0_235 = arith.constant 0 : index
    %286 = vector.load %arg10[%c0_234, %c0_235] : memref<576x128xf32, #tpu.memory_space<vmem>>, vector<64x128xf32>
    %cst_236 = arith.constant dense<0.000000e+00> : vector<22x128xf32>
    %287 = tpu.matmul %285, %286, %cst_236 {dimension_numbers = #tpu.dot_dimension_numbers<[1], [0], [0], [1], [0, 0, 1, 1], [], []>} : vector<22x64xf32>, vector<64x128xf32>, vector<22x128xf32> -> vector<22x128xf32>
    %c1_237 = arith.constant 1 : index
    %c0_238 = arith.constant 0 : index
    %288 = vector.load %arg26[%c1_237, %c0_238] : memref<36x64xf32, #tpu.memory_space<vmem>>, vector<22x64xf32>
    %c64_239 = arith.constant 64 : index
    %c0_240 = arith.constant 0 : index
    %289 = vector.load %arg10[%c64_239, %c0_240] : memref<576x128xf32, #tpu.memory_space<vmem>>, vector<64x128xf32>
    %cst_241 = arith.constant dense<0.000000e+00> : vector<22x128xf32>
    %290 = tpu.matmul %288, %289, %cst_241 {dimension_numbers = #tpu.dot_dimension_numbers<[1], [0], [0], [1], [0, 0, 1, 1], [], []>} : vector<22x64xf32>, vector<64x128xf32>, vector<22x128xf32> -> vector<22x128xf32>
    %291 = arith.addf %287, %290 : vector<22x128xf32>
    %c2_242 = arith.constant 2 : index
    %c0_243 = arith.constant 0 : index
    %292 = vector.load %arg26[%c2_242, %c0_243] : memref<36x64xf32, #tpu.memory_space<vmem>>, vector<22x64xf32>
    %c128_244 = arith.constant 128 : index
    %c0_245 = arith.constant 0 : index
    %293 = vector.load %arg10[%c128_244, %c0_245] : memref<576x128xf32, #tpu.memory_space<vmem>>, vector<64x128xf32>
    %cst_246 = arith.constant dense<0.000000e+00> : vector<22x128xf32>
    %294 = tpu.matmul %292, %293, %cst_246 {dimension_numbers = #tpu.dot_dimension_numbers<[1], [0], [0], [1], [0, 0, 1, 1], [], []>} : vector<22x64xf32>, vector<64x128xf32>, vector<22x128xf32> -> vector<22x128xf32>
    %295 = arith.addf %291, %294 : vector<22x128xf32>
    %c6_247 = arith.constant 6 : index
    %c0_248 = arith.constant 0 : index
    %296 = vector.load %arg26[%c6_247, %c0_248] : memref<36x64xf32, #tpu.memory_space<vmem>>, vector<22x64xf32>
    %c192_249 = arith.constant 192 : index
    %c0_250 = arith.constant 0 : index
    %297 = vector.load %arg10[%c192_249, %c0_250] : memref<576x128xf32, #tpu.memory_space<vmem>>, vector<64x128xf32>
    %cst_251 = arith.constant dense<0.000000e+00> : vector<22x128xf32>
    %298 = tpu.matmul %296, %297, %cst_251 {dimension_numbers = #tpu.dot_dimension_numbers<[1], [0], [0], [1], [0, 0, 1, 1], [], []>} : vector<22x64xf32>, vector<64x128xf32>, vector<22x128xf32> -> vector<22x128xf32>
    %299 = arith.addf %295, %298 : vector<22x128xf32>
    %c7_252 = arith.constant 7 : index
    %c0_253 = arith.constant 0 : index
    %300 = vector.load %arg26[%c7_252, %c0_253] : memref<36x64xf32, #tpu.memory_space<vmem>>, vector<22x64xf32>
    %c256_254 = arith.constant 256 : index
    %c0_255 = arith.constant 0 : index
    %301 = vector.load %arg10[%c256_254, %c0_255] : memref<576x128xf32, #tpu.memory_space<vmem>>, vector<64x128xf32>
    %cst_256 = arith.constant dense<0.000000e+00> : vector<22x128xf32>
    %302 = tpu.matmul %300, %301, %cst_256 {dimension_numbers = #tpu.dot_dimension_numbers<[1], [0], [0], [1], [0, 0, 1, 1], [], []>} : vector<22x64xf32>, vector<64x128xf32>, vector<22x128xf32> -> vector<22x128xf32>
    %303 = arith.addf %299, %302 : vector<22x128xf32>
    %c8_257 = arith.constant 8 : index
    %c0_258 = arith.constant 0 : index
    %304 = vector.load %arg26[%c8_257, %c0_258] : memref<36x64xf32, #tpu.memory_space<vmem>>, vector<22x64xf32>
    %c320 = arith.constant 320 : index
    %c0_259 = arith.constant 0 : index
    %305 = vector.load %arg10[%c320, %c0_259] : memref<576x128xf32, #tpu.memory_space<vmem>>, vector<64x128xf32>
    %cst_260 = arith.constant dense<0.000000e+00> : vector<22x128xf32>
    %306 = tpu.matmul %304, %305, %cst_260 {dimension_numbers = #tpu.dot_dimension_numbers<[1], [0], [0], [1], [0, 0, 1, 1], [], []>} : vector<22x64xf32>, vector<64x128xf32>, vector<22x128xf32> -> vector<22x128xf32>
    %307 = arith.addf %303, %306 : vector<22x128xf32>
    %c12_261 = arith.constant 12 : index
    %c0_262 = arith.constant 0 : index
    %308 = vector.load %arg26[%c12_261, %c0_262] : memref<36x64xf32, #tpu.memory_space<vmem>>, vector<22x64xf32>
    %c384 = arith.constant 384 : index
    %c0_263 = arith.constant 0 : index
    %309 = vector.load %arg10[%c384, %c0_263] : memref<576x128xf32, #tpu.memory_space<vmem>>, vector<64x128xf32>
    %cst_264 = arith.constant dense<0.000000e+00> : vector<22x128xf32>
    %310 = tpu.matmul %308, %309, %cst_264 {dimension_numbers = #tpu.dot_dimension_numbers<[1], [0], [0], [1], [0, 0, 1, 1], [], []>} : vector<22x64xf32>, vector<64x128xf32>, vector<22x128xf32> -> vector<22x128xf32>
    %311 = arith.addf %307, %310 : vector<22x128xf32>
    %c13_265 = arith.constant 13 : index
    %c0_266 = arith.constant 0 : index
    %312 = vector.load %arg26[%c13_265, %c0_266] : memref<36x64xf32, #tpu.memory_space<vmem>>, vector<22x64xf32>
    %c448 = arith.constant 448 : index
    %c0_267 = arith.constant 0 : index
    %313 = vector.load %arg10[%c448, %c0_267] : memref<576x128xf32, #tpu.memory_space<vmem>>, vector<64x128xf32>
    %cst_268 = arith.constant dense<0.000000e+00> : vector<22x128xf32>
    %314 = tpu.matmul %312, %313, %cst_268 {dimension_numbers = #tpu.dot_dimension_numbers<[1], [0], [0], [1], [0, 0, 1, 1], [], []>} : vector<22x64xf32>, vector<64x128xf32>, vector<22x128xf32> -> vector<22x128xf32>
    %315 = arith.addf %311, %314 : vector<22x128xf32>
    %c14 = arith.constant 14 : index
    %c0_269 = arith.constant 0 : index
    %316 = vector.load %arg26[%c14, %c0_269] : memref<36x64xf32, #tpu.memory_space<vmem>>, vector<22x64xf32>
    %c512 = arith.constant 512 : index
    %c0_270 = arith.constant 0 : index
    %317 = vector.load %arg10[%c512, %c0_270] : memref<576x128xf32, #tpu.memory_space<vmem>>, vector<64x128xf32>
    %cst_271 = arith.constant dense<0.000000e+00> : vector<22x128xf32>
    %318 = tpu.matmul %316, %317, %cst_271 {dimension_numbers = #tpu.dot_dimension_numbers<[1], [0], [0], [1], [0, 0, 1, 1], [], []>} : vector<22x64xf32>, vector<64x128xf32>, vector<22x128xf32> -> vector<22x128xf32>
    %319 = arith.addf %315, %318 : vector<22x128xf32>
    %c0_272 = arith.constant 0 : index
    %c0_273 = arith.constant 0 : index
    %320 = vector.load %arg11[%c0_272, %c0_273] : memref<1x128xf32, #tpu.memory_space<vmem>>, vector<1x128xf32>
    %321 = vector.broadcast %320 : vector<1x128xf32> to vector<22x128xf32>
    %322 = arith.addf %319, %321 : vector<22x128xf32>
    %cst_274 = arith.constant 0.000000e+00 : f32
    %323 = vector.broadcast %cst_274 : f32 to vector<22x128xf32>
    %324 = arith.maximumf %322, %323 : vector<22x128xf32>
    %c0_275 = arith.constant 0 : index
    %c0_276 = arith.constant 0 : index
    %325 = vector.load %arg27[%c0_275, %c0_276] : memref<24x128xf32, #tpu.memory_space<vmem>>, vector<22x128xf32>
    tpu.vector_store %arg27[%c0_275, %c0_276], %324 {strides = array<i32>} : memref<24x128xf32, #tpu.memory_space<vmem>>, vector<22x128xf32>,
    %c0_277 = arith.constant 0 : index
    %c0_278 = arith.constant 0 : index
    %326 = vector.load %arg27[%c0_277, %c0_278] : memref<24x128xf32, #tpu.memory_space<vmem>>, vector<4x128xf32>
    %c0_279 = arith.constant 0 : index
    %c0_280 = arith.constant 0 : index
    %327 = vector.load %arg28[%c0_279, %c0_280] : memref<16x128xf32, #tpu.memory_space<vmem>>, vector<4x128xf32>
    tpu.vector_store %arg28[%c0_279, %c0_280], %326 {strides = array<i32>} : memref<16x128xf32, #tpu.memory_space<vmem>>, vector<4x128xf32>,
    %c6_281 = arith.constant 6 : index
    %c0_282 = arith.constant 0 : index
    %328 = vector.load %arg27[%c6_281, %c0_282] : memref<24x128xf32, #tpu.memory_space<vmem>>, vector<4x128xf32>
    %c4_283 = arith.constant 4 : index
    %c0_284 = arith.constant 0 : index
    %329 = vector.load %arg28[%c4_283, %c0_284] : memref<16x128xf32, #tpu.memory_space<vmem>>, vector<4x128xf32>
    tpu.vector_store %arg28[%c4_283, %c0_284], %328 {strides = array<i32>} : memref<16x128xf32, #tpu.memory_space<vmem>>, vector<4x128xf32>,
    %c12_285 = arith.constant 12 : index
    %c0_286 = arith.constant 0 : index
    %330 = vector.load %arg27[%c12_285, %c0_286] : memref<24x128xf32, #tpu.memory_space<vmem>>, vector<4x128xf32>
    %c8_287 = arith.constant 8 : index
    %c0_288 = arith.constant 0 : index
    %331 = vector.load %arg28[%c8_287, %c0_288] : memref<16x128xf32, #tpu.memory_space<vmem>>, vector<4x128xf32>
    tpu.vector_store %arg28[%c8_287, %c0_288], %330 {strides = array<i32>} : memref<16x128xf32, #tpu.memory_space<vmem>>, vector<4x128xf32>,
    %c18_289 = arith.constant 18 : index
    %c0_290 = arith.constant 0 : index
    %332 = vector.load %arg27[%c18_289, %c0_290] : memref<24x128xf32, #tpu.memory_space<vmem>>, vector<4x128xf32>
    %c12_291 = arith.constant 12 : index
    %c0_292 = arith.constant 0 : index
    %333 = vector.load %arg28[%c12_291, %c0_292] : memref<16x128xf32, #tpu.memory_space<vmem>>, vector<4x128xf32>
    tpu.vector_store %arg28[%c12_291, %c0_292], %332 {strides = array<i32>} : memref<16x128xf32, #tpu.memory_space<vmem>>, vector<4x128xf32>,
    %c0_293 = arith.constant 0 : index
    %c0_294 = arith.constant 0 : index
    %334 = vector.load %arg28[%c0_293, %c0_294] : memref<16x128xf32, #tpu.memory_space<vmem>>, vector<16x128xf32>
    %c0_295 = arith.constant 0 : index
    %c0_296 = arith.constant 0 : index
    %335 = vector.load %arg12[%c0_295, %c0_296] : memref<16x128xf32, #tpu.memory_space<vmem>>, vector<16x128xf32>
    %c0_297 = arith.constant 0 : index
    %c0_298 = arith.constant 0 : index
    %336 = vector.load %arg13[%c0_297, %c0_298] : memref<16x128xf32, #tpu.memory_space<vmem>>, vector<16x128xf32>
    %cst_299 = arith.constant dense<0.000000e+00> : vector<16xf32>
    %337 = vector.multi_reduction <add>, %334, %cst_299 [1] : vector<16x128xf32> to vector<16xf32>
    %338 = vector.shape_cast %337 : vector<16xf32> to vector<16x1xf32>
    %cst_300 = arith.constant dense<0.000000e+00> : vector<1xf32>
    %339 = vector.multi_reduction <add>, %338, %cst_300 [0] : vector<16x1xf32> to vector<1xf32>
    %340 = vector.shape_cast %339 : vector<1xf32> to vector<1x1xf32>
    %cst_301 = arith.constant 2.048000e+03 : f32
    %341 = vector.broadcast %cst_301 : f32 to vector<1x1xf32>
    %342 = arith.divf %340, %341 : vector<1x1xf32>
    %343 = vector.broadcast %342 : vector<1x1xf32> to vector<16x128xf32>
    %344 = arith.subf %334, %343 : vector<16x128xf32>
    %345 = arith.mulf %344, %344 : vector<16x128xf32>
    %cst_302 = arith.constant dense<0.000000e+00> : vector<16xf32>
    %346 = vector.multi_reduction <add>, %345, %cst_302 [1] : vector<16x128xf32> to vector<16xf32>
    %347 = vector.shape_cast %346 : vector<16xf32> to vector<16x1xf32>
    %cst_303 = arith.constant dense<0.000000e+00> : vector<1xf32>
    %348 = vector.multi_reduction <add>, %347, %cst_303 [0] : vector<16x1xf32> to vector<1xf32>
    %349 = vector.shape_cast %348 : vector<1xf32> to vector<1x1xf32>
    %cst_304 = arith.constant 2.048000e+03 : f32
    %350 = vector.broadcast %cst_304 : f32 to vector<1x1xf32>
    %351 = arith.divf %349, %350 : vector<1x1xf32>
    %cst_305 = arith.constant 1.000000e-16 : f32
    %352 = vector.broadcast %cst_305 : f32 to vector<1x1xf32>
    %353 = arith.addf %351, %352 : vector<1x1xf32>
    %354 = math.rsqrt %353 : vector<1x1xf32>
    %355 = vector.broadcast %354 : vector<1x1xf32> to vector<16x128xf32>
    %356 = arith.mulf %344, %355 : vector<16x128xf32>
    %357 = arith.mulf %335, %356 : vector<16x128xf32>
    %358 = arith.addf %357, %336 : vector<16x128xf32>
    %c0_306 = arith.constant 0 : index
    %c0_307 = arith.constant 0 : index
    %359 = vector.load %arg28[%c0_306, %c0_307] : memref<16x128xf32, #tpu.memory_space<vmem>>, vector<16x128xf32>
    tpu.vector_store %arg28[%c0_306, %c0_307], %358 {strides = array<i32>} : memref<16x128xf32, #tpu.memory_space<vmem>>, vector<16x128xf32>,
    %c0_308 = arith.constant 0 : index
    %c0_309 = arith.constant 0 : index
    %360 = vector.load %arg28[%c0_308, %c0_309] : memref<16x128xf32, #tpu.memory_space<vmem>>, vector<1x128xf32>
    %c0_310 = arith.constant 0 : index
    %c0_311 = arith.constant 0 : index
    %361 = vector.load %arg14[%c0_310, %c0_311] : memref<2048x256xf32, #tpu.memory_space<vmem>>, vector<128x256xf32>
    %cst_312 = arith.constant dense<0.000000e+00> : vector<1x256xf32>
    %362 = tpu.matmul %360, %361, %cst_312 {dimension_numbers = #tpu.dot_dimension_numbers<[1], [0], [0], [1], [0, 0, 1, 1], [], []>} : vector<1x128xf32>, vector<128x256xf32>, vector<1x256xf32> -> vector<1x256xf32>
    %c1_313 = arith.constant 1 : index
    %c0_314 = arith.constant 0 : index
    %363 = vector.load %arg28[%c1_313, %c0_314] : memref<16x128xf32, #tpu.memory_space<vmem>>, vector<1x128xf32>
    %c128_315 = arith.constant 128 : index
    %c0_316 = arith.constant 0 : index
    %364 = vector.load %arg14[%c128_315, %c0_316] : memref<2048x256xf32, #tpu.memory_space<vmem>>, vector<128x256xf32>
    %cst_317 = arith.constant dense<0.000000e+00> : vector<1x256xf32>
    %365 = tpu.matmul %363, %364, %cst_317 {dimension_numbers = #tpu.dot_dimension_numbers<[1], [0], [0], [1], [0, 0, 1, 1], [], []>} : vector<1x128xf32>, vector<128x256xf32>, vector<1x256xf32> -> vector<1x256xf32>
    %366 = arith.addf %362, %365 : vector<1x256xf32>
    %c2_318 = arith.constant 2 : index
    %c0_319 = arith.constant 0 : index
    %367 = vector.load %arg28[%c2_318, %c0_319] : memref<16x128xf32, #tpu.memory_space<vmem>>, vector<1x128xf32>
    %c256_320 = arith.constant 256 : index
    %c0_321 = arith.constant 0 : index
    %368 = vector.load %arg14[%c256_320, %c0_321] : memref<2048x256xf32, #tpu.memory_space<vmem>>, vector<128x256xf32>
    %cst_322 = arith.constant dense<0.000000e+00> : vector<1x256xf32>
    %369 = tpu.matmul %367, %368, %cst_322 {dimension_numbers = #tpu.dot_dimension_numbers<[1], [0], [0], [1], [0, 0, 1, 1], [], []>} : vector<1x128xf32>, vector<128x256xf32>, vector<1x256xf32> -> vector<1x256xf32>
    %370 = arith.addf %366, %369 : vector<1x256xf32>
    %c3_323 = arith.constant 3 : index
    %c0_324 = arith.constant 0 : index
    %371 = vector.load %arg28[%c3_323, %c0_324] : memref<16x128xf32, #tpu.memory_space<vmem>>, vector<1x128xf32>
    %c384_325 = arith.constant 384 : index
    %c0_326 = arith.constant 0 : index
    %372 = vector.load %arg14[%c384_325, %c0_326] : memref<2048x256xf32, #tpu.memory_space<vmem>>, vector<128x256xf32>
    %cst_327 = arith.constant dense<0.000000e+00> : vector<1x256xf32>
    %373 = tpu.matmul %371, %372, %cst_327 {dimension_numbers = #tpu.dot_dimension_numbers<[1], [0], [0], [1], [0, 0, 1, 1], [], []>} : vector<1x128xf32>, vector<128x256xf32>, vector<1x256xf32> -> vector<1x256xf32>
    %374 = arith.addf %370, %373 : vector<1x256xf32>
    %c4_328 = arith.constant 4 : index
    %c0_329 = arith.constant 0 : index
    %375 = vector.load %arg28[%c4_328, %c0_329] : memref<16x128xf32, #tpu.memory_space<vmem>>, vector<1x128xf32>
    %c512_330 = arith.constant 512 : index
    %c0_331 = arith.constant 0 : index
    %376 = vector.load %arg14[%c512_330, %c0_331] : memref<2048x256xf32, #tpu.memory_space<vmem>>, vector<128x256xf32>
    %cst_332 = arith.constant dense<0.000000e+00> : vector<1x256xf32>
    %377 = tpu.matmul %375, %376, %cst_332 {dimension_numbers = #tpu.dot_dimension_numbers<[1], [0], [0], [1], [0, 0, 1, 1], [], []>} : vector<1x128xf32>, vector<128x256xf32>, vector<1x256xf32> -> vector<1x256xf32>
    %378 = arith.addf %374, %377 : vector<1x256xf32>
    %c5_333 = arith.constant 5 : index
    %c0_334 = arith.constant 0 : index
    %379 = vector.load %arg28[%c5_333, %c0_334] : memref<16x128xf32, #tpu.memory_space<vmem>>, vector<1x128xf32>
    %c640 = arith.constant 640 : index
    %c0_335 = arith.constant 0 : index
    %380 = vector.load %arg14[%c640, %c0_335] : memref<2048x256xf32, #tpu.memory_space<vmem>>, vector<128x256xf32>
    %cst_336 = arith.constant dense<0.000000e+00> : vector<1x256xf32>
    %381 = tpu.matmul %379, %380, %cst_336 {dimension_numbers = #tpu.dot_dimension_numbers<[1], [0], [0], [1], [0, 0, 1, 1], [], []>} : vector<1x128xf32>, vector<128x256xf32>, vector<1x256xf32> -> vector<1x256xf32>
    %382 = arith.addf %378, %381 : vector<1x256xf32>
    %c6_337 = arith.constant 6 : index
    %c0_338 = arith.constant 0 : index
    %383 = vector.load %arg28[%c6_337, %c0_338] : memref<16x128xf32, #tpu.memory_space<vmem>>, vector<1x128xf32>
    %c768 = arith.constant 768 : index
    %c0_339 = arith.constant 0 : index
    %384 = vector.load %arg14[%c768, %c0_339] : memref<2048x256xf32, #tpu.memory_space<vmem>>, vector<128x256xf32>
    %cst_340 = arith.constant dense<0.000000e+00> : vector<1x256xf32>
    %385 = tpu.matmul %383, %384, %cst_340 {dimension_numbers = #tpu.dot_dimension_numbers<[1], [0], [0], [1], [0, 0, 1, 1], [], []>} : vector<1x128xf32>, vector<128x256xf32>, vector<1x256xf32> -> vector<1x256xf32>
    %386 = arith.addf %382, %385 : vector<1x256xf32>
    %c7_341 = arith.constant 7 : index
    %c0_342 = arith.constant 0 : index
    %387 = vector.load %arg28[%c7_341, %c0_342] : memref<16x128xf32, #tpu.memory_space<vmem>>, vector<1x128xf32>
    %c896 = arith.constant 896 : index
    %c0_343 = arith.constant 0 : index
    %388 = vector.load %arg14[%c896, %c0_343] : memref<2048x256xf32, #tpu.memory_space<vmem>>, vector<128x256xf32>
    %cst_344 = arith.constant dense<0.000000e+00> : vector<1x256xf32>
    %389 = tpu.matmul %387, %388, %cst_344 {dimension_numbers = #tpu.dot_dimension_numbers<[1], [0], [0], [1], [0, 0, 1, 1], [], []>} : vector<1x128xf32>, vector<128x256xf32>, vector<1x256xf32> -> vector<1x256xf32>
    %390 = arith.addf %386, %389 : vector<1x256xf32>
    %c8_345 = arith.constant 8 : index
    %c0_346 = arith.constant 0 : index
    %391 = vector.load %arg28[%c8_345, %c0_346] : memref<16x128xf32, #tpu.memory_space<vmem>>, vector<1x128xf32>
    %c1024 = arith.constant 1024 : index
    %c0_347 = arith.constant 0 : index
    %392 = vector.load %arg14[%c1024, %c0_347] : memref<2048x256xf32, #tpu.memory_space<vmem>>, vector<128x256xf32>
    %cst_348 = arith.constant dense<0.000000e+00> : vector<1x256xf32>
    %393 = tpu.matmul %391, %392, %cst_348 {dimension_numbers = #tpu.dot_dimension_numbers<[1], [0], [0], [1], [0, 0, 1, 1], [], []>} : vector<1x128xf32>, vector<128x256xf32>, vector<1x256xf32> -> vector<1x256xf32>
    %394 = arith.addf %390, %393 : vector<1x256xf32>
    %c9 = arith.constant 9 : index
    %c0_349 = arith.constant 0 : index
    %395 = vector.load %arg28[%c9, %c0_349] : memref<16x128xf32, #tpu.memory_space<vmem>>, vector<1x128xf32>
    %c1152 = arith.constant 1152 : index
    %c0_350 = arith.constant 0 : index
    %396 = vector.load %arg14[%c1152, %c0_350] : memref<2048x256xf32, #tpu.memory_space<vmem>>, vector<128x256xf32>
    %cst_351 = arith.constant dense<0.000000e+00> : vector<1x256xf32>
    %397 = tpu.matmul %395, %396, %cst_351 {dimension_numbers = #tpu.dot_dimension_numbers<[1], [0], [0], [1], [0, 0, 1, 1], [], []>} : vector<1x128xf32>, vector<128x256xf32>, vector<1x256xf32> -> vector<1x256xf32>
    %398 = arith.addf %394, %397 : vector<1x256xf32>
    %c10_352 = arith.constant 10 : index
    %c0_353 = arith.constant 0 : index
    %399 = vector.load %arg28[%c10_352, %c0_353] : memref<16x128xf32, #tpu.memory_space<vmem>>, vector<1x128xf32>
    %c1280 = arith.constant 1280 : index
    %c0_354 = arith.constant 0 : index
    %400 = vector.load %arg14[%c1280, %c0_354] : memref<2048x256xf32, #tpu.memory_space<vmem>>, vector<128x256xf32>
    %cst_355 = arith.constant dense<0.000000e+00> : vector<1x256xf32>
    %401 = tpu.matmul %399, %400, %cst_355 {dimension_numbers = #tpu.dot_dimension_numbers<[1], [0], [0], [1], [0, 0, 1, 1], [], []>} : vector<1x128xf32>, vector<128x256xf32>, vector<1x256xf32> -> vector<1x256xf32>
    %402 = arith.addf %398, %401 : vector<1x256xf32>
    %c11_356 = arith.constant 11 : index
    %c0_357 = arith.constant 0 : index
    %403 = vector.load %arg28[%c11_356, %c0_357] : memref<16x128xf32, #tpu.memory_space<vmem>>, vector<1x128xf32>
    %c1408 = arith.constant 1408 : index
    %c0_358 = arith.constant 0 : index
    %404 = vector.load %arg14[%c1408, %c0_358] : memref<2048x256xf32, #tpu.memory_space<vmem>>, vector<128x256xf32>
    %cst_359 = arith.constant dense<0.000000e+00> : vector<1x256xf32>
    %405 = tpu.matmul %403, %404, %cst_359 {dimension_numbers = #tpu.dot_dimension_numbers<[1], [0], [0], [1], [0, 0, 1, 1], [], []>} : vector<1x128xf32>, vector<128x256xf32>, vector<1x256xf32> -> vector<1x256xf32>
    %406 = arith.addf %402, %405 : vector<1x256xf32>
    %c12_360 = arith.constant 12 : index
    %c0_361 = arith.constant 0 : index
    %407 = vector.load %arg28[%c12_360, %c0_361] : memref<16x128xf32, #tpu.memory_space<vmem>>, vector<1x128xf32>
    %c1536 = arith.constant 1536 : index
    %c0_362 = arith.constant 0 : index
    %408 = vector.load %arg14[%c1536, %c0_362] : memref<2048x256xf32, #tpu.memory_space<vmem>>, vector<128x256xf32>
    %cst_363 = arith.constant dense<0.000000e+00> : vector<1x256xf32>
    %409 = tpu.matmul %407, %408, %cst_363 {dimension_numbers = #tpu.dot_dimension_numbers<[1], [0], [0], [1], [0, 0, 1, 1], [], []>} : vector<1x128xf32>, vector<128x256xf32>, vector<1x256xf32> -> vector<1x256xf32>
    %410 = arith.addf %406, %409 : vector<1x256xf32>
    %c13_364 = arith.constant 13 : index
    %c0_365 = arith.constant 0 : index
    %411 = vector.load %arg28[%c13_364, %c0_365] : memref<16x128xf32, #tpu.memory_space<vmem>>, vector<1x128xf32>
    %c1664 = arith.constant 1664 : index
    %c0_366 = arith.constant 0 : index
    %412 = vector.load %arg14[%c1664, %c0_366] : memref<2048x256xf32, #tpu.memory_space<vmem>>, vector<128x256xf32>
    %cst_367 = arith.constant dense<0.000000e+00> : vector<1x256xf32>
    %413 = tpu.matmul %411, %412, %cst_367 {dimension_numbers = #tpu.dot_dimension_numbers<[1], [0], [0], [1], [0, 0, 1, 1], [], []>} : vector<1x128xf32>, vector<128x256xf32>, vector<1x256xf32> -> vector<1x256xf32>
    %414 = arith.addf %410, %413 : vector<1x256xf32>
    %c14_368 = arith.constant 14 : index
    %c0_369 = arith.constant 0 : index
    %415 = vector.load %arg28[%c14_368, %c0_369] : memref<16x128xf32, #tpu.memory_space<vmem>>, vector<1x128xf32>
    %c1792 = arith.constant 1792 : index
    %c0_370 = arith.constant 0 : index
    %416 = vector.load %arg14[%c1792, %c0_370] : memref<2048x256xf32, #tpu.memory_space<vmem>>, vector<128x256xf32>
    %cst_371 = arith.constant dense<0.000000e+00> : vector<1x256xf32>
    %417 = tpu.matmul %415, %416, %cst_371 {dimension_numbers = #tpu.dot_dimension_numbers<[1], [0], [0], [1], [0, 0, 1, 1], [], []>} : vector<1x128xf32>, vector<128x256xf32>, vector<1x256xf32> -> vector<1x256xf32>
    %418 = arith.addf %414, %417 : vector<1x256xf32>
    %c15 = arith.constant 15 : index
    %c0_372 = arith.constant 0 : index
    %419 = vector.load %arg28[%c15, %c0_372] : memref<16x128xf32, #tpu.memory_space<vmem>>, vector<1x128xf32>
    %c1920 = arith.constant 1920 : index
    %c0_373 = arith.constant 0 : index
    %420 = vector.load %arg14[%c1920, %c0_373] : memref<2048x256xf32, #tpu.memory_space<vmem>>, vector<128x256xf32>
    %cst_374 = arith.constant dense<0.000000e+00> : vector<1x256xf32>
    %421 = tpu.matmul %419, %420, %cst_374 {dimension_numbers = #tpu.dot_dimension_numbers<[1], [0], [0], [1], [0, 0, 1, 1], [], []>} : vector<1x128xf32>, vector<128x256xf32>, vector<1x256xf32> -> vector<1x256xf32>
    %422 = arith.addf %418, %421 : vector<1x256xf32>
    %c0_375 = arith.constant 0 : index
    %c0_376 = arith.constant 0 : index
    %423 = vector.load %arg15[%c0_375, %c0_376] : memref<1x256xf32, #tpu.memory_space<vmem>>, vector<1x256xf32>
    %424 = arith.addf %422, %423 : vector<1x256xf32>
    %cst_377 = arith.constant 0.000000e+00 : f32
    %425 = vector.broadcast %cst_377 : f32 to vector<1x256xf32>
    %426 = arith.maximumf %424, %425 : vector<1x256xf32>
    %c0_378 = arith.constant 0 : index
    %c0_379 = arith.constant 0 : index
    %427 = vector.load %arg16[%c0_378, %c0_379] : memref<1x256xf32, #tpu.memory_space<vmem>>, vector<1x256xf32>
    %c0_380 = arith.constant 0 : index
    %c0_381 = arith.constant 0 : index
    %428 = vector.load %arg17[%c0_380, %c0_381] : memref<1x256xf32, #tpu.memory_space<vmem>>, vector<1x256xf32>
    %cst_382 = arith.constant dense<0.000000e+00> : vector<1xf32>
    %429 = vector.multi_reduction <add>, %426, %cst_382 [1] : vector<1x256xf32> to vector<1xf32>
    %430 = vector.shape_cast %429 : vector<1xf32> to vector<1x1xf32>
    %cst_383 = arith.constant dense<0.000000e+00> : vector<1xf32>
    %431 = vector.multi_reduction <add>, %430, %cst_383 [0] : vector<1x1xf32> to vector<1xf32>
    %432 = vector.shape_cast %431 : vector<1xf32> to vector<1x1xf32>
    %cst_384 = arith.constant 2.560000e+02 : f32
    %433 = vector.broadcast %cst_384 : f32 to vector<1x1xf32>
    %434 = arith.divf %432, %433 : vector<1x1xf32>
    %435 = vector.broadcast %434 : vector<1x1xf32> to vector<1x256xf32>
    %436 = arith.subf %426, %435 : vector<1x256xf32>
    %437 = arith.mulf %436, %436 : vector<1x256xf32>
    %cst_385 = arith.constant dense<0.000000e+00> : vector<1xf32>
    %438 = vector.multi_reduction <add>, %437, %cst_385 [1] : vector<1x256xf32> to vector<1xf32>
    %439 = vector.shape_cast %438 : vector<1xf32> to vector<1x1xf32>
    %cst_386 = arith.constant dense<0.000000e+00> : vector<1xf32>
    %440 = vector.multi_reduction <add>, %439, %cst_386 [0] : vector<1x1xf32> to vector<1xf32>
    %441 = vector.shape_cast %440 : vector<1xf32> to vector<1x1xf32>
    %cst_387 = arith.constant 2.560000e+02 : f32
    %442 = vector.broadcast %cst_387 : f32 to vector<1x1xf32>
    %443 = arith.divf %441, %442 : vector<1x1xf32>
    %cst_388 = arith.constant 1.000000e-16 : f32
    %444 = vector.broadcast %cst_388 : f32 to vector<1x1xf32>
    %445 = arith.addf %443, %444 : vector<1x1xf32>
    %446 = math.rsqrt %445 : vector<1x1xf32>
    %447 = vector.broadcast %446 : vector<1x1xf32> to vector<1x256xf32>
    %448 = arith.mulf %436, %447 : vector<1x256xf32>
    %449 = arith.mulf %427, %448 : vector<1x256xf32>
    %450 = arith.addf %449, %428 : vector<1x256xf32>
    %c0_389 = arith.constant 0 : index
    %c0_390 = arith.constant 0 : index
    %451 = vector.load %arg18[%c0_389, %c0_390] : memref<256x10xf32, #tpu.memory_space<vmem>>, vector<256x10xf32>
    %cst_391 = arith.constant dense<0.000000e+00> : vector<1x10xf32>
    %452 = tpu.matmul %450, %451, %cst_391 {dimension_numbers = #tpu.dot_dimension_numbers<[1], [0], [0], [1], [0, 0, 1, 1], [], []>} : vector<1x256xf32>, vector<256x10xf32>, vector<1x10xf32> -> vector<1x10xf32>
    %c0_392 = arith.constant 0 : index
    %c0_393 = arith.constant 0 : index
    %453 = vector.load %arg19[%c0_392, %c0_393] : memref<1x10xf32, #tpu.memory_space<vmem>>, vector<1x10xf32>
    %454 = arith.addf %452, %453 : vector<1x10xf32>
    %c0_394 = arith.constant 0 : index
    %c0_395 = arith.constant 0 : index
    %c0_396 = arith.constant 0 : index
    %455 = vector.load %arg20[%c0_394, %c0_395, %c0_396] : memref<1x1x10xf32, #tpu.memory_space<vmem>>, vector<1x1x10xf32>
    %456 = vector.shape_cast %455 : vector<1x1x10xf32> to vector<1x10xf32>
    %457 = vector.shape_cast %454 : vector<1x10xf32> to vector<1x1x10xf32>
    tpu.vector_store %arg20[%c0_394, %c0_395, %c0_396], %457 {strides = array<i32>} : memref<1x1x10xf32, #tpu.memory_space<vmem>>, vector<1x1x10xf32>,
    return
  }
  func.func @transform_0(%arg0: i32) -> (i32, i32, i32) {
    %c0_i32 = arith.constant 0 : i32
    %c0_i32_0 = arith.constant 0 : i32
    %c0_i32_1 = arith.constant 0 : i32
    return %arg0, %c0_i32, %c0_i32_0 : i32, i32, i32
  }
  func.func @transform_1(%arg0: i32) -> (i32, i32) {
    %c0_i32 = arith.constant 0 : i32
    %c0_i32_0 = arith.constant 0 : i32
    %c0_i32_1 = arith.constant 0 : i32
    return %c0_i32, %c0_i32_0 : i32, i32
  }
  func.func @transform_2(%arg0: i32) -> (i32, i32) {
    %c0_i32 = arith.constant 0 : i32
    %c0_i32_0 = arith.constant 0 : i32
    %c0_i32_1 = arith.constant 0 : i32
    return %c0_i32, %c0_i32_0 : i32, i32
  }
  func.func @transform_3(%arg0: i32) -> (i32, i32) {
    %c0_i32 = arith.constant 0 : i32
    %c0_i32_0 = arith.constant 0 : i32
    %c0_i32_1 = arith.constant 0 : i32
    return %c0_i32, %c0_i32_0 : i32, i32
  }
  func.func @transform_4(%arg0: i32) -> (i32, i32) {
    %c0_i32 = arith.constant 0 : i32
    %c0_i32_0 = arith.constant 0 : i32
    %c0_i32_1 = arith.constant 0 : i32
    return %c0_i32, %c0_i32_0 : i32, i32
  }
  func.func @transform_5(%arg0: i32) -> (i32, i32) {
    %c0_i32 = arith.constant 0 : i32
    %c0_i32_0 = arith.constant 0 : i32
    %c0_i32_1 = arith.constant 0 : i32
    return %c0_i32, %c0_i32_0 : i32, i32
  }
  func.func @transform_6(%arg0: i32) -> (i32, i32) {
    %c0_i32 = arith.constant 0 : i32
    %c0_i32_0 = arith.constant 0 : i32
    %c0_i32_1 = arith.constant 0 : i32
    return %c0_i32, %c0_i32_0 : i32, i32
  }
  func.func @transform_7(%arg0: i32) -> (i32, i32) {
    %c0_i32 = arith.constant 0 : i32
    %c0_i32_0 = arith.constant 0 : i32
    %c0_i32_1 = arith.constant 0 : i32
    return %c0_i32, %c0_i32_0 : i32, i32
  }
  func.func @transform_8(%arg0: i32) -> (i32, i32) {
    %c0_i32 = arith.constant 0 : i32
    %c0_i32_0 = arith.constant 0 : i32
    %c0_i32_1 = arith.constant 0 : i32
    return %c0_i32, %c0_i32_0 : i32, i32
  }
  func.func @transform_9(%arg0: i32) -> (i32, i32) {
    %c0_i32 = arith.constant 0 : i32
    %c0_i32_0 = arith.constant 0 : i32
    %c0_i32_1 = arith.constant 0 : i32
    return %c0_i32, %c0_i32_0 : i32, i32
  }
  func.func @transform_10(%arg0: i32) -> (i32, i32) {
    %c0_i32 = arith.constant 0 : i32
    %c0_i32_0 = arith.constant 0 : i32
    %c0_i32_1 = arith.constant 0 : i32
    return %c0_i32, %c0_i32_0 : i32, i32
  }
  func.func @transform_11(%arg0: i32) -> (i32, i32) {
    %c0_i32 = arith.constant 0 : i32
    %c0_i32_0 = arith.constant 0 : i32
    %c0_i32_1 = arith.constant 0 : i32
    return %c0_i32, %c0_i32_0 : i32, i32
  }
  func.func @transform_12(%arg0: i32) -> (i32, i32) {
    %c0_i32 = arith.constant 0 : i32
    %c0_i32_0 = arith.constant 0 : i32
    %c0_i32_1 = arith.constant 0 : i32
    return %c0_i32, %c0_i32_0 : i32, i32
  }
  func.func @transform_13(%arg0: i32) -> (i32, i32) {
    %c0_i32 = arith.constant 0 : i32
    %c0_i32_0 = arith.constant 0 : i32
    %c0_i32_1 = arith.constant 0 : i32
    return %c0_i32, %c0_i32_0 : i32, i32
  }
  func.func @transform_14(%arg0: i32) -> (i32, i32) {
    %c0_i32 = arith.constant 0 : i32
    %c0_i32_0 = arith.constant 0 : i32
    %c0_i32_1 = arith.constant 0 : i32
    return %c0_i32, %c0_i32_0 : i32, i32
  }
  func.func @transform_15(%arg0: i32) -> (i32, i32) {
    %c0_i32 = arith.constant 0 : i32
    %c0_i32_0 = arith.constant 0 : i32
    %c0_i32_1 = arith.constant 0 : i32
    return %c0_i32, %c0_i32_0 : i32, i32
  }
  func.func @transform_16(%arg0: i32) -> (i32, i32) {
    %c0_i32 = arith.constant 0 : i32
    %c0_i32_0 = arith.constant 0 : i32
    %c0_i32_1 = arith.constant 0 : i32
    return %c0_i32, %c0_i32_0 : i32, i32
  }
  func.func @transform_17(%arg0: i32) -> (i32, i32) {
    %c0_i32 = arith.constant 0 : i32
    %c0_i32_0 = arith.constant 0 : i32
    %c0_i32_1 = arith.constant 0 : i32
    return %c0_i32, %c0_i32_0 : i32, i32
  }
  func.func @transform_18(%arg0: i32) -> (i32, i32) {
    %c0_i32 = arith.constant 0 : i32
    %c0_i32_0 = arith.constant 0 : i32
    %c0_i32_1 = arith.constant 0 : i32
    return %c0_i32, %c0_i32_0 : i32, i32
  }
  func.func @transform_19(%arg0: i32) -> (i32, i32, i32) {
    %c0_i32 = arith.constant 0 : i32
    %c0_i32_0 = arith.constant 0 : i32
    %c0_i32_1 = arith.constant 0 : i32
    return %arg0, %c0_i32, %c0_i32_0 : i32, i32, i32
  }
}

</mosaic_0001>

<bundles_post_ra>
// kernel: forward.1
= control target key start
LH: loop header
LB: loop body
LE: loop exit
PB: predicated region body
PF: predicated region fallthrough
CT: control target
= control target key end

     0   :  { %s13826_s0 = inlined_call_operand.vmem [shape: f32[2,324,1], index: 0, kind: input, shape index: {}]   ;;  %s13827_s1 = inlined_call_operand.hbm [shape: f32[9,32], index: 1, kind: input, shape index: {}]   ;;  %s13828_s2 = inlined_call_operand.hbm [shape: f32[1,32], index: 2, kind: input, shape index: {}]   ;;  %s13829_s3 = inlined_call_operand.vmem [shape: f32[64,32], index: 3, kind: input, shape index: {}]   ;;  %s13830_s4 = inlined_call_operand.vmem [shape: f32[64,32], index: 4, kind: input, shape index: {}]   ;;  %s13831_s5 = inlined_call_operand.vmem [shape: f32[288,64], index: 5, kind: input, shape index: {}]   ;;  %s13832_s6 = inlined_call_operand.hbm [shape: f32[1,64], index: 6, kind: input, shape index: {}]   ;;  %s13833_s7 = inlined_call_operand.hbm [shape: f32[16,64], index: 7, kind: input, shape index: {}]   ;;  %s13834_s8 = inlined_call_operand.hbm [shape: f32[16,64], index: 8, kind: input, shape index: {}]   ;;  %s13835_s9 = inlined_call_operand.hbm [shape: f32[576,128], index: 9, kind: input, shape index: {}]   ;;  %s13836_s10 = inlined_call_operand.hbm [shape: f32[1,128], index: 10, kind: input, shape index: {}]   ;;  %s13837_s11 = inlined_call_operand.hbm [shape: f32[16,128], index: 11, kind: input, shape index: {}]   ;;  %s13838_s12 = inlined_call_operand.hbm [shape: f32[16,128], index: 12, kind: input, shape index: {}]   ;;  %s13839_s13 = inlined_call_operand.hbm [shape: f32[2048,256], index: 13, kind: input, shape index: {}]   ;;  %s13840_s14 = inlined_call_operand.hbm [shape: f32[1,256], index: 14, kind: input, shape index: {}]   ;;  %s13841_s15 = inlined_call_operand.hbm [shape: f32[1,256], index: 15, kind: input, shape index: {}]   ;;  %s13842_s16 = inlined_call_operand.hbm [shape: f32[1,256], index: 16, kind: input, shape index: {}]   ;;  %s13843_s17 = inlined_call_operand.vmem [shape: f32[256,10], index: 17, kind: input, shape index: {}]   ;;  %s13844_s18 = inlined_call_operand.hbm [shape: f32[1,10], index: 18, kind: input, shape index: {}]   ;;  %s13845_s19 = inlined_call_operand.hbm [shape: f32[2,1,10], index: 19, kind: output, shape index: {}]  }
   0x1   :  { %13876 = sst [smem:[#allocation216_spill]] %s13826_s0 }
   0x2   :  { %13877 = sst [smem:[#allocation217_spill]] %s13827_s1 }
   0x3   :  { %13878 = sst [smem:[#allocation218_spill]] %s13828_s2 }
   0x4   :  { %13879 = sst [smem:[#allocation219_spill]] %s13829_s3 }
   0x5   :  { %13880 = sst [smem:[#allocation220_spill]] %s13830_s4 }
   0x6   :  { %13881 = sst [smem:[#allocation221_spill]] %s13833_s7 }
   0x7   :  { %13882 = sst [smem:[#allocation222_spill]] %s13835_s9 }
   0x8   :  { %13883 = sst [smem:[#allocation223_spill]] %s13843_s17 }
   0x9   :  { %13884 = sst [smem:[#allocation224_spill]] %s13845_s19 }
   0xa   :  { %24 = vsyncpa [#allocation11], 0 }
   0xb   :  { %25 = vsyncpa [#allocation14], 0 }
   0xc   :  { %26 = vsyncpa [#allocation17], 0 }
   0xd   :  { %27 = vsyncpa [#allocation20], 0 }
   0xe   :  { %28 = vsyncpa [#allocation23], 0 }
   0xf   :  { %29 = vsyncpa [#allocation26], 0 }
  0x10   :  { %30 = vsyncpa [#allocation29], 0 }
  0x11   :  { %31 = vsyncpa [#allocation32], 0 }
  0x12   :  { %32 = vsyncpa [#allocation12], 0 }
  0x13   :  { %34 = vsyncpa [#allocation12 + $0x1], 0  ;;  %s11012_s0 = smov 0   ;;  %s11014_s30 = smov 0  }
  0x14   :  { %s11016_s20 = smov 0   ;;  %s11018_s21 = smov 0  }
  0x15 LB: > { %13885 = sst [smem:[#allocation43_spill]] %s10874_s0  ;;  %s11033_s1 = sadd.s32 4294967295, %s10886_s21   ;;  %s10886_s21 = sphi %s11018_s21, %s14311_s21   ;;  %s10882_s20 = sphi %s11016_s20, %s14314_s20   ;;  %s10878_s30 = sphi %s11014_s30, %s14313_s30   ;;  %s10874_s0 = sphi %s11012_s0, %s14312_s0  }
  0x16   : > { %13886 = sst [smem:[#allocation44_spill]] %s10878_s30  ;;  %s8497_s22 = sadd.s32 4294967294, %s10886_s21  }
  0x17   : > { %13887 = sst [smem:[#allocation45_spill]] %s10882_s20  ;;  %s11037_s2 = sadd.s32 1, %s10886_s21  }
  0x18   : > { %13888 = sst [smem:[#allocation46_spill]] %s10886_s21  ;;  %s451_s23 = sadd.s32 1, %s10882_s20 }
  0x19   : > { %13889 = sst [smem:[#allocation47_spill]] %s11037_s2  ;;  %s448_s24 = ssub.s32 %s10886_s21, %s11037_s2 }
  0x1a   : > { %p461_p0 = scmp.ne.s32.totalorder %s10882_s20, %s10878_s30  ;;  %p449_p1 = scmp.eq.s32.totalorder %s448_s24, 0 }
  0x1b   : > { %p462_p2 = scmp.eq.s32.totalorder %s11033_s1, 1  ;;  %p467_p3 = scmp.ne.s32.totalorder %s10878_s30, %s10874_s0 }
  0x1c   : > { %p468_p4 = scmp.eq.s32.totalorder %s8497_s22, 1  ;;  %p8498_p7 = scmp.ge.s32.totalorder %s10886_s21, 1 }
  0x1d   : > { %s11048_s25 = scalar_select %p449_p1, %s10882_s20, %s451_s23  }
  0x1e   : > { %p11050_p5 = por %p462_p2, %p461_p0  ;;  %p11054_p6 = por %p468_p4, %p467_p3 }
  0x1f   : > { %13890 = sst [smem:[#allocation48_spill]] %s11048_s25  ;;  %p475_p8 = scmp.lt.s32.totalorder %s10886_s21, 3 }
  0x20   : > { %s13891_s3 = scalar_select %p11050_p5, 1, 0 }
  0x21   : > { %s13893_s26 = scalar_select %p11054_p6, 1, 0 }
  0x22   : > { %13892 = sst [smem:[#allocation49_spill]] %s13891_s3  ;;  %p13859_p9 = scmp.eq.s32.totalorder %s11033_s1, 0 }
  0x23   : > { %13894 = sst [smem:[#allocation50_spill]] %s13893_s26  ;;  %p11061_p10 = pnand %p8498_p7, %p475_p8 }
  0x24   : > { %s10888_s28 = smov [#allocation13]   ;;  %s10889_s23 = smov [#allocation16]  }
  0x25   : > { %s13895_s27 = scalar_select %p11061_p10, 1, 0 }
  0x26   : > { %s501_s29 = sshll.u32 %s10888_s28, 4  ;;  %p10247_p11 = pneg %p11061_p10  ;;  %s502_s29 = int_to_ptr.vmem [resolvable:$true] %s501_s29 }
  0x27   : > { %s531_s24 = sshll.u32 %s10889_s23, 4  ;;  %s10890_s25 = smov [#allocation19]   ;;  %s11073_s24 = int_to_ptr.vmem [resolvable:$true] %s531_s24 }
  0x28   : > { %p11069_p12 = pnand %p13859_p9, %p10247_p11  ;;  %s11075_s20 = sshll.u32 %s10890_s25, 4  ;;  %s558_s20 = int_to_ptr.vmem [resolvable:$true] %s11075_s20 }
  0x29   : > { %s13897_s0 = sld [smem:[#allocation218_spill]] }
  0x2a   : > { %p11085_p0 = pneg %p11069_p12 }
  0x2f   : > { %s13898_s19 = smov %s13897_s0  ;;  %s10400_s28 = scalar_lea.hbm %s13897_s0, 16 }
  0x30   : > { %p10401_p13 = scmp.ne.s32.totalorder %s13898_s19, %s10400_s28  ;;  %p10407_p3 = scmp.lt.u32.totalorder %s10400_s28, %s13898_s19 }
  0x32   : > { %p10403_p1 = pnand %p11085_p0, %p10401_p13 }
  0x34   : > { %p10404_p2 = pneg %p10403_p1 }
  0x36   : > { %p10409_p4 = pnand %p10407_p3, %p10404_p2 }
  0x38   : > { %10412 = shalt.err (!%p10409_p4)
}
  0x39   : > { %s10413_s0 = scalar_lea.vmem %s502_s29, 16  ;;  %s10420_s21 = scalar_lea.vmem %s502_s29, 32 }
  0x3a   : > { %p10414_p7 = scmp.ne.s32.totalorder %s502_s29, %s10413_s0  ;;  %p10421_p9 = scmp.lt.s32.totalorder %s502_s29, %s502_s29 }
  0x3b   : > { %p10422_p6 = scmp.lt.s32.totalorder %s10420_s21, %s10413_s0 }
  0x3c   : > { %p10416_p8 = pnand %p10414_p7, %p11085_p0 }
  0x3d   : > { %p10423_p5 = por %p10422_p6, %p10421_p9 }
  0x3e   : > { %p10417_p11 = pneg %p10416_p8 }
  0x40   : > { %p10424_p10 = pnand %p10423_p5, %p10417_p11 }
  0x42   : > { %10427 = shalt.err (!%p10424_p10)
}
  0x43   : > { %10253 = dma.hbm_to_vmem [thread:$0]  (!%p11069_p12), %s13898_s19, 16, %s502_s29, [#allocation14]  }
  0x44   : > { %s13900_s7 = sld [smem:[#allocation221_spill]] }
  0x4a   : > { %s10428_s23 = scalar_lea.hbm %s13900_s7, 256 }
  0x4b   : > { %p10429_p13 = scmp.ne.s32.totalorder %s13900_s7, %s10428_s23  ;;  %p10435_p5 = scmp.lt.u32.totalorder %s10428_s23, %s13900_s7 }
  0x4d   : > { %p10431_p1 = pnand %p10429_p13, %p11085_p0 }
  0x4f   : > { %p10432_p6 = pneg %p10431_p1 }
  0x51   : > { %p10437_p9 = pnand %p10435_p5, %p10432_p6 }
  0x53   : > { %10440 = shalt.err (!%p10437_p9)
}
  0x54   : > { %s10441_s29 = scalar_lea.vmem %s11073_s24, 256  ;;  %p10449_p4 = scmp.lt.s32.totalorder %s11073_s24, %s11073_s24 }
  0x55   : > { %p10442_p10 = scmp.ne.s32.totalorder %s11073_s24, %s10441_s29  ;;  %p10450_p7 = scmp.lt.s32.totalorder %s10441_s29, %s10441_s29 }
  0x57   : > { %p10444_p2 = pnand %p10442_p10, %p11085_p0  ;;  %p10451_p8 = por %p10450_p7, %p10449_p4 }
  0x59   : > { %p10445_p3 = pneg %p10444_p2 }
  0x5b   : > { %p10452_p11 = pnand %p10451_p8, %p10445_p3 }
  0x5d   : > { %10455 = shalt.err (!%p10452_p11)
}
  0x5e   : > { %s13865_s17 = smov 128   ;;  %s13867_s2 = smov 8  }
  0x5f   : > { %10259 = dma.hbm_to_vmem [thread:$0]  (!%p11069_p12), %s13900_s7, 256, %s11073_s24, [#allocation17], %s13865_s17, %s13865_s17, %s13867_s2  }
  0x60   : > { %s13901_s9 = sld [smem:[#allocation222_spill]] }
  0x66   : > { %s10456_s25 = scalar_lea.hbm %s13901_s9, 9216 }
  0x67   : > { %p10457_p13 = scmp.ne.s32.totalorder %s13901_s9, %s10456_s25  ;;  %p10463_p5 = scmp.lt.u32.totalorder %s10456_s25, %s13901_s9 }
  0x69   : > { %p10459_p1 = pnand %p10457_p13, %p11085_p0 }
  0x6b   : > { %p10460_p6 = pneg %p10459_p1 }
  0x6d   : > { %p10465_p9 = pnand %p10463_p5, %p10460_p6 }
  0x6f   : > { %10468 = shalt.err (!%p10465_p9)
}
  0x70   : > { %s10469_s3 = scalar_lea.vmem %s558_s20, 9216  ;;  %p10477_p4 = scmp.lt.s32.totalorder %s558_s20, %s558_s20 }
  0x71   : > { %p10470_p10 = scmp.ne.s32.totalorder %s558_s20, %s10469_s3  ;;  %p10478_p7 = scmp.lt.s32.totalorder %s10469_s3, %s10469_s3 }
  0x73   : > { %p10472_p2 = pnand %p10470_p10, %p11085_p0  ;;  %p10479_p8 = por %p10478_p7, %p10477_p4 }
  0x75   : > { %p10473_p3 = pneg %p10472_p2 }
  0x77   : > { %p10480_p11 = pnand %p10479_p8, %p10473_p3 }
  0x79   : > { %10483 = shalt.err (!%p10480_p11)
}
  0x7a   : > { %10265 = dma.hbm_to_vmem [thread:$0]  (!%p11069_p12), %s13901_s9, 9216, %s558_s20, [#allocation20], %s13865_s17, %s13865_s17, %s13867_s2  }
  0x7b   : > { %s10893_s26 = smov [#allocation22]   ;;  %s10894_s23 = smov [#allocation25]  }
  0x7c   : > { %s581_s28 = sshll.u32 %s10893_s26, 4  ;;  %s607_s25 = sshll.u32 %s10894_s23, 4  ;;  %s582_s28 = int_to_ptr.vmem [resolvable:$true] %s581_s28  ;;  %s608_s25 = int_to_ptr.vmem [resolvable:$true] %s607_s25 }
  0x7d   : > { %s10484_s29 = scalar_lea.hbm %s13837_s11, 256 }
  0x7e   : > { %p10485_p13 = scmp.ne.s32.totalorder %s13837_s11, %s10484_s29  ;;  %p10491_p5 = scmp.lt.u32.totalorder %s10484_s29, %s13837_s11 }
  0x80   : > { %p10487_p1 = pnand %p10485_p13, %p11085_p0 }
  0x82   : > { %p10488_p6 = pneg %p10487_p1 }
  0x84   : > { %p10493_p9 = pnand %p10491_p5, %p10488_p6 }
  0x86   : > { %10496 = shalt.err (!%p10493_p9)
}
  0x87   : > { %s10497_s20 = scalar_lea.vmem %s582_s28, 256  ;;  %p10505_p4 = scmp.lt.s32.totalorder %s582_s28, %s582_s28 }
  0x88   : > { %p10498_p10 = scmp.ne.s32.totalorder %s582_s28, %s10497_s20  ;;  %p10506_p7 = scmp.lt.s32.totalorder %s10497_s20, %s10497_s20 }
  0x8a   : > { %p10500_p2 = pnand %p10498_p10, %p11085_p0  ;;  %p10507_p8 = por %p10506_p7, %p10505_p4 }
  0x8c   : > { %p10501_p3 = pneg %p10500_p2 }
  0x8e   : > { %p10508_p11 = pnand %p10507_p8, %p10501_p3 }
  0x90   : > { %10511 = shalt.err (!%p10508_p11)
}
  0x91   : > { %10271 = dma.hbm_to_vmem [thread:$0]  (!%p11069_p12), %s13837_s11, 256, %s582_s28, [#allocation23], %s13865_s17, %s13865_s17, %s13867_s2  }
  0x92   : > { %s10512_s23 = scalar_lea.hbm %s13839_s13, 65536 }
  0x93   : > { %p10513_p13 = scmp.ne.s32.totalorder %s13839_s13, %s10512_s23  ;;  %p10519_p5 = scmp.lt.u32.totalorder %s10512_s23, %s13839_s13 }
  0x95   : > { %p10515_p1 = pnand %p10513_p13, %p11085_p0 }
  0x97   : > { %p10516_p6 = pneg %p10515_p1 }
  0x99   : > { %p10521_p9 = pnand %p10519_p5, %p10516_p6 }
  0x9b   : > { %10524 = shalt.err (!%p10521_p9)
}
  0x9c   : > { %s10525_s19 = scalar_lea.vmem %s608_s25, 65536  ;;  %p10533_p4 = scmp.lt.s32.totalorder %s608_s25, %s608_s25 }
  0x9d   : > { %p10526_p10 = scmp.ne.s32.totalorder %s608_s25, %s10525_s19  ;;  %p10534_p7 = scmp.lt.s32.totalorder %s10525_s19, %s10525_s19 }
  0x9f   : > { %p10528_p2 = pnand %p10526_p10, %p11085_p0  ;;  %p10535_p8 = por %p10534_p7, %p10533_p4 }
  0xa1   : > { %p10529_p3 = pneg %p10528_p2 }
  0xa3   : > { %p10536_p11 = pnand %p10535_p8, %p10529_p3 }
  0xa5   : > { %10539 = shalt.err (!%p10536_p11)
}
  0xa6   : > { %s10895_s28 = smov 256   ;;  %s10896_s20 = smov 16  }
  0xa7   : > { %10277 = dma.hbm_to_vmem [thread:$0]  (!%p11069_p12), %s13839_s13, 65536, %s608_s25, [#allocation26], %s10895_s28, %s10895_s28, %s10896_s20  }
  0xa8   : > { %s10897_s24 = smov [#allocation28]   ;;  %s10898_s23 = smov [#allocation10]  }
  0xa9   : > { %s632_s26 = sshll.u32 %s10897_s24, 4  ;;  %s487_s0 = sshll.u32 %s10898_s23, 4  ;;  %s633_s26 = int_to_ptr.vmem [resolvable:$true] %s632_s26  ;;  %s488_s0 = int_to_ptr.vmem [resolvable:$true] %s487_s0 }
  0xaa   : > { %s10540_s3 = scalar_lea.hbm %s13841_s15, 32 }
  0xab   : > { %p10541_p13 = scmp.ne.s32.totalorder %s13841_s15, %s10540_s3  ;;  %p10547_p5 = scmp.lt.u32.totalorder %s10540_s3, %s13841_s15 }
  0xad   : > { %p10543_p1 = pnand %p10541_p13, %p11085_p0 }
  0xaf   : > { %p10544_p6 = pneg %p10543_p1 }
  0xb1   : > { %p10549_p9 = pnand %p10547_p5, %p10544_p6 }
  0xb3   : > { %10552 = shalt.err (!%p10549_p9)
}
  0xb4   : > { %s10553_s25 = scalar_lea.vmem %s633_s26, 32  ;;  %p10561_p4 = scmp.lt.s32.totalorder %s633_s26, %s633_s26 }
  0xb5   : > { %p10554_p10 = scmp.ne.s32.totalorder %s633_s26, %s10553_s25  ;;  %p10562_p7 = scmp.lt.s32.totalorder %s10553_s25, %s10553_s25 }
  0xb7   : > { %p10556_p2 = pnand %p10554_p10, %p11085_p0  ;;  %p10563_p8 = por %p10562_p7, %p10561_p4 }
  0xb9   : > { %p10557_p3 = pneg %p10556_p2 }
  0xbb   : > { %p10564_p11 = pnand %p10563_p8, %p10557_p3 }
  0xbd   : > { %10567 = shalt.err (!%p10564_p11)
}
  0xbe   : > { %10283 = dma.hbm_to_vmem [thread:$0]  (!%p11069_p12), %s13841_s15, 32, %s633_s26, [#allocation29]  }
  0xbf   : > { %s13902_s20 = sld [smem:[#allocation217_spill]] }
  0xc5   : > { %s13903_s4 = smov %s13902_s20  ;;  %s10568_s7 = scalar_lea.hbm %s13902_s20, 256 }
  0xc6   : > { %p10569_p13 = scmp.ne.s32.totalorder %s13903_s4, %s10568_s7  ;;  %p10575_p5 = scmp.lt.u32.totalorder %s10568_s7, %s13903_s4 }
  0xc8   : > { %p10571_p1 = pnand %p10569_p13, %p11085_p0 }
  0xca   : > { %p10572_p6 = pneg %p10571_p1 }
  0xcc   : > { %p10577_p9 = pnand %p10575_p5, %p10572_p6 }
  0xce   : > { %10580 = shalt.err (!%p10577_p9)
}
  0xcf   : > { %s10581_s3 = scalar_lea.vmem %s488_s0, 256  ;;  %p10589_p4 = scmp.lt.s32.totalorder %s488_s0, %s488_s0 }
  0xd0   : > { %p10582_p10 = scmp.ne.s32.totalorder %s488_s0, %s10581_s3  ;;  %p10590_p7 = scmp.lt.s32.totalorder %s10581_s3, %s10581_s3 }
  0xd2   : > { %p10584_p2 = pnand %p10582_p10, %p11085_p0  ;;  %p10591_p8 = por %p10590_p7, %p10589_p4 }
  0xd4   : > { %p10585_p3 = pneg %p10584_p2 }
  0xd6   : > { %p10592_p11 = pnand %p10591_p8, %p10585_p3 }
  0xd8   : > { %10595 = shalt.err (!%p10592_p11)
}
  0xd9   : > { %s13904_s26 = smov 8   ;;  %s13905_s19 = smov 128  }
  0xda   : > { %10250 = dma.hbm_to_vmem [thread:$0]  (!%p11069_p12), %s13903_s4, 256, %s488_s0, [#allocation11], %s13905_s19, %s13905_s19, %s13904_s26  }
  0xdb   : > { %s10899_s28 = smov [#allocation15]   ;;  %s10900_s2 = smov [#allocation18]  }
  0xdc   : > { %s521_s9 = sshll.u32 %s10899_s28, 4  ;;  %s544_s20 = sshll.u32 %s10900_s2, 4  ;;  %s522_s9 = int_to_ptr.vmem [resolvable:$true] %s521_s9  ;;  %s545_s20 = int_to_ptr.vmem [resolvable:$true] %s544_s20 }
  0xdd   : > { %s10596_s23 = scalar_lea.hbm %s13832_s6, 16 }
  0xde   : > { %p10597_p13 = scmp.ne.s32.totalorder %s13832_s6, %s10596_s23  ;;  %p10603_p5 = scmp.lt.u32.totalorder %s10596_s23, %s13832_s6 }
  0xe0   : > { %p10599_p1 = pnand %p10597_p13, %p11085_p0 }
  0xe2   : > { %p10600_p6 = pneg %p10599_p1 }
  0xe4   : > { %p10605_p9 = pnand %p10603_p5, %p10600_p6 }
  0xe6   : > { %10608 = shalt.err (!%p10605_p9)
}
  0xe7   : > { %s10609_s0 = scalar_lea.vmem %s522_s9, 16  ;;  %s10616_s17 = scalar_lea.vmem %s522_s9, 32 }
  0xe8   : > { %p10610_p10 = scmp.ne.s32.totalorder %s522_s9, %s10609_s0  ;;  %p10617_p4 = scmp.lt.s32.totalorder %s522_s9, %s522_s9 }
  0xe9   : > { %p10618_p7 = scmp.lt.s32.totalorder %s10616_s17, %s10609_s0 }
  0xea   : > { %p10612_p2 = pnand %p10610_p10, %p11085_p0 }
  0xeb   : > { %p10619_p8 = por %p10618_p7, %p10617_p4 }
  0xec   : > { %p10613_p3 = pneg %p10612_p2 }
  0xee   : > { %p10620_p11 = pnand %p10619_p8, %p10613_p3 }
  0xf0   : > { %10623 = shalt.err (!%p10620_p11)
}
  0xf1   : > { %10256 = dma.hbm_to_vmem [thread:$0]  (!%p11069_p12), %s13832_s6, 16, %s522_s9, [#allocation14]  }
  0xf2   : > { %s10624_s23 = scalar_lea.hbm %s13834_s8, 256 }
  0xf3   : > { %p10625_p13 = scmp.ne.s32.totalorder %s13834_s8, %s10624_s23  ;;  %p10631_p5 = scmp.lt.u32.totalorder %s10624_s23, %s13834_s8 }
  0xf5   : > { %p10627_p1 = pnand %p10625_p13, %p11085_p0 }
  0xf7   : > { %p10628_p6 = pneg %p10627_p1 }
  0xf9   : > { %p10633_p9 = pnand %p10631_p5, %p10628_p6 }
  0xfb   : > { %10636 = shalt.err (!%p10633_p9)
}
  0xfc   : > { %s10637_s0 = scalar_lea.vmem %s545_s20, 256  ;;  %p10645_p4 = scmp.lt.s32.totalorder %s545_s20, %s545_s20 }
  0xfd   : > { %p10638_p10 = scmp.ne.s32.totalorder %s545_s20, %s10637_s0  ;;  %p10646_p7 = scmp.lt.s32.totalorder %s10637_s0, %s10637_s0 }
  0xff   : > { %p10640_p2 = pnand %p10638_p10, %p11085_p0  ;;  %p10647_p8 = por %p10646_p7, %p10645_p4 }
 0x101   : > { %p10641_p3 = pneg %p10640_p2 }
 0x103   : > { %p10648_p11 = pnand %p10647_p8, %p10641_p3 }
 0x105   : > { %10651 = shalt.err (!%p10648_p11)
}
 0x106   : > { %10262 = dma.hbm_to_vmem [thread:$0]  (!%p11069_p12), %s13834_s8, 256, %s545_s20, [#allocation17], %s13905_s19, %s13905_s19, %s13904_s26  }
 0x107   : > { %s10901_s28 = smov [#allocation21]   ;;  %s10902_s7 = smov [#allocation24]  }
 0x108   : > { %s571_s2 = sshll.u32 %s10901_s28, 4  ;;  %s594_s24 = sshll.u32 %s10902_s7, 4  ;;  %s572_s2 = int_to_ptr.vmem [resolvable:$true] %s571_s2  ;;  %s595_s24 = int_to_ptr.vmem [resolvable:$true] %s594_s24 }
 0x109   : > { %s10652_s29 = scalar_lea.hbm %s13836_s10, 16 }
 0x10a   : > { %p10653_p13 = scmp.ne.s32.totalorder %s13836_s10, %s10652_s29  ;;  %p10659_p5 = scmp.lt.u32.totalorder %s10652_s29, %s13836_s10 }
 0x10c   : > { %p10655_p1 = pnand %p10653_p13, %p11085_p0 }
 0x10e   : > { %p10656_p6 = pneg %p10655_p1 }
 0x110   : > { %p10661_p9 = pnand %p10659_p5, %p10656_p6 }
 0x112   : > { %10664 = shalt.err (!%p10661_p9)
}
 0x113   : > { %s10665_s20 = scalar_lea.vmem %s572_s2, 16  ;;  %s10672_s17 = scalar_lea.vmem %s572_s2, 32 }
 0x114   : > { %p10666_p10 = scmp.ne.s32.totalorder %s572_s2, %s10665_s20  ;;  %p10673_p4 = scmp.lt.s32.totalorder %s572_s2, %s572_s2 }
 0x115   : > { %p10674_p7 = scmp.lt.s32.totalorder %s10672_s17, %s10665_s20 }
 0x116   : > { %p10668_p2 = pnand %p10666_p10, %p11085_p0 }
 0x117   : > { %p10675_p8 = por %p10674_p7, %p10673_p4 }
 0x118   : > { %p10669_p3 = pneg %p10668_p2 }
 0x11a   : > { %p10676_p11 = pnand %p10675_p8, %p10669_p3 }
 0x11c   : > { %10679 = shalt.err (!%p10676_p11)
}
 0x11d   : > { %10268 = dma.hbm_to_vmem [thread:$0]  (!%p11069_p12), %s13836_s10, 16, %s572_s2, [#allocation20]  }
 0x11e   : > { %s10680_s29 = scalar_lea.hbm %s13838_s12, 256 }
 0x11f   : > { %p10681_p13 = scmp.ne.s32.totalorder %s13838_s12, %s10680_s29  ;;  %p10687_p5 = scmp.lt.u32.totalorder %s10680_s29, %s13838_s12 }
 0x121   : > { %p10683_p1 = pnand %p10681_p13, %p11085_p0 }
 0x123   : > { %p10684_p6 = pneg %p10683_p1 }
 0x125   : > { %p10689_p9 = pnand %p10687_p5, %p10684_p6 }
 0x127   : > { %10692 = shalt.err (!%p10689_p9)
}
 0x128   : > { %s10693_s20 = scalar_lea.vmem %s595_s24, 256  ;;  %p10701_p4 = scmp.lt.s32.totalorder %s595_s24, %s595_s24 }
 0x129   : > { %p10694_p10 = scmp.ne.s32.totalorder %s595_s24, %s10693_s20  ;;  %p10702_p7 = scmp.lt.s32.totalorder %s10693_s20, %s10693_s20 }
 0x12b   : > { %p10696_p2 = pnand %p10694_p10, %p11085_p0  ;;  %p10703_p8 = por %p10702_p7, %p10701_p4 }
 0x12d   : > { %p10697_p3 = pneg %p10696_p2 }
 0x12f   : > { %p10704_p11 = pnand %p10703_p8, %p10697_p3 }
 0x131   : > { %10707 = shalt.err (!%p10704_p11)
}
 0x132   : > { %10274 = dma.hbm_to_vmem [thread:$0]  (!%p11069_p12), %s13838_s12, 256, %s595_s24, [#allocation23], %s13905_s19, %s13905_s19, %s13904_s26  }
 0x133   : > { %s10903_s28 = smov [#allocation27]   ;;  %s10904_s23 = smov [#allocation30]  }
 0x134   : > { %s621_s7 = sshll.u32 %s10903_s28, 4  ;;  %s643_s21 = sshll.u32 %s10904_s23, 4  ;;  %s622_s7 = int_to_ptr.vmem [resolvable:$true] %s621_s7  ;;  %s644_s21 = int_to_ptr.vmem [resolvable:$true] %s643_s21 }
 0x135   : > { %s10708_s25 = scalar_lea.hbm %s13840_s14, 32 }
 0x136   : > { %p10709_p13 = scmp.ne.s32.totalorder %s13840_s14, %s10708_s25  ;;  %p10715_p5 = scmp.lt.u32.totalorder %s10708_s25, %s13840_s14 }
 0x138   : > { %p10711_p1 = pnand %p10709_p13, %p11085_p0 }
 0x13a   : > { %p10712_p6 = pneg %p10711_p1 }
 0x13c   : > { %p10717_p9 = pnand %p10715_p5, %p10712_p6 }
 0x13e   : > { %10720 = shalt.err (!%p10717_p9)
}
 0x13f   : > { %s10721_s26 = scalar_lea.vmem %s622_s7, 32  ;;  %p10729_p4 = scmp.lt.s32.totalorder %s622_s7, %s622_s7 }
 0x140   : > { %p10722_p10 = scmp.ne.s32.totalorder %s622_s7, %s10721_s26  ;;  %p10730_p7 = scmp.lt.s32.totalorder %s10721_s26, %s10721_s26 }
 0x142   : > { %p10724_p2 = pnand %p10722_p10, %p11085_p0  ;;  %p10731_p8 = por %p10730_p7, %p10729_p4 }
 0x144   : > { %p10725_p3 = pneg %p10724_p2 }
 0x146   : > { %p10732_p11 = pnand %p10731_p8, %p10725_p3 }
 0x148   : > { %10735 = shalt.err (!%p10732_p11)
}
 0x149   : > { %10280 = dma.hbm_to_vmem [thread:$0]  (!%p11069_p12), %s13840_s14, 32, %s622_s7, [#allocation26]  }
 0x14a   : > { %s10736_s23 = scalar_lea.hbm %s13842_s16, 32 }
 0x14b   : > { %p10737_p13 = scmp.ne.s32.totalorder %s13842_s16, %s10736_s23  ;;  %p10743_p5 = scmp.lt.u32.totalorder %s10736_s23, %s13842_s16 }
 0x14d   : > { %p10739_p1 = pnand %p10737_p13, %p11085_p0 }
 0x14f   : > { %p10740_p6 = pneg %p10739_p1 }
 0x151   : > { %p10745_p9 = pnand %p10743_p5, %p10740_p6 }
 0x153   : > { %10748 = shalt.err (!%p10745_p9)
}
 0x154   : > { %s10749_s9 = scalar_lea.vmem %s644_s21, 32  ;;  %p10757_p4 = scmp.lt.s32.totalorder %s644_s21, %s644_s21 }
 0x155   : > { %p10750_p10 = scmp.ne.s32.totalorder %s644_s21, %s10749_s9  ;;  %p10758_p7 = scmp.lt.s32.totalorder %s10749_s9, %s10749_s9 }
 0x157   : > { %p10752_p2 = pnand %p10750_p10, %p11085_p0  ;;  %p10759_p8 = por %p10758_p7, %p10757_p4 }
 0x159   : > { %p10753_p3 = pneg %p10752_p2 }
 0x15b   : > { %p10760_p11 = pnand %p10759_p8, %p10753_p3 }
 0x15d   : > { %10763 = shalt.err (!%p10760_p11)
}
 0x15e   : > { %10286 = dma.hbm_to_vmem [thread:$0]  (!%p11069_p12), %s13842_s16, 32, %s644_s21, [#allocation29]  }
 0x15f   : > { %s10905_s2 = smov [#allocation31]   ;;  %s10764_s17 = scalar_lea.hbm %s13844_s18, 16 }
 0x160   : > { %s657_s26 = sshll.u32 %s10905_s2, 4  ;;  %p10765_p13 = scmp.ne.s32.totalorder %s13844_s18, %s10764_s17  ;;  %s658_s26 = int_to_ptr.vmem [resolvable:$true] %s657_s26 }
 0x161   : > { %p10771_p5 = scmp.lt.u32.totalorder %s10764_s17, %s13844_s18 }
 0x162   : > { %p10767_p1 = pnand %p10765_p13, %p11085_p0 }
 0x164   : > { %p10768_p6 = pneg %p10767_p1 }
 0x166   : > { %p10773_p9 = pnand %p10771_p5, %p10768_p6 }
 0x168   : > { %10776 = shalt.err (!%p10773_p9)
}
 0x169   : > { %s10777_s21 = scalar_lea.vmem %s658_s26, 16  ;;  %s10784_s25 = scalar_lea.vmem %s658_s26, 32 }
 0x16a   : > { %p10778_p10 = scmp.ne.s32.totalorder %s658_s26, %s10777_s21  ;;  %p10785_p4 = scmp.lt.s32.totalorder %s658_s26, %s658_s26 }
 0x16b   : > { %p10786_p7 = scmp.lt.s32.totalorder %s10784_s25, %s10777_s21 }
 0x16c   : > { %p10780_p2 = pnand %p10778_p10, %p11085_p0 }
 0x16d   : > { %p10787_p8 = por %p10786_p7, %p10785_p4 }
 0x16e   : > { %p10781_p3 = pneg %p10780_p2 }
 0x170   : > { %p10788_p11 = pnand %p10787_p8, %p10781_p3 }
 0x172   : > { %10791 = shalt.err (!%p10788_p11)
}
 0x173   : > { %10289 = dma.hbm_to_vmem [thread:$0]  (!%p11069_p12), %s13844_s18, 16, %s658_s26, [#allocation32]  }
 0x174   : > { %p13906_p13 = scmp.ne.s32.totalorder %s13895_s27, 0 }
 0x176   : > { %678 = sbr.rel (%p13906_p13) target bundleno = 4109 (0x100d), region = 96 }
 0x17d   : > { %p13907_p1 = scmp.eq.s32.totalorder %s11033_s1, 0 }
 0x17f   : > { %10837 = dma.done.wait (%p13907_p1), [#allocation11], 256   ;;  %p13908_p0 = pmov %p13907_p1 }
 0x181   : > { %10839 = vsyncadd (%p13908_p0), [#allocation11], 4294967040  ;;  %p13909_p6 = pmov %p13908_p0 }
 0x182   : > { %p13910_p5 = pmov %p13908_p0 }
 0x183   : > { %10841 = dma.done.wait (%p13909_p6), [#allocation14], 32  }
 0x184   : > { %10843 = vsyncadd (%p13910_p5), [#allocation14], 4294967264  ;;  %p13911_p9 = pmov %p13908_p0 }
 0x185   : > { %p13912_p12 = pmov %p13908_p0 }
 0x186   : > { %10845 = dma.done.wait (%p13911_p9), [#allocation17], 512  }
 0x187   : > { %10847 = vsyncadd (%p13912_p12), [#allocation17], 4294966784  ;;  %p13913_p10 = pmov %p13908_p0 }
 0x188   : > { %p13914_p2 = pmov %p13908_p0 }
 0x189   : > { %10849 = dma.done.wait (%p13913_p10), [#allocation20], 9232  }
 0x18a   : > { %10851 = vsyncadd (%p13914_p2), [#allocation20], 4294958064  ;;  %p13915_p3 = pmov %p13908_p0 }
 0x18b   : > { %p13916_p4 = pmov %p13908_p0 }
 0x18c   : > { %10853 = dma.done.wait (%p13915_p3), [#allocation23], 512  }
 0x18d   : > { %10855 = vsyncadd (%p13916_p4), [#allocation23], 4294966784  ;;  %p13917_p7 = pmov %p13908_p0 }
 0x18e   : > { %p13918_p8 = pmov %p13908_p0 }
 0x18f   : > { %10857 = dma.done.wait (%p13917_p7), [#allocation26], 65568  }
 0x190   : > { %10859 = vsyncadd (%p13918_p8), [#allocation26], 4294901728  ;;  %p13919_p11 = pmov %p13908_p0 }
 0x191   : > { %p13920_p13 = pmov %p13908_p0 }
 0x192   : > { %10861 = dma.done.wait (%p13919_p11), [#allocation29], 64  }
 0x193   : > { %10863 = vsyncadd (%p13920_p13), [#allocation29], 4294967232  ;;  %p13921_p1 = pmov %p13908_p0 }
 0x195   : > { %10865 = dma.done.wait (%p13921_p1), [#allocation32], 16  }
 0x196   : > { %10867 = vsyncadd (%p13908_p0), [#allocation32], 4294967280  ;;  %p785_p6 = scmp.lt.s32.totalorder %s11033_s1, 1  ;;  %v10906_v0 = vmov 0   ;;  %s13922_s20 = sld [smem:[#allocation216_spill]]  ;;  %vm790_vm0 = vcmask 261120  }
 0x197   : > { %10379 = vset.pattern.permute.xlu1 %v10906_v0  ;;  %10378 = vset.pattern.permute.xlu0 %v10906_v0  ;;  %vm3527_vm1 = vcmask 259072   ;;  %s14299_s22 = sld [smem:[#allocation219_spill]]  ;;  %s14300_s17 = sld [smem:[#allocation220_spill]]  ;;  %vm803_vm2 = vcmask 257024   ;;  %vm805_vm3 = vcmask 523264   ;;  %vm810_vm4 = vcmask 519168  }
 0x198   : > { %s786_s30 = scalar_select %p785_p6, %s11033_s1, 1  ;;  %vm5328_vm5 = vcmask 521216   ;;  %vm10909_vm6 = vmmov 0   ;;  %vm8133_vm7 = vcmask 1040384   ;;  %vm8291_vm8 = vcmask 73728  }
 0x199   : > { %s14301_s0 = sld [smem:[#allocation223_spill]]  ;;  %s14303_s7 = sld [smem:[#allocation44_spill]] }
 0x19a   : > { %s10188_s27 = smul.u32 328, %s786_s30  ;;  %s8659_s26 = sshll.u32 %s11033_s1, 4 }
 0x19b   : > { %s14305_s29 = sld [smem:[#allocation224_spill]]  ;;  %s10911_s1 = smov [#allocation33]  }
 0x19c   : > { %s11398_s2 = scalar_lea.vmem %s13922_s20, %s10188_s27 }
 0x19d   : > { %v814_v1 = vld [vmem:[%s11398_s2 + $0x10] sm:$0xff]  ;;  %v812_v2 = vld [vmem:[%s11398_s2] sm:$0xff]  ;;  %v815_v3 = vld [vmem:[%s11398_s2 + $0x18] sm:$0xff] }
 0x19e   : > { %861 = vperm.xlu1 %10379, %v814_v1   ;;  %851 = vperm.xlu0 %10378, %v812_v2   ;;  %v813_v4 = vld [vmem:[%s11398_s2 + $0x8] sm:$0xff]  ;;  %v816_v6 = vld [vmem:[%s11398_s2 + $0x20] sm:$0xff]  ;;  %v819_v7 = vld [vmem:[%s11398_s2 + $0x38] sm:$0xff] }
 0x19f   : > { %v817_v5 = vld [vmem:[%s11398_s2 + $0x28] sm:$0xff]  ;;  %v818_v8 = vld [vmem:[%s11398_s2 + $0x30] sm:$0xff]  ;;  %v820_v10 = vld [vmem:[%s11398_s2 + $0x40] sm:$0xff]  ;;  %s14302_s9 = smov %s14301_s0  ;;  %s783_s20 = sand.u32 1, %s14303_s7  }
 0x1a0   : > { %v1069_v9 = vld [vmem:[%s11398_s2 + $0x1] sm:$0xff]  ;;  %v1071_v11 = vld [vmem:[%s11398_s2 + $0x11] sm:$0xff]  ;;  %v1070_v12 = vld [vmem:[%s11398_s2 + $0x9] sm:$0xff]  ;;  %s784_s19 = scalar_lea.vmem [#allocation33], %s783_s20  ;;  %s8294_s21 = scalar_lea.sflag [#allocation12], %s783_s20 }
 0x1a1   : > { %v1073_v13 = vld [vmem:[%s11398_s2 + $0x21] sm:$0xff]  ;;  %v1072_v14 = vld [vmem:[%s11398_s2 + $0x19] sm:$0xff]  ;;  %v1075_v15 = vld [vmem:[%s11398_s2 + $0x31] sm:$0xff]  ;;  %s8306_s24 = sshll.u32 %s784_s19, 4  ;;  %s13784_s3 = scalar_lea.hbm %s14305_s29, %s8659_s26  ;;  %s13786_s24 = int_to_ptr.vmem [resolvable:$true] %s8306_s24 }
 0x1a2   : > { %866 = vperm.xlu1 %10379, %v815_v3   ;;  %856 = vperm.xlu0 %10378, %v813_v4   ;;  %v1074_v16 = vld [vmem:[%s11398_s2 + $0x29] sm:$0xff]  ;;  %v1077_v17 = vld [vmem:[%s11398_s2 + $0x41] sm:$0xff]  ;;  %v1076_v18 = vld [vmem:[%s11398_s2 + $0x39] sm:$0xff]  ;;  %s10792_s25 = scalar_lea.vmem %s13786_s24, 16 }
 0x1a3   : > { %v822_v19 = vld [vmem:[%s11398_s2 + $0x50] sm:$0xff]  ;;  %v821_v20 = vld [vmem:[%s11398_s2 + $0x48] sm:$0xff]  ;;  %v824_v21 = vld [vmem:[%s11398_s2 + $0x60] sm:$0xff]  ;;  %p10793_p5 = scmp.ne.s32.totalorder %s13786_s24, %s10792_s25 }
 0x1a4   : > { %v823_v22 = vld [vmem:[%s11398_s2 + $0x58] sm:$0xff]  ;;  %v1078_v23 = vld [vmem:[%s11398_s2 + $0x49] sm:$0xff]  ;;  %v1081_v28 = vld [vmem:[%s11398_s2 + $0x61] sm:$0xff] }
 0x1a5   : > { %v825_v24 = vld [vmem:[%s11398_s2 + $0x68] sm:$0xff]  ;;  %v1080_v25 = vld [vmem:[%s11398_s2 + $0x59] sm:$0xff]  ;;  %v1079_v26 = vld [vmem:[%s11398_s2 + $0x51] sm:$0xff] }
 0x1a6   : > { %876 = vperm.xlu1 %10379, %v817_v5   ;;  %871 = vperm.xlu0 %10378, %v816_v6   ;;  %v1082_v27 = vld [vmem:[%s11398_s2 + $0x69] sm:$0xff]  ;;  %v1365_v31 = vld [vmem:[%s11398_s2 + $0x1a] sm:$0xff]  ;;  %v1364_v32 = vld [vmem:[%s11398_s2 + $0x12] sm:$0xff] }
 0x1a7   : > { %v1363_v29 = vld [vmem:[%s11398_s2 + $0xa] sm:$0xff]  ;;  %v1362_v30 = vld [vmem:[%s11398_s2 + $0x2] sm:$0xff]  ;;  %v1369_v35 = vld [vmem:[%s11398_s2 + $0x3a] sm:$0xff] }
 0x1a8   : > { %v1367_v33 = vld [vmem:[%s11398_s2 + $0x2a] sm:$0xff]  ;;  %v1366_v34 = vld [vmem:[%s11398_s2 + $0x22] sm:$0xff]  ;;  %v1368_v36 = vld [vmem:[%s11398_s2 + $0x32] sm:$0xff] }
 0x1a9   : > { %v826_v37 = vld [vmem:[%s11398_s2 + $0x70] sm:$0xff]  ;;  %v1370_v38 = vld [vmem:[%s11398_s2 + $0x42] sm:$0xff]  ;;  %v827_v40 = vld [vmem:[%s11398_s2 + $0x78] sm:$0xff] }
 0x1aa   : > { %886 = vperm.xlu1 %10379, %v819_v7   ;;  %881 = vperm.xlu0 %10378, %v818_v8   ;;  %v828_v39 = vld [vmem:[%s11398_s2 + $0x80] sm:$0xff]  ;;  %v1083_v41 = vld [vmem:[%s11398_s2 + $0x71] sm:$0xff]  ;;  %v829_v42 = vld [vmem:[%s11398_s2 + $0x88] sm:$0xff] }
 0x1ab   : > { %v1085_v43 = vld [vmem:[%s11398_s2 + $0x81] sm:$0xff]  ;;  %v1084_v44 = vld [vmem:[%s11398_s2 + $0x79] sm:$0xff]  ;;  %v1371_v45 = vld [vmem:[%s11398_s2 + $0x4a] sm:$0xff] }
 0x1ac   : > { %v1086_v46 = vld [vmem:[%s11398_s2 + $0x89] sm:$0xff]  ;;  %v1373_v47 = vld [vmem:[%s11398_s2 + $0x5a] sm:$0xff]  ;;  %v1372_v48 = vld [vmem:[%s11398_s2 + $0x52] sm:$0xff] }
 0x1ad   : > { %v1375_v49 = vld [vmem:[%s11398_s2 + $0x6a] sm:$0xff]  ;;  %v1374_v50 = vld [vmem:[%s11398_s2 + $0x62] sm:$0xff]  ;;  %v831_v53 = vld [vmem:[%s11398_s2 + $0x98] sm:$0xff] }
 0x1ae   : > { %1108 = vperm.xlu1 %10379, %v1069_v9   ;;  %891 = vperm.xlu0 %10378, %v820_v10   ;;  %v830_v51 = vld [vmem:[%s11398_s2 + $0x90] sm:$0xff]  ;;  %v832_v52 = vld [vmem:[%s11398_s2 + $0xa0] sm:$0xff]  ;;  %v833_v55 = vld [vmem:[%s11398_s2 + $0xa8] sm:$0xff] }
 0x1af   : > { %v834_v54 = vld [vmem:[%s11398_s2 + $0xb0] sm:$0xff]  ;;  %v1088_v56 = vld [vmem:[%s11398_s2 + $0x99] sm:$0xff]  ;;  %v1089_v61 = vld [vmem:[%s11398_s2 + $0xa1] sm:$0xff] }
 0x1b0   : > { %v1087_v57 = vld [vmem:[%s11398_s2 + $0x91] sm:$0xff]  ;;  %v1090_v60 = vld [vmem:[%s11398_s2 + $0xa9] sm:$0xff]  ;;  %v1377_v5 = vld [vmem:[%s11398_s2 + $0x7a] sm:$0xff] }
 0x1b1   : > { %v1376_v0 = vld [vmem:[%s11398_s2 + $0x72] sm:$0xff]  ;;  %v11474_v4 = vld [vmem:[%s11398_s2 + $0x82] sm:$0xff]  ;;  %v11483_v8 = vld [vmem:[%s11398_s2 + $0x8a] sm:$0xff] }
 0x1b2   : > { %1118 = vperm.xlu1 %10379, %v1071_v11   ;;  %1113 = vperm.xlu0 %10378, %v1070_v12   ;;  %v1091_v1 = vld [vmem:[%s11398_s2 + $0xb1] sm:$0xff] }
 0x1b6   : > { %1128 = vperm.xlu1 %10379, %v1073_v13   ;;  %1123 = vperm.xlu0 %10378, %v1072_v14  }
 0x1ba   : > { %1138 = vperm.xlu1 %10379, %v1075_v15   ;;  %1133 = vperm.xlu0 %10378, %v1074_v16   ;;  %v1949_v15 = vld [vmem:[%s11398_s2 + $0x1b] sm:$0xff]  ;;  %v1948_v16 = vld [vmem:[%s11398_s2 + $0x13] sm:$0xff] }
 0x1be   : > { %1148 = vperm.xlu1 %10379, %v1077_v17   ;;  %1143 = vperm.xlu0 %10378, %v1076_v18  }
 0x1c2   : > { %901 = vperm.xlu1 %10379, %v822_v19   ;;  %896 = vperm.xlu0 %10378, %v821_v20   ;;  %v1951_v19 = vld [vmem:[%s11398_s2 + $0x2b] sm:$0xff]  ;;  %v1950_v20 = vld [vmem:[%s11398_s2 + $0x23] sm:$0xff] }
 0x1c6   : > { %911 = vperm.xlu1 %10379, %v824_v21   ;;  %906 = vperm.xlu0 %10378, %v823_v22  }
 0x1ca   : > { %1153 = vperm.xlu1 %10379, %v1078_v23   ;;  %916 = vperm.xlu0 %10378, %v825_v24   ;;  %v1953_v23 = vld [vmem:[%s11398_s2 + $0x3b] sm:$0xff]  ;;  %v1952_v24 = vld [vmem:[%s11398_s2 + $0x33] sm:$0xff] }
 0x1ce   : > { %1163 = vperm.xlu1 %10379, %v1080_v25   ;;  %1158 = vperm.xlu0 %10378, %v1079_v26  }
 0x1d2   : > { %1173 = vperm.xlu1 %10379, %v1082_v27   ;;  %1168 = vperm.xlu0 %10378, %v1081_v28   ;;  %v1955_v27 = vld [vmem:[%s11398_s2 + $0x4b] sm:$0xff]  ;;  %v1954_v28 = vld [vmem:[%s11398_s2 + $0x43] sm:$0xff] }
 0x1d6   : > { %1406 = vperm.xlu1 %10379, %v1363_v29   ;;  %1401 = vperm.xlu0 %10378, %v1362_v30  }
 0x1da   : > { %1416 = vperm.xlu1 %10379, %v1365_v31   ;;  %1411 = vperm.xlu0 %10378, %v1364_v32  }
 0x1de   : > { %1426 = vperm.xlu1 %10379, %v1367_v33   ;;  %1421 = vperm.xlu0 %10378, %v1366_v34  }
 0x1e2   : > { %1436 = vperm.xlu1 %10379, %v1369_v35   ;;  %1431 = vperm.xlu0 %10378, %v1368_v36  }
 0x1e6   : > { %921 = vperm.xlu1 %10379, %v826_v37   ;;  %1441 = vperm.xlu0 %10378, %v1370_v38  }
 0x1ea   : > { %931 = vperm.xlu1 %10379, %v828_v39   ;;  %926 = vperm.xlu0 %10378, %v827_v40   ;;  %v1092_v39 = vld [vmem:[%s11398_s2 + $0xb9] sm:$0xff]  ;;  %v838_v40 = vld [vmem:[%s11398_s2 + $0xd0] sm:$0xff] }
 0x1ee   : > { %1178 = vperm.xlu1 %10379, %v1083_v41   ;;  %936 = vperm.xlu0 %10378, %v829_v42  }
 0x1f2   : > { %1188 = vperm.xlu1 %10379, %v1085_v43   ;;  %1183 = vperm.xlu0 %10378, %v1084_v44   ;;  %v1094_v43 = vld [vmem:[%s11398_s2 + $0xc9] sm:$0xff]  ;;  %v1093_v44 = vld [vmem:[%s11398_s2 + $0xc1] sm:$0xff] }
 0x1f6   : > { %1446 = vperm.xlu1 %10379, %v1371_v45   ;;  %1193 = vperm.xlu0 %10378, %v1086_v46  }
 0x1fa   : > { %1456 = vperm.xlu1 %10379, %v1373_v47   ;;  %1451 = vperm.xlu0 %10378, %v1372_v48  }
 0x1fe   : > { %1466 = vperm.xlu1 %10379, %v1375_v49   ;;  %1461 = vperm.xlu0 %10378, %v1374_v50  }
 0x202   : > { %1699 = vperm.xlu1 %10379, %v1365_v31   ;;  %1694 = vperm.xlu0 %10378, %v1364_v32   ;;  %v835_v31 = vld [vmem:[%s11398_s2 + $0xb8] sm:$0xff] }
 0x203   : > { %v1956_v32 = vld [vmem:[%s11398_s2 + $0x53] sm:$0xff] }
 0x206   : > { %1709 = vperm.xlu1 %10379, %v1367_v33   ;;  %1704 = vperm.xlu0 %10378, %v1366_v34  }
 0x20a   : > { %1719 = vperm.xlu1 %10379, %v1369_v35   ;;  %1714 = vperm.xlu0 %10378, %v1368_v36   ;;  %v837_v35 = vld [vmem:[%s11398_s2 + $0xc8] sm:$0xff]  ;;  %v836_v36 = vld [vmem:[%s11398_s2 + $0xc0] sm:$0xff] }
 0x20e   : > { %1729 = vperm.xlu1 %10379, %v1371_v45   ;;  %1724 = vperm.xlu0 %10378, %v1370_v38  }
 0x212   : > { %941 = vperm.xlu1 %10379, %v830_v51   ;;  %1734 = vperm.xlu0 %10378, %v1372_v48   ;;  %v1095_v48 = vld [vmem:[%s11398_s2 + $0xd1] sm:$0xff]  ;;  %v11553_v51 = vld [vmem:[%s11398_s2 + $0xa2] sm:$0xff] }
 0x216   : > { %951 = vperm.xlu1 %10379, %v832_v52   ;;  %946 = vperm.xlu0 %10378, %v831_v53   ;;  %v1381_v52 = vld [vmem:[%s11398_s2 + $0x9a] sm:$0xff] }
 0x21a   : > { %961 = vperm.xlu1 %10379, %v834_v54   ;;  %956 = vperm.xlu0 %10378, %v833_v55   ;;  %v11562_v55 = vld [vmem:[%s11398_s2 + $0xb2] sm:$0xff] }
 0x21d   : > { %v11457_v58 = vpop.permute.xlu1 %861  ;;  %v11459_v59 = vpop.permute.xlu0 %851 }
 0x21e   : > { %1203 = vperm.xlu1 %10379, %v1088_v56   ;;  %1198 = vperm.xlu0 %10378, %v1087_v57   ;;  %v11565_v56 = vld [vmem:[%s11398_s2 + $0xaa] sm:$0xff] }
 0x221   : > { %v11463_v62 = vpop.permute.xlu1 %866  ;;  %v11465_v63 = vpop.permute.xlu0 %856 }
 0x222   : > { %1213 = vperm.xlu1 %10379, %v1090_v60   ;;  %1208 = vperm.xlu0 %10378, %v1089_v61  }
 0x225   : > { %v11469_v2 = vpop.permute.xlu1 %876  ;;  %v11471_v3 = vpop.permute.xlu0 %871 }
 0x226   : > { %1471 = vperm.xlu1 %10379, %v1376_v0   ;;  %1218 = vperm.xlu0 %10378, %v1091_v1  }
 0x229   : > { %v11477_v6 = vpop.permute.xlu1 %886  ;;  %v11479_v7 = vpop.permute.xlu0 %881 }
 0x22a   : > { %1481 = vperm.xlu1 %10379, %v11474_v4   ;;  %1476 = vperm.xlu0 %10378, %v1377_v5  }
 0x22d   : > { %v11485_v9 = vpop.permute.xlu1 %1108  ;;  %v11487_v10 = vpop.permute.xlu0 %891 }
 0x22e   : > { %1739 = vperm.xlu1 %10379, %v1373_v47   ;;  %1486 = vperm.xlu0 %10378, %v11483_v8   ;;  %v1380_v47 = vld [vmem:[%s11398_s2 + $0x92] sm:$0xff] }
 0x231   : > { %v11490_v11 = vpop.permute.xlu1 %1118  ;;  %v11492_v12 = vpop.permute.xlu0 %1113 }
 0x232   : > { %1749 = vperm.xlu1 %10379, %v1375_v49   ;;  %1744 = vperm.xlu0 %10378, %v1374_v50  }
 0x235   : > { %v11494_v13 = vpop.permute.xlu1 %1128  ;;  %v11496_v14 = vpop.permute.xlu0 %1123 }
 0x236   : > { %1759 = vperm.xlu1 %10379, %v1377_v5   ;;  %1754 = vperm.xlu0 %10378, %v1376_v0  }
 0x239   : > { %v11500_v17 = vpop.permute.xlu1 %1138  ;;  %v11502_v18 = vpop.permute.xlu0 %1133 }
 0x23a   : > { %1992 = vperm.xlu1 %10379, %v1949_v15   ;;  %1987 = vperm.xlu0 %10378, %v1948_v16   ;;  %v1958_v15 = vld [vmem:[%s11398_s2 + $0x63] sm:$0xff]  ;;  %v1957_v16 = vld [vmem:[%s11398_s2 + $0x5b] sm:$0xff] }
 0x23d   : > { %v11506_v21 = vpop.permute.xlu1 %1148  ;;  %v11508_v22 = vpop.permute.xlu0 %1143 }
 0x23e   : > { %2002 = vperm.xlu1 %10379, %v1951_v19   ;;  %1997 = vperm.xlu0 %10378, %v1950_v20  }
 0x241   : > { %v11512_v25 = vpop.permute.xlu1 %901  ;;  %v11514_v26 = vpop.permute.xlu0 %896 }
 0x242   : > { %13923 = vst [vmem:[#allocation51_spill] sm:$0xff] %v11512_v25  ;;  %13924 = vst [vmem:[#allocation52_spill] sm:$0xff] %v11514_v26  ;;  %2012 = vperm.xlu1 %10379, %v1953_v23   ;;  %2007 = vperm.xlu0 %10378, %v1952_v24  }
 0x245   : > { %v11518_v29 = vpop.permute.xlu1 %911  ;;  %v11520_v30 = vpop.permute.xlu0 %906 }
 0x246   : > { %13925 = vst [vmem:[#allocation53_spill] sm:$0xff] %v11518_v29  ;;  %13926 = vst [vmem:[#allocation54_spill] sm:$0xff] %v11520_v30  ;;  %2022 = vperm.xlu1 %10379, %v1955_v27   ;;  %2017 = vperm.xlu0 %10378, %v1954_v28   ;;  %v2241_v27 = vld [vmem:[%s11398_s2 + $0x14] sm:$0xff] }
 0x247   : > { %v1961_v28 = vld [vmem:[%s11398_s2 + $0x7b] sm:$0xff] }
 0x249   : > { %v11524_v33 = vpop.permute.xlu1 %1153  ;;  %v11526_v34 = vpop.permute.xlu0 %916 }
 0x24a   : > { %13927 = vst [vmem:[#allocation55_spill] sm:$0xff] %v11524_v33  ;;  %13928 = vst [vmem:[#allocation56_spill] sm:$0xff] %v11526_v34  ;;  %966 = vperm.xlu1 %10379, %v835_v31   ;;  %2027 = vperm.xlu0 %10378, %v1956_v32  }
 0x24d   : > { %v11530_v37 = vpop.permute.xlu1 %1163  ;;  %v11532_v38 = vpop.permute.xlu0 %1158 }
 0x24e   : > { %13929 = vst [vmem:[#allocation57_spill] sm:$0xff] %v11530_v37  ;;  %13930 = vst [vmem:[#allocation58_spill] sm:$0xff] %v11532_v38  ;;  %976 = vperm.xlu1 %10379, %v837_v35   ;;  %971 = vperm.xlu0 %10378, %v836_v36   ;;  %v11602_v35 = vld [vmem:[%s11398_s2 + $0x24] sm:$0xff]  ;;  %v2242_v36 = vld [vmem:[%s11398_s2 + $0x1c] sm:$0xff] }
 0x251   : > { %v11536_v41 = vpop.permute.xlu1 %1173  ;;  %v11538_v42 = vpop.permute.xlu0 %1168 }
 0x252   : > { %13931 = vst [vmem:[#allocation59_spill] sm:$0xff] %v11536_v41  ;;  %13932 = vst [vmem:[#allocation60_spill] sm:$0xff] %v11538_v42  ;;  %1223 = vperm.xlu1 %10379, %v1092_v39   ;;  %981 = vperm.xlu0 %10378, %v838_v40  }
 0x255   : > { %v11542_v45 = vpop.permute.xlu1 %1406  ;;  %v11544_v46 = vpop.permute.xlu0 %1401 }
 0x256   : > { %1233 = vperm.xlu1 %10379, %v1094_v43   ;;  %1228 = vperm.xlu0 %10378, %v1093_v44   ;;  %v11611_v43 = vld [vmem:[%s11398_s2 + $0x34] sm:$0xff]  ;;  %v11614_v44 = vld [vmem:[%s11398_s2 + $0x2c] sm:$0xff] }
 0x259   : > { %v11548_v49 = vpop.permute.xlu1 %1416  ;;  %v11550_v50 = vpop.permute.xlu0 %1411 }
 0x25a   : > { %1491 = vperm.xlu1 %10379, %v1380_v47   ;;  %1238 = vperm.xlu0 %10378, %v1095_v48  }
 0x25d   : > { %v11556_v53 = vpop.permute.xlu1 %1426  ;;  %v11558_v54 = vpop.permute.xlu0 %1421 }
 0x25e   : > { %1501 = vperm.xlu1 %10379, %v11553_v51   ;;  %1496 = vperm.xlu0 %10378, %v1381_v52  }
 0x261   : > { %v11567_v57 = vpop.permute.xlu1 %1436  ;;  %v11569_v60 = vpop.permute.xlu0 %1431 }
 0x262   : > { %1511 = vperm.xlu1 %10379, %v11562_v55   ;;  %1506 = vperm.xlu0 %10378, %v11565_v56  }
 0x265   : > { %v11573_v61 = vpop.permute.xlu1 %921  ;;  %v11575_v0 = vpop.permute.xlu0 %1441 }
 0x266   : > { %13933 = vst [vmem:[#allocation61_spill] sm:$0xff] %v11573_v61  ;;  %1769 = vperm.xlu1 %10379, %v11483_v8   ;;  %1764 = vperm.xlu0 %10378, %v11474_v4   ;;  %v1960_v8 = vld [vmem:[%s11398_s2 + $0x73] sm:$0xff]  ;;  %v1959_v4 = vld [vmem:[%s11398_s2 + $0x6b] sm:$0xff] }
 0x269   : > { %v11579_v1 = vpop.permute.xlu1 %931  ;;  %v11581_v5 = vpop.permute.xlu0 %926 }
 0x26a   : > { %13934 = vst [vmem:[#allocation62_spill] sm:$0xff] %v11579_v1  ;;  %13935 = vst [vmem:[#allocation63_spill] sm:$0xff] %v11581_v5  ;;  %1779 = vperm.xlu1 %10379, %v1381_v52   ;;  %1774 = vperm.xlu0 %10378, %v1380_v47   ;;  %v11623_v52 = vld [vmem:[%s11398_s2 + $0x44] sm:$0xff]  ;;  %v839_v5 = vld [vmem:[%s11398_s2 + $0xd8] sm:$0xff] }
 0x26d   : > { %v11585_v19 = vpop.permute.xlu1 %1178  ;;  %v11587_v20 = vpop.permute.xlu0 %936 }
 0x26e   : > { %13936 = vst [vmem:[#allocation64_spill] sm:$0xff] %v11585_v19  ;;  %13937 = vst [vmem:[#allocation65_spill] sm:$0xff] %v11587_v20  ;;  %2037 = vperm.xlu1 %10379, %v1958_v15   ;;  %2032 = vperm.xlu0 %10378, %v1957_v16   ;;  %v11626_v15 = vld [vmem:[%s11398_s2 + $0x3c] sm:$0xff] }
 0x26f   : > { %v840_v20 = vld [vmem:[%s11398_s2 + $0xe0] sm:$0xff] }
 0x271   : > { %v11591_v23 = vpop.permute.xlu1 %1188  ;;  %v11593_v24 = vpop.permute.xlu0 %1183 }
 0x272   : > { %13938 = vst [vmem:[#allocation66_spill] sm:$0xff] %v11591_v23  ;;  %13939 = vst [vmem:[#allocation67_spill] sm:$0xff] %v11593_v24  ;;  %2047 = vperm.xlu1 %10379, %v1960_v8   ;;  %2042 = vperm.xlu0 %10378, %v1959_v4   ;;  %v11635_v4 = vld [vmem:[%s11398_s2 + $0x54] sm:$0xff]  ;;  %v841_v24 = vld [vmem:[%s11398_s2 + $0xe8] sm:$0xff] }
 0x275   : > { %v11597_v31 = vpop.permute.xlu1 %1446  ;;  %v11599_v32 = vpop.permute.xlu0 %1193 }
 0x276   : > { %13940 = vst [vmem:[#allocation68_spill] sm:$0xff] %v11597_v31  ;;  %13941 = vst [vmem:[#allocation69_spill] sm:$0xff] %v11599_v32  ;;  %2280 = vperm.xlu1 %10379, %v2241_v27   ;;  %2052 = vperm.xlu0 %10378, %v1961_v28   ;;  %v11638_v27 = vld [vmem:[%s11398_s2 + $0x4c] sm:$0xff] }
 0x277   : > { %v842_v32 = vld [vmem:[%s11398_s2 + $0xf0] sm:$0xff] }
 0x279   : > { %v11605_v39 = vpop.permute.xlu1 %1456  ;;  %v11607_v40 = vpop.permute.xlu0 %1451 }
 0x27a   : > { %13942 = vst [vmem:[#allocation70_spill] sm:$0xff] %v11605_v39  ;;  %13943 = vst [vmem:[#allocation71_spill] sm:$0xff] %v11607_v40  ;;  %2290 = vperm.xlu1 %10379, %v11602_v35   ;;  %2285 = vperm.xlu0 %10378, %v2242_v36  }
 0x27d   : > { %v11616_v47 = vpop.permute.xlu1 %1466  ;;  %v11618_v48 = vpop.permute.xlu0 %1461 }
 0x27e   : > { %13944 = vst [vmem:[#allocation72_spill] sm:$0xff] %v11616_v47  ;;  %13945 = vst [vmem:[#allocation73_spill] sm:$0xff] %v11618_v48  ;;  %2300 = vperm.xlu1 %10379, %v11611_v43   ;;  %2295 = vperm.xlu0 %10378, %v11614_v44   ;;  %v1096_v48 = vld [vmem:[%s11398_s2 + $0xd9] sm:$0xff] }
 0x27f   : > { %v843_v47 = vld [vmem:[%s11398_s2 + $0xf8] sm:$0xff] }
 0x281   : > { %v11628_v16 = vpop.permute.xlu1 %1699  ;;  %v11630_v8 = vpop.permute.xlu0 %1694 }
 0x282   : > { %2310 = vperm.xlu1 %10379, %v11623_v52   ;;  %2305 = vperm.xlu0 %10378, %v11626_v15  }
 0x285   : > { %v11640_v28 = vpop.permute.xlu1 %1709  ;;  %v11642_v36 = vpop.permute.xlu0 %1704 }
 0x286   : > { %2320 = vperm.xlu1 %10379, %v11635_v4   ;;  %2315 = vperm.xlu0 %10378, %v11638_v27  }
 0x289   : > { %v11648_v1 = vpop.permute.xlu1 %1719  ;;  %v11650_v61 = vpop.permute.xlu0 %1714 }
 0x28a   : > { %991 = vperm.xlu1 %10379, %v840_v20   ;;  %986 = vperm.xlu0 %10378, %v839_v5   ;;  %v1098_v5 = vld [vmem:[%s11398_s2 + $0xe9] sm:$0xff]  ;;  %v1097_v20 = vld [vmem:[%s11398_s2 + $0xe1] sm:$0xff] }
 0x28d   : > { %v11654_v23 = vpop.permute.xlu1 %1729  ;;  %v11656_v19 = vpop.permute.xlu0 %1724 }
 0x28e   : > { %1001 = vperm.xlu1 %10379, %v842_v32   ;;  %996 = vperm.xlu0 %10378, %v841_v24   ;;  %v1100_v24 = vld [vmem:[%s11398_s2 + $0xf9] sm:$0xff]  ;;  %v1099_v32 = vld [vmem:[%s11398_s2 + $0xf1] sm:$0xff] }
 0x291   : > { %v11660_v40 = vpop.permute.xlu1 %941  ;;  %v11662_v34 = vpop.permute.xlu0 %1734 }
 0x292   : > { %13946 = vst [vmem:[#allocation74_spill] sm:$0xff] %v11660_v40  ;;  %1243 = vperm.xlu1 %10379, %v1096_v48   ;;  %1006 = vperm.xlu0 %10378, %v843_v47   ;;  %v1386_v48 = vld [vmem:[%s11398_s2 + $0xc2] sm:$0xff]  ;;  %v1385_v47 = vld [vmem:[%s11398_s2 + $0xba] sm:$0xff] }
 0x295   : > { %v11666_v39 = vpop.permute.xlu1 %951  ;;  %v11668_v29 = vpop.permute.xlu0 %946 }
 0x296   : > { %13947 = vst [vmem:[#allocation75_spill] sm:$0xff] %v11666_v39  ;;  %13948 = vst [vmem:[#allocation76_spill] sm:$0xff] %v11668_v29  ;;  %1253 = vperm.xlu1 %10379, %v1098_v5   ;;  %1248 = vperm.xlu0 %10378, %v1097_v20   ;;  %v11683_v29 = vld [vmem:[%s11398_s2 + $0xd2] sm:$0xff]  ;;  %v11686_v5 = vld [vmem:[%s11398_s2 + $0xca] sm:$0xff] }
 0x299   : > { %v11672_v42 = vpop.permute.xlu1 %961  ;;  %v11674_v40 = vpop.permute.xlu0 %956 }
 0x29a   : > { %13949 = vst [vmem:[#allocation77_spill] sm:$0xff] %v11672_v42  ;;  %13950 = vst [vmem:[#allocation78_spill] sm:$0xff] %v11674_v40  ;;  %1263 = vperm.xlu1 %10379, %v1100_v24   ;;  %1258 = vperm.xlu0 %10378, %v1099_v32  }
 0x29d   : > { %v11678_v41 = vpop.permute.xlu1 %1203  ;;  %v11680_v30 = vpop.permute.xlu0 %1198 }
 0x29e   : > { %13951 = vst [vmem:[#allocation79_spill] sm:$0xff] %v11678_v41  ;;  %13952 = vst [vmem:[#allocation80_spill] sm:$0xff] %v11680_v30  ;;  %1521 = vperm.xlu1 %10379, %v1386_v48   ;;  %1516 = vperm.xlu0 %10378, %v1385_v47  }
 0x2a1   : > { %v11688_v20 = vpop.permute.xlu1 %1213  ;;  %v11690_v42 = vpop.permute.xlu0 %1208 }
 0x2a2   : > { %13953 = vst [vmem:[#allocation81_spill] sm:$0xff] %v11688_v20  ;;  %13954 = vst [vmem:[#allocation82_spill] sm:$0xff] %v11690_v42  ;;  %1531 = vperm.xlu1 %10379, %v11683_v29   ;;  %1526 = vperm.xlu0 %10378, %v11686_v5   ;;  %v1962_v42 = vld [vmem:[%s11398_s2 + $0x83] sm:$0xff] }
 0x2a5   : > { %v11694_v24 = vpop.permute.xlu1 %1471  ;;  %v11696_v32 = vpop.permute.xlu0 %1218 }
 0x2a6   : > { %13955 = vst [vmem:[#allocation83_spill] sm:$0xff] %v11694_v24  ;;  %13956 = vst [vmem:[#allocation84_spill] sm:$0xff] %v11696_v32  ;;  %1789 = vperm.xlu1 %10379, %v11565_v56   ;;  %1784 = vperm.xlu0 %10378, %v11553_v51   ;;  %v1964_v56 = vld [vmem:[%s11398_s2 + $0x93] sm:$0xff]  ;;  %v1963_v51 = vld [vmem:[%s11398_s2 + $0x8b] sm:$0xff] }
 0x2a9   : > { %v11700_v40 = vpop.permute.xlu1 %1481  ;;  %v11702_v39 = vpop.permute.xlu0 %1476 }
 0x2aa   : > { %13957 = vst [vmem:[#allocation85_spill] sm:$0xff] %v11700_v40  ;;  %13958 = vst [vmem:[#allocation86_spill] sm:$0xff] %v11702_v39  ;;  %1799 = vperm.xlu1 %10379, %v1385_v47   ;;  %1794 = vperm.xlu0 %10378, %v11562_v55   ;;  %v2250_v55 = vld [vmem:[%s11398_s2 + $0x5c] sm:$0xff] }
 0x2ab   : > { %v1965_v47 = vld [vmem:[%s11398_s2 + $0x9b] sm:$0xff] }
 0x2ad   : > { %v11706_v20 = vpop.permute.xlu1 %1739  ;;  %v11708_v41 = vpop.permute.xlu0 %1486 }
 0x2ae   : > { %13959 = vst [vmem:[#allocation87_spill] sm:$0xff] %v11706_v20  ;;  %13960 = vst [vmem:[#allocation88_spill] sm:$0xff] %v11708_v41  ;;  %2057 = vperm.xlu1 %10379, %v1962_v42   ;;  %1804 = vperm.xlu0 %10378, %v1386_v48   ;;  %v11723_v42 = vld [vmem:[%s11398_s2 + $0x6c] sm:$0xff]  ;;  %v2251_v48 = vld [vmem:[%s11398_s2 + $0x64] sm:$0xff] }
 0x2b1   : > { %v11712_v32 = vpop.permute.xlu1 %1749  ;;  %v11714_v30 = vpop.permute.xlu0 %1744 }
 0x2b2   : > { %13961 = vst [vmem:[#allocation89_spill] sm:$0xff] %v11712_v32  ;;  %13962 = vst [vmem:[#allocation90_spill] sm:$0xff] %v11714_v30  ;;  %2067 = vperm.xlu1 %10379, %v1964_v56   ;;  %2062 = vperm.xlu0 %10378, %v1963_v51   ;;  %v11732_v56 = vld [vmem:[%s11398_s2 + $0x7c] sm:$0xff]  ;;  %v11735_v51 = vld [vmem:[%s11398_s2 + $0x74] sm:$0xff] }
 0x2b5   : > { %v11718_v39 = vpop.permute.xlu1 %1759  ;;  %v11720_v40 = vpop.permute.xlu0 %1754 }
 0x2b6   : > { %13963 = vst [vmem:[#allocation91_spill] sm:$0xff] %v11718_v39  ;;  %13964 = vst [vmem:[#allocation92_spill] sm:$0xff] %v11720_v40  ;;  %2325 = vperm.xlu1 %10379, %v2250_v55   ;;  %2072 = vperm.xlu0 %10378, %v1965_v47  }
 0x2b9   : > { %v11726_v41 = vpop.permute.xlu1 %1992  ;;  %v11728_v24 = vpop.permute.xlu0 %1987 }
 0x2ba   : > { %2335 = vperm.xlu1 %10379, %v11723_v42   ;;  %2330 = vperm.xlu0 %10378, %v2251_v48  }
 0x2bd   : > { %v11737_v30 = vpop.permute.xlu1 %2002  ;;  %v11739_v39 = vpop.permute.xlu0 %1997 }
 0x2be   : > { %2345 = vperm.xlu1 %10379, %v11732_v56   ;;  %2340 = vperm.xlu0 %10378, %v11735_v51  }
 0x2c1   : > { %v11743_v47 = vpop.permute.xlu1 %2012  ;;  %v11745_v40 = vpop.permute.xlu0 %2007 }
 0x2c2   : > { %2578 = vperm.xlu1 %10379, %v11614_v44   ;;  %2573 = vperm.xlu0 %10378, %v11602_v35  }
 0x2c5   : > { %v11749_v32 = vpop.permute.xlu1 %2022  ;;  %v11751_v20 = vpop.permute.xlu0 %2017 }
 0x2c6   : > { %2588 = vperm.xlu1 %10379, %v11626_v15   ;;  %2583 = vperm.xlu0 %10378, %v11611_v43   ;;  %v844_v15 = vld [vmem:[%s11398_s2 + $0x100] sm:$0xff] }
 0x2c9   : > { %v11755_v25 = vpop.permute.xlu1 %966  ;;  %v11757_v31 = vpop.permute.xlu0 %2027 }
 0x2ca   : > { %13965 = vst [vmem:[#allocation93_spill] sm:$0xff] %v11755_v25  ;;  %13966 = vst [vmem:[#allocation94_spill] sm:$0xff] %v11757_v31  ;;  %2598 = vperm.xlu1 %10379, %v11638_v27   ;;  %2593 = vperm.xlu0 %10378, %v11623_v52   ;;  %v846_v27 = vld [vmem:[%s11398_s2 + $0x110] sm:$0xff]  ;;  %v845_v52 = vld [vmem:[%s11398_s2 + $0x108] sm:$0xff] }
 0x2cd   : > { %v11761_v35 = vpop.permute.xlu1 %976  ;;  %v11763_v44 = vpop.permute.xlu0 %971 }
 0x2ce   : > { %13967 = vst [vmem:[#allocation95_spill] sm:$0xff] %v11761_v35  ;;  %13968 = vst [vmem:[#allocation96_spill] sm:$0xff] %v11763_v44  ;;  %2608 = vperm.xlu1 %10379, %v2250_v55   ;;  %2603 = vperm.xlu0 %10378, %v11635_v4   ;;  %v1101_v4 = vld [vmem:[%s11398_s2 + $0x101] sm:$0xff]  ;;  %v847_v55 = vld [vmem:[%s11398_s2 + $0x118] sm:$0x3f] }
 0x2d1   : > { %v11767_v38 = vpop.permute.xlu1 %1223  ;;  %v11769_v43 = vpop.permute.xlu0 %981 }
 0x2d2   : > { %13969 = vst [vmem:[#allocation97_spill] sm:$0xff] %v11767_v38  ;;  %13970 = vst [vmem:[#allocation98_spill] sm:$0xff] %v11769_v43  ;;  %1011 = vperm.xlu1 %10379, %v844_v15   ;;  %2613 = vperm.xlu0 %10378, %v2251_v48   ;;  %v1103_v48 = vld [vmem:[%s11398_s2 + $0x111] sm:$0xff]  ;;  %v1102_v15 = vld [vmem:[%s11398_s2 + $0x109] sm:$0xff] }
 0x2d5   : > { %v11773_v25 = vpop.permute.xlu1 %1233  ;;  %v11775_v35 = vpop.permute.xlu0 %1228 }
 0x2d6   : > { %13971 = vst [vmem:[#allocation99_spill] sm:$0xff] %v11773_v25  ;;  %13972 = vst [vmem:[#allocation100_spill] sm:$0xff] %v11775_v35  ;;  %1021 = vperm.xlu1 %10379, %v846_v27   ;;  %1016 = vperm.xlu0 %10378, %v845_v52   ;;  %v1389_v27 = vld [vmem:[%s11398_s2 + $0xda] sm:$0xff] }
 0x2d7   : > { %v1104_v52 = vld [vmem:[%s11398_s2 + $0x119] sm:$0x3f] }
 0x2d9   : > { %v11779_v44 = vpop.permute.xlu1 %1491  ;;  %v11781_v38 = vpop.permute.xlu0 %1238 }
 0x2da   : > { %13973 = vst [vmem:[#allocation101_spill] sm:$0xff] %v11779_v44  ;;  %13974 = vst [vmem:[#allocation102_spill] sm:$0xff] %v11781_v38  ;;  %1268 = vperm.xlu1 %10379, %v1101_v4   ;;  %1026 = vperm.xlu0 %10378, %v847_v55   ;;  %v11796_v4 = vld [vmem:[%s11398_s2 + $0xea] sm:$0xff]  ;;  %v1390_v55 = vld [vmem:[%s11398_s2 + $0xe2] sm:$0xff] }
 0x2dd   : > { %v11785_v43 = vpop.permute.xlu1 %1501  ;;  %v11787_v25 = vpop.permute.xlu0 %1496 }
 0x2de   : > { %13975 = vst [vmem:[#allocation103_spill] sm:$0xff] %v11785_v43  ;;  %13976 = vst [vmem:[#allocation104_spill] sm:$0xff] %v11787_v25  ;;  %1278 = vperm.xlu1 %10379, %v1103_v48   ;;  %1273 = vperm.xlu0 %10378, %v1102_v15   ;;  %v11805_v48 = vld [vmem:[%s11398_s2 + $0xfa] sm:$0xff]  ;;  %v11808_v15 = vld [vmem:[%s11398_s2 + $0xf2] sm:$0xff] }
 0x2e1   : > { %v11791_v35 = vpop.permute.xlu1 %1511  ;;  %v11793_v44 = vpop.permute.xlu0 %1506 }
 0x2e2   : > { %13977 = vst [vmem:[#allocation105_spill] sm:$0xff] %v11791_v35  ;;  %13978 = vst [vmem:[#allocation106_spill] sm:$0xff] %v11793_v44  ;;  %1536 = vperm.xlu1 %10379, %v1389_v27   ;;  %1283 = vperm.xlu0 %10378, %v1104_v52  }
 0x2e5   : > { %v11799_v38 = vpop.permute.xlu1 %1769  ;;  %v11801_v43 = vpop.permute.xlu0 %1764 }
 0x2e6   : > { %13979 = vst [vmem:[#allocation107_spill] sm:$0xff] %v11799_v38  ;;  %13980 = vst [vmem:[#allocation108_spill] sm:$0xff] %v11801_v43  ;;  %1546 = vperm.xlu1 %10379, %v11796_v4   ;;  %1541 = vperm.xlu0 %10378, %v1390_v55   ;;  %v1966_v43 = vld [vmem:[%s11398_s2 + $0xa3] sm:$0xff] }
 0x2e9   : > { %v11810_v35 = vpop.permute.xlu1 %1779  ;;  %v11812_v44 = vpop.permute.xlu0 %1774 }
 0x2ea   : > { %13981 = vst [vmem:[#allocation109_spill] sm:$0xff] %v11810_v35  ;;  %13982 = vst [vmem:[#allocation110_spill] sm:$0xff] %v11812_v44  ;;  %1556 = vperm.xlu1 %10379, %v11805_v48   ;;  %1551 = vperm.xlu0 %10378, %v11808_v15   ;;  %v1967_v44 = vld [vmem:[%s11398_s2 + $0xab] sm:$0xff] }
 0x2ed   : > { %v11816_v52 = vpop.permute.xlu1 %2037  ;;  %v11818_v25 = vpop.permute.xlu0 %2032 }
 0x2ee   : > { %13983 = vst [vmem:[#allocation111_spill] sm:$0xff] %v11816_v52  ;;  %13984 = vst [vmem:[#allocation112_spill] sm:$0xff] %v11818_v25  ;;  %1814 = vperm.xlu1 %10379, %v11683_v29   ;;  %1809 = vperm.xlu0 %10378, %v11686_v5   ;;  %v1969_v29 = vld [vmem:[%s11398_s2 + $0xbb] sm:$0xff]  ;;  %v1968_v5 = vld [vmem:[%s11398_s2 + $0xb3] sm:$0xff] }
 0x2f1   : > { %v11822_v38 = vpop.permute.xlu1 %2047  ;;  %v11824_v35 = vpop.permute.xlu0 %2042 }
 0x2f2   : > { %13985 = vst [vmem:[#allocation113_spill] sm:$0xff] %v11822_v38  ;;  %13986 = vst [vmem:[#allocation114_spill] sm:$0xff] %v11824_v35  ;;  %1824 = vperm.xlu1 %10379, %v1390_v55   ;;  %1819 = vperm.xlu0 %10378, %v1389_v27   ;;  %v2255_v27 = vld [vmem:[%s11398_s2 + $0x84] sm:$0xff] }
 0x2f3   : > { %v1970_v55 = vld [vmem:[%s11398_s2 + $0xc3] sm:$0xff] }
 0x2f5   : > { %v11828_v26 = vpop.permute.xlu1 %2280  ;;  %v11830_v52 = vpop.permute.xlu0 %2052 }
 0x2f6   : > { %13987 = vst [vmem:[#allocation115_spill] sm:$0xff] %v11830_v52  ;;  %2082 = vperm.xlu1 %10379, %v1967_v44   ;;  %2077 = vperm.xlu0 %10378, %v1966_v43   ;;  %v11845_v52 = vld [vmem:[%s11398_s2 + $0x94] sm:$0xff]  ;;  %v2256_v44 = vld [vmem:[%s11398_s2 + $0x8c] sm:$0xff] }
 0x2f9   : > { %v11834_v25 = vpop.permute.xlu1 %2290  ;;  %v11836_v38 = vpop.permute.xlu0 %2285 }
 0x2fa   : > { %2092 = vperm.xlu1 %10379, %v1969_v29   ;;  %2087 = vperm.xlu0 %10378, %v1968_v5   ;;  %v11854_v29 = vld [vmem:[%s11398_s2 + $0x9c] sm:$0xff] }
 0x2fd   : > { %v11840_v35 = vpop.permute.xlu1 %2300  ;;  %v11842_v37 = vpop.permute.xlu0 %2295 }
 0x2fe   : > { %13988 = vst [vmem:[#allocation116_spill] sm:$0xff] %v11840_v35  ;;  %13989 = vst [vmem:[#allocation117_spill] sm:$0xff] %v11842_v37  ;;  %2350 = vperm.xlu1 %10379, %v2255_v27   ;;  %2097 = vperm.xlu0 %10378, %v1970_v55  }
 0x301   : > { %v11848_v43 = vpop.permute.xlu1 %2310  ;;  %v11850_v33 = vpop.permute.xlu0 %2305 }
 0x302   : > { %13990 = vst [vmem:[#allocation118_spill] sm:$0xff] %v11848_v43  ;;  %13991 = vst [vmem:[#allocation119_spill] sm:$0xff] %v11850_v33  ;;  %2360 = vperm.xlu1 %10379, %v11845_v52   ;;  %2355 = vperm.xlu0 %10378, %v2256_v44  }
 0x305   : > { %v11856_v5 = vpop.permute.xlu1 %2320  ;;  %v11858_v31 = vpop.permute.xlu0 %2315 }
 0x306   : > { %13992 = vst [vmem:[#allocation120_spill] sm:$0xff] %v11856_v5  ;;  %13993 = vst [vmem:[#allocation121_spill] sm:$0xff] %v11858_v31  ;;  %2618 = vperm.xlu1 %10379, %v11723_v42   ;;  %2365 = vperm.xlu0 %10378, %v11854_v29   ;;  %v2828_v42 = vld [vmem:[%s11398_s2 + $0x2d] sm:$0xff]  ;;  %v2827_v31 = vld [vmem:[%s11398_s2 + $0x25] sm:$0xff] }
 0x309   : > { %v11862_v55 = vpop.permute.xlu1 %991  ;;  %v11864_v33 = vpop.permute.xlu0 %986 }
 0x30a   : > { %13994 = vst [vmem:[#allocation122_spill] sm:$0xff] %v11862_v55  ;;  %13995 = vst [vmem:[#allocation123_spill] sm:$0xff] %v11864_v33  ;;  %2628 = vperm.xlu1 %10379, %v11732_v56   ;;  %2623 = vperm.xlu0 %10378, %v11735_v51   ;;  %v2830_v56 = vld [vmem:[%s11398_s2 + $0x3d] sm:$0xff]  ;;  %v2829_v51 = vld [vmem:[%s11398_s2 + $0x35] sm:$0xff] }
 0x30d   : > { %v11868_v43 = vpop.permute.xlu1 %1001  ;;  %v11870_v5 = vpop.permute.xlu0 %996 }
 0x30e   : > { %13996 = vst [vmem:[#allocation124_spill] sm:$0xff] %v11868_v43  ;;  %13997 = vst [vmem:[#allocation125_spill] sm:$0xff] %v11870_v5  ;;  %2638 = vperm.xlu1 %10379, %v2256_v44   ;;  %2633 = vperm.xlu0 %10378, %v2255_v27   ;;  %v2832_v27 = vld [vmem:[%s11398_s2 + $0x4d] sm:$0xff]  ;;  %v2831_v44 = vld [vmem:[%s11398_s2 + $0x45] sm:$0xff] }
 0x311   : > { %v11874_v37 = vpop.permute.xlu1 %1243  ;;  %v11876_v55 = vpop.permute.xlu0 %1006 }
 0x312   : > { %13998 = vst [vmem:[#allocation126_spill] sm:$0xff] %v11874_v37  ;;  %13999 = vst [vmem:[#allocation127_spill] sm:$0xff] %v11876_v55  ;;  %2871 = vperm.xlu1 %10379, %v2828_v42   ;;  %2866 = vperm.xlu0 %10378, %v2827_v31   ;;  %v2834_v31 = vld [vmem:[%s11398_s2 + $0x5d] sm:$0xff]  ;;  %v2833_v42 = vld [vmem:[%s11398_s2 + $0x55] sm:$0xff] }
 0x315   : > { %v11880_v33 = vpop.permute.xlu1 %1253  ;;  %v11882_v43 = vpop.permute.xlu0 %1248 }
 0x316   : > { %14000 = vst [vmem:[#allocation128_spill] sm:$0xff] %v11880_v33  ;;  %14001 = vst [vmem:[#allocation129_spill] sm:$0xff] %v11882_v43  ;;  %2881 = vperm.xlu1 %10379, %v2830_v56   ;;  %2876 = vperm.xlu0 %10378, %v2829_v51   ;;  %v1394_v56 = vld [vmem:[%s11398_s2 + $0x102] sm:$0xff] }
 0x317   : > { %v2835_v51 = vld [vmem:[%s11398_s2 + $0x65] sm:$0xff] }
 0x319   : > { %v11886_v5 = vpop.permute.xlu1 %1263  ;;  %v11888_v37 = vpop.permute.xlu0 %1258 }
 0x31a   : > { %14002 = vst [vmem:[#allocation130_spill] sm:$0xff] %v11886_v5  ;;  %14003 = vst [vmem:[#allocation131_spill] sm:$0xff] %v11888_v37  ;;  %2891 = vperm.xlu1 %10379, %v2832_v27   ;;  %2886 = vperm.xlu0 %10378, %v2831_v44   ;;  %v11903_v37 = vld [vmem:[%s11398_s2 + $0x112] sm:$0xff]  ;;  %v1395_v27 = vld [vmem:[%s11398_s2 + $0x10a] sm:$0xff] }
 0x31d   : > { %v11892_v55 = vpop.permute.xlu1 %1521  ;;  %v11894_v33 = vpop.permute.xlu0 %1516 }
 0x31e   : > { %14004 = vst [vmem:[#allocation132_spill] sm:$0xff] %v11892_v55  ;;  %14005 = vst [vmem:[#allocation133_spill] sm:$0xff] %v11894_v33  ;;  %2901 = vperm.xlu1 %10379, %v2834_v31   ;;  %2896 = vperm.xlu0 %10378, %v2833_v42   ;;  %v1397_v31 = vld [vmem:[%s11398_s2 + $0x11a] sm:$0x3f] }
 0x321   : > { %v11898_v43 = vpop.permute.xlu1 %1531  ;;  %v11900_v5 = vpop.permute.xlu0 %1526 }
 0x322   : > { %14006 = vst [vmem:[#allocation134_spill] sm:$0xff] %v11898_v43  ;;  %14007 = vst [vmem:[#allocation135_spill] sm:$0xff] %v11900_v5  ;;  %1561 = vperm.xlu1 %10379, %v1394_v56   ;;  %2906 = vperm.xlu0 %10378, %v2835_v51  }
 0x325   : > { %v11906_v44 = vpop.permute.xlu1 %1789  ;;  %v11908_v35 = vpop.permute.xlu0 %1784 }
 0x326   : > { %14008 = vst [vmem:[#allocation136_spill] sm:$0xff] %v11906_v44  ;;  %14009 = vst [vmem:[#allocation137_spill] sm:$0xff] %v11908_v35  ;;  %1571 = vperm.xlu1 %10379, %v11903_v37   ;;  %1566 = vperm.xlu0 %10378, %v1395_v27  }
 0x329   : > { %v11912_v42 = vpop.permute.xlu1 %1799  ;;  %v11914_v43 = vpop.permute.xlu0 %1794 }
 0x32a   : > { %14010 = vst [vmem:[#allocation138_spill] sm:$0xff] %v11912_v42  ;;  %14011 = vst [vmem:[#allocation139_spill] sm:$0xff] %v11914_v43  ;;  %1829 = vperm.xlu1 %10379, %v11796_v4   ;;  %1576 = vperm.xlu0 %10378, %v1397_v31   ;;  %v1972_v4 = vld [vmem:[%s11398_s2 + $0xd3] sm:$0xff]  ;;  %v1971_v42 = vld [vmem:[%s11398_s2 + $0xcb] sm:$0xff] }
 0x32d   : > { %v11917_v51 = vpop.permute.xlu1 %2057  ;;  %v11919_v5 = vpop.permute.xlu0 %1804 }
 0x32e   : > { %14012 = vst [vmem:[#allocation140_spill] sm:$0xff] %v11917_v51  ;;  %14013 = vst [vmem:[#allocation141_spill] sm:$0xff] %v11919_v5  ;;  %1839 = vperm.xlu1 %10379, %v11805_v48   ;;  %1834 = vperm.xlu0 %10378, %v11808_v15   ;;  %v1974_v48 = vld [vmem:[%s11398_s2 + $0xe3] sm:$0xff]  ;;  %v1973_v15 = vld [vmem:[%s11398_s2 + $0xdb] sm:$0xff] }
 0x331   : > { %v11923_v55 = vpop.permute.xlu1 %2067  ;;  %v11925_v33 = vpop.permute.xlu0 %2062 }
 0x332   : > { %14014 = vst [vmem:[#allocation142_spill] sm:$0xff] %v11923_v55  ;;  %14015 = vst [vmem:[#allocation143_spill] sm:$0xff] %v11925_v33  ;;  %1849 = vperm.xlu1 %10379, %v1395_v27   ;;  %1844 = vperm.xlu0 %10378, %v1394_v56   ;;  %v2260_v56 = vld [vmem:[%s11398_s2 + $0xac] sm:$0xff]  ;;  %v2259_v27 = vld [vmem:[%s11398_s2 + $0xa4] sm:$0xff] }
 0x335   : > { %v11929_v31 = vpop.permute.xlu1 %2325  ;;  %v11931_v44 = vpop.permute.xlu0 %2072 }
 0x336   : > { %14016 = vst [vmem:[#allocation144_spill] sm:$0xff] %v11929_v31  ;;  %14017 = vst [vmem:[#allocation145_spill] sm:$0xff] %v11931_v44  ;;  %2107 = vperm.xlu1 %10379, %v1972_v4   ;;  %2102 = vperm.xlu0 %10378, %v1971_v42   ;;  %v11946_v4 = vld [vmem:[%s11398_s2 + $0xbc] sm:$0xff]  ;;  %v11949_v42 = vld [vmem:[%s11398_s2 + $0xb4] sm:$0xff] }
 0x339   : > { %v11935_v5 = vpop.permute.xlu1 %2335  ;;  %v11937_v43 = vpop.permute.xlu0 %2330 }
 0x33a   : > { %14018 = vst [vmem:[#allocation146_spill] sm:$0xff] %v11935_v5  ;;  %14019 = vst [vmem:[#allocation147_spill] sm:$0xff] %v11937_v43  ;;  %2117 = vperm.xlu1 %10379, %v1974_v48   ;;  %2112 = vperm.xlu0 %10378, %v1973_v15   ;;  %v11958_v48 = vld [vmem:[%s11398_s2 + $0xc4] sm:$0xff]  ;;  %v2836_v43 = vld [vmem:[%s11398_s2 + $0x6d] sm:$0xff] }
 0x33d   : > { %v11941_v35 = vpop.permute.xlu1 %2345  ;;  %v11943_v33 = vpop.permute.xlu0 %2340 }
 0x33e   : > { %14020 = vst [vmem:[#allocation148_spill] sm:$0xff] %v11941_v35  ;;  %14021 = vst [vmem:[#allocation149_spill] sm:$0xff] %v11943_v33  ;;  %2375 = vperm.xlu1 %10379, %v2260_v56   ;;  %2370 = vperm.xlu0 %10378, %v2259_v27  }
 0x341   : > { %v11951_v44 = vpop.permute.xlu1 %2578  ;;  %v11953_v55 = vpop.permute.xlu0 %2573 }
 0x342   : > { %2385 = vperm.xlu1 %10379, %v11946_v4   ;;  %2380 = vperm.xlu0 %10378, %v11949_v42  }
 0x345   : > { %v11960_v15 = vpop.permute.xlu1 %2588  ;;  %v11962_v51 = vpop.permute.xlu0 %2583 }
 0x346   : > { %14022 = vst [vmem:[#allocation150_spill] sm:$0xff] %v11960_v15  ;;  %14023 = vst [vmem:[#allocation151_spill] sm:$0xff] %v11962_v51  ;;  %2643 = vperm.xlu1 %10379, %v11845_v52   ;;  %2390 = vperm.xlu0 %10378, %v11958_v48   ;;  %v2838_v52 = vld [vmem:[%s11398_s2 + $0x7d] sm:$0xff]  ;;  %v2837_v51 = vld [vmem:[%s11398_s2 + $0x75] sm:$0xff] }
 0x349   : > { %v11966_v33 = vpop.permute.xlu1 %2598  ;;  %v11968_v35 = vpop.permute.xlu0 %2593 }
 0x34a   : > { %14024 = vst [vmem:[#allocation152_spill] sm:$0xff] %v11966_v33  ;;  %14025 = vst [vmem:[#allocation153_spill] sm:$0xff] %v11968_v35  ;;  %2653 = vperm.xlu1 %10379, %v2259_v27   ;;  %2648 = vperm.xlu0 %10378, %v11854_v29   ;;  %v2840_v29 = vld [vmem:[%s11398_s2 + $0x8d] sm:$0xff]  ;;  %v2839_v27 = vld [vmem:[%s11398_s2 + $0x85] sm:$0xff] }
 0x34d   : > { %v11972_v5 = vpop.permute.xlu1 %2608  ;;  %v11974_v31 = vpop.permute.xlu0 %2603 }
 0x34e   : > { %14026 = vst [vmem:[#allocation154_spill] sm:$0xff] %v11972_v5  ;;  %14027 = vst [vmem:[#allocation155_spill] sm:$0xff] %v11974_v31  ;;  %2911 = vperm.xlu1 %10379, %v2836_v43   ;;  %2658 = vperm.xlu0 %10378, %v2260_v56   ;;  %v3121_v43 = vld [vmem:[%s11398_s2 + $0x2e] sm:$0xff]  ;;  %v3120_v56 = vld [vmem:[%s11398_s2 + $0x26] sm:$0xff] }
 0x351   : > { %v11978_v15 = vpop.permute.xlu1 %1011  ;;  %v11980_v33 = vpop.permute.xlu0 %2613 }
 0x352   : > { %14028 = vst [vmem:[#allocation156_spill] sm:$0xff] %v11978_v15  ;;  %14029 = vst [vmem:[#allocation157_spill] sm:$0xff] %v11980_v33  ;;  %2921 = vperm.xlu1 %10379, %v2838_v52   ;;  %2916 = vperm.xlu0 %10378, %v2837_v51   ;;  %v3123_v51 = vld [vmem:[%s11398_s2 + $0x3e] sm:$0xff]  ;;  %v3122_v52 = vld [vmem:[%s11398_s2 + $0x36] sm:$0xff] }
 0x355   : > { %v11984_v35 = vpop.permute.xlu1 %1021  ;;  %v11986_v5 = vpop.permute.xlu0 %1016 }
 0x356   : > { %14030 = vst [vmem:[#allocation158_spill] sm:$0xff] %v11984_v35  ;;  %14031 = vst [vmem:[#allocation159_spill] sm:$0xff] %v11986_v5  ;;  %2931 = vperm.xlu1 %10379, %v2840_v29   ;;  %2926 = vperm.xlu0 %10378, %v2839_v27   ;;  %v3125_v29 = vld [vmem:[%s11398_s2 + $0x4e] sm:$0xff]  ;;  %v3124_v27 = vld [vmem:[%s11398_s2 + $0x46] sm:$0xff] }
 0x359   : > { %v11990_v31 = vpop.permute.xlu1 %1268  ;;  %v11992_v15 = vpop.permute.xlu0 %1026 }
 0x35a   : > { %14032 = vst [vmem:[#allocation160_spill] sm:$0xff] %v11990_v31  ;;  %14033 = vst [vmem:[#allocation161_spill] sm:$0xff] %v11992_v15  ;;  %3164 = vperm.xlu1 %10379, %v3121_v43   ;;  %3159 = vperm.xlu0 %10378, %v3120_v56   ;;  %v3127_v43 = vld [vmem:[%s11398_s2 + $0x5e] sm:$0xff]  ;;  %v3126_v56 = vld [vmem:[%s11398_s2 + $0x56] sm:$0xff] }
 0x35d   : > { %v11996_v33 = vpop.permute.xlu1 %1278  ;;  %v11998_v35 = vpop.permute.xlu0 %1273 }
 0x35e   : > { %14034 = vst [vmem:[#allocation162_spill] sm:$0xff] %v11996_v33  ;;  %14035 = vst [vmem:[#allocation163_spill] sm:$0xff] %v11998_v35  ;;  %3174 = vperm.xlu1 %10379, %v3123_v51   ;;  %3169 = vperm.xlu0 %10378, %v3122_v52   ;;  %v3128_v51 = vld [vmem:[%s11398_s2 + $0x66] sm:$0xff] }
 0x361   : > { %v12002_v5 = vpop.permute.xlu1 %1536  ;;  %v12004_v31 = vpop.permute.xlu0 %1283 }
 0x362   : > { %14036 = vst [vmem:[#allocation164_spill] sm:$0xff] %v12002_v5  ;;  %14037 = vst [vmem:[#allocation165_spill] sm:$0xff] %v12004_v31  ;;  %3184 = vperm.xlu1 %10379, %v3125_v29   ;;  %3179 = vperm.xlu0 %10378, %v3124_v27   ;;  %v1689_v29 = vld [vmem:[%s11398_s2 + $0x122] sm:$0xff]  ;;  %v1688_v27 = vld [vmem:[%s11398_s2 + $0x11a] sm:$0xff] }
 0x365   : > { %v12008_v15 = vpop.permute.xlu1 %1546  ;;  %v12010_v33 = vpop.permute.xlu0 %1541 }
 0x366   : > { %14038 = vst [vmem:[#allocation166_spill] sm:$0xff] %v12008_v15  ;;  %14039 = vst [vmem:[#allocation167_spill] sm:$0xff] %v12010_v33  ;;  %3194 = vperm.xlu1 %10379, %v3127_v43   ;;  %3189 = vperm.xlu0 %10378, %v3126_v56   ;;  %v1975_v43 = vld [vmem:[%s11398_s2 + $0xeb] sm:$0xff] }
 0x367   : > { %v1690_v56 = vld [vmem:[%s11398_s2 + $0x12a] sm:$0x3f] }
 0x369   : > { %v12013_v52 = vpop.permute.xlu1 %1556  ;;  %v12015_v5 = vpop.permute.xlu0 %1551 }
 0x36a   : > { %14040 = vst [vmem:[#allocation168_spill] sm:$0xff] %v12013_v52  ;;  %14041 = vst [vmem:[#allocation169_spill] sm:$0xff] %v12015_v5  ;;  %1854 = vperm.xlu1 %10379, %v11903_v37   ;;  %3199 = vperm.xlu0 %10378, %v3128_v51   ;;  %v1977_v37 = vld [vmem:[%s11398_s2 + $0xfb] sm:$0xff]  ;;  %v1976_v51 = vld [vmem:[%s11398_s2 + $0xf3] sm:$0xff] }
 0x36d   : > { %v12020_v31 = vpop.permute.xlu1 %1814  ;;  %v12022_v15 = vpop.permute.xlu0 %1809 }
 0x36e   : > { %14042 = vst [vmem:[#allocation170_spill] sm:$0xff] %v12020_v31  ;;  %14043 = vst [vmem:[#allocation171_spill] sm:$0xff] %v12022_v15  ;;  %1864 = vperm.xlu1 %10379, %v1689_v29   ;;  %1859 = vperm.xlu0 %10378, %v1688_v27   ;;  %v1979_v29 = vld [vmem:[%s11398_s2 + $0x10b] sm:$0xff]  ;;  %v1978_v27 = vld [vmem:[%s11398_s2 + $0x103] sm:$0xff] }
 0x371   : > { %v12026_v52 = vpop.permute.xlu1 %1824  ;;  %v12028_v5 = vpop.permute.xlu0 %1819 }
 0x372   : > { %14044 = vst [vmem:[#allocation172_spill] sm:$0xff] %v12026_v52  ;;  %14045 = vst [vmem:[#allocation173_spill] sm:$0xff] %v12028_v5  ;;  %2122 = vperm.xlu1 %10379, %v1975_v43   ;;  %1869 = vperm.xlu0 %10378, %v1690_v56   ;;  %v2265_v43 = vld [vmem:[%s11398_s2 + $0xd4] sm:$0xff]  ;;  %v2264_v56 = vld [vmem:[%s11398_s2 + $0xcc] sm:$0xff] }
 0x375   : > { %v12032_v33 = vpop.permute.xlu1 %2082  ;;  %v12034_v31 = vpop.permute.xlu0 %2077 }
 0x376   : > { %14046 = vst [vmem:[#allocation174_spill] sm:$0xff] %v12032_v33  ;;  %14047 = vst [vmem:[#allocation175_spill] sm:$0xff] %v12034_v31  ;;  %2132 = vperm.xlu1 %10379, %v1977_v37   ;;  %2127 = vperm.xlu0 %10378, %v1976_v51   ;;  %v12049_v33 = vld [vmem:[%s11398_s2 + $0xe4] sm:$0xff]  ;;  %v12052_v37 = vld [vmem:[%s11398_s2 + $0xdc] sm:$0xff] }
 0x377   : > { %v2841_v31 = vld [vmem:[%s11398_s2 + $0x95] sm:$0xff] }
 0x379   : > { %v12038_v15 = vpop.permute.xlu1 %2092  ;;  %v12040_v52 = vpop.permute.xlu0 %2087 }
 0x37a   : > { %14048 = vst [vmem:[#allocation176_spill] sm:$0xff] %v12038_v15  ;;  %14049 = vst [vmem:[#allocation177_spill] sm:$0xff] %v12040_v52  ;;  %2142 = vperm.xlu1 %10379, %v1979_v29   ;;  %2137 = vperm.xlu0 %10378, %v1978_v27  }
 0x37d   : > { %v12044_v5 = vpop.permute.xlu1 %2350  ;;  %v12046_v35 = vpop.permute.xlu0 %2097 }
 0x37e   : > { %14050 = vst [vmem:[#allocation178_spill] sm:$0xff] %v12044_v5  ;;  %14051 = vst [vmem:[#allocation179_spill] sm:$0xff] %v12046_v35  ;;  %2400 = vperm.xlu1 %10379, %v2265_v43   ;;  %2395 = vperm.xlu0 %10378, %v2264_v56  }
 0x381   : > { %v12054_v51 = vpop.permute.xlu1 %2360  ;;  %v12056_v15 = vpop.permute.xlu0 %2355 }
 0x382   : > { %14052 = vst [vmem:[#allocation180_spill] sm:$0xff] %v12054_v51  ;;  %14053 = vst [vmem:[#allocation181_spill] sm:$0xff] %v12056_v15  ;;  %2410 = vperm.xlu1 %10379, %v12049_v33   ;;  %2405 = vperm.xlu0 %10378, %v12052_v37  }
 0x385   : > { %v12060_v29 = vpop.permute.xlu1 %2618  ;;  %v12062_v27 = vpop.permute.xlu0 %2365 }
 0x386   : > { %14054 = vst [vmem:[#allocation182_spill] sm:$0xff] %v12060_v29  ;;  %14055 = vst [vmem:[#allocation183_spill] sm:$0xff] %v12062_v27  ;;  %2668 = vperm.xlu1 %10379, %v11946_v4   ;;  %2663 = vperm.xlu0 %10378, %v11949_v42   ;;  %v2843_v4 = vld [vmem:[%s11398_s2 + $0xa5] sm:$0xff]  ;;  %v2842_v42 = vld [vmem:[%s11398_s2 + $0x9d] sm:$0xff] }
 0x389   : > { %v12066_v35 = vpop.permute.xlu1 %2628  ;;  %v12068_v52 = vpop.permute.xlu0 %2623 }
 0x38a   : > { %14056 = vst [vmem:[#allocation184_spill] sm:$0xff] %v12066_v35  ;;  %14057 = vst [vmem:[#allocation185_spill] sm:$0xff] %v12068_v52  ;;  %2678 = vperm.xlu1 %10379, %v2264_v56   ;;  %2673 = vperm.xlu0 %10378, %v11958_v48   ;;  %v3129_v48 = vld [vmem:[%s11398_s2 + $0x6e] sm:$0xff] }
 0x38b   : > { %v2844_v56 = vld [vmem:[%s11398_s2 + $0xad] sm:$0xff] }
 0x38d   : > { %v12072_v15 = vpop.permute.xlu1 %2638  ;;  %v12074_v51 = vpop.permute.xlu0 %2633 }
 0x38e   : > { %14058 = vst [vmem:[#allocation186_spill] sm:$0xff] %v12072_v15  ;;  %14059 = vst [vmem:[#allocation187_spill] sm:$0xff] %v12074_v51  ;;  %2936 = vperm.xlu1 %10379, %v2841_v31   ;;  %2683 = vperm.xlu0 %10378, %v2265_v43   ;;  %v3131_v31 = vld [vmem:[%s11398_s2 + $0x7e] sm:$0xff]  ;;  %v3130_v43 = vld [vmem:[%s11398_s2 + $0x76] sm:$0xff] }
 0x391   : > { %v12078_v27 = vpop.permute.xlu1 %2871  ;;  %v12080_v5 = vpop.permute.xlu0 %2866 }
 0x392   : > { %2946 = vperm.xlu1 %10379, %v2843_v4   ;;  %2941 = vperm.xlu0 %10378, %v2842_v42   ;;  %v3133_v4 = vld [vmem:[%s11398_s2 + $0x8e] sm:$0xff]  ;;  %v3132_v42 = vld [vmem:[%s11398_s2 + $0x86] sm:$0xff] }
 0x395   : > { %v12084_v52 = vpop.permute.xlu1 %2881  ;;  %v12086_v15 = vpop.permute.xlu0 %2876 }
 0x396   : > { %14060 = vst [vmem:[#allocation188_spill] sm:$0xff] %v12084_v52  ;;  %14061 = vst [vmem:[#allocation189_spill] sm:$0xff] %v12086_v15  ;;  %3204 = vperm.xlu1 %10379, %v3129_v48   ;;  %2951 = vperm.xlu0 %10378, %v2844_v56   ;;  %v1981_v48 = vld [vmem:[%s11398_s2 + $0x11b] sm:$0xff]  ;;  %v1980_v56 = vld [vmem:[%s11398_s2 + $0x113] sm:$0xff] }
 0x399   : > { %v12090_v51 = vpop.permute.xlu1 %2891  ;;  %v12092_v35 = vpop.permute.xlu0 %2886 }
 0x39a   : > { %14062 = vst [vmem:[#allocation190_spill] sm:$0xff] %v12090_v51  ;;  %14063 = vst [vmem:[#allocation191_spill] sm:$0xff] %v12092_v35  ;;  %3214 = vperm.xlu1 %10379, %v3131_v31   ;;  %3209 = vperm.xlu0 %10378, %v3130_v43   ;;  %v1983_v31 = vld [vmem:[%s11398_s2 + $0x12b] sm:$0x3f]  ;;  %v1982_v43 = vld [vmem:[%s11398_s2 + $0x123] sm:$0xff] }
 0x39d   : > { %v12096_v29 = vpop.permute.xlu1 %2901  ;;  %v12098_v52 = vpop.permute.xlu0 %2896 }
 0x39e   : > { %14064 = vst [vmem:[#allocation192_spill] sm:$0xff] %v12096_v29  ;;  %14065 = vst [vmem:[#allocation193_spill] sm:$0xff] %v12098_v52  ;;  %3224 = vperm.xlu1 %10379, %v3133_v4   ;;  %3219 = vperm.xlu0 %10378, %v3132_v42   ;;  %v2269_v4 = vld [vmem:[%s11398_s2 + $0xf4] sm:$0xff]  ;;  %v2268_v42 = vld [vmem:[%s11398_s2 + $0xec] sm:$0xff] }
 0x3a1   : > { %v12102_v15 = vpop.permute.xlu1 %1561  ;;  %v12104_v51 = vpop.permute.xlu0 %2906 }
 0x3a2   : > { %14066 = vst [vmem:[#allocation194_spill] sm:$0xff] %v12102_v15  ;;  %14067 = vst [vmem:[#allocation195_spill] sm:$0xff] %v12104_v51  ;;  %2152 = vperm.xlu1 %10379, %v1981_v48   ;;  %2147 = vperm.xlu0 %10378, %v1980_v56   ;;  %v12119_v48 = vld [vmem:[%s11398_s2 + $0x104] sm:$0xff]  ;;  %v12122_v56 = vld [vmem:[%s11398_s2 + $0xfc] sm:$0xff] }
 0x3a3   : > { %14072 = vst [vmem:[#allocation200_spill] sm:$0xff] %v12119_v48  ;;  %14073 = vst [vmem:[#allocation201_spill] sm:$0xff] %v12122_v56 }
 0x3a5   : > { %v12108_v35 = vpop.permute.xlu1 %1571  ;;  %v12110_v29 = vpop.permute.xlu0 %1566 }
 0x3a6   : > { %14068 = vst [vmem:[#allocation196_spill] sm:$0xff] %v12108_v35  ;;  %14069 = vst [vmem:[#allocation197_spill] sm:$0xff] %v12110_v29  ;;  %2162 = vperm.xlu1 %10379, %v1983_v31   ;;  %2157 = vperm.xlu0 %10378, %v1982_v43   ;;  %v12131_v31 = vld [vmem:[%s11398_s2 + $0x10c] sm:$0xff] }
 0x3a7   : > { %14076 = vst [vmem:[#allocation204_spill] sm:$0xff] %v12131_v31 }
 0x3a9   : > { %v12114_v52 = vpop.permute.xlu1 %1829  ;;  %v12116_v15 = vpop.permute.xlu0 %1576 }
 0x3aa   : > { %14070 = vst [vmem:[#allocation198_spill] sm:$0xff] %v12114_v52  ;;  %14071 = vst [vmem:[#allocation199_spill] sm:$0xff] %v12116_v15  ;;  %2420 = vperm.xlu1 %10379, %v2269_v4   ;;  %2415 = vperm.xlu0 %10378, %v2268_v42  }
 0x3ad   : > { %v12124_v51 = vpop.permute.xlu1 %1839  ;;  %v12126_v35 = vpop.permute.xlu0 %1834 }
 0x3ae   : > { %14074 = vst [vmem:[#allocation202_spill] sm:$0xff] %v12124_v51  ;;  %14075 = vst [vmem:[#allocation203_spill] sm:$0xff] %v12126_v35  ;;  %2430 = vperm.xlu1 %10379, %v12119_v48   ;;  %2425 = vperm.xlu0 %10378, %v12122_v56   ;;  %v2845_v35 = vld [vmem:[%s11398_s2 + $0xb5] sm:$0xff] }
 0x3af   : > { %v12151_v48 = vld [vmem:[#allocation10 + $0x1] ss:$0 sm:$0xff] }
 0x3b1   : > { %v12133_v43 = vpop.permute.xlu1 %1849  ;;  %v12135_v52 = vpop.permute.xlu0 %1844 }
 0x3b2   : > { %14077 = vst [vmem:[#allocation205_spill] sm:$0xff] %v12133_v43  ;;  %14078 = vst [vmem:[#allocation206_spill] sm:$0xff] %v12135_v52  ;;  %2688 = vperm.xlu1 %10379, %v12052_v37   ;;  %2435 = vperm.xlu0 %10378, %v12131_v31   ;;  %v12149_v43 = vld [vmem:[#allocation10] ss:$0 sm:$0xff]  ;;  %v2847_v37 = vld [vmem:[%s11398_s2 + $0xc5] sm:$0xff] }
 0x3b3   : > { %14083 = vst [vmem:[#allocation211_spill] sm:$0xff] %v12149_v43  ;;  %v2846_v52 = vld [vmem:[%s11398_s2 + $0xbd] sm:$0xff] }
 0x3b5   : > { %v12139_v15 = vpop.permute.xlu1 %2107  ;;  %v12141_v51 = vpop.permute.xlu0 %2102 }
 0x3b6   : > { %14079 = vst [vmem:[#allocation207_spill] sm:$0xff] %v12139_v15  ;;  %14080 = vst [vmem:[#allocation208_spill] sm:$0xff] %v12141_v51  ;;  %2698 = vperm.xlu1 %10379, %v2268_v42   ;;  %2693 = vperm.xlu0 %10378, %v12049_v33   ;;  %v1035_v42 = vmul.f32 %v12149_v43, %v11457_v58  ;;  %v1290_v33 = vmul.f32 %v12151_v48, %v11485_v9 }
 0x3b7   : > { %v1034_v58 = vmul.f32 %v12149_v43, %v11465_v63  ;;  %v1038_v9 = vmul.f32 %v12149_v43, %v11469_v2  ;;  %v1291_v51 = vmul.f32 %v12151_v48, %v11492_v12  ;;  %v1039_v63 = vmul.f32 %v12149_v43, %v11479_v7 }
 0x3b8   : > { %v1293_v2 = vmul.f32 %v12151_v48, %v11496_v14  ;;  %v1298_v14 = vmul.f32 %v12151_v48, %v11506_v21 }
 0x3b9   : > { %v12145_v29 = vpop.permute.xlu1 %2117  ;;  %v12147_v56 = vpop.permute.xlu0 %2112 }
 0x3ba   : > { %14081 = vst [vmem:[#allocation209_spill] sm:$0xff] %v12145_v29  ;;  %14082 = vst [vmem:[#allocation210_spill] sm:$0xff] %v12147_v56  ;;  %2956 = vperm.xlu1 %10379, %v2845_v35   ;;  %2703 = vperm.xlu0 %10378, %v2269_v4   ;;  %v1033_v56 = vmul.f32 %v12149_v43, %v11459_v59  ;;  %v1036_v35 = vmul.f32 %v12149_v43, %v11463_v62 }
 0x3bb   : > { %v1292_v4 = vmul.f32 %v12151_v48, %v11490_v11  ;;  %v1294_v59 = vmul.f32 %v12151_v48, %v11494_v13  ;;  %v1037_v62 = vmul.f32 %v12149_v43, %v11471_v3  ;;  %v1040_v11 = vmul.f32 %v12149_v43, %v11477_v6 }
 0x3bc   : > { %v1326_v12 = vadd.f32 %v1290_v33, %v1033_v56  ;;  %v1041_v13 = vmul.f32 %v12149_v43, %v11487_v10  ;;  %v1296_v3 = vmul.f32 %v12151_v48, %v11500_v17  ;;  %v1295_v6 = vmul.f32 %v12151_v48, %v11502_v18  ;;  %v3134_v43 = vld [vmem:[%s11398_s2 + $0x96] sm:$0xff] }
 0x3bd   : > { %v12159_v15 = vpop.permute.xlu1 %2375  ;;  %v12161_v29 = vpop.permute.xlu0 %2370  ;;  %v1328_v31 = vadd.f32 %v1292_v4, %v1035_v42  ;;  %v1297_v56 = vmul.f32 %v12151_v48, %v11508_v22  ;;  %v1327_v10 = vadd.f32 %v1291_v51, %v1034_v58  ;;  %v1330_v33 = vadd.f32 %v1294_v59, %v1037_v62  ;;  %v3136_v62 = vld [vmem:[%s11398_s2 + $0xa6] sm:$0xff] }
 0x3be   : > { %14084 = vst [vmem:[#allocation212_spill] sm:$0xff] %v12159_v15  ;;  %14085 = vst [vmem:[#allocation213_spill] sm:$0xff] %v12161_v29  ;;  %2966 = vperm.xlu1 %10379, %v2847_v37   ;;  %2961 = vperm.xlu0 %10378, %v2846_v52   ;;  %v2849_v15 = vld [vmem:[%s11398_s2 + $0xd5] sm:$0xff]  ;;  %v2848_v29 = vld [vmem:[%s11398_s2 + $0xcd] sm:$0xff]  ;;  %v1332_v51 = vadd.f32 %v1296_v3, %v1039_v63 }
 0x3bf   : > { %v12187_v52 = vld [vmem:[#allocation10 + $0x2] ss:$0 sm:$0xff]  ;;  %v1333_v4 = vadd.f32 %v1297_v56, %v1040_v11  ;;  %v12254_v56 = vld [vmem:[%s11398_s2 + $0x11c] sm:$0xff] }
 0x3c0   : > { %v1584_v17 = vmul.f32 %v12187_v52, %v11542_v45  ;;  %v1583_v18 = vmul.f32 %v12187_v52, %v11544_v46  ;;  %v1586_v42 = vmul.f32 %v12187_v52, %v11548_v49  ;;  %v1585_v21 = vmul.f32 %v12187_v52, %v11550_v50 }
 0x3c1   : > { %v12195_v37 = vpop.permute.xlu1 %2385  ;;  %v12197_v7 = vpop.permute.xlu0 %2380  ;;  %v1588_v22 = vmul.f32 %v12187_v52, %v11556_v53  ;;  %v1331_v45 = vadd.f32 %v1295_v6, %v1038_v9  ;;  %v1587_v46 = vmul.f32 %v12187_v52, %v11558_v54  ;;  %v1334_v50 = vadd.f32 %v1298_v14, %v1041_v13 }
 0x3c2   : > { %14086 = vst [vmem:[#allocation214_spill] sm:$0xff] %v12195_v37  ;;  %14087 = vst [vmem:[#allocation215_spill] sm:$0xff] %v12197_v7  ;;  %2976 = vperm.xlu1 %10379, %v2849_v15   ;;  %2971 = vperm.xlu0 %10378, %v2848_v29   ;;  %v3135_v37 = vld [vmem:[%s11398_s2 + $0x9e] sm:$0xff]  ;;  %v1329_v7 = vadd.f32 %v1293_v2, %v1036_v35  ;;  %v12215_v15 = vld [vmem:[#allocation10 + $0x3] ss:$0 sm:$0xff]  ;;  %v1590_v29 = vmul.f32 %v12187_v52, %v11567_v57 }
 0x3c3   : > { %v1589_v53 = vmul.f32 %v12187_v52, %v11569_v60  ;;  %v1620_v58 = vadd.f32 %v1584_v17, %v1327_v10  ;;  %v1619_v59 = vadd.f32 %v1583_v18, %v1326_v12  ;;  %v1591_v9 = vmul.f32 %v12187_v52, %v11575_v0  ;;  %v3137_v57 = vld [vmem:[%s11398_s2 + $0xae] sm:$0xff]  ;;  %v12239_v12 = vld [vmem:[#allocation10 + $0x4] ss:$0 sm:$0xff] }
 0x3c4   : > { %v1877_v54 = vmul.f32 %v12215_v15, %v11628_v16  ;;  %v1622_v63 = vadd.f32 %v1586_v42, %v1329_v7  ;;  %v1621_v2 = vadd.f32 %v1585_v21, %v1328_v31  ;;  %v1624_v3 = vadd.f32 %v1588_v22, %v1331_v45  ;;  %v12257_v10 = vld [vmem:[%s11398_s2 + $0x114] sm:$0xff] }
 0x3c5   : > { %v12221_v35 = vpop.permute.xlu1 %2643  ;;  %v12223_v49 = vpop.permute.xlu0 %2390  ;;  %v1876_v11 = vmul.f32 %v12215_v15, %v11630_v8  ;;  %v1623_v13 = vadd.f32 %v1587_v46, %v1330_v33  ;;  %v1626_v60 = vadd.f32 %v1590_v29, %v1333_v4  ;;  %v1878_v0 = vmul.f32 %v12215_v15, %v11642_v36  ;;  %v2276_v29 = vld [vmem:[%s11398_s2 + $0x12c] sm:$0x3f] }
 0x3c6   : > { %3234 = vperm.xlu1 %10379, %v3135_v37   ;;  %3229 = vperm.xlu0 %10378, %v3134_v43   ;;  %v1879_v43 = vmul.f32 %v12215_v15, %v11640_v28  ;;  %v1625_v31 = vadd.f32 %v1589_v53, %v1332_v51  ;;  %v1881_v8 = vmul.f32 %v12215_v15, %v11648_v1 }
 0x3c7   : > { %v1880_v37 = vmul.f32 %v12215_v15, %v11650_v61  ;;  %v1627_v7 = vadd.f32 %v1591_v9, %v1334_v50  ;;  %v1913_v28 = vadd.f32 %v1877_v54, %v1620_v58  ;;  %v1883_v36 = vmul.f32 %v12215_v15, %v11654_v23  ;;  %v12285_v50 = vld [vmem:[%s11398_s2 + $0x124] sm:$0xff] }
 0x3c8   : > { %v1882_v14 = vmul.f32 %v12215_v15, %v11656_v19  ;;  %v1912_v33 = vadd.f32 %v1876_v11, %v1619_v59  ;;  %v1884_v1 = vmul.f32 %v12215_v15, %v11662_v34  ;;  %v2170_v61 = vmul.f32 %v12239_v12, %v11726_v41  ;;  %v12291_v59 = vld [vmem:[#allocation10 + $0x6] ss:$0 sm:$0xff]  ;;  %v12305_v11 = vld [vmem:[#allocation10 + $0x7] ss:$0 sm:$0xff] }
 0x3c9   : > { %v12241_v16 = vpop.permute.xlu1 %2653  ;;  %v12243_v6 = vpop.permute.xlu0 %2648  ;;  %v2169_v17 = vmul.f32 %v12239_v12, %v11728_v24  ;;  %v1915_v18 = vadd.f32 %v1879_v43, %v1622_v63  ;;  %v1914_v23 = vadd.f32 %v1878_v0, %v1621_v2  ;;  %v2172_v19 = vmul.f32 %v12239_v12, %v11737_v30  ;;  %v12275_v24 = vld [vmem:[#allocation10 + $0x5] ss:$0 sm:$0xff] }
 0x3ca   : > { %3244 = vperm.xlu1 %10379, %v3137_v57   ;;  %3239 = vperm.xlu0 %10378, %v3136_v62   ;;  %v2171_v42 = vmul.f32 %v12239_v12, %v11739_v39  ;;  %v1917_v34 = vadd.f32 %v1881_v8, %v1624_v3  ;;  %v1916_v51 = vadd.f32 %v1880_v37, %v1623_v13  ;;  %v14088_v3 = vld [vmem:[#allocation116_spill] sm:$0xff]  ;;  %v14091_v8 = vld [vmem:[#allocation118_spill] sm:$0xff] }
 0x3cb   : > { %v2174_v41 = vmul.f32 %v12239_v12, %v11743_v47  ;;  %v1919_v45 = vadd.f32 %v1883_v36, %v1626_v60  ;;  %v1918_v30 = vadd.f32 %v1882_v14, %v1625_v31  ;;  %v2173_v39 = vmul.f32 %v12239_v12, %v11745_v40  ;;  %v14089_v60 = vld [vmem:[#allocation117_spill] sm:$0xff]  ;;  %v14090_v31 = vld [vmem:[#allocation94_spill] sm:$0xff]  ;;  %v14092_v14 = vld [vmem:[#allocation119_spill] sm:$0xff] }
 0x3cc   : > { %v2176_v46 = vmul.f32 %v12239_v12, %v11749_v32  ;;  %v12287_v4 = vadd.f32 %v1884_v1, %v1627_v7  ;;  %v2206_v47 = vadd.f32 %v2170_v61, %v1913_v28  ;;  %v2205_v53 = vadd.f32 %v2169_v17, %v1912_v33 }
 0x3cd   : > { %v12269_v21 = vpop.permute.xlu1 %2911  ;;  %v12271_v22 = vpop.permute.xlu0 %2658  ;;  %v2175_v58 = vmul.f32 %v12239_v12, %v11751_v20  ;;  %v2208_v9 = vadd.f32 %v2172_v19, %v1915_v18  ;;  %v2207_v54 = vadd.f32 %v2171_v42, %v1914_v23  ;;  %v2462_v40 = vmul.f32 %v12275_v24, %v11828_v26  ;;  %v14093_v19 = vld [vmem:[#allocation200_spill] sm:$0xff] }
 0x3ce   : > { %2445 = vperm.xlu1 %10379, %v12254_v56   ;;  %2440 = vperm.xlu0 %10378, %v12257_v10   ;;  %v2463_v32 = vmul.f32 %v12275_v24, %v11836_v38  ;;  %v2210_v63 = vadd.f32 %v2174_v41, %v1917_v34  ;;  %v2464_v2 = vmul.f32 %v12275_v24, %v11834_v25 }
 0x3cf   : > { %v2466_v20 = vmul.f32 %v12275_v24, %v14088_v3  ;;  %v2209_v26 = vadd.f32 %v2173_v39, %v1916_v51  ;;  %v2212_v13 = vadd.f32 %v2176_v46, %v1919_v45  ;;  %v2465_v38 = vmul.f32 %v12275_v24, %v14089_v60  ;;  %v14095_v51 = vld [vmem:[#allocation150_spill] sm:$0xff]  ;;  %v14096_v45 = vld [vmem:[#allocation151_spill] sm:$0xff]  ;;  %v14097_v46 = vld [vmem:[#allocation121_spill] sm:$0xff] }
 0x3d0   : > { %v2756_v43 = vmul.f32 %v12291_v59, %v11951_v44  ;;  %v2211_v0 = vadd.f32 %v2175_v58, %v1918_v30  ;;  %v12314_v25 = vmul.f32 %v12239_v12, %v14090_v31  ;;  %v2468_v37 = vmul.f32 %v12275_v24, %v14091_v8  ;;  %v12336_v30 = vld [vmem:[#allocation10 + $0x8] ss:$0 sm:$0xff] }
 0x3d1   : > { %v12297_v57 = vpop.permute.xlu1 %2921  ;;  %v12299_v62 = vpop.permute.xlu0 %2916  ;;  %v2755_v7 = vmul.f32 %v12291_v59, %v11953_v55  ;;  %v2498_v28 = vadd.f32 %v2462_v40, %v2205_v53  ;;  %v2499_v36 = vadd.f32 %v2463_v32, %v2206_v47  ;;  %v2467_v33 = vmul.f32 %v12275_v24, %v14092_v14  ;;  %v14094_v55 = vld [vmem:[#allocation201_spill] sm:$0xff] }
 0x3d2   : > { %2455 = vperm.xlu1 %10379, %v2276_v29   ;;  %2450 = vperm.xlu0 %10378, %v12285_v50   ;;  %v3049_v1 = vmul.f32 %v12305_v11, %v12078_v27  ;;  %v2500_v17 = vadd.f32 %v2464_v2, %v2207_v54  ;;  %v2502_v18 = vadd.f32 %v2466_v20, %v2209_v26  ;;  %v14099_v54 = vld [vmem:[#allocation188_spill] sm:$0xff]  ;;  %v14100_v32 = vld [vmem:[#allocation189_spill] sm:$0xff] }
 0x3d3   : > { %v3048_v23 = vmul.f32 %v12305_v11, %v12080_v5  ;;  %v2501_v42 = vadd.f32 %v2465_v38, %v2208_v9  ;;  %v2792_v34 = vadd.f32 %v2756_v43, %v2499_v36  ;;  %v2758_v41 = vmul.f32 %v12291_v59, %v14095_v51  ;;  %v14098_v5 = vld [vmem:[#allocation152_spill] sm:$0xff]  ;;  %v14105_v51 = vld [vmem:[#allocation191_spill] sm:$0xff] }
 0x3d4   : > { %v2757_v27 = vmul.f32 %v12291_v59, %v14096_v45  ;;  %v2504_v39 = vadd.f32 %v2468_v37, %v2211_v0  ;;  %v2469_v29 = vmul.f32 %v12275_v24, %v14097_v46  ;;  %v2791_v47 = vadd.f32 %v2755_v7, %v2498_v28  ;;  %v14101_v43 = vld [vmem:[#allocation204_spill] sm:$0xff]  ;;  %v14103_v37 = vld [vmem:[#allocation153_spill] sm:$0xff] }
 0x3d5   : > { %v12324_v44 = vpop.permute.xlu1 %2931  ;;  %v12326_v61 = vpop.permute.xlu0 %2926  ;;  %v2760_v53 = vmul.f32 %v12291_v59, %v14098_v5  ;;  %v2503_v58 = vadd.f32 %v2467_v33, %v2210_v63  ;;  %v3085_v9 = vadd.f32 %v3049_v1, %v2792_v34  ;;  %v3051_v40 = vmul.f32 %v12305_v11, %v14099_v54  ;;  %v14102_v63 = vld [vmem:[#allocation120_spill] sm:$0xff]  ;;  %v12354_v28 = vld [vmem:[#allocation13] ss:$0 sm:$0xff] }
 0x3d6   : > { %2713 = vperm.xlu1 %10379, %v14093_v19   ;;  %2708 = vperm.xlu0 %10378, %v14094_v55   ;;  %v3050_v2 = vmul.f32 %v12305_v11, %v14100_v32  ;;  %v3084_v26 = vadd.f32 %v3048_v23, %v2791_v47  ;;  %v2470_v0 = vmul.f32 %v12275_v24, %v14102_v63  ;;  %v2850_v36 = vld [vmem:[%s11398_s2 + $0xdd] sm:$0xff]  ;;  %v14104_v55 = vld [vmem:[#allocation190_spill] sm:$0xff] }
 0x3d7   : > { %v2794_v31 = vadd.f32 %v2758_v41, %v2501_v42  ;;  %v2793_v8 = vadd.f32 %v2757_v27, %v2500_v17  ;;  %v2759_v7 = vmul.f32 %v12291_v59, %v14103_v37  ;;  %v2505_v14 = vadd.f32 %v2469_v29, %v2212_v13  ;;  %v14106_v47 = vld [vmem:[#allocation154_spill] sm:$0xff] }
 0x3d8   : > { %v2796_v33 = vadd.f32 %v2760_v53, %v2503_v58  ;;  %v3053_v34 = vmul.f32 %v12305_v11, %v14104_v55  ;;  %v3052_v42 = vmul.f32 %v12305_v11, %v14105_v51  ;;  %v2762_v5 = vmul.f32 %v12291_v59, %v14106_v47  ;;  %v14107_v53 = vld [vmem:[#allocation155_spill] sm:$0xff] }
 0x3d9   : > { %v3165_v3 = vpop.permute.xlu1 %3164  ;;  %v3160_v20 = vpop.permute.xlu0 %3159  ;;  %v3087_v19 = vadd.f32 %v3051_v40, %v2794_v31  ;;  %v2795_v29 = vadd.f32 %v2759_v7, %v2502_v18  ;;  %v2761_v58 = vmul.f32 %v12291_v59, %v14107_v53 }
 0x3da   : > { %v3342_v60 = vmul.f32 %v12336_v30, %v3165_v3  ;;  %v3341_v38 = vmul.f32 %v12336_v30, %v3160_v20  ;;  %2723 = vperm.xlu1 %10379, %v12257_v10   ;;  %2718 = vperm.xlu0 %10378, %v14101_v43   ;;  %v3086_v10 = vadd.f32 %v3050_v2, %v2793_v8  ;;  %v2851_v3 = vld [vmem:[%s11398_s2 + $0xe5] sm:$0xff] }
 0x3db   : > { %v3089_v20 = vadd.f32 %v3053_v34, %v2796_v33  ;;  %v2798_v33 = vadd.f32 %v2762_v5, %v2505_v14  ;;  %v3140_v5 = vld [vmem:[%s11398_s2 + $0xc6] sm:$0xff] }
 0x3dc   : > { %v3378_v1 = vadd.f32 %v3342_v60, %v3085_v9  ;;  %v3377_v23 = vadd.f32 %v3341_v38, %v3084_v26  ;;  %v2852_v9 = vld [vmem:[%s11398_s2 + $0xed] sm:$0xff]  ;;  %v3088_v26 = vadd.f32 %v3052_v42, %v2795_v29  ;;  %v14108_v60 = vld [vmem:[#allocation192_spill] sm:$0xff] }
 0x3dd   : > { %v3175_v17 = vpop.permute.xlu1 %3174  ;;  %v3170_v41 = vpop.permute.xlu0 %3169  ;;  %v3055_v18 = vmul.f32 %v12305_v11, %v14108_v60  ;;  %v14109_v38 = vld [vmem:[#allocation193_spill] sm:$0xff] }
 0x3de   : > { %v3421_v45 = vadd.f32 %v12354_v28, %v3378_v1  ;;  %v3420_v27 = vadd.f32 %v12354_v28, %v3377_v23  ;;  %v3344_v13 = vmul.f32 %v12336_v30, %v3175_v17  ;;  %v3343_v46 = vmul.f32 %v12336_v30, %v3170_v41  ;;  %2981 = vperm.xlu1 %10379, %v2850_v36   ;;  %v14110_v23 = vld [vmem:[#allocation157_spill] sm:$0xff]  ;;  %v2853_v17 = vld [vmem:[%s11398_s2 + $0xf5] sm:$0xff] }
 0x3df   : > { %2728 = vperm.xlu0 %10378, %v12254_v56   ;;  %v3054_v43 = vmul.f32 %v12305_v11, %v14109_v38  ;;  %v2213_v36 = vadd.f32 %v12314_v25, %v12287_v4  ;;  %v2797_v1 = vadd.f32 %v2761_v58, %v2504_v39 }
 0x3e0   : > { %v3457_v54 = vmax.f32 %v3421_v45, 0.0  ;;  %v3456_v40 = vmax.f32 %v3420_v27, 0.0  ;;  %v3380_v32 = vadd.f32 %v3344_v13, %v3087_v19  ;;  %v3379_v2 = vadd.f32 %v3343_v46, %v3086_v10  ;;  %v3138_v10 = vld [vmem:[%s11398_s2 + $0xb6] sm:$0xff] }
 0x3e1   : > { %v3185_v63 = vpop.permute.xlu1 %3184  ;;  %v3180_v31 = vpop.permute.xlu0 %3179  ;;  %v2763_v19 = vmul.f32 %v12291_v59, %v14110_v23  ;;  %v2506_v41 = vadd.f32 %v2470_v0, %v2213_v36  ;;  %v3091_v45 = vadd.f32 %v3055_v18, %v2798_v33  ;;  %v3090_v27 = vadd.f32 %v3054_v43, %v2797_v1  ;;  %v14111_v13 = vld [vmem:[#allocation195_spill] sm:$0xff]  ;;  %v2567_v33 = vld [vmem:[%s11398_s2 + $0x12c] sm:$0xff] }
 0x3e2   : > { %3493 = vst.msk [vmem:[#allocation2 + $0x8] sm:$0xff] %vm790_vm0, %v3457_v54  ;;  %3492 = vst.msk [vmem:[#allocation2] sm:$0xff] %vm790_vm0, %v3456_v40  ;;  %v3423_v56 = vadd.f32 %v12354_v28, %v3380_v32  ;;  %v3422_v8 = vadd.f32 %v12354_v28, %v3379_v2  ;;  %v3346_v37 = vmul.f32 %v12336_v30, %v3185_v63  ;;  %2991 = vperm.xlu1 %10379, %v2852_v9   ;;  %v3139_v40 = vld [vmem:[%s11398_s2 + $0xbe] sm:$0xff]  ;;  %v3142_v18 = vld [vmem:[%s11398_s2 + $0xd6] sm:$0xff] }
 0x3e3   : > { %v3345_v7 = vmul.f32 %v12336_v30, %v3180_v31  ;;  %2986 = vperm.xlu0 %10378, %v2851_v3   ;;  %v3056_v46 = vmul.f32 %v12305_v11, %v14111_v13  ;;  %v2799_v47 = vadd.f32 %v2763_v19, %v2506_v41  ;;  %v3141_v31 = vld [vmem:[%s11398_s2 + $0xce] sm:$0xff] }
 0x3e4   : > { %v3459_v55 = vmax.f32 %v3423_v56, 0.0  ;;  %v3458_v34 = vmax.f32 %v3422_v8, 0.0  ;;  %v3382_v51 = vadd.f32 %v3346_v37, %v3089_v20 }
 0x3e5   : > { %v3381_v42 = vadd.f32 %v3345_v7, %v3088_v26  ;;  %v3195_v4 = vpop.permute.xlu1 %3194  ;;  %v3190_v25 = vpop.permute.xlu0 %3189  ;;  %v3092_v3 = vadd.f32 %v3056_v46, %v2799_v47 }
 0x3e6   : > { %3495 = vst.msk [vmem:[#allocation2 + $0x18] sm:$0xff] %vm790_vm0, %v3459_v55  ;;  %3494 = vst.msk [vmem:[#allocation2 + $0x10] sm:$0xff] %vm790_vm0, %v3458_v34  ;;  %v3425_v39 = vadd.f32 %v12354_v28, %v3382_v51  ;;  %v3348_v29 = vmul.f32 %v12336_v30, %v3195_v4  ;;  %v3347_v0 = vmul.f32 %v12336_v30, %v3190_v25  ;;  %3249 = vperm.xlu1 %10379, %v3138_v10   ;;  %v2855_v4 = vld [vmem:[%s11398_s2 + $0x105] sm:$0xff]  ;;  %v2854_v25 = vld [vmem:[%s11398_s2 + $0xfd] sm:$0xff] }
 0x3e7   : > { %v3424_v14 = vadd.f32 %v12354_v28, %v3381_v42  ;;  %2996 = vperm.xlu0 %10378, %v2853_v17   ;;  %v2569_v42 = vld [vmem:[%s11398_s2 + $0x13c] sm:$0x3f]  ;;  %v2568_v17 = vld [vmem:[%s11398_s2 + $0x134] sm:$0xff] }
 0x3e8   : > { %v3461_v53 = vmax.f32 %v3425_v39, 0.0  ;;  %v3384_v9 = vadd.f32 %v3348_v29, %v3091_v45  ;;  %v3383_v54 = vadd.f32 %v3347_v0, %v3090_v27 }
 0x3e9   : > { %v3460_v58 = vmax.f32 %v3424_v14, 0.0  ;;  %v12398_v32 = vpop.permute.xlu1 %1854  ;;  %v3200_v2 = vpop.permute.xlu0 %3199  ;;  %v3529_v7 = vld [vmem:[#allocation2] ss:$2 sm:$0xff]  ;;  %v3531_v36 = vld [vmem:[#allocation2 + $0x1] ss:$2 sm:$0xff] }
 0x3ea   : > { %3497 = vst.msk [vmem:[#allocation2 + $0x28] sm:$0xff] %vm790_vm0, %v3461_v53  ;;  %v3427_v20 = vadd.f32 %v12354_v28, %v3384_v9  ;;  %v3426_v26 = vadd.f32 %v12354_v28, %v3383_v54  ;;  %v3349_v60 = vmul.f32 %v12336_v30, %v3200_v2  ;;  %3259 = vperm.xlu1 %10379, %v3140_v5   ;;  %v2857_v5 = vld [vmem:[%s11398_s2 + $0x115] sm:$0xff]  ;;  %v2856_v53 = vld [vmem:[%s11398_s2 + $0x10d] sm:$0xff]  ;;  %v2858_v2 = vld [vmem:[%s11398_s2 + $0x11d] sm:$0xff] }
 0x3eb   : > { %3496 = vst.msk [vmem:[#allocation2 + $0x20] sm:$0xff] %vm790_vm0, %v3460_v58  ;;  %3254 = vperm.xlu0 %10378, %v3139_v40   ;;  %v3536_v34 = vmax.f32 %v3529_v7, %v3531_v36  ;;  %v3143_v40 = vld [vmem:[%s11398_s2 + $0xde] sm:$0xff] }
 0x3ec   : > { %v3463_v38 = vmax.f32 %v3427_v20, 0.0  ;;  %v3462_v43 = vmax.f32 %v3426_v26, 0.0  ;;  %v3385_v63 = vadd.f32 %v3349_v60, %v3092_v3  ;;  %v3145_v26 = vld [vmem:[%s11398_s2 + $0xee] sm:$0xff]  ;;  %v3144_v60 = vld [vmem:[%s11398_s2 + $0xe6] sm:$0xff] }
 0x3ed   : > { %v12407_v56 = vpop.permute.xlu1 %1864  ;;  %v12409_v8 = vpop.permute.xlu0 %1859  ;;  %v2859_v7 = vld [vmem:[%s11398_s2 + $0x125] sm:$0xff] }
 0x3ee   : > { %3499 = vst.msk [vmem:[#allocation2 + $0x38] sm:$0xff] %vm790_vm0, %v3463_v38  ;;  %3498 = vst.msk [vmem:[#allocation2 + $0x30] sm:$0xff] %vm790_vm0, %v3462_v43  ;;  %v3428_v37 = vadd.f32 %v12354_v28, %v3385_v63  ;;  %3269 = vperm.xlu1 %10379, %v3142_v18   ;;  %v14121_v43 = vld [vmem:[#allocation55_spill] sm:$0xff]  ;;  %v14123_v36 = vld [vmem:[#allocation52_spill] sm:$0xff] }
 0x3ef   : > { %3264 = vperm.xlu0 %10378, %v3141_v31   ;;  %v1299_v63 = vmul.f32 %v12151_v48, %v14121_v43  ;;  %v14122_v31 = vld [vmem:[#allocation57_spill] sm:$0xff]  ;;  %v14135_v43 = vld [vmem:[#allocation56_spill] sm:$0xff] }
 0x3f0   : > { %v3464_v1 = vmax.f32 %v3428_v37, 0.0  ;;  %v1301_v37 = vmul.f32 %v12151_v48, %v14122_v31 }
 0x3f1   : > { %v12415_v10 = vpop.permute.xlu1 %2122  ;;  %v12417_v55 = vpop.permute.xlu0 %1869 }
 0x3f2   : > { %v3533_v23 = vld [vmem:[#allocation2 + $0x12] ss:$2 sm:$0xff]  ;;  %v3535_v19 = vld [vmem:[#allocation2 + $0x13] ss:$2 sm:$0xff]  ;;  %14112 = vst [vmem:[#allocation116_spill] sm:$0xff] %v12415_v10  ;;  %3500 = vst.msk [vmem:[#allocation2 + $0x40] sm:$0xff] %vm790_vm0, %v3464_v1  ;;  %2738 = vperm.xlu1 %10379, %v2567_v33  }
 0x3f3   : > { %v3537_v51 = vmax.f32 %v3533_v23, %v3535_v19  ;;  %2733 = vperm.xlu0 %10378, %v12285_v50   ;;  %v14124_v33 = vld [vmem:[#allocation211_spill] sm:$0xff]  ;;  %v14125_v23 = vld [vmem:[#allocation58_spill] sm:$0xff] }
 0x3f4   : > { %v1042_v1 = vmul.f32 %v14124_v33, %v14123_v36  ;;  %v1300_v19 = vmul.f32 %v12151_v48, %v14125_v23  ;;  %v1046_v31 = vmul.f32 %v14124_v33, %v14135_v43  ;;  %v14136_v23 = vld [vmem:[#allocation71_spill] sm:$0xff] }
 0x3f5   : > { %v3538_v41 = vmax.f32 %v3536_v34, %v3537_v51  ;;  %v12423_v45 = vpop.permute.xlu1 %2132  ;;  %v12425_v27 = vpop.permute.xlu0 %2127  ;;  %v3541_v13 = vld [vmem:[#allocation2 + $0x24] ss:$2 sm:$0xff]  ;;  %v3543_v46 = vld [vmem:[#allocation2 + $0x25] ss:$2 sm:$0xff] }
 0x3f6   : > { %14113 = vst [vmem:[#allocation117_spill] sm:$0xff] %v12423_v45  ;;  %14114 = vst [vmem:[#allocation94_spill] sm:$0xff] %v12425_v27  ;;  %2748 = vperm.xlu1 %10379, %v2569_v42   ;;  %v3548_v0 = vmax.f32 %v3541_v13, %v3543_v46  ;;  %v14126_v34 = vld [vmem:[#allocation68_spill] sm:$0xff]  ;;  %v3146_v42 = vld [vmem:[%s11398_s2 + $0xf6] sm:$0xff] }
 0x3f7   : > { %3539 = vst.msk [vmem:[#allocation3] sm:$0xff] %vm790_vm0, %v3538_v41  ;;  %2743 = vperm.xlu0 %10378, %v2568_v17   ;;  %v1592_v51 = vmul.f32 %v12187_v52, %v14126_v34  ;;  %v14127_v17 = vld [vmem:[#allocation51_spill] sm:$0xff]  ;;  %v14128_v13 = vld [vmem:[#allocation54_spill] sm:$0xff]  ;;  %v1593_v34 = vmul.f32 %v12187_v52, %v14136_v23 }
 0x3f8   : > { %v1043_v41 = vmul.f32 %v14124_v33, %v14127_v17  ;;  %v1044_v46 = vmul.f32 %v14124_v33, %v14128_v13  ;;  %v14137_v17 = vld [vmem:[#allocation72_spill] sm:$0xff]  ;;  %v14141_v23 = vld [vmem:[#allocation90_spill] sm:$0xff] }
 0x3f9   : > { %v3545_v39 = vld [vmem:[#allocation2 + $0x36] ss:$2 sm:$0xff]  ;;  %v3547_v50 = vld [vmem:[#allocation2 + $0x37] ss:$2 sm:$0xff]  ;;  %v12430_v14 = vpop.permute.xlu1 %2142  ;;  %v12432_v29 = vpop.permute.xlu0 %2137  ;;  %v1596_v13 = vmul.f32 %v12187_v52, %v14137_v17  ;;  %v1886_v17 = vmul.f32 %v12215_v15, %v14141_v23 }
 0x3fa   : > { %14115 = vst [vmem:[#allocation118_spill] sm:$0xff] %v12430_v14  ;;  %14116 = vst [vmem:[#allocation119_spill] sm:$0xff] %v12432_v29  ;;  %3006 = vperm.xlu1 %10379, %v2855_v4   ;;  %v3549_v47 = vmax.f32 %v3545_v39, %v3547_v50  ;;  %v14129_v4 = vld [vmem:[#allocation59_spill] sm:$0xff]  ;;  %v14130_v39 = vld [vmem:[#allocation60_spill] sm:$0xff]  ;;  %v1337_v36 = vadd.f32 %v1301_v37, %v1044_v46 }
 0x3fb   : > { %3001 = vperm.xlu0 %10378, %v2854_v25   ;;  %v1303_v25 = vmul.f32 %v12151_v48, %v14129_v4  ;;  %v1302_v50 = vmul.f32 %v12151_v48, %v14130_v39  ;;  %v2861_v4 = vld [vmem:[%s11398_s2 + $0x135] sm:$0xff]  ;;  %v14138_v39 = vld [vmem:[#allocation73_spill] sm:$0xff]  ;;  %v3147_v27 = vld [vmem:[%s11398_s2 + $0xfe] sm:$0xff] }
 0x3fc   : > { %v3550_v58 = vmax.f32 %v3548_v0, %v3549_v47  ;;  %v14140_v46 = vld [vmem:[#allocation89_spill] sm:$0xff]  ;;  %v14146_v23 = vld [vmem:[#allocation114_spill] sm:$0xff] }
 0x3fd   : > { %v12436_v9 = vpop.permute.xlu1 %2400  ;;  %v12438_v54 = vpop.permute.xlu0 %2395  ;;  %v1339_v29 = vadd.f32 %v1303_v25, %v1046_v31  ;;  %v1887_v43 = vmul.f32 %v12215_v15, %v14140_v46  ;;  %v14145_v31 = vld [vmem:[#allocation92_spill] sm:$0xff]  ;;  %v2180_v14 = vmul.f32 %v12239_v12, %v14146_v23 }
 0x3fe   : > { %14117 = vst [vmem:[#allocation200_spill] sm:$0xff] %v12436_v9  ;;  %14118 = vst [vmem:[#allocation201_spill] sm:$0xff] %v12438_v54  ;;  %3016 = vperm.xlu1 %10379, %v2857_v5   ;;  %v14132_v5 = vld [vmem:[#allocation53_spill] sm:$0xff]  ;;  %v1888_v46 = vmul.f32 %v12215_v15, %v14145_v31  ;;  %v2769_v9 = vmul.f32 %v12291_v59, %v12221_v35  ;;  %v14201_v54 = vld [vmem:[#allocation196_spill] sm:$0xff] }
 0x3ff   : > { %3551 = vst.msk [vmem:[#allocation3 + $0x8] sm:$0xff] %vm790_vm0, %v3550_v58  ;;  %3011 = vperm.xlu0 %10378, %v2856_v53   ;;  %v1045_v53 = vmul.f32 %v14124_v33, %v14132_v5  ;;  %v1335_v58 = vadd.f32 %v1299_v63, %v1042_v1  ;;  %v1336_v63 = vadd.f32 %v1300_v19, %v1043_v41 }
 0x400   : > { %v1595_v5 = vmul.f32 %v12187_v52, %v14138_v39 }
 0x401   : > { %v12443_v3 = vpop.permute.xlu1 %2410  ;;  %v12445_v20 = vpop.permute.xlu0 %2405  ;;  %v1628_v1 = vadd.f32 %v1592_v51, %v1335_v58  ;;  %v1338_v37 = vadd.f32 %v1302_v50, %v1045_v53  ;;  %v14143_v58 = vld [vmem:[#allocation91_spill] sm:$0xff]  ;;  %v1629_v50 = vadd.f32 %v1593_v34, %v1336_v63  ;;  %v1632_v53 = vadd.f32 %v1596_v13, %v1339_v29  ;;  %v14150_v63 = vld [vmem:[#allocation146_spill] sm:$0xff] }
 0x402   : > { %14119 = vst [vmem:[#allocation150_spill] sm:$0xff] %v12443_v3  ;;  %14120 = vst [vmem:[#allocation151_spill] sm:$0xff] %v12445_v20  ;;  %3274 = vperm.xlu1 %10379, %v3143_v40   ;;  %v14133_v40 = vld [vmem:[#allocation70_spill] sm:$0xff]  ;;  %v1889_v39 = vmul.f32 %v12215_v15, %v14143_v58  ;;  %v14149_v34 = vld [vmem:[#allocation115_spill] sm:$0xff]  ;;  %v2473_v31 = vmul.f32 %v12275_v24, %v14150_v63 }
 0x403   : > { %3021 = vperm.xlu0 %10378, %v2858_v2   ;;  %v1594_v2 = vmul.f32 %v12187_v52, %v14133_v40  ;;  %v14139_v40 = vld [vmem:[#allocation112_spill] sm:$0xff]  ;;  %v1631_v45 = vadd.f32 %v1595_v5, %v1338_v37  ;;  %v1922_v29 = vadd.f32 %v1886_v17, %v1629_v50  ;;  %v2182_v13 = vmul.f32 %v12239_v12, %v14149_v34  ;;  %v3149_v63 = vld [vmem:[%s11398_s2 + $0x10e] sm:$0xff] }
 0x404   : > { %v1925_v37 = vadd.f32 %v1889_v39, %v1632_v53  ;;  %v14154_v39 = vld [vmem:[#allocation148_spill] sm:$0xff] }
 0x405   : > { %v12449_v18 = vpop.permute.xlu1 %2668  ;;  %v12451_v38 = vpop.permute.xlu0 %2663  ;;  %v1630_v51 = vadd.f32 %v1594_v2, %v1337_v36  ;;  %v14147_v2 = vld [vmem:[#allocation111_spill] sm:$0xff]  ;;  %v1924_v17 = vadd.f32 %v1888_v46, %v1631_v45  ;;  %v14156_v46 = vld [vmem:[#allocation149_spill] sm:$0xff] }
 0x406   : > { %3284 = vperm.xlu1 %10379, %v3145_v26   ;;  %v14134_v26 = vld [vmem:[#allocation87_spill] sm:$0xff]  ;;  %v3625_v35 = vld [vmem:[#allocation3 + $0x8] sm:$0xff] }
 0x407   : > { %3279 = vperm.xlu0 %10378, %v3144_v60   ;;  %v1885_v60 = vmul.f32 %v12215_v15, %v14134_v26  ;;  %v2860_v26 = vld [vmem:[%s11398_s2 + $0x12d] sm:$0xff] }
 0x409   : > { %v12473_v0 = vpop.permute.xlu1 %2678  ;;  %v12475_v47 = vpop.permute.xlu0 %2673  ;;  %v1921_v41 = vadd.f32 %v1885_v60, %v1628_v1  ;;  %v2179_v60 = vmul.f32 %v12239_v12, %v14147_v2  ;;  %v14148_v1 = vld [vmem:[#allocation182_spill] sm:$0xff] }
 0x40a   : > { %14131 = vst [vmem:[#allocation121_spill] sm:$0xff] %v12473_v0  ;;  %3026 = vperm.xlu1 %10379, %v2859_v7   ;;  %v2178_v7 = vmul.f32 %v12239_v12, %v14139_v40  ;;  %v14144_v40 = vld [vmem:[#allocation144_spill] sm:$0xff]  ;;  %v2764_v58 = vmul.f32 %v12291_v59, %v14148_v1 }
 0x40b   : > { %3289 = vperm.xlu0 %10378, %v3146_v42   ;;  %v2471_v25 = vmul.f32 %v12275_v24, %v14144_v40  ;;  %v2862_v40 = vld [vmem:[%s11398_s2 + $0x13d] sm:$0x3f]  ;;  %v2215_v10 = vadd.f32 %v2179_v60, %v1922_v29 }
 0x40c   : > { %v2214_v36 = vadd.f32 %v2178_v7, %v1921_v41  ;;  %v14151_v41 = vld [vmem:[#allocation147_spill] sm:$0xff]  ;;  %v14153_v1 = vld [vmem:[#allocation184_spill] sm:$0xff] }
 0x40d   : > { %v12499_v42 = vpop.permute.xlu1 %2936  ;;  %v12501_v19 = vpop.permute.xlu0 %2683  ;;  %v2472_v23 = vmul.f32 %v12275_v24, %v14151_v41  ;;  %v2766_v34 = vmul.f32 %v12291_v59, %v14153_v1  ;;  %v14158_v1 = vld [vmem:[#allocation187_spill] sm:$0xff] }
 0x40e   : > { %14142 = vst [vmem:[#allocation152_spill] sm:$0xff] %v12501_v19  ;;  %3036 = vperm.xlu1 %10379, %v2861_v4   ;;  %v1923_v4 = vadd.f32 %v1887_v43, %v1630_v51  ;;  %v2507_v7 = vadd.f32 %v2471_v25, %v2214_v36  ;;  %v3057_v43 = vmul.f32 %v12305_v11, %v12269_v21  ;;  %v14152_v51 = vld [vmem:[#allocation113_spill] sm:$0xff] }
 0x40f   : > { %3031 = vperm.xlu0 %10378, %v2860_v26   ;;  %v2181_v50 = vmul.f32 %v12239_v12, %v14152_v51  ;;  %v2475_v25 = vmul.f32 %v12275_v24, %v14154_v39  ;;  %v14155_v36 = vld [vmem:[#allocation185_spill] sm:$0xff]  ;;  %v2508_v29 = vadd.f32 %v2472_v23, %v2215_v10  ;;  %v3151_v39 = vld [vmem:[%s11398_s2 + $0x11e] sm:$0xff]  ;;  %v3150_v23 = vld [vmem:[%s11398_s2 + $0x116] sm:$0xff] }
 0x410   : > { %v2216_v2 = vadd.f32 %v2180_v14, %v1923_v4  ;;  %v2800_v53 = vadd.f32 %v2764_v58, %v2507_v7  ;;  %v2765_v41 = vmul.f32 %v12291_v59, %v14155_v36  ;;  %v3148_v21 = vld [vmem:[%s11398_s2 + $0x106] sm:$0xff]  ;;  %v2474_v14 = vmul.f32 %v12275_v24, %v14156_v46 }
 0x411   : > { %v12521_v26 = vpop.permute.xlu1 %2946  ;;  %v12523_v5 = vpop.permute.xlu0 %2941  ;;  %v3059_v4 = vmul.f32 %v12305_v11, %v12297_v57  ;;  %v3058_v58 = vmul.f32 %v12305_v11, %v12299_v62  ;;  %v2767_v57 = vmul.f32 %v12291_v59, %v14158_v1  ;;  %v3155_v1 = vld [vmem:[%s11398_s2 + $0x13e] sm:$0x3f] }
 0x412   : > { %3294 = vperm.xlu1 %10379, %v3147_v27   ;;  %v2218_v27 = vadd.f32 %v2182_v13, %v1925_v37  ;;  %v2509_v45 = vadd.f32 %v2473_v31, %v2216_v2  ;;  %v3093_v51 = vadd.f32 %v3057_v43, %v2800_v53  ;;  %v2217_v13 = vadd.f32 %v2181_v50, %v1924_v17  ;;  %v14157_v37 = vld [vmem:[#allocation186_spill] sm:$0xff] }
 0x413   : > { %3041 = vperm.xlu0 %10378, %v2862_v40   ;;  %v2768_v2 = vmul.f32 %v12291_v59, %v14157_v37  ;;  %v2801_v46 = vadd.f32 %v2765_v41, %v2508_v29  ;;  %v3060_v17 = vmul.f32 %v12305_v11, %v12326_v61  ;;  %v3152_v29 = vld [vmem:[%s11398_s2 + $0x126] sm:$0xff] }
 0x414   : > { %v2802_v31 = vadd.f32 %v2766_v34, %v2509_v45  ;;  %v2511_v36 = vadd.f32 %v2475_v25, %v2218_v27  ;;  %v2510_v43 = vadd.f32 %v2474_v14, %v2217_v13  ;;  %v3153_v14 = vld [vmem:[%s11398_s2 + $0x12e] sm:$0xff] }
 0x415   : > { %v3205_v40 = vpop.permute.xlu1 %3204  ;;  %v12543_v60 = vpop.permute.xlu0 %2951  ;;  %v3094_v53 = vadd.f32 %v3058_v58, %v2801_v46 }
 0x416   : > { %v3350_v7 = vmul.f32 %v12336_v30, %v3205_v40  ;;  %3304 = vperm.xlu1 %10379, %v3149_v63   ;;  %v3095_v62 = vadd.f32 %v3059_v4, %v2802_v31  ;;  %v3061_v63 = vmul.f32 %v12305_v11, %v12324_v44  ;;  %v2804_v27 = vadd.f32 %v2768_v2, %v2511_v36 }
 0x417   : > { %3299 = vperm.xlu0 %10378, %v3148_v21   ;;  %v2803_v45 = vadd.f32 %v2767_v57, %v2510_v43 }
 0x418   : > { %v3386_v10 = vadd.f32 %v3350_v7, %v3093_v51  ;;  %v3097_v61 = vadd.f32 %v3061_v63, %v2804_v27 }
 0x419   : > { %v3215_v50 = vpop.permute.xlu1 %3214  ;;  %v3210_v34 = vpop.permute.xlu0 %3209  ;;  %v3096_v51 = vadd.f32 %v3060_v17, %v2803_v45 }
 0x41a   : > { %v3429_v21 = vadd.f32 %v12354_v28, %v3386_v10  ;;  %v3352_v25 = vmul.f32 %v12336_v30, %v3215_v50  ;;  %v3351_v41 = vmul.f32 %v12336_v30, %v3210_v34  ;;  %3314 = vperm.xlu1 %10379, %v3151_v39   ;;  %v3154_v10 = vld [vmem:[%s11398_s2 + $0x136] sm:$0xff]  ;;  %s14304_s2 = sld [smem:[#allocation49_spill]] }
 0x41b   : > { %3309 = vperm.xlu0 %10378, %v3150_v23  }
 0x41c   : > { %v3465_v44 = vmax.f32 %v3429_v21, 0.0  ;;  %v3388_v4 = vadd.f32 %v3352_v25, %v3095_v62  ;;  %v3387_v40 = vadd.f32 %v3351_v41, %v3094_v53 }
 0x41d   : > { %v3225_v58 = vpop.permute.xlu1 %3224  ;;  %v3220_v7 = vpop.permute.xlu0 %3219 }
 0x41e   : > { %3501 = vst.msk [vmem:[#allocation2 + $0x48] sm:$0xff] %vm790_vm0, %v3465_v44  ;;  %v3431_v13 = vadd.f32 %v12354_v28, %v3388_v4  ;;  %v3430_v31 = vadd.f32 %v12354_v28, %v3387_v40  ;;  %v3354_v37 = vmul.f32 %v12336_v30, %v3225_v58  ;;  %v3353_v2 = vmul.f32 %v12336_v30, %v3220_v7  ;;  %v14164_v7 = vld [vmem:[#allocation66_spill] sm:$0xff] }
 0x41f   : > { %3324 = vperm.xlu1 %10379, %v3153_v14   ;;  %3319 = vperm.xlu0 %10378, %v3152_v29  }
 0x420   : > { %v3467_v57 = vmax.f32 %v3431_v13, 0.0  ;;  %v3466_v39 = vmax.f32 %v3430_v31, 0.0  ;;  %v3390_v36 = vadd.f32 %v3354_v37, %v3097_v61  ;;  %v3389_v46 = vadd.f32 %v3353_v2, %v3096_v51  ;;  %v14163_v61 = vld [vmem:[#allocation64_spill] sm:$0xff]  ;;  %v14165_v31 = vld [vmem:[#allocation67_spill] sm:$0xff]  ;;  %v14166_v2 = vld [vmem:[#allocation69_spill] sm:$0xff]  ;;  %p14306_p9 = scmp.ne.s32.totalorder %s14304_s2, 0 }
 0x421   : > { %v12570_v23 = vpop.permute.xlu1 %2152  ;;  %v12572_v43 = vpop.permute.xlu0 %2147  ;;  %v1304_v51 = vmul.f32 %v12151_v48, %v14163_v61  ;;  %v1306_v13 = vmul.f32 %v12151_v48, %v14164_v7  ;;  %v1305_v37 = vmul.f32 %v12151_v48, %v14165_v31  ;;  %v14176_v7 = vld [vmem:[#allocation88_spill] sm:$0xff] }
 0x422   : > { %3503 = vst.msk [vmem:[#allocation2 + $0x58] sm:$0xff] %vm790_vm0, %v3467_v57  ;;  %3502 = vst.msk [vmem:[#allocation2 + $0x50] sm:$0xff] %vm790_vm0, %v3466_v39  ;;  %v3433_v62 = vadd.f32 %v12354_v28, %v3390_v36  ;;  %v3432_v63 = vadd.f32 %v12354_v28, %v3389_v46  ;;  %v14169_v36 = vld [vmem:[#allocation61_spill] sm:$0xff]  ;;  %v1600_v31 = vmul.f32 %v12187_v52, %v14176_v7  ;;  %p10794_p12 = pnand %p10793_p5, %p14306_p9 }
 0x423   : > { %3334 = vperm.xlu1 %10379, %v3155_v1   ;;  %3329 = vperm.xlu0 %10378, %v3154_v10   ;;  %v1307_v1 = vmul.f32 %v12151_v48, %v14166_v2  ;;  %v1047_v46 = vmul.f32 %v14124_v33, %v14169_v36  ;;  %v14170_v10 = vld [vmem:[#allocation83_spill] sm:$0xff] }
 0x424   : > { %v3469_v17 = vmax.f32 %v3433_v62, 0.0  ;;  %v3468_v50 = vmax.f32 %v3432_v63, 0.0  ;;  %v1597_v62 = vmul.f32 %v12187_v52, %v14170_v10  ;;  %v14171_v63 = vld [vmem:[#allocation62_spill] sm:$0xff]  ;;  %p10795_p10 = pneg %p10794_p12 }
 0x425   : > { %v12578_v34 = vpop.permute.xlu1 %2162  ;;  %v12580_v53 = vpop.permute.xlu0 %2157 }
 0x426   : > { %3505 = vst.msk [vmem:[#allocation2 + $0x68] sm:$0xff] %vm790_vm0, %v3469_v17  ;;  %3504 = vst.msk [vmem:[#allocation2 + $0x60] sm:$0xff] %vm790_vm0, %v3468_v50  ;;  %v1049_v17 = vmul.f32 %v14124_v33, %v14171_v63  ;;  %v14172_v50 = vld [vmem:[#allocation63_spill] sm:$0xff] }
 0x428   : > { %v1342_v36 = vadd.f32 %v1306_v13, %v1049_v17 }
 0x429   : > { %v12584_v21 = vpop.permute.xlu1 %2420  ;;  %v12586_v25 = vpop.permute.xlu0 %2415  ;;  %v3553_v41 = vld [vmem:[#allocation2 + $0x48] ss:$2 sm:$0xff]  ;;  %v3555_v27 = vld [vmem:[#allocation2 + $0x49] ss:$2 sm:$0xff] }
 0x42a   : > { %14159 = vst [vmem:[#allocation188_spill] sm:$0xff] %v12584_v21  ;;  %14160 = vst [vmem:[#allocation189_spill] sm:$0xff] %v12586_v25  ;;  %v3560_v40 = vmax.f32 %v3553_v41, %v3555_v27  ;;  %v1048_v41 = vmul.f32 %v14124_v33, %v14172_v50  ;;  %v14173_v27 = vld [vmem:[#allocation65_spill] sm:$0xff]  ;;  %v14178_v50 = vld [vmem:[#allocation110_spill] sm:$0xff] }
 0x42b   : > { %v1050_v48 = vmul.f32 %v14124_v33, %v14173_v27 }
 0x42c   : > { %v1341_v10 = vadd.f32 %v1305_v37, %v1048_v41  ;;  %v14184_v37 = vld [vmem:[#allocation142_spill] sm:$0xff] }
 0x42d   : > { %v3557_v45 = vld [vmem:[#allocation2 + $0x5a] ss:$2 sm:$0xff]  ;;  %v3559_v14 = vld [vmem:[#allocation2 + $0x5b] ss:$2 sm:$0xff]  ;;  %v12588_v44 = vpop.permute.xlu1 %2430  ;;  %v12590_v4 = vpop.permute.xlu0 %2425  ;;  %v1343_v63 = vadd.f32 %v1307_v1, %v1050_v48  ;;  %v2185_v1 = vmul.f32 %v12239_v12, %v14184_v37 }
 0x42e   : > { %14161 = vst [vmem:[#allocation204_spill] sm:$0xff] %v12588_v44  ;;  %14162 = vst [vmem:[#allocation120_spill] sm:$0xff] %v12590_v4  ;;  %v3561_v29 = vmax.f32 %v3557_v45, %v3559_v14  ;;  %v14174_v45 = vld [vmem:[#allocation85_spill] sm:$0xff]  ;;  %v14183_v44 = vld [vmem:[#allocation140_spill] sm:$0xff] }
 0x42f   : > { %v1599_v14 = vmul.f32 %v12187_v52, %v14174_v45  ;;  %v1636_v41 = vadd.f32 %v1600_v31, %v1343_v63  ;;  %v12651_v63 = vld [vmem:[#allocation10] ss:$0 sm:$0xff] }
 0x430   : > { %v3562_v58 = vmax.f32 %v3560_v40, %v3561_v29  ;;  %v1340_v40 = vadd.f32 %v1304_v51, %v1047_v46  ;;  %v14175_v29 = vld [vmem:[#allocation86_spill] sm:$0xff]  ;;  %v14181_v46 = vld [vmem:[#allocation107_spill] sm:$0xff] }
 0x431   : > { %v12600_v57 = vpop.permute.xlu1 %2688  ;;  %v12602_v39 = vpop.permute.xlu0 %2435  ;;  %v1598_v61 = vmul.f32 %v12187_v52, %v14175_v29  ;;  %v1891_v45 = vmul.f32 %v12215_v15, %v14181_v46  ;;  %v14182_v29 = vld [vmem:[#allocation109_spill] sm:$0xff]  ;;  %v1635_v13 = vadd.f32 %v1599_v14, %v1342_v36  ;;  %v12645_v36 = vld [vmem:[#allocation10 + $0x1] ss:$0 sm:$0xff] }
 0x432   : > { %14167 = vst [vmem:[#allocation153_spill] sm:$0xff] %v12600_v57  ;;  %14168 = vst [vmem:[#allocation190_spill] sm:$0xff] %v12602_v39  ;;  %v1892_v39 = vmul.f32 %v12215_v15, %v14178_v50  ;;  %v1633_v51 = vadd.f32 %v1597_v62, %v1340_v40  ;;  %v1893_v7 = vmul.f32 %v12215_v15, %v14182_v29  ;;  %v14185_v50 = vld [vmem:[#allocation143_spill] sm:$0xff] }
 0x433   : > { %3563 = vst.msk [vmem:[#allocation3 + $0x10] sm:$0xff] %vm790_vm0, %v3562_v58  ;;  %v14177_v58 = vld [vmem:[#allocation108_spill] sm:$0xff]  ;;  %v1634_v17 = vadd.f32 %v1598_v61, %v1341_v10  ;;  %v2184_v21 = vmul.f32 %v12239_v12, %v14185_v50  ;;  %v14195_v50 = vld [vmem:[#allocation178_spill] sm:$0xff] }
 0x434   : > { %v1890_v2 = vmul.f32 %v12215_v15, %v14177_v58  ;;  %v2183_v58 = vmul.f32 %v12239_v12, %v14183_v44  ;;  %v1928_v62 = vadd.f32 %v1892_v39, %v1635_v13  ;;  %v1929_v15 = vadd.f32 %v1893_v7, %v1636_v41  ;;  %v14187_v44 = vld [vmem:[#allocation145_spill] sm:$0xff]  ;;  %v14188_v61 = vld [vmem:[#allocation160_spill] sm:$0xff]  ;;  %v14191_v7 = vld [vmem:[#allocation163_spill] sm:$0xff] }
 0x435   : > { %v12625_v33 = vpop.permute.xlu1 %2698  ;;  %v12627_v27 = vpop.permute.xlu0 %2693  ;;  %v1927_v4 = vadd.f32 %v1891_v45, %v1634_v17  ;;  %v2186_v14 = vmul.f32 %v12239_v12, %v14187_v44  ;;  %v1322_v31 = vmul.f32 %v12645_v36, %v14188_v61  ;;  %v14192_v13 = vld [vmem:[#allocation165_spill] sm:$0xff]  ;;  %v14194_v41 = vld [vmem:[#allocation159_spill] sm:$0xff] }
 0x436   : > { %14179 = vst [vmem:[#allocation191_spill] sm:$0xff] %v12625_v33  ;;  %14180 = vst [vmem:[#allocation154_spill] sm:$0xff] %v12627_v27  ;;  %v1926_v48 = vadd.f32 %v1890_v2, %v1633_v51  ;;  %v2221_v25 = vadd.f32 %v2185_v1, %v1928_v62  ;;  %v14189_v2 = vld [vmem:[#allocation162_spill] sm:$0xff]  ;;  %v14190_v51 = vld [vmem:[#allocation156_spill] sm:$0xff]  ;;  %v1325_v37 = vmul.f32 %v12645_v36, %v14192_v13 }
 0x437   : > { %v1324_v10 = vmul.f32 %v12645_v36, %v14189_v2  ;;  %v2220_v39 = vadd.f32 %v2184_v21, %v1927_v4  ;;  %v1065_v45 = vmul.f32 %v12651_v63, %v14190_v51  ;;  %v14193_v1 = vld [vmem:[#allocation158_spill] sm:$0xff]  ;;  %v2476_v21 = vmul.f32 %v12275_v24, %v14195_v50  ;;  %v14196_v4 = vld [vmem:[#allocation180_spill] sm:$0xff]  ;;  %v14197_v2 = vld [vmem:[#allocation161_spill] sm:$0xff] }
 0x438   : > { %v2219_v29 = vadd.f32 %v2183_v58, %v1926_v48  ;;  %v1323_v58 = vmul.f32 %v12645_v36, %v14191_v7  ;;  %v1067_v17 = vmul.f32 %v12651_v63, %v14193_v1  ;;  %v1066_v48 = vmul.f32 %v12651_v63, %v14194_v41  ;;  %v14198_v7 = vld [vmem:[#allocation181_spill] sm:$0xff]  ;;  %v14199_v1 = vld [vmem:[#allocation183_spill] sm:$0xff]  ;;  %v14200_v41 = vld [vmem:[#allocation194_spill] sm:$0xff] }
 0x439   : > { %v12639_v40 = vpop.permute.xlu1 %2956  ;;  %v12641_v46 = vpop.permute.xlu0 %2703  ;;  %v2478_v62 = vmul.f32 %v12275_v24, %v14196_v4  ;;  %v1068_v51 = vmul.f32 %v12651_v63, %v14197_v2  ;;  %v2477_v13 = vmul.f32 %v12275_v24, %v14198_v7  ;;  %v1615_v3 = vmul.f32 %v12187_v52, %v14200_v41  ;;  %v3624_v50 = vld [vmem:[#allocation3] sm:$0xff] }
 0x43a   : > { %14186 = vst [vmem:[#allocation155_spill] sm:$0xff] %v12641_v46  ;;  %v2479_v46 = vmul.f32 %v12275_v24, %v14199_v1  ;;  %v2222_v27 = vadd.f32 %v2186_v14, %v1929_v15  ;;  %v1358_v33 = vadd.f32 %v1322_v31, %v1065_v45  ;;  %v1360_v4 = vadd.f32 %v1324_v10, %v1067_v17 }
 0x43b   : > { %v1359_v20 = vadd.f32 %v1323_v58, %v1066_v48  ;;  %v1361_v57 = vadd.f32 %v1325_v37, %v1068_v51  ;;  %v1617_v2 = vmul.f32 %v12187_v52, %v14201_v54  ;;  %v2770_v7 = vmul.f32 %v12291_v59, %v12243_v6  ;;  %v12694_v6 = vld [vmem:[#allocation3 + $0x10] sm:$0xff]  ;;  %v12696_v54 = vld [vmem:[#allocation10 + $0x2] ss:$0 sm:$0xff] }
 0x43c   : > { %v2512_v0 = vadd.f32 %v2476_v21, %v2219_v29  ;;  %v2514_v1 = vadd.f32 %v2478_v62, %v2221_v25  ;;  %v3062_v41 = vmul.f32 %v12305_v11, %v12499_v42  ;;  %v3648_v15 = vsel %vm790_vm0, %v3624_v50, 0.0  ;;  %14202 = vst [vmem:[#allocation192_spill] sm:$0xff] %v12694_v6  ;;  %v14203_v25 = vld [vmem:[#allocation197_spill] sm:$0xff] }
 0x43d   : > { %v12667_v44 = vpop.permute.xlu1 %2966  ;;  %v12669_v61 = vpop.permute.xlu0 %2961  ;;  %v2513_v31 = vadd.f32 %v2477_v13, %v2220_v39  ;;  %v2515_v10 = vadd.f32 %v2479_v46, %v2222_v27  ;;  %v1651_v45 = vadd.f32 %v1615_v3, %v1358_v33  ;;  %v3063_v52 = vmul.f32 %v12305_v11, %v12523_v5  ;;  %v14204_v3 = vld [vmem:[#allocation199_spill] sm:$0xff] }
 0x43e   : > { %v1616_v42 = vmul.f32 %v12696_v54, %v14203_v25  ;;  %v2805_v29 = vadd.f32 %v2769_v9, %v2512_v0  ;;  %v2771_v58 = vmul.f32 %v12291_v59, %v12241_v16  ;;  %v2772_v39 = vmul.f32 %v12291_v59, %v12271_v22  ;;  %v12715_v13 = vld [vmem:[#allocation10 + $0x3] ss:$0 sm:$0xff] }
 0x43f   : > { %v1653_v27 = vadd.f32 %v1617_v2, %v1360_v4  ;;  %v1618_v33 = vmul.f32 %v12696_v54, %v14204_v3  ;;  %v2806_v5 = vadd.f32 %v2770_v7, %v2513_v31  ;;  %v3651_v46 = vsel %vm790_vm0, %v3625_v35, 0.0  ;;  %v12733_v3 = vld [vmem:[#allocation10 + $0x4] ss:$0 sm:$0xff] }
 0x440   : > { %v3098_v37 = vadd.f32 %v3062_v41, %v2805_v29  ;;  %v3064_v17 = vmul.f32 %v12305_v11, %v12521_v26  ;;  %v3065_v9 = vmul.f32 %v12305_v11, %v12543_v60  ;;  %v3654_v16 = vsel %vm790_vm0, %v12694_v6, 0.0  ;;  %v14280_v6 = vld [vmem:[#allocation154_spill] sm:$0xff] }
 0x441   : > { %v12687_v19 = vpop.permute.xlu1 %2976  ;;  %v12690_v14 = vpop.permute.xlu0 %2971  ;;  %v3099_v22 = vadd.f32 %v3063_v52, %v2806_v5  ;;  %v2807_v62 = vadd.f32 %v2771_v58, %v2514_v1  ;;  %v2808_v51 = vadd.f32 %v2772_v39, %v2515_v10  ;;  %v1908_v26 = vmul.f32 %v12715_v13, %v12398_v32 }
 0x442   : > { %3649 = vadd.xlane.f32.xlu0 %v3648_v15  ;;  %v1909_v11 = vmul.f32 %v12715_v13, %v12409_v8  ;;  %v1652_v60 = vadd.f32 %v1616_v42, %v1359_v20  ;;  %v1654_v50 = vadd.f32 %v1618_v33, %v1361_v57  ;;  %v2202_v15 = vmul.f32 %v12239_v12, %v12570_v23 }
 0x443   : > { %v3100_v7 = vadd.f32 %v3064_v17, %v2807_v62  ;;  %v3101_v41 = vadd.f32 %v3065_v9, %v2808_v51  ;;  %v2201_v1 = vmul.f32 %v12239_v12, %v12572_v43  ;;  %v1944_v57 = vadd.f32 %v1908_v26, %v1651_v45 }
 0x444   : > { %v1910_v52 = vmul.f32 %v12715_v13, %v12407_v56  ;;  %v1945_v25 = vadd.f32 %v1909_v11, %v1652_v60  ;;  %v1911_v23 = vmul.f32 %v12715_v13, %v12417_v55  ;;  %v2204_v33 = vmul.f32 %v12733_v3, %v12578_v34  ;;  %v14206_v60 = vld [vmem:[#allocation80_spill] sm:$0xff] }
 0x445   : > { %v3235_v0 = vpop.permute.xlu1 %3234  ;;  %v3230_v48 = vpop.permute.xlu0 %3229  ;;  %v2237_v39 = vadd.f32 %v2201_v1, %v1944_v57  ;;  %v14212_v57 = vld [vmem:[#allocation101_spill] sm:$0xff] }
 0x446   : > { %v3356_v59 = vmul.f32 %v12336_v30, %v3235_v0  ;;  %3655 = vadd.xlane.f32.xlu0 %v3654_v16  ;;  %v3355_v21 = vmul.f32 %v12336_v30, %v3230_v48  ;;  %v2238_v58 = vadd.f32 %v2202_v15, %v1945_v25  ;;  %v1946_v17 = vadd.f32 %v1910_v52, %v1653_v27  ;;  %v14213_v25 = vld [vmem:[#allocation76_spill] sm:$0xff] }
 0x447   : > { %3652 = vadd.xlane.f32.xlu1 %v3651_v46  ;;  %v1947_v9 = vadd.f32 %v1911_v23, %v1654_v50  ;;  %v1308_v50 = vmul.f32 %v12645_v36, %v14206_v60  ;;  %v1601_v52 = vmul.f32 %v12696_v54, %v14212_v57  ;;  %v1052_v23 = vmul.f32 %v12651_v63, %v14213_v25 }
 0x448   : > { %v3392_v4 = vadd.f32 %v3356_v59, %v3099_v22  ;;  %v3391_v2 = vadd.f32 %v3355_v21, %v3098_v37 }
 0x449   : > { %v3245_v35 = vpop.permute.xlu1 %3244  ;;  %v3240_v31 = vpop.permute.xlu0 %3239  ;;  %v2240_v59 = vadd.f32 %v2204_v33, %v1947_v9 }
 0x44a   : > { %v3435_v10 = vadd.f32 %v12354_v28, %v3392_v4  ;;  %v3434_v32 = vadd.f32 %v12354_v28, %v3391_v2  ;;  %v3358_v8 = vmul.f32 %v12336_v30, %v3245_v35  ;;  %v3357_v20 = vmul.f32 %v12336_v30, %v3240_v31  ;;  %v14207_v4 = vld [vmem:[#allocation79_spill] sm:$0xff]  ;;  %v14209_v35 = vld [vmem:[#allocation74_spill] sm:$0xff] }
 0x44b   : > { %v2203_v30 = vmul.f32 %v12733_v3, %v12580_v53  ;;  %v1309_v2 = vmul.f32 %v12645_v36, %v14207_v4  ;;  %v1051_v31 = vmul.f32 %v12651_v63, %v14209_v35 }
 0x44c   : > { %v3471_v42 = vmax.f32 %v3435_v10, 0.0  ;;  %v3470_v12 = vmax.f32 %v3434_v32, 0.0  ;;  %v3394_v43 = vadd.f32 %v3358_v8, %v3101_v41  ;;  %v3393_v29 = vadd.f32 %v3357_v20, %v3100_v7  ;;  %v14208_v7 = vld [vmem:[#allocation81_spill] sm:$0xff]  ;;  %v14210_v10 = vld [vmem:[#allocation75_spill] sm:$0xff]  ;;  %v14211_v8 = vld [vmem:[#allocation82_spill] sm:$0xff] }
 0x44d   : > { %v2446_v45 = vpop.permute.xlu1 %2445  ;;  %v2441_v56 = vpop.permute.xlu0 %2440  ;;  %v2239_v21 = vadd.f32 %v2203_v30, %v1946_v17  ;;  %v1311_v41 = vmul.f32 %v12645_v36, %v14208_v7  ;;  %v1053_v32 = vmul.f32 %v12651_v63, %v14210_v10  ;;  %v1310_v20 = vmul.f32 %v12645_v36, %v14211_v8  ;;  %v14221_v7 = vld [vmem:[#allocation93_spill] sm:$0xff]  ;;  %v14225_v8 = vld [vmem:[#allocation136_spill] sm:$0xff] }
 0x44e   : > { %3507 = vst.msk [vmem:[#allocation2 + $0x78] sm:$0xff] %vm790_vm0, %v3471_v42  ;;  %3506 = vst.msk [vmem:[#allocation2 + $0x70] sm:$0xff] %vm790_vm0, %v3470_v12  ;;  %v3437_v55 = vadd.f32 %v12354_v28, %v3394_v43  ;;  %v3436_v5 = vadd.f32 %v12354_v28, %v3393_v29  ;;  %v2495_v46 = vmul.f32 %v12275_v24, %v2446_v45  ;;  %v12751_v28 = vld [vmem:[#allocation10 + $0x5] ss:$0 sm:$0xff]  ;;  %v14214_v42 = vld [vmem:[#allocation77_spill] sm:$0xff] }
 0x44f   : > { %v2494_v37 = vmul.f32 %v12275_v24, %v2441_v56  ;;  %v1055_v12 = vmul.f32 %v12651_v63, %v14214_v42  ;;  %v14215_v43 = vld [vmem:[#allocation78_spill] sm:$0xff]  ;;  %v1345_v9 = vadd.f32 %v1309_v2, %v1052_v23  ;;  %v12799_v35 = vmul.f32 %v12651_v63, %v14221_v7  ;;  %v14224_v10 = vld [vmem:[#allocation105_spill] sm:$0xff] }
 0x450   : > { %v3473_v34 = vmax.f32 %v3437_v55, 0.0  ;;  %v3472_v0 = vmax.f32 %v3436_v5, 0.0  ;;  %v12745_v16 = vadd.f32 %v2495_v46, %v2238_v58  ;;  %v1054_v29 = vmul.f32 %v12651_v63, %v14215_v43  ;;  %v14216_v58 = vld [vmem:[#allocation84_spill] sm:$0xff]  ;;  %v14217_v5 = vld [vmem:[#allocation137_spill] sm:$0xff]  ;;  %v14227_v43 = vld [vmem:[#allocation138_spill] sm:$0xff] }
 0x451   : > { %v12747_v53 = vadd.f32 %v2494_v37, %v2237_v39  ;;  %v2456_v48 = vpop.permute.xlu1 %2455  ;;  %v2451_v22 = vpop.permute.xlu0 %2450  ;;  %v1312_v39 = vmul.f32 %v12645_v36, %v14216_v58  ;;  %v1344_v55 = vadd.f32 %v1308_v50, %v1051_v31  ;;  %v1894_v46 = vmul.f32 %v12715_v13, %v14217_v5  ;;  %v14228_v58 = vld [vmem:[#allocation177_spill] sm:$0xff] }
 0x452   : > { %3509 = vst.msk [vmem:[#allocation2 + $0x88] sm:$0xff] %vm790_vm0, %v3473_v34  ;;  %3508 = vst.msk [vmem:[#allocation2 + $0x80] sm:$0xff] %vm790_vm0, %v3472_v0  ;;  %v2497_v24 = vmul.f32 %v12751_v28, %v2456_v48  ;;  %v2496_v27 = vmul.f32 %v12751_v28, %v2451_v22  ;;  %v1347_v34 = vadd.f32 %v1311_v41, %v1054_v29  ;;  %v14218_v0 = vld [vmem:[#allocation103_spill] sm:$0xff]  ;;  %v14219_v22 = vld [vmem:[#allocation104_spill] sm:$0xff] }
 0x453   : > { %v1603_v48 = vmul.f32 %v12696_v54, %v14218_v0  ;;  %v1348_v50 = vadd.f32 %v1312_v39, %v1055_v12  ;;  %v14223_v41 = vld [vmem:[#allocation139_spill] sm:$0xff]  ;;  %v1897_v29 = vmul.f32 %v12715_v13, %v14227_v43  ;;  %v2189_v39 = vmul.f32 %v12733_v3, %v14228_v58 }
 0x454   : > { %v12755_v62 = vadd.f32 %v2497_v24, %v2240_v59  ;;  %v12757_v51 = vadd.f32 %v2496_v27, %v2239_v21  ;;  %v1602_v59 = vmul.f32 %v12696_v54, %v14219_v22  ;;  %v1346_v21 = vadd.f32 %v1310_v20, %v1053_v32  ;;  %v14220_v27 = vld [vmem:[#allocation175_spill] sm:$0xff] }
 0x455   : > { %v12759_v26 = vpop.permute.xlu1 %2713  ;;  %v12761_v11 = vpop.permute.xlu0 %2708  ;;  %v3565_v15 = vld [vmem:[#allocation2 + $0x6c] ss:$2 sm:$0xff]  ;;  %v3567_v1 = vld [vmem:[#allocation2 + $0x6d] ss:$2 sm:$0xff]  ;;  %v1637_v24 = vadd.f32 %v1601_v52, %v1344_v55  ;;  %v2187_v60 = vmul.f32 %v12733_v3, %v14220_v27  ;;  %v1605_v32 = vmul.f32 %v12696_v54, %v14224_v10  ;;  %v1895_v20 = vmul.f32 %v12715_v13, %v14225_v8 }
 0x456   : > { %14205 = vst [vmem:[#allocation193_spill] sm:$0xff] %v12757_v51  ;;  %v3572_v37 = vmax.f32 %v3565_v15, %v3567_v1  ;;  %v14222_v15 = vld [vmem:[#allocation106_spill] sm:$0xff]  ;;  %v1896_v1 = vmul.f32 %v12715_v13, %v14223_v41  ;;  %v14226_v52 = vld [vmem:[#allocation213_spill] sm:$0xff]  ;;  %v1639_v42 = vadd.f32 %v1603_v48, %v1346_v21  ;;  %v1638_v12 = vadd.f32 %v1602_v59, %v1345_v9  ;;  %v14231_v0 = vld [vmem:[#allocation95_spill] sm:$0xff] }
 0x457   : > { %v1604_v2 = vmul.f32 %v12696_v54, %v14222_v15  ;;  %v1930_v57 = vadd.f32 %v1894_v46, %v1637_v24  ;;  %v2480_v25 = vmul.f32 %v12751_v28, %v14226_v52  ;;  %v14230_v55 = vld [vmem:[#allocation174_spill] sm:$0xff]  ;;  %v12830_v9 = vmul.f32 %v12651_v63, %v14231_v0  ;;  %v14232_v59 = vld [vmem:[#allocation215_spill] sm:$0xff]  ;;  %v14238_v0 = vld [vmem:[#allocation97_spill] sm:$0xff] }
 0x458   : > { %v2188_v5 = vmul.f32 %v12733_v3, %v14230_v55  ;;  %v1932_v22 = vadd.f32 %v1896_v1, %v1639_v42  ;;  %v2482_v21 = vmul.f32 %v12751_v28, %v14232_v59  ;;  %v1641_v27 = vadd.f32 %v1605_v32, %v1348_v50  ;;  %v14233_v8 = vld [vmem:[#allocation179_spill] sm:$0xff] }
 0x459   : > { %v3569_v33 = vld [vmem:[#allocation2 + $0x7e] ss:$2 sm:$0xff]  ;;  %v3571_v30 = vld [vmem:[#allocation2 + $0x7f] ss:$2 sm:$0xff]  ;;  %v12785_v45 = vpop.permute.xlu1 %2723  ;;  %v12787_v56 = vpop.permute.xlu0 %2718  ;;  %v2223_v46 = vadd.f32 %v2187_v60, %v1930_v57  ;;  %v1640_v48 = vadd.f32 %v1604_v2, %v1347_v34  ;;  %v2191_v34 = vmul.f32 %v12733_v3, %v14233_v8  ;;  %v2484_v42 = vmul.f32 %v12751_v28, %v12223_v49 }
 0x45a   : > { %v3573_v17 = vmax.f32 %v3569_v33, %v3571_v30  ;;  %v14229_v33 = vld [vmem:[#allocation141_spill] sm:$0xff]  ;;  %v12836_v60 = vld [vmem:[#allocation10 + $0x7] ss:$0 sm:$0xff]  ;;  %v2225_v10 = vadd.f32 %v2189_v39, %v1932_v22  ;;  %v14234_v2 = vld [vmem:[#allocation212_spill] sm:$0xff] }
 0x45b   : > { %v1898_v30 = vmul.f32 %v12715_v13, %v14229_v33  ;;  %v2516_v7 = vadd.f32 %v2480_v25, %v2223_v46  ;;  %v3066_v15 = vmul.f32 %v12836_v60, %v12639_v40  ;;  %v1933_v41 = vadd.f32 %v1897_v29, %v1640_v48  ;;  %v12858_v33 = vld [vmem:[#allocation10 + $0x8] ss:$0 sm:$0xff]  ;;  %v14237_v46 = vld [vmem:[#allocation214_spill] sm:$0xff] }
 0x45c   : > { %v3574_v4 = vmax.f32 %v3572_v37, %v3573_v17  ;;  %v12824_v37 = vld [vmem:[#allocation10 + $0x6] ss:$0 sm:$0xff]  ;;  %v2481_v1 = vmul.f32 %v12751_v28, %v14234_v2  ;;  %v2518_v40 = vadd.f32 %v2482_v21, %v2225_v10  ;;  %v3068_v39 = vmul.f32 %v12836_v60, %v12667_v44  ;;  %v14239_v22 = vld [vmem:[#allocation152_spill] sm:$0xff]  ;;  %v12877_v2 = vld [vmem:[#allocation13] ss:$0 sm:$0xff] }
 0x45d   : > { %v12805_v31 = vpop.permute.xlu1 %2981  ;;  %v2773_v17 = vmul.f32 %v12824_v37, %v12451_v38  ;;  %v1934_v57 = vadd.f32 %v1898_v30, %v1641_v27  ;;  %v2775_v32 = vmul.f32 %v12824_v37, %v12475_v47  ;;  %v1313_v44 = vmul.f32 %v12645_v36, %v14238_v0 }
 0x45e   : > { %v12813_v23 = vpop.permute.xlu0 %2728  ;;  %3575 = vst.msk [vmem:[#allocation3 + $0x18] sm:$0xff] %vm790_vm0, %v3574_v4  ;;  %v1931_v4 = vadd.f32 %v1895_v20, %v1638_v12  ;;  %v14235_v20 = vld [vmem:[#allocation176_spill] sm:$0xff]  ;;  %v2774_v12 = vmul.f32 %v12824_v37, %v12449_v18  ;;  %v2483_v18 = vmul.f32 %v12751_v28, %v14237_v46  ;;  %v2777_v59 = vmul.f32 %v12824_v37, %v14239_v22  ;;  %v14245_v22 = vld [vmem:[#allocation98_spill] sm:$0xff] }
 0x45f   : > { %v2809_v50 = vadd.f32 %v2773_v17, %v2516_v7  ;;  %v2190_v25 = vmul.f32 %v12733_v3, %v14235_v20  ;;  %v2227_v49 = vadd.f32 %v2191_v34, %v1934_v57  ;;  %v3067_v17 = vmul.f32 %v12836_v60, %v12669_v61  ;;  %v14244_v46 = vld [vmem:[#allocation96_spill] sm:$0xff] }
 0x460   : > { %v2224_v52 = vadd.f32 %v2188_v5, %v1931_v4  ;;  %v2811_v48 = vadd.f32 %v2775_v32, %v2518_v40  ;;  %v3070_v61 = vmul.f32 %v12836_v60, %v12687_v19 }
 0x461   : > { %v12834_v24 = vpop.permute.xlu1 %2991  ;;  %v3102_v58 = vadd.f32 %v3066_v15, %v2809_v50  ;;  %v2226_v27 = vadd.f32 %v2190_v25, %v1933_v41  ;;  %v2520_v4 = vadd.f32 %v2484_v42, %v2227_v49  ;;  %v14240_v15 = vld [vmem:[#allocation121_spill] sm:$0xff]  ;;  %v3069_v41 = vmul.f32 %v12836_v60, %v12690_v14  ;;  %v14241_v25 = vld [vmem:[#allocation99_spill] sm:$0xff] }
 0x462   : > { %v12840_v38 = vpop.permute.xlu0 %2986  ;;  %v2517_v5 = vadd.f32 %v2481_v1, %v2224_v52  ;;  %v2776_v10 = vmul.f32 %v12824_v37, %v14240_v15  ;;  %v3104_v34 = vadd.f32 %v3068_v39, %v2811_v48  ;;  %v1315_v40 = vmul.f32 %v12645_v36, %v14241_v25  ;;  %v14243_v39 = vld [vmem:[#allocation102_spill] sm:$0xff]  ;;  %v14248_v25 = vld [vmem:[#allocation128_spill] sm:$0xff] }
 0x463   : > { %v2519_v50 = vadd.f32 %v2483_v18, %v2226_v27  ;;  %v2813_v42 = vadd.f32 %v2777_v59, %v2520_v4  ;;  %v1057_v14 = vmul.f32 %v12651_v63, %v14244_v46  ;;  %v1059_v59 = vmul.f32 %v12651_v63, %v14245_v22  ;;  %v14254_v46 = vld [vmem:[#allocation133_spill] sm:$0xff] }
 0x464   : > { %v2810_v7 = vadd.f32 %v2774_v12, %v2517_v5  ;;  %v1351_v15 = vadd.f32 %v1315_v40, %v12830_v9 }
 0x465   : > { %v3250_v43 = vpop.permute.xlu1 %3249  ;;  %v12854_v29 = vld [vmem:[#allocation3 + $0x18] sm:$0xff]  ;;  %v3106_v18 = vadd.f32 %v3070_v61, %v2813_v42  ;;  %v1319_v42 = vmul.f32 %v12645_v36, %v14248_v25 }
 0x466   : > { %14236 = vst [vmem:[#allocation157_spill] sm:$0xff] %v12854_v29  ;;  %v3359_v47 = vmul.f32 %v12858_v33, %v3250_v43  ;;  %v12861_v30 = vpop.permute.xlu0 %2996  ;;  %v3657_v55 = vsel %vm790_vm0, %v12854_v29, 0.0  ;;  %v3103_v32 = vadd.f32 %v3067_v17, %v2810_v7  ;;  %v14242_v43 = vld [vmem:[#allocation100_spill] sm:$0xff]  ;;  %v1349_v7 = vadd.f32 %v1313_v44, %v12799_v35  ;;  %v14249_v44 = vld [vmem:[#allocation123_spill] sm:$0xff] }
 0x467   : > { %3658 = vadd.xlane.f32.xlu0 %v3657_v55  ;;  %v2812_v55 = vadd.f32 %v2776_v10, %v2519_v50  ;;  %v14246_v50 = vld [vmem:[#allocation122_spill] sm:$0xff]  ;;  %v1060_v40 = vmul.f32 %v12651_v63, %v14249_v44  ;;  %v14260_v25 = vld [vmem:[#allocation135_spill] sm:$0xff] }
 0x468   : > { %v3395_v21 = vadd.f32 %v3359_v47, %v3102_v58  ;;  %v1314_v58 = vmul.f32 %v12645_v36, %v14242_v43  ;;  %v1316_v47 = vmul.f32 %v12645_v36, %v14243_v39  ;;  %v14251_v43 = vld [vmem:[#allocation125_spill] sm:$0xff] }
 0x469   : > { %v3260_v8 = vpop.permute.xlu1 %3259 }
 0x46a   : > { %v3438_v1 = vadd.f32 %v12877_v2, %v3395_v21  ;;  %v3361_v57 = vmul.f32 %v12858_v33, %v3260_v8  ;;  %v3255_v52 = vpop.permute.xlu0 %3254  ;;  %v3105_v21 = vadd.f32 %v3069_v41, %v2812_v55  ;;  %v1352_v61 = vadd.f32 %v1316_v47, %v1059_v59  ;;  %v14247_v41 = vld [vmem:[#allocation126_spill] sm:$0xff]  ;;  %v14252_v47 = vld [vmem:[#allocation129_spill] sm:$0xff]  ;;  %v14257_v59 = vld [vmem:[#allocation132_spill] sm:$0xff] }
 0x46b   : > { %v3360_v20 = vmul.f32 %v12858_v33, %v3255_v52  ;;  %v1318_v55 = vmul.f32 %v12645_v36, %v14252_v47  ;;  %v14264_v47 = vld [vmem:[#allocation208_spill] sm:$0xff] }
 0x46c   : > { %v3474_v12 = vmax.f32 %v3438_v1, 0.0  ;;  %v3397_v19 = vadd.f32 %v3361_v57, %v3104_v34  ;;  %v1350_v34 = vadd.f32 %v1314_v58, %v1057_v14  ;;  %v1062_v58 = vmul.f32 %v12651_v63, %v14251_v43 }
 0x46d   : > { %v3396_v49 = vadd.f32 %v3360_v20, %v3103_v32  ;;  %v3270_v5 = vpop.permute.xlu1 %3269  ;;  %v1061_v32 = vmul.f32 %v12651_v63, %v14246_v50  ;;  %v1317_v20 = vmul.f32 %v12645_v36, %v14247_v41  ;;  %v1606_v14 = vmul.f32 %v12696_v54, %v14254_v46  ;;  %v14259_v50 = vld [vmem:[#allocation171_spill] sm:$0xff] }
 0x46e   : > { %3510 = vst.msk [vmem:[#allocation2 + $0x90] sm:$0xff] %vm790_vm0, %v3474_v12  ;;  %v3440_v17 = vadd.f32 %v12877_v2, %v3397_v19  ;;  %v3363_v0 = vmul.f32 %v12858_v33, %v3270_v5  ;;  %v3265_v48 = vpop.permute.xlu0 %3264  ;;  %v14250_v12 = vld [vmem:[#allocation124_spill] sm:$0xff]  ;;  %v1899_v41 = vmul.f32 %v12715_v13, %v14259_v50 }
 0x46f   : > { %v3439_v27 = vadd.f32 %v12877_v2, %v3396_v49  ;;  %v3362_v4 = vmul.f32 %v12858_v33, %v3265_v48  ;;  %v1063_v19 = vmul.f32 %v12651_v63, %v14250_v12  ;;  %v14253_v49 = vld [vmem:[#allocation130_spill] sm:$0xff]  ;;  %v14256_v48 = vld [vmem:[#allocation131_spill] sm:$0xff]  ;;  %v1354_v43 = vadd.f32 %v1318_v55, %v1061_v32  ;;  %v14268_v55 = vld [vmem:[#allocation201_spill] sm:$0xff] }
 0x470   : > { %v3476_v10 = vmax.f32 %v3440_v17, 0.0  ;;  %v3399_v8 = vadd.f32 %v3363_v0, %v3106_v18  ;;  %v1321_v5 = vmul.f32 %v12645_v36, %v14253_v49  ;;  %v14255_v17 = vld [vmem:[#allocation127_spill] sm:$0xff]  ;;  %v1320_v22 = vmul.f32 %v12645_v36, %v14256_v48  ;;  %v14262_v12 = vld [vmem:[#allocation166_spill] sm:$0xff] }
 0x471   : > { %v3475_v1 = vmax.f32 %v3439_v27, 0.0  ;;  %v3398_v57 = vadd.f32 %v3362_v4, %v3105_v21  ;;  %v12901_v52 = vpop.permute.xlu1 %2738  ;;  %v1064_v0 = vmul.f32 %v12651_v63, %v14255_v17  ;;  %v1607_v21 = vmul.f32 %v12696_v54, %v14257_v59  ;;  %v14265_v17 = vld [vmem:[#allocation168_spill] sm:$0xff]  ;;  %v14266_v59 = vld [vmem:[#allocation170_spill] sm:$0xff] }
 0x472   : > { %3512 = vst.msk [vmem:[#allocation2 + $0xa0] sm:$0xff] %vm790_vm0, %v3476_v10  ;;  %v3442_v35 = vadd.f32 %v12877_v2, %v3399_v8  ;;  %v12911_v9 = vpop.permute.xlu0 %2733  ;;  %v1353_v10 = vadd.f32 %v1317_v20, %v1060_v40  ;;  %v1355_v8 = vadd.f32 %v1319_v42, %v1062_v58  ;;  %v1608_v36 = vmul.f32 %v12696_v54, %v14260_v25  ;;  %v14263_v42 = vld [vmem:[#allocation167_spill] sm:$0xff] }
 0x473   : > { %3511 = vst.msk [vmem:[#allocation2 + $0x98] sm:$0xff] %vm790_vm0, %v3475_v1  ;;  %v3441_v39 = vadd.f32 %v12877_v2, %v3398_v57  ;;  %v14258_v1 = vld [vmem:[#allocation134_spill] sm:$0xff]  ;;  %v1612_v20 = vmul.f32 %v12696_v54, %v14262_v12  ;;  %v1611_v40 = vmul.f32 %v12696_v54, %v14263_v42  ;;  %v1357_v58 = vadd.f32 %v1321_v5, %v1064_v0  ;;  %v14267_v12 = vld [vmem:[#allocation173_spill] sm:$0xff] }
 0x474   : > { %v3478_v18 = vmax.f32 %v3442_v35, 0.0  ;;  %v1609_v57 = vmul.f32 %v12696_v54, %v14258_v1  ;;  %v14261_v35 = vld [vmem:[#allocation164_spill] sm:$0xff]  ;;  %v2192_v49 = vmul.f32 %v12733_v3, %v14264_v47  ;;  %v1356_v46 = vadd.f32 %v1320_v22, %v1063_v19  ;;  %v14269_v22 = vld [vmem:[#allocation169_spill] sm:$0xff]  ;;  %v14270_v42 = vld [vmem:[#allocation210_spill] sm:$0xff] }
 0x475   : > { %v3477_v27 = vmax.f32 %v3441_v39, 0.0  ;;  %v12933_v4 = vpop.permute.xlu1 %2748  ;;  %v1610_v44 = vmul.f32 %v12696_v54, %v14261_v35  ;;  %v1642_v39 = vadd.f32 %v1606_v14, %v1349_v7  ;;  %v1614_v48 = vmul.f32 %v12696_v54, %v14265_v17 }
 0x476   : > { %3514 = vst.msk [vmem:[#allocation2 + $0xb0] sm:$0xff] %vm790_vm0, %v3478_v18  ;;  %v12940_v63 = vpop.permute.xlu0 %2743  ;;  %v1643_v18 = vadd.f32 %v1607_v21, %v1350_v34  ;;  %v1900_v1 = vmul.f32 %v12715_v13, %v14266_v59  ;;  %v1645_v25 = vadd.f32 %v1609_v57, %v1352_v61  ;;  %v1901_v32 = vmul.f32 %v12715_v13, %v14267_v12  ;;  %v14271_v57 = vld [vmem:[#allocation153_spill] sm:$0xff]  ;;  %v14276_v12 = vld [vmem:[#allocation200_spill] sm:$0xff] }
 0x477   : > { %3513 = vst.msk [vmem:[#allocation2 + $0xa8] sm:$0xff] %vm790_vm0, %v3477_v27  ;;  %v1935_v35 = vadd.f32 %v1899_v41, %v1642_v39  ;;  %v2485_v7 = vmul.f32 %v12751_v28, %v14268_v55  ;;  %v1644_v19 = vadd.f32 %v1608_v36, %v1351_v15  ;;  %v1646_v34 = vadd.f32 %v1610_v44, %v1353_v10  ;;  %v14272_v15 = vld [vmem:[#allocation172_spill] sm:$0xff] }
 0x478   : > { %v1648_v14 = vadd.f32 %v1612_v20, %v1355_v8  ;;  %v12965_v0 = vadd.f32 %v1611_v40, %v1354_v43  ;;  %v1613_v21 = vmul.f32 %v12696_v54, %v14269_v22  ;;  %v2194_v61 = vmul.f32 %v12733_v3, %v14270_v42  ;;  %v14273_v8 = vld [vmem:[#allocation207_spill] sm:$0xff] }
 0x479   : > { %v12957_v50 = vpop.permute.xlu1 %3006  ;;  %v2228_v27 = vadd.f32 %v2192_v49, %v1935_v35  ;;  %v2778_v41 = vmul.f32 %v12824_v37, %v14271_v57  ;;  %v12973_v17 = vadd.f32 %v1614_v48, %v1357_v58  ;;  %v1936_v59 = vadd.f32 %v1900_v1, %v1643_v18  ;;  %v14274_v40 = vld [vmem:[#allocation151_spill] sm:$0xff]  ;;  %v14275_v18 = vld [vmem:[#allocation198_spill] sm:$0xff] }
 0x47a   : > { %v12963_v5 = vpop.permute.xlu0 %3001  ;;  %v3577_v39 = vld [vmem:[#allocation2 + $0x90] ss:$2 sm:$0xff]  ;;  %v3579_v47 = vld [vmem:[#allocation2 + $0x91] ss:$2 sm:$0xff]  ;;  %v1902_v10 = vmul.f32 %v12715_v13, %v14272_v15  ;;  %v2193_v36 = vmul.f32 %v12733_v3, %v14273_v8  ;;  %v1937_v54 = vadd.f32 %v1901_v32, %v1644_v19  ;;  %v2487_v43 = vmul.f32 %v12751_v28, %v14274_v40  ;;  %v14279_v8 = vld [vmem:[#allocation209_spill] sm:$0xff] }
 0x47b   : > { %v2521_v20 = vadd.f32 %v2485_v7, %v2228_v27  ;;  %v3071_v49 = vmul.f32 %v12836_v60, %v12805_v31  ;;  %v1903_v1 = vmul.f32 %v12715_v13, %v14275_v18  ;;  %v2486_v55 = vmul.f32 %v12751_v28, %v14276_v12  ;;  %v14277_v32 = vld [vmem:[#allocation202_spill] sm:$0xff]  ;;  %v14278_v57 = vld [vmem:[#allocation191_spill] sm:$0xff] }
 0x47c   : > { %v3584_v22 = vmax.f32 %v3577_v39, %v3579_v47  ;;  %v1905_v7 = vmul.f32 %v12715_v13, %v14277_v32  ;;  %v2230_v19 = vadd.f32 %v2194_v61, %v1937_v54  ;;  %v2780_v31 = vmul.f32 %v12824_v37, %v14278_v57  ;;  %v14283_v32 = vld [vmem:[#allocation155_spill] sm:$0xff]  ;;  %v14284_v57 = vld [vmem:[#allocation205_spill] sm:$0xff] }
 0x47d   : > { %v12979_v44 = vpop.permute.xlu1 %3016  ;;  %v2814_v27 = vadd.f32 %v2778_v41, %v2521_v20  ;;  %v2229_v15 = vadd.f32 %v2193_v36, %v1936_v59  ;;  %v2195_v40 = vmul.f32 %v12733_v3, %v14279_v8  ;;  %v2779_v18 = vmul.f32 %v12824_v37, %v14280_v6  ;;  %v14281_v59 = vld [vmem:[#allocation150_spill] sm:$0xff] }
 0x47e   : > { %v3581_v35 = vld [vmem:[#allocation2 + $0xa2] ss:$2 sm:$0xff]  ;;  %v3583_v58 = vld [vmem:[#allocation2 + $0xa3] ss:$2 sm:$0xff]  ;;  %v12985_v48 = vpop.permute.xlu0 %3011  ;;  %v2523_v12 = vadd.f32 %v2487_v43, %v2230_v19  ;;  %v3073_v47 = vmul.f32 %v12836_v60, %v12834_v24  ;;  %v1938_v54 = vadd.f32 %v1902_v10, %v1645_v25  ;;  %v2488_v36 = vmul.f32 %v12751_v28, %v14281_v59 }
 0x47f   : > { %v3585_v42 = vmax.f32 %v3581_v35, %v3583_v58  ;;  %v3107_v39 = vadd.f32 %v3071_v49, %v2814_v27  ;;  %v2522_v20 = vadd.f32 %v2486_v55, %v2229_v15  ;;  %v3072_v35 = vmul.f32 %v12836_v60, %v12840_v38  ;;  %v14285_v15 = vld [vmem:[#allocation116_spill] sm:$0xff] }
 0x480   : > { %v1649_v6 = vadd.f32 %v1613_v21, %v1356_v46  ;;  %v1939_v43 = vadd.f32 %v1903_v1, %v1646_v34  ;;  %v2816_v49 = vadd.f32 %v2780_v31, %v2523_v12  ;;  %v2781_v25 = vmul.f32 %v12824_v37, %v14283_v32 }
 0x481   : > { %v3275_v29 = vpop.permute.xlu1 %3274  ;;  %v3586_v51 = vmax.f32 %v3584_v22, %v3585_v42  ;;  %v14282_v22 = vld [vmem:[#allocation203_spill] sm:$0xff]  ;;  %v2815_v42 = vadd.f32 %v2779_v18, %v2522_v20  ;;  %v1941_v55 = vadd.f32 %v1905_v7, %v1648_v14  ;;  %v3074_v21 = vmul.f32 %v12836_v60, %v12861_v30  ;;  %v14286_v18 = vld [vmem:[#allocation206_spill] sm:$0xff]  ;;  %v14287_v30 = vld [vmem:[#allocation117_spill] sm:$0xff] }
 0x482   : > { %v3364_v61 = vmul.f32 %v12858_v33, %v3275_v29  ;;  %v13002_v41 = vpop.permute.xlu0 %3021  ;;  %v1904_v24 = vmul.f32 %v12715_v13, %v14282_v22  ;;  %v2231_v29 = vadd.f32 %v2195_v40, %v1938_v54  ;;  %v3109_v19 = vadd.f32 %v3073_v47, %v2816_v49  ;;  %v14288_v20 = vld [vmem:[#allocation94_spill] sm:$0xff] }
 0x483   : > { %3587 = vst.msk [vmem:[#allocation3 + $0x20] sm:$0xff] %vm790_vm0, %v3586_v51  ;;  %v3108_v34 = vadd.f32 %v3072_v35, %v2815_v42  ;;  %v1907_v31 = vmul.f32 %v12715_v13, %v14284_v57  ;;  %v2196_v8 = vmul.f32 %v12733_v3, %v14285_v15  ;;  %v1906_v12 = vmul.f32 %v12715_v13, %v14286_v18  ;;  %v14292_v15 = vld [vmem:[#allocation120_spill] sm:$0xff] }
 0x484   : > { %v3400_v58 = vadd.f32 %v3364_v61, %v3107_v39  ;;  %v2524_v46 = vadd.f32 %v2488_v36, %v2231_v29  ;;  %v1940_v40 = vadd.f32 %v1904_v24, %v12965_v0  ;;  %v2198_v54 = vmul.f32 %v12733_v3, %v14287_v30  ;;  %v14289_v36 = vld [vmem:[#allocation189_spill] sm:$0xff] }
 0x485   : > { %v3285_v10 = vpop.permute.xlu1 %3284  ;;  %v2197_v59 = vmul.f32 %v12733_v3, %v14288_v20  ;;  %v2489_v35 = vmul.f32 %v12751_v28, %v14289_v36  ;;  %v1943_v42 = vadd.f32 %v1907_v31, %v12973_v17  ;;  %v2232_v32 = vadd.f32 %v2196_v8, %v1939_v43 }
 0x486   : > { %v3443_v27 = vadd.f32 %v12877_v2, %v3400_v58  ;;  %v3366_v38 = vmul.f32 %v12858_v33, %v3285_v10  ;;  %v3280_v51 = vpop.permute.xlu0 %3279  ;;  %v2817_v39 = vadd.f32 %v2781_v25, %v2524_v46  ;;  %v2782_v25 = vmul.f32 %v12824_v37, %v12761_v11 }
 0x487   : > { %v3365_v1 = vmul.f32 %v12858_v33, %v3280_v51  ;;  %v2525_v57 = vadd.f32 %v2489_v35, %v2232_v32  ;;  %v2491_v17 = vmul.f32 %v12751_v28, %v14292_v15  ;;  %v3075_v11 = vmul.f32 %v12836_v60, %v12963_v5 }
 0x488   : > { %v3479_v14 = vmax.f32 %v3443_v27, 0.0  ;;  %v3402_v7 = vadd.f32 %v3366_v38, %v3109_v19  ;;  %v3110_v13 = vadd.f32 %v3074_v21, %v2817_v39  ;;  %v14290_v19 = vld [vmem:[#allocation118_spill] sm:$0xff]  ;;  %v14291_v38 = vld [vmem:[#allocation119_spill] sm:$0xff]  ;;  %v2234_v31 = vadd.f32 %v2198_v54, %v1941_v55 }
 0x489   : > { %v3401_v47 = vadd.f32 %v3365_v1, %v3108_v34  ;;  %v13025_v61 = vpop.permute.xlu1 %3026  ;;  %v2200_v27 = vmul.f32 %v12733_v3, %v14290_v19  ;;  %v2199_v51 = vmul.f32 %v12733_v3, %v14291_v38  ;;  %v1942_v1 = vadd.f32 %v1906_v12, %v1649_v6  ;;  %v14294_v6 = vld [vmem:[#allocation204_spill] sm:$0xff]  ;;  %v14295_v12 = vld [vmem:[#allocation190_spill] sm:$0xff] }
 0x48a   : > { %3515 = vst.msk [vmem:[#allocation2 + $0xb8] sm:$0xff] %vm790_vm0, %v3479_v14  ;;  %v3445_v0 = vadd.f32 %v12877_v2, %v3402_v7  ;;  %v3290_v49 = vpop.permute.xlu0 %3289  ;;  %v13035_v58 = vld [vmem:[#allocation3 + $0x20] sm:$0xff]  ;;  %v2233_v8 = vadd.f32 %v2197_v59, %v1940_v40  ;;  %v2492_v18 = vmul.f32 %v12751_v28, %v14294_v6  ;;  %v2493_v39 = vmul.f32 %v12751_v28, %v14295_v12 }
 0x48b   : > { %v3444_v22 = vadd.f32 %v12877_v2, %v3401_v47  ;;  %v3367_v24 = vmul.f32 %v12858_v33, %v3290_v49  ;;  %v3660_v29 = vsel %vm790_vm0, %v13035_v58, 0.0  ;;  %v14293_v14 = vld [vmem:[#allocation188_spill] sm:$0xff]  ;;  %v2818_v47 = vadd.f32 %v2782_v25, %v2525_v57 }
 0x48c   : > { %v3481_v10 = vmax.f32 %v3445_v0, 0.0  ;;  %3661 = vadd.xlane.f32.xlu1 %v3660_v29  ;;  %v2490_v3 = vmul.f32 %v12751_v28, %v14293_v14  ;;  %v2784_v5 = vmul.f32 %v12824_v37, %v12787_v56  ;;  %v2236_v30 = vadd.f32 %v2200_v27, %v1943_v42 }
 0x48d   : > { %v3480_v46 = vmax.f32 %v3444_v22, 0.0  ;;  %v3403_v34 = vadd.f32 %v3367_v24, %v3110_v13  ;;  %v13048_v21 = vpop.permute.xlu1 %3036  ;;  %v2235_v55 = vadd.f32 %v2199_v51, %v1942_v1  ;;  %v2783_v40 = vmul.f32 %v12824_v37, %v12759_v26 }
 0x48e   : > { %3517 = vst.msk [vmem:[#allocation2 + $0xc8] sm:$0xff] %vm790_vm0, %v3481_v10  ;;  %v3032_v43 = vpop.permute.xlu0 %3031  ;;  %v2527_v59 = vadd.f32 %v2491_v17, %v2234_v31  ;;  %v3111_v36 = vadd.f32 %v3075_v11, %v2818_v47  ;;  %v3077_v35 = vmul.f32 %v12836_v60, %v12985_v48  ;;  %v2526_v28 = vadd.f32 %v2490_v3, %v2233_v8 }
 0x48f   : > { %3516 = vst.msk [vmem:[#allocation2 + $0xc0] sm:$0xff] %vm790_vm0, %v3480_v46  ;;  %v3446_v7 = vadd.f32 %v12877_v2, %v3403_v34  ;;  %v2785_v13 = vmul.f32 %v12824_v37, %v12785_v45  ;;  %v2786_v56 = vmul.f32 %v12824_v37, %v12813_v23  ;;  %v3076_v26 = vmul.f32 %v12836_v60, %v12957_v50 }
 0x490   : > { %v2528_v22 = vadd.f32 %v2492_v18, %v2235_v55  ;;  %v2529_v24 = vadd.f32 %v2493_v39, %v2236_v30  ;;  %v2820_v29 = vadd.f32 %v2784_v5, %v2527_v59  ;;  %v2819_v48 = vadd.f32 %v2783_v40, %v2526_v28 }
 0x491   : > { %v3482_v54 = vmax.f32 %v3446_v7, 0.0  ;;  %v3295_v20 = vpop.permute.xlu1 %3294  ;;  %v2788_v32 = vmul.f32 %v12824_v37, %v12901_v52  ;;  %v3078_v25 = vmul.f32 %v12836_v60, %v12979_v44  ;;  %v3079_v45 = vmul.f32 %v12836_v60, %v13002_v41 }
 0x492   : > { %v3368_v0 = vmul.f32 %v12858_v33, %v3295_v20  ;;  %v3042_v49 = vpop.permute.xlu0 %3041  ;;  %v3113_v10 = vadd.f32 %v3077_v35, %v2820_v29  ;;  %v2821_v38 = vadd.f32 %v2785_v13, %v2528_v22  ;;  %v2822_v51 = vadd.f32 %v2786_v56, %v2529_v24  ;;  %v14296_v24 = vld [vmem:[#allocation193_spill] sm:$0xff] }
 0x493   : > { %3518 = vst.msk [vmem:[#allocation2 + $0xd0] sm:$0xff] %vm790_vm0, %v3482_v54  ;;  %v3112_v46 = vadd.f32 %v3076_v26, %v2819_v48  ;;  %v2787_v52 = vmul.f32 %v12824_v37, %v12911_v9  ;;  %v2824_v41 = vadd.f32 %v2788_v32, %v12745_v16  ;;  %v3080_v14 = vmul.f32 %v12836_v60, %v13025_v61 }
 0x494   : > { %v3404_v42 = vadd.f32 %v3368_v0, %v3111_v36  ;;  %v3114_v17 = vadd.f32 %v3078_v25, %v2821_v38  ;;  %v3115_v11 = vadd.f32 %v3079_v45, %v2822_v51  ;;  %v3081_v6 = vmul.f32 %v12836_v60, %v3032_v43 }
 0x495   : > { %v3305_v23 = vpop.permute.xlu1 %3304  ;;  %v2823_v30 = vadd.f32 %v2787_v52, %v12747_v53  ;;  %v2790_v61 = vmul.f32 %v12824_v37, %v12933_v4  ;;  %v2789_v40 = vmul.f32 %v12824_v37, %v12940_v63  ;;  %v3083_v0 = vmul.f32 %v12836_v60, %v3042_v49 }
 0x496   : > { %v3447_v50 = vadd.f32 %v12877_v2, %v3404_v42  ;;  %v3370_v19 = vmul.f32 %v12858_v33, %v3305_v23  ;;  %v3300_v27 = vpop.permute.xlu0 %3299  ;;  %v3589_v1 = vld [vmem:[#allocation2 + $0xb4] ss:$2 sm:$0xff]  ;;  %v3591_v44 = vld [vmem:[#allocation2 + $0xb5] ss:$2 sm:$0xff]  ;;  %v3117_v35 = vadd.f32 %v3081_v6, %v2824_v41  ;;  %v3082_v56 = vmul.f32 %v12836_v60, %v13048_v21 }
 0x497   : > { %v3369_v34 = vmul.f32 %v12858_v33, %v3300_v27  ;;  %v3596_v47 = vmax.f32 %v3589_v1, %v3591_v44  ;;  %v3116_v4 = vadd.f32 %v3080_v14, %v2823_v30  ;;  %v2826_v49 = vadd.f32 %v2790_v61, %v12755_v62 }
 0x498   : > { %v3483_v57 = vmax.f32 %v3447_v50, 0.0  ;;  %v3406_v15 = vadd.f32 %v3370_v19, %v3113_v10  ;;  %v2825_v29 = vadd.f32 %v2789_v40, %v14296_v24 }
 0x499   : > { %v3405_v31 = vadd.f32 %v3369_v34, %v3112_v46  ;;  %v3315_v8 = vpop.permute.xlu1 %3314  ;;  %v3119_v25 = vadd.f32 %v3083_v0, %v2826_v49 }
 0x49a   : > { %v3593_v3 = vld [vmem:[#allocation2 + $0xc6] ss:$2 sm:$0xff]  ;;  %v3595_v7 = vld [vmem:[#allocation2 + $0xc7] ss:$2 sm:$0xff]  ;;  %3519 = vst.msk [vmem:[#allocation2 + $0xd8] sm:$0xff] %vm790_vm0, %v3483_v57  ;;  %v3449_v9 = vadd.f32 %v12877_v2, %v3406_v15  ;;  %v3372_v18 = vmul.f32 %v12858_v33, %v3315_v8  ;;  %v3310_v12 = vpop.permute.xlu0 %3309  ;;  %v3118_v23 = vadd.f32 %v3082_v56, %v2825_v29 }
 0x49b   : > { %v3448_v16 = vadd.f32 %v12877_v2, %v3405_v31  ;;  %v3371_v39 = vmul.f32 %v12858_v33, %v3310_v12  ;;  %v3597_v5 = vmax.f32 %v3593_v3, %v3595_v7  ;;  %v10399_v29 = vld [vmem:[#allocation3] sm:$0xff] }
 0x49c   : > { %v3485_v55 = vmax.f32 %v3449_v9, 0.0  ;;  %v3408_v43 = vadd.f32 %v3372_v18, %v3115_v11 }
 0x49d   : > { %v3484_v54 = vmax.f32 %v3448_v16, 0.0  ;;  %v3407_v20 = vadd.f32 %v3371_v39, %v3114_v17  ;;  %v3598_v36 = vmax.f32 %v3596_v47, %v3597_v5 }
 0x49e   : > { %v3325_v59 = vpop.permute.xlu1 %3324  ;;  %3521 = vst.msk [vmem:[#allocation2 + $0xe8] sm:$0xff] %vm790_vm0, %v3485_v55  ;;  %v3451_v28 = vadd.f32 %v12877_v2, %v3408_v43  ;;  %v3320_v13 = vpop.permute.xlu0 %3319 }
 0x49f   : > { %v3374_v53 = vmul.f32 %v12858_v33, %v3325_v59  ;;  %3520 = vst.msk [vmem:[#allocation2 + $0xe0] sm:$0xff] %vm790_vm0, %v3484_v54  ;;  %v3450_v37 = vadd.f32 %v12877_v2, %v3407_v20  ;;  %v3373_v63 = vmul.f32 %v12858_v33, %v3320_v13  ;;  %3599 = vst.msk [vmem:[#allocation3 + $0x28] sm:$0xff] %vm790_vm0, %v3598_v36 }
 0x4a0   : > { %v3487_v26 = vmax.f32 %v3451_v28, 0.0 }
 0x4a1   : > { %v3410_v22 = vadd.f32 %v3374_v53, %v3117_v35  ;;  %v3486_v42 = vmax.f32 %v3450_v37, 0.0  ;;  %v3409_v48 = vadd.f32 %v3373_v63, %v3116_v4 }
 0x4a2   : > { %v3335_v32 = vpop.permute.xlu1 %3334  ;;  %3523 = vst.msk [vmem:[#allocation2 + $0xf8] sm:$0xff] %vm790_vm0, %v3487_v26  ;;  %v3330_v45 = vpop.permute.xlu0 %3329 }
 0x4a3   : > { %v3453_v60 = vadd.f32 %v12877_v2, %v3410_v22  ;;  %v3376_v21 = vmul.f32 %v12858_v33, %v3335_v32  ;;  %3522 = vst.msk [vmem:[#allocation2 + $0xf0] sm:$0xff] %vm790_vm0, %v3486_v42  ;;  %v3452_v62 = vadd.f32 %v12877_v2, %v3409_v48  ;;  %v3375_v10 = vmul.f32 %v12858_v33, %v3330_v45  ;;  %v10398_v22 = vld [vmem:[#allocation3 + $0x8] sm:$0xff] }
 0x4a4   : > { %v14297_v48 = vld [vmem:[#allocation157_spill] sm:$0xff] }
 0x4a5   : > { %v3489_v50 = vmax.f32 %v3453_v60, 0.0  ;;  %v3412_v19 = vadd.f32 %v3376_v21, %v3119_v25  ;;  %v3488_v27 = vmax.f32 %v3452_v62, 0.0  ;;  %v3411_v38 = vadd.f32 %v3375_v10, %v3118_v23  ;;  %v14298_v25 = vld [vmem:[#allocation192_spill] sm:$0xff] }
 0x4a6   : > { %v3629_v46 = vld [vmem:[#allocation3 + $0x28] sm:$0xff]  ;;  %v3601_v1 = vld [vmem:[#allocation2 + $0xd8] ss:$2 sm:$0xff]  ;;  %v3603_v44 = vld [vmem:[#allocation2 + $0xd9] ss:$2 sm:$0xff] }
 0x4a7   : > { %3525 = vst.msk [vmem:[#allocation2 + $0x108] sm:$0xff] %vm790_vm0, %v3489_v50  ;;  %v3455_v51 = vadd.f32 %v12877_v2, %v3412_v19  ;;  %3524 = vst.msk [vmem:[#allocation2 + $0x100] sm:$0xff] %vm790_vm0, %v3488_v27  ;;  %v3454_v34 = vadd.f32 %v12877_v2, %v3411_v38  ;;  %v3663_v52 = vsel %vm790_vm0, %v3629_v46, 0.0  ;;  %v3608_v17 = vmax.f32 %v3601_v1, %v3603_v44 }
 0x4a8   : > { %3664 = vadd.xlane.f32.xlu0 %v3663_v52 }
 0x4a9   : > { %v3491_v57 = vmax.f32 %v3455_v51, 0.0  ;;  %v3490_v33 = vmax.f32 %v3454_v34, 0.0 }
 0x4aa   : > { %v3605_v15 = vld [vmem:[#allocation2 + $0xea] ss:$2 sm:$0xff]  ;;  %v3607_v41 = vld [vmem:[#allocation2 + $0xeb] ss:$2 sm:$0xff] }
 0x4ab   : > { %3528 = vst.msk [vmem:[#allocation2 + $0x118] sm:$0x3f] %vm3527_vm1, %v3491_v57  ;;  %v3609_v11 = vmax.f32 %v3605_v15, %v3607_v41 }
 0x4ac   : > { %3526 = vst.msk [vmem:[#allocation2 + $0x110] sm:$0xff] %vm790_vm0, %v3490_v33 }
 0x4ad   : > { %v3610_v31 = vmax.f32 %v3608_v17, %v3609_v11  ;;  %v3815_v17 = vld [vmem:[%s13831_s5 + $0x20] sm:$0xff]  ;;  %v3816_v11 = vld [vmem:[%s13831_s5 + $0x28] sm:$0xff] }
 0x4ae   : > { %v3613_v8 = vld [vmem:[#allocation2 + $0xfc] ss:$2 sm:$0xff]  ;;  %v3615_v14 = vld [vmem:[#allocation2 + $0xfd] ss:$2 sm:$0xff] }
 0x4af   : > { %3611 = vst.msk [vmem:[#allocation3 + $0x30] sm:$0xff] %vm790_vm0, %v3610_v31  ;;  %v3620_v7 = vmax.f32 %v3613_v8, %v3615_v14  ;;  %v3817_v31 = vld [vmem:[%s13831_s5 + $0x30] sm:$0xff]  ;;  %v9354_v8 = vpack.c.bf16 %v3816_v11, %v3815_v17  ;;  %v3818_v14 = vld [vmem:[%s13831_s5 + $0x38] sm:$0xff]  ;;  %v3645_v17 = vld [vmem:[%s14300_s17 + $0x28] sm:$0xff] }
 0x4b0   : > { %v3646_v11 = vld [vmem:[%s14300_s17 + $0x30] sm:$0xff] }
 0x4b1   : > { %9355 = vmatprep.subr.bf16.mxu0 %v9354_v8 }
 0x4b2   : > { %9357 = vmatpush3.bf16.msra.mxu0 %v9354_v8 }
 0x4b3   : > { %v3617_v2 = vld [vmem:[#allocation2 + $0x10e] ss:$2 sm:$0xff]  ;;  %v3619_v3 = vld [vmem:[#allocation2 + $0x10f] ss:$2 sm:$0xff] }
 0x4b4   : > { %v3621_v6 = vmax.f32 %v3617_v2, %v3619_v3  ;;  %v10907_v2 = vmov 0.0   ;;  %v9358_v3 = vpack.c.bf16 %v3818_v14, %v3817_v31 }
 0x4b5   : > { %791 = vst.msk [vmem:[#allocation4] sm:$0xff] %vm790_vm0, %v10907_v2  ;;  %792 = vst.msk [vmem:[#allocation4 + $0x8] sm:$0xff] %vm790_vm0, %v10907_v2  ;;  %9145 = vmatprep.mubr.msk.f32.mxu1 %vm10909_vm6, %v10907_v2 }
 0x4b6   : > { %v3622_v9 = vmax.f32 %v3620_v7, %v3621_v6  ;;  %v3630_v18 = vld [vmem:[#allocation3 + $0x30] sm:$0xff]  ;;  %793 = vst.msk [vmem:[#allocation4 + $0x10] sm:$0xff] %vm790_vm0, %v10907_v2  ;;  %794 = vst.msk [vmem:[#allocation4 + $0x18] sm:$0xff] %vm790_vm0, %v10907_v2  ;;  %v3801_v7 = vld [vmem:[%s13831_s5] sm:$0xff]  ;;  %9359 = vmatprep.subr.bf16.mxu0 %v9358_v3 }
 0x4b7   : > { %v3666_v12 = vsel %vm790_vm0, %v3630_v18, 0.0  ;;  %795 = vst.msk [vmem:[#allocation4 + $0x20] sm:$0xff] %vm790_vm0, %v10907_v2  ;;  %796 = vst.msk [vmem:[#allocation4 + $0x28] sm:$0xff] %vm790_vm0, %v10907_v2  ;;  %v3802_v6 = vld [vmem:[%s13831_s5 + $0x8] sm:$0xff]  ;;  %9361 = vmatpush3.bf16.msra.mxu0 %v9358_v3 }
 0x4b8   : > { %3623 = vst.msk [vmem:[#allocation3 + $0x38] sm:$0xff] %vm790_vm0, %v3622_v9  ;;  %3667 = vadd.xlane.f32.xlu1 %v3666_v12  ;;  %797 = vst.msk [vmem:[#allocation4 + $0x30] sm:$0xff] %vm790_vm0, %v10907_v2  ;;  %v13215_v9 = vpack.c.bf16 %v3802_v6, %v3801_v7 }
 0x4b9   : > { %798 = vst.msk [vmem:[#allocation4 + $0x38] sm:$0xff] %vm790_vm0, %v10907_v2  ;;  %799 = vst.msk [vmem:[#allocation4 + $0x40] sm:$0xff] %vm790_vm0, %v10907_v2 }
 0x4ba   : > { %800 = vst.msk [vmem:[#allocation4 + $0x48] sm:$0xff] %vm790_vm0, %v10907_v2  ;;  %801 = vst.msk [vmem:[#allocation4 + $0x50] sm:$0xff] %vm790_vm0, %v10907_v2  ;;  %9363 = vmatprep.subr.bf16.mxu0 %v13215_v9 }
 0x4bb   : > { %802 = vst.msk [vmem:[#allocation4 + $0x58] sm:$0xff] %vm790_vm0, %v10907_v2 }
 0x4bc   : > { %804 = vst.msk [vmem:[#allocation4 + $0x60] sm:$0xf] %vm803_vm2, %v10907_v2 }
 0x4bd   : > { %806 = vst.msk [vmem:[#allocation7] sm:$0xff] %vm805_vm3, %v10907_v2  ;;  %807 = vst.msk [vmem:[#allocation7 + $0x8] sm:$0xff] %vm805_vm3, %v10907_v2 }
 0x4be   : > { %808 = vst.msk [vmem:[#allocation7 + $0x10] sm:$0xff] %vm805_vm3, %v10907_v2  ;;  %809 = vst.msk [vmem:[#allocation7 + $0x18] sm:$0xff] %vm805_vm3, %v10907_v2 }
 0x4bf   : > { %v3631_v16 = vld [vmem:[#allocation3 + $0x38] sm:$0xff]  ;;  %811 = vst.msk [vmem:[#allocation7 + $0x20] sm:$0xf] %vm810_vm4, %v10907_v2 }
 0x4c0   : > { %v3669_v39 = vsel %vm790_vm0, %v3631_v16, 0.0 }
 0x4c1   : > { %3670 = vadd.xlane.f32.xlu0 %v3669_v39 }
 0x4cf   : > { %v3650_v47 = vpop.xlane.xlu0 %3649 }
 0x4d3   : > { %v3656_v30 = vpop.xlane.xlu0 %3655 }
 0x4d4   : > { %v3653_v5 = vpop.xlane.xlu1 %3652 }
 0x4d5   : > { %v3672_v61 = vadd.f32 %v3653_v5, %v3650_v47 }
 0x4d7   : > { %v3673_v43 = vadd.f32 %v3672_v61, %v3656_v30 }
 0x4f4   : > { %v3659_v55 = vpop.xlane.xlu0 %3658 }
 0x4f5   : > { %v3674_v54 = vadd.f32 %v3673_v43, %v3659_v55 }
 0x519   : > { %v3662_v40 = vpop.xlane.xlu1 %3661 }
 0x51a   : > { %v3675_v59 = vadd.f32 %v3674_v54, %v3662_v40 }
 0x535   : > { %v3665_v20 = vpop.xlane.xlu0 %3664 }
 0x536   : > { %v3676_v35 = vadd.f32 %v3675_v59, %v3665_v20 }
 0x545   : > { %v3668_v36 = vpop.xlane.xlu1 %3667 }
 0x546   : > { %v3677_v0 = vadd.f32 %v3676_v35, %v3668_v36 }
 0x54e   : > { %v3671_v28 = vpop.xlane.xlu0 %3670 }
 0x54f   : > { %v3678_v53 = vadd.f32 %v3677_v0, %v3671_v28 }
 0x551   : > { %v3679_v13 = vrot.slane %v3678_v53, 4 }
 0x553   : > { %v3680_v4 = vadd.f32 %v3679_v13, %v3678_v53 }
 0x555   : > { %v3681_v56 = vrot.slane %v3680_v4, 2 }
 0x557   : > { %v3682_v37 = vadd.f32 %v3681_v56, %v3680_v4 }
 0x559   : > { %v3683_v63 = vrot.slane %v3682_v37, 1 }
 0x55b   : > { %v3684_v49 = vadd.f32 %v3683_v63, %v3682_v37 }
 0x55d   : > { %v3686_v26 = vmul.f32 0.00048828125, %v3684_v49  ;;  %v3632_v49 = vld [vmem:[%s14299_s22] sm:$0xff] }
 0x55f   : > { %v13130_v24 = vsub.f32 %v10398_v22, %v3686_v26  ;;  %v13132_v42 = vsub.f32 %v10399_v29, %v3686_v26  ;;  %v13135_v32 = vsub.f32 %v14297_v48, %v3686_v26  ;;  %v13138_v60 = vsub.f32 %v14298_v25, %v3686_v26  ;;  %v3634_v22 = vld [vmem:[%s14299_s22 + $0x10] sm:$0xff]  ;;  %v3640_v48 = vld [vmem:[%s14300_s17] sm:$0xff]  ;;  %v3635_v25 = vld [vmem:[%s14299_s22 + $0x18] sm:$0xff] }
 0x560   : > { %v13144_v23 = vsub.f32 %v3629_v46, %v3686_v26  ;;  %v13147_v62 = vsub.f32 %v13035_v58, %v3686_v26  ;;  %v13155_v38 = vsub.f32 %v3631_v16, %v3686_v26  ;;  %v13157_v51 = vsub.f32 %v3630_v18, %v3686_v26  ;;  %v3805_v18 = vld [vmem:[#allocation4 + $0x1] sm:$0xff] }
 0x561   : > { %v3696_v21 = vmul.f32 %v13130_v24, %v13130_v24  ;;  %v3695_v45 = vmul.f32 %v13132_v42, %v13132_v42  ;;  %v3698_v19 = vmul.f32 %v13135_v32, %v13135_v32  ;;  %v3697_v27 = vmul.f32 %v13138_v60, %v13138_v60  ;;  %8930 = vmatprep.mubr.msk.f32.mxu0 %vm790_vm0, %v3805_v18  ;;  %v3633_v26 = vld [vmem:[%s14299_s22 + $0x8] sm:$0xff] }
 0x562   : > { %v3700_v34 = vmul.f32 %v13144_v23, %v13144_v23  ;;  %v3699_v52 = vmul.f32 %v13147_v62, %v13147_v62  ;;  %v3702_v57 = vmul.f32 %v13155_v38, %v13155_v38  ;;  %v3701_v33 = vmul.f32 %v13157_v51, %v13157_v51 }
 0x563   : > { %v3706_v10 = vsel %vm790_vm0, %v3696_v21, 0.0  ;;  %v3703_v50 = vsel %vm790_vm0, %v3695_v45, 0.0  ;;  %v3712_v46 = vsel %vm790_vm0, %v3698_v19, 0.0  ;;  %v3709_v58 = vsel %vm790_vm0, %v3697_v27, 0.0  ;;  %v3636_v21 = vld [vmem:[%s14299_s22 + $0x20] sm:$0xff]  ;;  %v3637_v45 = vld [vmem:[%s14299_s22 + $0x28] sm:$0xff] }
 0x564   : > { %3707 = vadd.xlane.f32.xlu0 %v3706_v10  ;;  %3704 = vadd.xlane.f32.xlu1 %v3703_v50  ;;  %v3718_v1 = vsel %vm790_vm0, %v3700_v34, 0.0  ;;  %v3715_v44 = vsel %vm790_vm0, %v3699_v52, 0.0  ;;  %v3724_v15 = vsel %vm790_vm0, %v3702_v57, 0.0  ;;  %v3721_v41 = vsel %vm790_vm0, %v3701_v33, 0.0  ;;  %v3641_v50 = vld [vmem:[%s14300_s17 + $0x8] sm:$0xff]  ;;  %v3639_v34 = vld [vmem:[%s14299_s22 + $0x38] sm:$0xff] }
 0x568   : > { %3713 = vadd.xlane.f32.xlu0 %v3712_v46  ;;  %3710 = vadd.xlane.f32.xlu1 %v3709_v58  ;;  %v3638_v58 = vld [vmem:[%s14299_s22 + $0x30] sm:$0xff] }
 0x56c   : > { %3719 = vadd.xlane.f32.xlu0 %v3718_v1  ;;  %3716 = vadd.xlane.f32.xlu1 %v3715_v44 }
 0x570   : > { %3725 = vadd.xlane.f32.xlu0 %v3724_v15  ;;  %3722 = vadd.xlane.f32.xlu1 %v3721_v41 }
 0x5f1   : > { %v3708_v12 = vpop.xlane.xlu0 %3707  ;;  %v3705_v16 = vpop.xlane.xlu1 %3704 }
 0x5f2   : > { %v3727_v39 = vadd.f32 %v3708_v12, %v3705_v16 }
 0x5f5   : > { %v3714_v47 = vpop.xlane.xlu0 %3713  ;;  %v3711_v5 = vpop.xlane.xlu1 %3710 }
 0x5f6   : > { %v3728_v30 = vadd.f32 %v3727_v39, %v3711_v5 }
 0x5f8   : > { %v3729_v61 = vadd.f32 %v3728_v30, %v3714_v47 }
 0x5f9   : > { %v3720_v55 = vpop.xlane.xlu0 %3719  ;;  %v3717_v43 = vpop.xlane.xlu1 %3716 }
 0x5fa   : > { %v3730_v40 = vadd.f32 %v3729_v61, %v3717_v43 }
 0x5fc   : > { %v3731_v54 = vadd.f32 %v3730_v40, %v3720_v55 }
 0x5fd   : > { %v3723_v20 = vpop.xlane.xlu1 %3722  ;;  %v3726_v36 = vpop.xlane.xlu0 %3725 }
 0x5fe   : > { %v3732_v59 = vadd.f32 %v3731_v54, %v3723_v20  ;;  %v3803_v54 = vld [vmem:[%s13831_s5 + $0x10] sm:$0xff]  ;;  %v3804_v20 = vld [vmem:[%s13831_s5 + $0x18] sm:$0xff] }
 0x600   : > { %v3733_v35 = vadd.f32 %v3732_v59, %v3726_v36  ;;  %v9366_v59 = vpack.c.bf16 %v3804_v20, %v3803_v54  ;;  %v4119_v36 = vld [vmem:[%s13831_s5 + $0x40] sm:$0xff] }
 0x602   : > { %v3734_v0 = vrot.slane %v3733_v35, 4 }
 0x604   : > { %v3735_v28 = vadd.f32 %v3734_v0, %v3733_v35 }
 0x606   : > { %v3736_v53 = vrot.slane %v3735_v28, 2 }
 0x608   : > { %v3737_v13 = vadd.f32 %v3736_v53, %v3735_v28  ;;  %v4120_v28 = vld [vmem:[%s13831_s5 + $0x48] sm:$0xff] }
 0x609   : > { %v9370_v53 = vpack.c.bf16 %v4120_v28, %v4119_v36 }
 0x60a   : > { %v3738_v4 = vrot.slane %v3737_v13, 1 }
 0x60c   : > { %v3739_v56 = vadd.f32 %v3738_v4, %v3737_v13 }
 0x60e   : > { %v3740_v37 = vmul.f32 0.00048828125, %v3739_v56 }
 0x610   : > { %v3741_v63 = vadd.f32 1e-16, %v3740_v37 }
 0x612   : > { %10380 = vrsqrt.f32 %v3741_v63 }
 0x61c   : > { %v10381_v29 = vpop.eup %10380 }
 0x61d   : > { %v3743_v10 = vmul.f32 %v10381_v29, %v13132_v42  ;;  %v3744_v19 = vmul.f32 %v10381_v29, %v13130_v24  ;;  %v3745_v27 = vmul.f32 %v10381_v29, %v13138_v60  ;;  %v3746_v46 = vmul.f32 %v10381_v29, %v13135_v32  ;;  %v3642_v42 = vld [vmem:[%s14300_s17 + $0x10] sm:$0xff]  ;;  %v3643_v24 = vld [vmem:[%s14300_s17 + $0x18] sm:$0xff]  ;;  %v3644_v32 = vld [vmem:[%s14300_s17 + $0x20] sm:$0xff] }
 0x61e   : > { %v3747_v60 = vmul.f32 %v10381_v29, %v13147_v62  ;;  %v3748_v52 = vmul.f32 %v10381_v29, %v13144_v23  ;;  %v3749_v1 = vmul.f32 %v10381_v29, %v13157_v51  ;;  %v3750_v44 = vmul.f32 %v10381_v29, %v13155_v38  ;;  %v3647_v23 = vld [vmem:[%s14300_s17 + $0x38] sm:$0xff] }
 0x61f   : > { %v3751_v57 = vmul.f32 %v3743_v10, %v3632_v49  ;;  %v3752_v33 = vmul.f32 %v3744_v19, %v3633_v26  ;;  %v3753_v15 = vmul.f32 %v3745_v27, %v3634_v22  ;;  %v3754_v41 = vmul.f32 %v3746_v46, %v3635_v25  ;;  %v3791_v49 = vld [vmem:[#allocation4] sm:$0xff]  ;;  %v4121_v22 = vld [vmem:[%s13831_s5 + $0x50] sm:$0xff]  ;;  %v4122_v29 = vld [vmem:[%s13831_s5 + $0x58] sm:$0xff] }
 0x620   : > { %v3755_v62 = vmul.f32 %v3747_v60, %v3636_v21  ;;  %v3756_v51 = vmul.f32 %v3748_v52, %v3637_v45  ;;  %v3757_v31 = vmul.f32 %v3749_v1, %v3638_v58  ;;  %v3758_v38 = vmul.f32 %v3750_v44, %v3639_v34  ;;  %v4288_v21 = vld [vmem:[%s13831_s5 + $0x60] sm:$0xff]  ;;  %v4289_v45 = vld [vmem:[%s13831_s5 + $0x68] sm:$0xff]  ;;  %v4290_v60 = vld [vmem:[%s13831_s5 + $0x70] sm:$0xff] }
 0x621   : > { %v3759_v8 = vadd.f32 %v3751_v57, %v3640_v48  ;;  %v3760_v14 = vadd.f32 %v3752_v33, %v3641_v50  ;;  %v3761_v3 = vadd.f32 %v3753_v15, %v3642_v42  ;;  %v3762_v7 = vadd.f32 %v3754_v41, %v3643_v24  ;;  %v4109_v24 = vld [vmem:[#allocation4 + $0x2] sm:$0xff]  ;;  %v4291_v52 = vld [vmem:[%s13831_s5 + $0x78] sm:$0xff] }
 0x622   : > { %v3763_v6 = vadd.f32 %v3755_v62, %v3644_v32  ;;  %v3764_v18 = vadd.f32 %v3756_v51, %v3645_v17  ;;  %v3765_v12 = vadd.f32 %v3757_v31, %v3646_v11  ;;  %v3766_v16 = vadd.f32 %v3758_v38, %v3647_v23  ;;  %v4457_v57 = vld [vmem:[%s13831_s5 + $0x80] sm:$0xff]  ;;  %v4458_v33 = vld [vmem:[%s13831_s5 + $0x88] sm:$0xff] }
 0x623   : > { %3767 = vst.msk [vmem:[#allocation3] sm:$0xff] %vm790_vm0, %v3759_v8  ;;  %3768 = vst.msk [vmem:[#allocation3 + $0x8] sm:$0xff] %vm790_vm0, %v3760_v14  ;;  %v9374_v48 = vpack.c.bf16 %v4122_v29, %v4121_v22  ;;  %v9378_v50 = vpack.c.bf16 %v4289_v45, %v4288_v21  ;;  %v9382_v1 = vpack.c.bf16 %v4291_v52, %v4290_v60  ;;  %v4459_v8 = vld [vmem:[%s13831_s5 + $0x90] sm:$0xff]  ;;  %v4460_v14 = vld [vmem:[%s13831_s5 + $0x98] sm:$0xff] }
 0x624   : > { %3769 = vst.msk [vmem:[#allocation3 + $0x10] sm:$0xff] %vm790_vm0, %v3761_v3  ;;  %3770 = vst.msk [vmem:[#allocation3 + $0x18] sm:$0xff] %vm790_vm0, %v3762_v7  ;;  %v9386_v41 = vpack.c.bf16 %v4458_v33, %v4457_v57  ;;  %v9390_v3 = vpack.c.bf16 %v4460_v14, %v4459_v8  ;;  %v4626_v7 = vld [vmem:[%s13831_s5 + $0xa0] sm:$0xff]  ;;  %v5135_v60 = vld [vmem:[%s13831_s5 + $0x110] sm:$0xff] }
 0x625   : > { %3771 = vst.msk [vmem:[#allocation3 + $0x20] sm:$0xff] %vm790_vm0, %v3763_v6  ;;  %3772 = vst.msk [vmem:[#allocation3 + $0x28] sm:$0xff] %vm790_vm0, %v3764_v18  ;;  %v4627_v6 = vld [vmem:[%s13831_s5 + $0xa8] sm:$0xff]  ;;  %v5136_v52 = vld [vmem:[%s13831_s5 + $0x118] sm:$0xff] }
 0x626   : > { %3773 = vst.msk [vmem:[#allocation3 + $0x30] sm:$0xff] %vm790_vm0, %v3765_v12  ;;  %3774 = vst.msk [vmem:[#allocation3 + $0x38] sm:$0xff] %vm790_vm0, %v3766_v16  ;;  %v9394_v18 = vpack.c.bf16 %v4627_v6, %v4626_v7 }
 0x62a   : > { %v3775_v39 = vld [vmem:[#allocation3] sm:$0xff]  ;;  %v3777_v47 = vld [vmem:[#allocation3 + $0x8] sm:$0xff] }
 0x62b   : > { %v3779_v5 = vld [vmem:[#allocation3 + $0x10] sm:$0xff]  ;;  %3776 = vst.msk [vmem:[#allocation4 + $0xb] sm:$0xff] %vm790_vm0, %v3775_v39  ;;  %3778 = vst.msk [vmem:[#allocation4 + $0x15] sm:$0xff] %vm790_vm0, %v3777_v47  ;;  %v3781_v30 = vld [vmem:[#allocation3 + $0x18] sm:$0xff] }
 0x62c   : > { %3780 = vst.msk [vmem:[#allocation4 + $0x1f] sm:$0xff] %vm790_vm0, %v3779_v5  ;;  %v3783_v61 = vld [vmem:[#allocation3 + $0x20] sm:$0xff]  ;;  %v3785_v55 = vld [vmem:[#allocation3 + $0x28] sm:$0xff]  ;;  %3782 = vst.msk [vmem:[#allocation4 + $0x29] sm:$0xff] %vm790_vm0, %v3781_v30 }
 0x62d   : > { %3784 = vst.msk [vmem:[#allocation4 + $0x33] sm:$0xff] %vm790_vm0, %v3783_v61  ;;  %3786 = vst.msk [vmem:[#allocation4 + $0x3d] sm:$0xff] %vm790_vm0, %v3785_v55  ;;  %v3787_v43 = vld [vmem:[#allocation3 + $0x30] sm:$0xff]  ;;  %v3789_v40 = vld [vmem:[#allocation3 + $0x38] sm:$0xff] }
 0x62e   : > { %3788 = vst.msk [vmem:[#allocation4 + $0x47] sm:$0xff] %vm790_vm0, %v3787_v43  ;;  %3790 = vst.msk [vmem:[#allocation4 + $0x51] sm:$0xff] %vm790_vm0, %v3789_v40  ;;  %v4628_v39 = vld [vmem:[%s13831_s5 + $0xb0] sm:$0xff]  ;;  %v4629_v47 = vld [vmem:[%s13831_s5 + $0xb8] sm:$0xff] }
 0x62f   : > { %v9398_v30 = vpack.c.bf16 %v4629_v47, %v4628_v39  ;;  %v4795_v55 = vld [vmem:[%s13831_s5 + $0xc0] sm:$0xff]  ;;  %v4796_v43 = vld [vmem:[%s13831_s5 + $0xc8] sm:$0xff] }
 0x630   : > { %v9402_v54 = vpack.c.bf16 %v4796_v43, %v4795_v55  ;;  %v8630_v39 = vld [vmem:[#allocation15] ss:$0 sm:$0xff] }
 0x632   : > { %v3806_v35 = vld [vmem:[#allocation4 + $0x9] sm:$0xff]  ;;  %v3807_v0 = vld [vmem:[#allocation4 + $0x11] sm:$0xff] }
 0x633   : > { %8931 = vmatmul.mubr.msk.f32.vlgmr.msra.gmra.mrb[0].mxu0 %vm790_vm0, %v3806_v35  ;;  %v3808_v13 = vld [vmem:[#allocation4 + $0x19] sm:$0xff]  ;;  %v3809_v4 = vld [vmem:[#allocation4 + $0x21] sm:$0xff]  ;;  %v3810_v56 = vld [vmem:[#allocation4 + $0x29] sm:$0xff] }
 0x634   : > { %9365 = vmatpush3.bf16.msra.mxu0 %v13215_v9  ;;  %8933 = vmatprep.mubr.msk.f32.mxu0 %vm790_vm0, %v3807_v0  ;;  %v3811_v37 = vld [vmem:[#allocation4 + $0x31] sm:$0xff]  ;;  %v3812_v9 = vld [vmem:[#allocation4 + $0x39] sm:$0xff]  ;;  %v3792_v25 = vld [vmem:[#allocation4 + $0x8] sm:$0xff] }
 0x635   : > { %9367 = vmatprep.subr.bf16.mxu0 %v9366_v59  ;;  %v3813_v63 = vld [vmem:[#allocation4 + $0x41] sm:$0xff]  ;;  %v3814_v26 = vld [vmem:[#allocation4 + $0x49] sm:$0x3f]  ;;  %v3793_v10 = vld [vmem:[#allocation4 + $0x10] sm:$0xff] }
 0x636   : > { %v3794_v19 = vld [vmem:[#allocation4 + $0x18] sm:$0xff]  ;;  %v3795_v27 = vld [vmem:[#allocation4 + $0x20] sm:$0xff]  ;;  %v3796_v46 = vld [vmem:[#allocation4 + $0x28] sm:$0xff] }
 0x637   : > { %8934 = vmatmul.mubr.msk.f32.gmra.mrb[2].mxu0 %vm790_vm0, %v3808_v13  ;;  %v3797_v58 = vld [vmem:[#allocation4 + $0x30] sm:$0xff]  ;;  %v3798_v34 = vld [vmem:[#allocation4 + $0x38] sm:$0xff]  ;;  %v3799_v42 = vld [vmem:[#allocation4 + $0x40] sm:$0xff] }
 0x638   : > { %8936 = vmatprep.mubr.msk.f32.mxu0 %vm790_vm0, %v3809_v4  ;;  %9369 = vmatpush3.bf16.msra.mxu0 %v9366_v59  ;;  %v3800_v32 = vld [vmem:[#allocation4 + $0x48] sm:$0x3f]  ;;  %v4111_v15 = vld [vmem:[#allocation4 + $0x12] sm:$0xff]  ;;  %v4112_v17 = vld [vmem:[#allocation4 + $0x1a] sm:$0xff] }
 0x639   : > { %9371 = vmatprep.subr.bf16.mxu0 %v9370_v53  ;;  %v4110_v44 = vld [vmem:[#allocation4 + $0xa] sm:$0xff]  ;;  %v4113_v11 = vld [vmem:[#allocation4 + $0x22] sm:$0xff]  ;;  %v4115_v62 = vld [vmem:[#allocation4 + $0x32] sm:$0xff] }
 0x63a   : > { %v4114_v23 = vld [vmem:[#allocation4 + $0x2a] sm:$0xff]  ;;  %v4116_v51 = vld [vmem:[#allocation4 + $0x3a] sm:$0xff]  ;;  %v4117_v31 = vld [vmem:[#allocation4 + $0x42] sm:$0xff] }
 0x63b   : > { %8937 = vmatmul.mubr.msk.f32.gmra.mrb[4].mxu0 %vm790_vm0, %v3810_v56  ;;  %v4118_v38 = vld [vmem:[#allocation4 + $0x4a] sm:$0x3f]  ;;  %v4287_v16 = vld [vmem:[#allocation4 + $0x52] sm:$0x3f]  ;;  %v4449_v40 = vld [vmem:[#allocation4 + $0x1b] sm:$0xff] }
 0x63c   : > { %8939 = vmatprep.mubr.msk.f32.mxu0 %vm790_vm0, %v3811_v37  ;;  %v4286_v12 = vld [vmem:[#allocation4 + $0x4a] sm:$0xff]  ;;  %v4448_v61 = vld [vmem:[#allocation4 + $0x13] sm:$0xff]  ;;  %v4453_v35 = vld [vmem:[#allocation4 + $0x3b] sm:$0xff] }
 0x63d   : > { %v4447_v5 = vld [vmem:[#allocation4 + $0xb] sm:$0xff]  ;;  %v4450_v20 = vld [vmem:[#allocation4 + $0x23] sm:$0xff]  ;;  %v4452_v36 = vld [vmem:[#allocation4 + $0x33] sm:$0xff] }
 0x63e   : > { %v4451_v59 = vld [vmem:[#allocation4 + $0x2b] sm:$0xff]  ;;  %v4454_v0 = vld [vmem:[#allocation4 + $0x43] sm:$0xff]  ;;  %v4798_v4 = vld [vmem:[%s13831_s5 + $0xd8] sm:$0xff] }
 0x63f   : > { %8940 = vmatmul.mubr.msk.f32.gmra.mrb[6].mxu0 %vm790_vm0, %v3812_v9  ;;  %v4455_v28 = vld [vmem:[#allocation4 + $0x4b] sm:$0xff]  ;;  %v4617_v9 = vld [vmem:[#allocation4 + $0x14] sm:$0xff]  ;;  %v4622_v21 = vld [vmem:[#allocation4 + $0x3c] sm:$0xff] }
 0x640   : > { %8942 = vmatprep.mubr.msk.f32.mxu0 %vm790_vm0, %v3813_v63  ;;  %v4797_v13 = vld [vmem:[%s13831_s5 + $0xd0] sm:$0xff]  ;;  %v4964_v63 = vld [vmem:[%s13831_s5 + $0xe0] sm:$0xff] }
 0x641   : > { %v4616_v56 = vld [vmem:[#allocation4 + $0xc] sm:$0xff]  ;;  %v9406_v37 = vpack.c.bf16 %v4798_v4, %v4797_v13  ;;  %v4619_v29 = vld [vmem:[#allocation4 + $0x24] sm:$0xff] }
 0x642   : > { %v4623_v45 = vld [vmem:[#allocation4 + $0x44] sm:$0xff]  ;;  %v5126_v14 = vld [vmem:[#allocation4 + $0x2e] sm:$0xff] }
 0x643   : > { %8943 = vmatmul.mubr.msk.f32.gmra.mrb[8].mxu0 %vm790_vm0, %v3814_v26  ;;  %v4618_v26 = vld [vmem:[#allocation4 + $0x1c] sm:$0xff]  ;;  %v4956_v33 = vld [vmem:[#allocation4 + $0x25] sm:$0xff] }
 0x644   : > { %8953 = vmatprep.mubr.msk.f32.mxu0 %vm790_vm0, %v3791_v49  ;;  %v4965_v49 = vld [vmem:[%s13831_s5 + $0xe8] sm:$0xff]  ;;  %v4955_v57 = vld [vmem:[#allocation4 + $0x1d] sm:$0xff] }
 0x645   : > { %v9410_v22 = vpack.c.bf16 %v4965_v49, %v4964_v63  ;;  %v5125_v8 = vld [vmem:[#allocation4 + $0x26] sm:$0xff]  ;;  %v5128_v7 = vld [vmem:[#allocation4 + $0x3e] sm:$0xff] }
 0x646   : > { %v5129_v6 = vld [vmem:[#allocation4 + $0x46] sm:$0xff] }
 0x647   : > { %8954 = vmatmul.mubr.msk.f32.vlgmr.msra.gmra.mrb[0].mxu0 %vm790_vm0, %v3792_v25  ;;  %v4621_v25 = vld [vmem:[#allocation4 + $0x34] sm:$0xff] }
 0x648   : > { %9373 = vmatpush3.bf16.msra.mxu0 %v9370_v53  ;;  %8956 = vmatprep.mubr.msk.f32.mxu0 %vm790_vm0, %v3793_v10  ;;  %v4456_v53 = vld [vmem:[#allocation4 + $0x53] sm:$0x3f] }
 0x649   : > { %9375 = vmatprep.subr.bf16.mxu0 %v9374_v48  ;;  %v4624_v10 = vld [vmem:[#allocation4 + $0x4c] sm:$0xff] }
 0x64b   : > { %8957 = vmatmul.mubr.msk.f32.gmra.mrb[2].mxu0 %vm790_vm0, %v3794_v19  ;;  %v4966_v19 = vld [vmem:[%s13831_s5 + $0xf0] sm:$0xff] }
 0x64c   : > { %8959 = vmatprep.mubr.msk.f32.mxu0 %vm790_vm0, %v3795_v27  ;;  %9377 = vmatpush3.bf16.msra.mxu0 %v9374_v48  ;;  %v4620_v48 = vld [vmem:[#allocation4 + $0x2c] sm:$0xff]  ;;  %v4967_v27 = vld [vmem:[%s13831_s5 + $0xf8] sm:$0xff] }
 0x64d   : > { %9379 = vmatprep.subr.bf16.mxu0 %v9378_v50 }
 0x64f   : > { %8960 = vmatmul.mubr.msk.f32.gmra.mrb[4].mxu0 %vm790_vm0, %v3796_v46  ;;  %v9414_v46 = vpack.c.bf16 %v4967_v27, %v4966_v19 }
 0x650   : > { %8962 = vmatprep.mubr.msk.f32.mxu0 %vm790_vm0, %v3797_v58  ;;  %v5133_v58 = vld [vmem:[%s13831_s5 + $0x100] sm:$0xff] }
 0x653   : > { %8963 = vmatmul.mubr.msk.f32.gmra.mrb[6].mxu0 %vm790_vm0, %v3798_v34  ;;  %v5134_v34 = vld [vmem:[%s13831_s5 + $0x108] sm:$0xff] }
 0x654   : > { %8965 = vmatprep.mubr.msk.f32.mxu0 %vm790_vm0, %v3799_v42  ;;  %v9418_v42 = vpack.c.bf16 %v5134_v34, %v5133_v58 }
 0x657   : > { %8966 = vmatmul.mubr.msk.f32.gmra.mrb[8].mxu0 %vm790_vm0, %v3800_v32  ;;  %v4794_v32 = vld [vmem:[#allocation4 + $0x5c] sm:$0x3f] }
 0x658   : > { %8976 = vmatprep.mubr.msk.f32.mxu0 %vm790_vm0, %v4109_v24  ;;  %v4793_v24 = vld [vmem:[#allocation4 + $0x54] sm:$0xff] }
 0x65b   : > { %8977 = vmatmul.mubr.msk.f32.vlgmr.msra.gmra.mrb[0].mxu0 %vm790_vm0, %v4110_v44 }
 0x65c   : > { %9381 = vmatpush3.bf16.msra.mxu0 %v9378_v50  ;;  %8979 = vmatprep.mubr.msk.f32.mxu0 %vm790_vm0, %v4111_v15  ;;  %v4625_v50 = vld [vmem:[#allocation4 + $0x54] sm:$0x3f] }
 0x65d   : > { %9383 = vmatprep.subr.bf16.mxu0 %v9382_v1 }
 0x65f   : > { %8980 = vmatmul.mubr.msk.f32.gmra.mrb[2].mxu0 %vm790_vm0, %v4112_v17 }
 0x660   : > { %8982 = vmatprep.mubr.msk.f32.mxu0 %vm790_vm0, %v4113_v11  ;;  %9385 = vmatpush3.bf16.msra.mxu0 %v9382_v1  ;;  %v4954_v1 = vld [vmem:[#allocation4 + $0x15] sm:$0xff] }
 0x661   : > { %9387 = vmatprep.subr.bf16.mxu0 %v9386_v41 }
 0x663   : > { %8983 = vmatmul.mubr.msk.f32.gmra.mrb[4].mxu0 %vm790_vm0, %v4114_v23 }
 0x664   : > { %8985 = vmatprep.mubr.msk.f32.mxu0 %vm790_vm0, %v4115_v62 }
 0x667   : > { %8986 = vmatmul.mubr.msk.f32.gmra.mrb[6].mxu0 %vm790_vm0, %v4116_v51 }
 0x668   : > { %8988 = vmatprep.mubr.msk.f32.mxu0 %vm790_vm0, %v4117_v31 }
 0x66b   : > { %8989 = vmatmul.mubr.msk.f32.gmra.mrb[8].mxu0 %vm790_vm0, %v4118_v38  ;;  %v5124_v38 = vld [vmem:[#allocation4 + $0x1e] sm:$0xff] }
 0x66c   : > { %8999 = vmatprep.mubr.msk.f32.mxu0 %vm790_vm0, %v4110_v44  ;;  %v9422_v44 = vpack.c.bf16 %v5136_v52, %v5135_v60 }
 0x66f   : > { %9000 = vmatmul.mubr.msk.f32.vlgmr.msra.gmra.mrb[0].mxu0 %vm790_vm0, %v4111_v15  ;;  %v4957_v15 = vld [vmem:[#allocation4 + $0x2d] sm:$0xff] }
 0x670   : > { %9389 = vmatpush3.bf16.msra.mxu0 %v9386_v41  ;;  %9002 = vmatprep.mubr.msk.f32.mxu0 %vm790_vm0, %v4112_v17  ;;  %v4958_v41 = vld [vmem:[#allocation4 + $0x35] sm:$0xff]  ;;  %v4959_v17 = vld [vmem:[#allocation4 + $0x3d] sm:$0xff] }
 0x671   : > { %9391 = vmatprep.subr.bf16.mxu0 %v9390_v3 }
 0x673   : > { %9003 = vmatmul.mubr.msk.f32.gmra.mrb[2].mxu0 %vm790_vm0, %v4113_v11  ;;  %v4960_v11 = vld [vmem:[#allocation4 + $0x45] sm:$0xff] }
 0x674   : > { %9005 = vmatprep.mubr.msk.f32.mxu0 %vm790_vm0, %v4114_v23  ;;  %9393 = vmatpush3.bf16.msra.mxu0 %v9390_v3  ;;  %v4961_v23 = vld [vmem:[#allocation4 + $0x4d] sm:$0xff]  ;;  %v5127_v3 = vld [vmem:[#allocation4 + $0x36] sm:$0xff] }
 0x675   : > { %9395 = vmatprep.subr.bf16.mxu0 %v9394_v18 }
 0x677   : > { %9006 = vmatmul.mubr.msk.f32.gmra.mrb[4].mxu0 %vm790_vm0, %v4115_v62  ;;  %v4962_v62 = vld [vmem:[#allocation4 + $0x55] sm:$0xff] }
 0x678   : > { %9008 = vmatprep.mubr.msk.f32.mxu0 %vm790_vm0, %v4116_v51  ;;  %v4963_v51 = vld [vmem:[#allocation4 + $0x5d] sm:$0x3f] }
 0x67b   : > { %9009 = vmatmul.mubr.msk.f32.gmra.mrb[6].mxu0 %vm790_vm0, %v4117_v31  ;;  %v5123_v31 = vld [vmem:[#allocation4 + $0x16] sm:$0xff] }
 0x67c   : > { %9011 = vmatprep.mubr.msk.f32.mxu0 %vm790_vm0, %v4286_v12  ;;  %v5131_v12 = vld [vmem:[#allocation4 + $0x56] sm:$0xff] }
 0x67f   : > { %9012 = vmatmul.mubr.msk.f32.gmra.mrb[8].mxu0 %vm790_vm0, %v4287_v16  ;;  %v5132_v16 = vld [vmem:[#allocation4 + $0x5e] sm:$0x3f] }
 0x680   : > { %9022 = vmatprep.mubr.msk.f32.mxu0 %vm790_vm0, %v4447_v5 }
 0x683   : > { %9023 = vmatmul.mubr.msk.f32.vlgmr.msra.gmra.mrb[0].mxu0 %vm790_vm0, %v4448_v61 }
 0x684   : > { %9397 = vmatpush3.bf16.msra.mxu0 %v9394_v18  ;;  %9025 = vmatprep.mubr.msk.f32.mxu0 %vm790_vm0, %v4449_v40  ;;  %v5130_v18 = vld [vmem:[#allocation4 + $0x4e] sm:$0xff] }
 0x685   : > { %9399 = vmatprep.subr.bf16.mxu0 %v9398_v30 }
 0x687   : > { %9026 = vmatmul.mubr.msk.f32.gmra.mrb[2].mxu0 %vm790_vm0, %v4450_v20 }
 0x688   : > { %9028 = vmatprep.mubr.msk.f32.mxu0 %vm790_vm0, %v4451_v59  ;;  %9401 = vmatpush3.bf16.msra.mxu0 %v9398_v30 }
 0x689   : > { %9403 = vmatprep.subr.bf16.mxu0 %v9402_v54 }
 0x68b   : > { %9029 = vmatmul.mubr.msk.f32.gmra.mrb[4].mxu0 %vm790_vm0, %v4452_v36 }
 0x68c   : > { %9031 = vmatprep.mubr.msk.f32.mxu0 %vm790_vm0, %v4453_v35 }
 0x68f   : > { %9032 = vmatmul.mubr.msk.f32.gmra.mrb[6].mxu0 %vm790_vm0, %v4454_v0 }
 0x690   : > { %9034 = vmatprep.mubr.msk.f32.mxu0 %vm790_vm0, %v4455_v28 }
 0x693   : > { %9035 = vmatmul.mubr.msk.f32.gmra.mrb[8].mxu0 %vm790_vm0, %v4456_v53 }
 0x694   : > { %9045 = vmatprep.mubr.msk.f32.mxu0 %vm790_vm0, %v4616_v56 }
 0x697   : > { %9046 = vmatmul.mubr.msk.f32.vlgmr.msra.gmra.mrb[0].mxu0 %vm790_vm0, %v4617_v9 }
 0x698   : > { %9405 = vmatpush3.bf16.msra.mxu0 %v9402_v54  ;;  %9048 = vmatprep.mubr.msk.f32.mxu0 %vm790_vm0, %v4618_v26 }
 0x699   : > { %9407 = vmatprep.subr.bf16.mxu0 %v9406_v37 }
 0x69b   : > { %9049 = vmatmul.mubr.msk.f32.gmra.mrb[2].mxu0 %vm790_vm0, %v4619_v29 }
 0x69c   : > { %9051 = vmatprep.mubr.msk.f32.mxu0 %vm790_vm0, %v4620_v48  ;;  %9409 = vmatpush3.bf16.msra.mxu0 %v9406_v37 }
 0x69d   : > { %9411 = vmatprep.subr.bf16.mxu0 %v9410_v22 }
 0x69f   : > { %9052 = vmatmul.mubr.msk.f32.gmra.mrb[4].mxu0 %vm790_vm0, %v4621_v25 }
 0x6a0   : > { %9054 = vmatprep.mubr.msk.f32.mxu0 %vm790_vm0, %v4622_v21 }
 0x6a3   : > { %9055 = vmatmul.mubr.msk.f32.gmra.mrb[6].mxu0 %vm790_vm0, %v4623_v45 }
 0x6a4   : > { %9057 = vmatprep.mubr.msk.f32.mxu0 %vm790_vm0, %v4624_v10 }
 0x6a7   : > { %9058 = vmatmul.mubr.msk.f32.gmra.mrb[8].mxu0 %vm790_vm0, %v4625_v50 }
 0x6a8   : > { %9068 = vmatprep.mubr.msk.f32.mxu0 %vm790_vm0, %v4617_v9 }
 0x6ab   : > { %9069 = vmatmul.mubr.msk.f32.vlgmr.msra.gmra.mrb[0].mxu0 %vm790_vm0, %v4618_v26 }
 0x6ac   : > { %9413 = vmatpush3.bf16.msra.mxu0 %v9410_v22  ;;  %9071 = vmatprep.mubr.msk.f32.mxu0 %vm790_vm0, %v4619_v29 }
 0x6ad   : > { %9415 = vmatprep.subr.bf16.mxu0 %v9414_v46 }
 0x6af   : > { %9072 = vmatmul.mubr.msk.f32.gmra.mrb[2].mxu0 %vm790_vm0, %v4620_v48 }
 0x6b0   : > { %9074 = vmatprep.mubr.msk.f32.mxu0 %vm790_vm0, %v4621_v25  ;;  %9417 = vmatpush3.bf16.msra.mxu0 %v9414_v46 }
 0x6b1   : > { %9419 = vmatprep.subr.bf16.mxu0 %v9418_v42 }
 0x6b3   : > { %9075 = vmatmul.mubr.msk.f32.gmra.mrb[4].mxu0 %vm790_vm0, %v4622_v21 }
 0x6b4   : > { %9077 = vmatprep.mubr.msk.f32.mxu0 %vm790_vm0, %v4623_v45 }
 0x6b7   : > { %9078 = vmatmul.mubr.msk.f32.gmra.mrb[6].mxu0 %vm790_vm0, %v4624_v10 }
 0x6b8   : > { %9080 = vmatprep.mubr.msk.f32.mxu0 %vm790_vm0, %v4793_v24 }
 0x6bb   : > { %9081 = vmatmul.mubr.msk.f32.gmra.mrb[8].mxu0 %vm790_vm0, %v4794_v32 }
 0x6bc   : > { %9091 = vmatprep.mubr.msk.f32.mxu0 %vm790_vm0, %v4954_v1 }
 0x6bf   : > { %9092 = vmatmul.mubr.msk.f32.vlgmr.msra.gmra.mrb[0].mxu0 %vm790_vm0, %v4955_v57 }
 0x6c0   : > { %9421 = vmatpush3.bf16.msra.mxu0 %v9418_v42  ;;  %9094 = vmatprep.mubr.msk.f32.mxu0 %vm790_vm0, %v4956_v33 }
 0x6c1   : > { %9423 = vmatprep.subr.bf16.mxu0 %v9422_v44 }
 0x6c3   : > { %9095 = vmatmul.mubr.msk.f32.gmra.mrb[2].mxu0 %vm790_vm0, %v4957_v15 }
 0x6c4   : > { %9097 = vmatprep.mubr.msk.f32.mxu0 %vm790_vm0, %v4958_v41  ;;  %9425 = vmatpush3.bf16.msra.mxu0 %v9422_v44 }
 0x6c7   : > { %9098 = vmatmul.mubr.msk.f32.gmra.mrb[4].mxu0 %vm790_vm0, %v4959_v17 }
 0x6c8   : > { %9100 = vmatprep.mubr.msk.f32.mxu0 %vm790_vm0, %v4960_v11 }
 0x6cb   : > { %9101 = vmatmul.mubr.msk.f32.gmra.mrb[6].mxu0 %vm790_vm0, %v4961_v23 }
 0x6cc   : > { %9103 = vmatprep.mubr.msk.f32.mxu0 %vm790_vm0, %v4962_v62 }
 0x6cf   : > { %9104 = vmatmul.mubr.msk.f32.gmra.mrb[8].mxu0 %vm790_vm0, %v4963_v51 }
 0x6d0   : > { %9114 = vmatprep.mubr.msk.f32.mxu0 %vm790_vm0, %v5123_v31 }
 0x6d3   : > { %9115 = vmatmul.mubr.msk.f32.vlgmr.msra.gmra.mrb[0].mxu0 %vm790_vm0, %v5124_v38 }
 0x6d4   : > { %9117 = vmatprep.mubr.msk.f32.mxu0 %vm790_vm0, %v5125_v8 }
 0x6d7   : > { %9118 = vmatmul.mubr.msk.f32.gmra.mrb[2].mxu0 %vm790_vm0, %v5126_v14 }
 0x6d8   : > { %9120 = vmatprep.mubr.msk.f32.mxu0 %vm790_vm0, %v5127_v3 }
 0x6db   : > { %9121 = vmatmul.mubr.msk.f32.gmra.mrb[4].mxu0 %vm790_vm0, %v5128_v7 }
 0x6dc   : > { %9123 = vmatprep.mubr.msk.f32.mxu0 %vm790_vm0, %v5129_v6 }
 0x6df   : > { %9124 = vmatmul.mubr.msk.f32.gmra.mrb[6].mxu0 %vm790_vm0, %v5130_v18 }
 0x6e0   : > { %9126 = vmatprep.mubr.msk.f32.mxu0 %vm790_vm0, %v5131_v12 }
 0x6e3   : > { %9127 = vmatmul.mubr.msk.f32.gmra.mrb[8].mxu0 %vm790_vm0, %v5132_v16 }
 0x6e4   : > { %6553 = vmatprep.mubr.f32.mxu0 %v10907_v2 }
 0x7a6   : > { %v9116_v47 = vpop.f32.mrb[0].mxu0 }
 0x7a7   : > { %v5300_v5 = vadd.f32 %v9116_v47, %v8630_v39  ;;  %v5233_v30 = vpop.f32.mrb[1].mxu0 }
 0x7a8   : > { %v5299_v61 = vadd.f32 %v8630_v39, %v5233_v30 }
 0x7a9   : > { %v5310_v55 = vmax.f32 %v5300_v5, 0.0 }
 0x7aa   : > { %v5309_v43 = vmax.f32 %v5299_v61, 0.0  ;;  %v9119_v40 = vpop.f32.mrb[2].mxu0 }
 0x7ab   : > { %5320 = vst.msk [vmem:[#allocation5 + $0x8] sm:$0xff] %vm805_vm3, %v5310_v55  ;;  %v5302_v54 = vadd.f32 %v9119_v40, %v8630_v39  ;;  %v5243_v20 = vpop.f32.mrb[3].mxu0 }
 0x7ac   : > { %5319 = vst.msk [vmem:[#allocation5] sm:$0xff] %vm805_vm3, %v5309_v43  ;;  %v5301_v59 = vadd.f32 %v8630_v39, %v5243_v20 }
 0x7ad   : > { %v5312_v36 = vmax.f32 %v5302_v54, 0.0 }
 0x7ae   : > { %v5311_v35 = vmax.f32 %v5301_v59, 0.0  ;;  %v9122_v0 = vpop.f32.mrb[4].mxu0 }
 0x7af   : > { %5322 = vst.msk [vmem:[#allocation5 + $0x18] sm:$0xff] %vm805_vm3, %v5312_v36  ;;  %v5304_v28 = vadd.f32 %v9122_v0, %v8630_v39  ;;  %v5253_v53 = vpop.f32.mrb[5].mxu0 }
 0x7b0   : > { %5321 = vst.msk [vmem:[#allocation5 + $0x10] sm:$0xff] %vm805_vm3, %v5311_v35  ;;  %v5303_v13 = vadd.f32 %v8630_v39, %v5253_v53 }
 0x7b1   : > { %v5314_v4 = vmax.f32 %v5304_v28, 0.0 }
 0x7b2   : > { %v5313_v56 = vmax.f32 %v5303_v13, 0.0  ;;  %v9125_v37 = vpop.f32.mrb[6].mxu0  ;;  %v5448_v13 = vld [vmem:[#allocation19 + $0x40] sm:$0xff] }
 0x7b3   : > { %5324 = vst.msk [vmem:[#allocation5 + $0x28] sm:$0xff] %vm805_vm3, %v5314_v4  ;;  %v5306_v9 = vadd.f32 %v9125_v37, %v8630_v39  ;;  %v5330_v63 = vld [vmem:[#allocation5] ss:$2 sm:$0xf]  ;;  %v5263_v49 = vpop.f32.mrb[7].mxu0  ;;  %v5449_v4 = vld [vmem:[#allocation19 + $0x48] sm:$0xff] }
 0x7b4   : > { %5323 = vst.msk [vmem:[#allocation5 + $0x20] sm:$0xff] %vm805_vm3, %v5313_v56  ;;  %v5332_v26 = vld [vmem:[#allocation5 + $0x1] ss:$2 sm:$0xf]  ;;  %v5305_v29 = vadd.f32 %v8630_v39, %v5263_v49  ;;  %v5450_v56 = vld [vmem:[#allocation19 + $0x50] sm:$0xff]  ;;  %v10908_v37 = vmov 0.0|0.0  }
 0x7b5   : > { %v5316_v22 = vmax.f32 %v5306_v9, 0.0  ;;  %v5337_v10 = vmax.f32 %v5330_v63, %v5332_v26  ;;  %9426 = vmatprep.subr.bf16.mxu1 %v10908_v37  ;;  %v9427_v9 = vpack.c.bf16 %v5449_v4, %v5448_v13  ;;  %v5451_v63 = vld [vmem:[#allocation19 + $0x58] sm:$0xff]  ;;  %v5452_v26 = vld [vmem:[#allocation19 + $0x60] sm:$0xff] }
 0x7b6   : > { %v9128_v48 = vpop.f32.mrb[8].mxu0  ;;  %v5315_v46 = vmax.f32 %v5305_v29, 0.0  ;;  %v9430_v49 = vpack.c.bf16 %v5451_v63, %v5450_v56  ;;  %v5643_v56 = vld [vmem:[#allocation19 + $0xb0] sm:$0xff] }
 0x7b7   : > { %v5334_v25 = vld [vmem:[#allocation5 + $0xa] ss:$2 sm:$0xf]  ;;  %v5336_v21 = vld [vmem:[#allocation5 + $0xb] ss:$2 sm:$0xf]  ;;  %v5308_v45 = vadd.f32 %v9128_v48, %v8630_v39  ;;  %9428 = vmatpush3.bf16.msra.mxu1 %v9427_v9 }
 0x7b8   : > { %5326 = vst.msk [vmem:[#allocation5 + $0x38] sm:$0xff] %vm805_vm3, %v5316_v22  ;;  %v5338_v50 = vmax.f32 %v5334_v25, %v5336_v21  ;;  %v5342_v19 = vld [vmem:[#allocation5 + $0x14] ss:$2 sm:$0xf]  ;;  %v5273_v34 = vpop.f32.mrb[9].mxu0  ;;  %5325 = vst.msk [vmem:[#allocation5 + $0x30] sm:$0xff] %vm805_vm3, %v5315_v46  ;;  %9429 = vmatprep.subr.bf16.mxu1 %v10908_v37 }
 0x7b9   : > { %v5344_v27 = vld [vmem:[#allocation5 + $0x15] ss:$2 sm:$0xf]  ;;  %v5318_v58 = vmax.f32 %v5308_v45, 0.0  ;;  %v5307_v42 = vadd.f32 %v8630_v39, %v5273_v34  ;;  %v5453_v22 = vld [vmem:[#allocation19 + $0x68] sm:$0xff]  ;;  %v5455_v25 = vld [vmem:[#allocation19 + $0x78] sm:$0xff] }
 0x7ba   : > { %v5339_v24 = vmax.f32 %v5337_v10, %v5338_v50  ;;  %v5349_v52 = vmax.f32 %v5342_v19, %v5344_v27  ;;  %v5354_v33 = vld [vmem:[#allocation5 + $0x28] ss:$2 sm:$0xf]  ;;  %v5356_v15 = vld [vmem:[#allocation5 + $0x29] ss:$2 sm:$0xf]  ;;  %v9433_v29 = vpack.c.bf16 %v5453_v22, %v5452_v26 }
 0x7bb   : > { %v5346_v32 = vld [vmem:[#allocation5 + $0x1e] ss:$2 sm:$0xf]  ;;  %v5348_v60 = vld [vmem:[#allocation5 + $0x1f] ss:$2 sm:$0xf]  ;;  %v5361_v11 = vmax.f32 %v5354_v33, %v5356_v15  ;;  %9431 = vmatpush3.bf16.msra.mxu1 %v9430_v49 }
 0x7bc   : > { %5329 = vst.msk [vmem:[#allocation5 + $0x48] sm:$0x3f] %vm5328_vm5, %v5318_v58  ;;  %v5350_v1 = vmax.f32 %v5346_v32, %v5348_v60  ;;  %v5317_v44 = vmax.f32 %v5307_v42, 0.0  ;;  %9432 = vmatprep.subr.bf16.mxu1 %v10908_v37  ;;  %v5454_v48 = vld [vmem:[#allocation19 + $0x70] sm:$0xff]  ;;  %v5382_v15 = vld [vmem:[#allocation18 + $0x8] sm:$0xff]  ;;  %v5740_v26 = vld [vmem:[#allocation19 + $0xc0] sm:$0xff] }
 0x7bd   : > { %5340 = vst.msk [vmem:[#allocation6] sm:$0xf] %vm810_vm4, %v5339_v24  ;;  %v9436_v21 = vpack.c.bf16 %v5455_v25, %v5454_v48  ;;  %v5381_v33 = vld [vmem:[#allocation18] sm:$0xff]  ;;  %v5644_v9 = vld [vmem:[#allocation19 + $0xb8] sm:$0xff]  ;;  %v5741_v22 = vld [vmem:[#allocation19 + $0xc8] sm:$0xff] }
 0x7be   : > { %5327 = vst.msk [vmem:[#allocation5 + $0x40] sm:$0xff] %vm805_vm3, %v5317_v44  ;;  %v5351_v57 = vmax.f32 %v5349_v52, %v5350_v1  ;;  %v5379_v52 = vld [vmem:[#allocation16] sm:$0xff]  ;;  %v5380_v1 = vld [vmem:[#allocation16 + $0x8] sm:$0xff]  ;;  %v9460_v49 = vpack.c.bf16 %v5644_v9, %v5643_v56  ;;  %v5742_v48 = vld [vmem:[#allocation19 + $0xd0] sm:$0xff] }
 0x7bf   : > { %v5358_v41 = vld [vmem:[#allocation5 + $0x32] ss:$2 sm:$0xf]  ;;  %v5360_v17 = vld [vmem:[#allocation5 + $0x33] ss:$2 sm:$0xf]  ;;  %9434 = vmatpush3.bf16.msra.mxu1 %v9433_v29  ;;  %v9463_v29 = vpack.c.bf16 %v5741_v22, %v5740_v26 }
 0x7c0   : > { %5352 = vst.msk [vmem:[#allocation6 + $0x4] sm:$0xf] %vm810_vm4, %v5351_v57  ;;  %v5362_v23 = vmax.f32 %v5358_v41, %v5360_v17  ;;  %9435 = vmatprep.subr.bf16.mxu1 %v10908_v37  ;;  %v5743_v25 = vld [vmem:[#allocation19 + $0xd8] sm:$0xff]  ;;  %v6152_v9 = vld [vmem:[#allocation19 + $0x1c0] sm:$0xff]  ;;  %v6154_v26 = vld [vmem:[#allocation19 + $0x1d0] sm:$0xff] }
 0x7c1   : > { %v6155_v22 = vld [vmem:[#allocation19 + $0x1d8] sm:$0xff] }
 0x7c2   : > { %v5363_v31 = vmax.f32 %v5361_v11, %v5362_v23 }
 0x7c3   : > { %9437 = vmatpush3.bf16.msra.mxu1 %v9436_v21 }
 0x7c4   : > { %5364 = vst.msk [vmem:[#allocation6 + $0x8] sm:$0xf] %vm810_vm4, %v5363_v31  ;;  %9438 = vmatprep.subr.bf16.mxu1 %v10908_v37 }
 0x7c5   : > { %v5366_v62 = vld [vmem:[#allocation5 + $0x3c] ss:$2 sm:$0xf]  ;;  %v5368_v51 = vld [vmem:[#allocation5 + $0x3d] ss:$2 sm:$0xf] }
 0x7c6   : > { %v5370_v38 = vld [vmem:[#allocation5 + $0x46] ss:$2 sm:$0xf]  ;;  %v5372_v8 = vld [vmem:[#allocation5 + $0x47] ss:$2 sm:$0xf]  ;;  %v5373_v14 = vmax.f32 %v5366_v62, %v5368_v51 }
 0x7c7   : > { %v5374_v3 = vmax.f32 %v5370_v38, %v5372_v8  ;;  %v5377_v7 = vld [vmem:[#allocation6] sm:$0xff]  ;;  %v5437_v8 = vld [vmem:[#allocation19] sm:$0xff] }
 0x7c8   : > { %v5383_v6 = vsel %vm805_vm3, %v5377_v7, 0.0 }
 0x7c9   : > { %5384 = vadd.xlane.f32.xlu1 %v5383_v6  ;;  %v5375_v18 = vmax.f32 %v5373_v14, %v5374_v3  ;;  %v5438_v14 = vld [vmem:[#allocation19 + $0x8] sm:$0xff]  ;;  %v5440_v6 = vld [vmem:[#allocation19 + $0x18] sm:$0xff] }
 0x7ca   : > { %v9439_v3 = vpack.c.bf16 %v5438_v14, %v5437_v8  ;;  %v5948_v14 = vld [vmem:[#allocation19 + $0x150] sm:$0xff] }
 0x7cb   : > { %5376 = vst.msk [vmem:[#allocation6 + $0xc] sm:$0xf] %vm810_vm4, %v5375_v18 }
 0x7d2   : > { %v5378_v12 = vld [vmem:[#allocation6 + $0x8] sm:$0xff] }
 0x7d3   : > { %v5386_v16 = vsel %vm805_vm3, %v5378_v12, 0.0 }
 0x7d4   : > { %5387 = vadd.xlane.f32.xlu0 %v5386_v16  ;;  %v5441_v16 = vld [vmem:[#allocation19 + $0x20] sm:$0xff] }
 0x856   : > { %v5385_v39 = vpop.xlane.xlu1 %5384 }
 0x861   : > { %v5388_v47 = vpop.xlane.xlu0 %5387 }
 0x862   : > { %v5389_v5 = vadd.f32 %v5388_v47, %v5385_v39  ;;  %v5442_v39 = vld [vmem:[#allocation19 + $0x28] sm:$0xff] }
 0x864   : > { %v5390_v30 = vrot.slane %v5389_v5, 4 }
 0x866   : > { %v5391_v61 = vadd.f32 %v5390_v30, %v5389_v5  ;;  %v9445_v5 = vpack.c.bf16 %v5442_v39, %v5441_v16  ;;  %v5443_v30 = vld [vmem:[#allocation19 + $0x30] sm:$0xff] }
 0x868   : > { %v5392_v55 = vrot.slane %v5391_v61, 2 }
 0x86a   : > { %v5393_v43 = vadd.f32 %v5392_v55, %v5391_v61  ;;  %v5444_v61 = vld [vmem:[#allocation19 + $0x38] sm:$0xff] }
 0x86c   : > { %v5394_v40 = vrot.slane %v5393_v43, 1 }
 0x86e   : > { %v5395_v54 = vadd.f32 %v5394_v40, %v5393_v43  ;;  %v9448_v43 = vpack.c.bf16 %v5444_v61, %v5443_v30  ;;  %v5637_v40 = vld [vmem:[#allocation19 + $0x80] sm:$0xff] }
 0x870   : > { %v5397_v20 = vmul.f32 0.0009765625, %v5395_v54  ;;  %v5638_v54 = vld [vmem:[#allocation19 + $0x88] sm:$0xff] }
 0x872   : > { %v5399_v59 = vsub.f32 %v5378_v12, %v5397_v20  ;;  %v5398_v36 = vsub.f32 %v5377_v7, %v5397_v20  ;;  %v5439_v7 = vld [vmem:[#allocation19 + $0x10] sm:$0xff]  ;;  %v9451_v20 = vpack.c.bf16 %v5638_v54, %v5637_v40 }
 0x873   : > { %v9442_v12 = vpack.c.bf16 %v5440_v6, %v5439_v7  ;;  %v6051_v54 = vld [vmem:[#allocation19 + $0x190] sm:$0xff] }
 0x874   : > { %v5401_v35 = vmul.f32 %v5399_v59, %v5399_v59  ;;  %v5400_v0 = vmul.f32 %v5398_v36, %v5398_v36 }
 0x876   : > { %v5405_v28 = vsel %vm805_vm3, %v5401_v35, 0.0  ;;  %v5402_v53 = vsel %vm805_vm3, %v5400_v0, 0.0 }
 0x877   : > { %5406 = vadd.xlane.f32.xlu0 %v5405_v28  ;;  %5403 = vadd.xlane.f32.xlu1 %v5402_v53  ;;  %v5641_v28 = vld [vmem:[#allocation19 + $0xa0] sm:$0xff]  ;;  %v5642_v53 = vld [vmem:[#allocation19 + $0xa8] sm:$0xff] }
 0x878   : > { %v9457_v4 = vpack.c.bf16 %v5642_v53, %v5641_v28  ;;  %v6055_v53 = vld [vmem:[#allocation19 + $0x1b0] sm:$0xff] }
 0x904   : > { %v5407_v45 = vpop.xlane.xlu0 %5406  ;;  %v5404_v10 = vpop.xlane.xlu1 %5403 }
 0x905   : > { %v5408_v50 = vadd.f32 %v5407_v45, %v5404_v10  ;;  %v9466_v45 = vpack.c.bf16 %v5743_v25, %v5742_v48  ;;  %v5744_v10 = vld [vmem:[#allocation19 + $0xe0] sm:$0xff]  ;;  %v9514_v48 = vpack.c.bf16 %v6155_v22, %v6154_v26 }
 0x906   : > { %v6156_v25 = vld [vmem:[#allocation19 + $0x1e0] sm:$0xff] }
 0x907   : > { %v5409_v19 = vrot.slane %v5408_v50, 4 }
 0x909   : > { %v5410_v27 = vadd.f32 %v5409_v19, %v5408_v50  ;;  %v5745_v50 = vld [vmem:[#allocation19 + $0xe8] sm:$0xff] }
 0x90b   : > { %v5411_v46 = vrot.slane %v5410_v27, 2 }
 0x90d   : > { %v5412_v58 = vadd.f32 %v5411_v46, %v5410_v27  ;;  %v9469_v27 = vpack.c.bf16 %v5745_v50, %v5744_v10  ;;  %v5746_v46 = vld [vmem:[#allocation19 + $0xf0] sm:$0xff] }
 0x90e   : > { %v6158_v50 = vld [vmem:[#allocation19 + $0x1f0] sm:$0xff] }
 0x90f   : > { %v5413_v34 = vrot.slane %v5412_v58, 1 }
 0x911   : > { %v5414_v42 = vadd.f32 %v5413_v34, %v5412_v58  ;;  %v5747_v58 = vld [vmem:[#allocation19 + $0xf8] sm:$0xff] }
 0x913   : > { %v5415_v24 = vmul.f32 0.0009765625, %v5414_v42  ;;  %v9472_v42 = vpack.c.bf16 %v5747_v58, %v5746_v46  ;;  %v6255_v58 = vld [vmem:[#allocation19 + $0x200] sm:$0xff] }
 0x915   : > { %v5416_v32 = vadd.f32 1e-16, %v5415_v24  ;;  %v5843_v24 = vld [vmem:[#allocation19 + $0x100] sm:$0xff] }
 0x917   : > { %10382 = vrsqrt.f32 %v5416_v32  ;;  %v5844_v32 = vld [vmem:[#allocation19 + $0x108] sm:$0xff] }
 0x921   : > { %v10383_v60 = vpop.eup %10382 }
 0x922   : > { %v5418_v44 = vmul.f32 %v10383_v60, %v5398_v36  ;;  %v5419_v57 = vmul.f32 %v10383_v60, %v5399_v59  ;;  %v5639_v59 = vld [vmem:[#allocation19 + $0x90] sm:$0xff]  ;;  %v5640_v36 = vld [vmem:[#allocation19 + $0x98] sm:$0xff]  ;;  %v9475_v60 = vpack.c.bf16 %v5844_v32, %v5843_v24 }
 0x923   : > { %v9454_v0 = vpack.c.bf16 %v5640_v36, %v5639_v59  ;;  %v6053_v36 = vld [vmem:[#allocation19 + $0x1a0] sm:$0xff]  ;;  %v6257_v24 = vld [vmem:[#allocation19 + $0x210] sm:$0xff]  ;;  %v6258_v32 = vld [vmem:[#allocation19 + $0x218] sm:$0xff] }
 0x924   : > { %v5420_v41 = vmul.f32 %v5418_v44, %v5379_v52  ;;  %v5421_v17 = vmul.f32 %v5419_v57, %v5380_v1  ;;  %v5845_v52 = vld [vmem:[#allocation19 + $0x110] sm:$0xff]  ;;  %v5846_v1 = vld [vmem:[#allocation19 + $0x118] sm:$0xff] }
 0x925   : > { %v9478_v57 = vpack.c.bf16 %v5846_v1, %v5845_v52  ;;  %v9526_v52 = vpack.c.bf16 %v6258_v32, %v6257_v24  ;;  %v6259_v1 = vld [vmem:[#allocation19 + $0x220] sm:$0xff] }
 0x926   : > { %v5422_v11 = vadd.f32 %v5420_v41, %v5381_v33  ;;  %v5423_v23 = vadd.f32 %v5421_v17, %v5382_v15  ;;  %v5847_v33 = vld [vmem:[#allocation19 + $0x120] sm:$0xff]  ;;  %v5848_v15 = vld [vmem:[#allocation19 + $0x128] sm:$0xff] }
 0x927   : > { %v9481_v17 = vpack.c.bf16 %v5848_v15, %v5847_v33  ;;  %v6151_v33 = vld [vmem:[#allocation7 + $0x1d] sm:$0x3f] }
 0x928   : > { %5424 = vst.msk [vmem:[#allocation6] sm:$0xff] %vm805_vm3, %v5422_v11  ;;  %5425 = vst.msk [vmem:[#allocation6 + $0x8] sm:$0xff] %vm805_vm3, %v5423_v23  ;;  %v5849_v11 = vld [vmem:[#allocation19 + $0x130] sm:$0xff]  ;;  %v5850_v23 = vld [vmem:[#allocation19 + $0x138] sm:$0xff] }
 0x92f   : > { %v5426_v62 = vld [vmem:[#allocation6] sm:$0xf]  ;;  %v5428_v51 = vld [vmem:[#allocation6 + $0x4] sm:$0xf]  ;;  %v5430_v31 = vld [vmem:[#allocation6 + $0x8] sm:$0xf] }
 0x930   : > { %5427 = vst.msk [vmem:[#allocation7 + $0x7] sm:$0xf] %vm810_vm4, %v5426_v62  ;;  %5429 = vst.msk [vmem:[#allocation7 + $0xd] sm:$0xf] %vm810_vm4, %v5428_v51  ;;  %v5432_v38 = vld [vmem:[#allocation6 + $0xc] sm:$0xf]  ;;  %v9484_v51 = vpack.c.bf16 %v5850_v23, %v5849_v11 }
 0x931   : > { %5431 = vst.msk [vmem:[#allocation7 + $0x13] sm:$0xf] %vm810_vm4, %v5430_v31  ;;  %5433 = vst.msk [vmem:[#allocation7 + $0x19] sm:$0xf] %vm810_vm4, %v5432_v38  ;;  %v5946_v31 = vld [vmem:[#allocation19 + $0x140] sm:$0xff]  ;;  %v5947_v38 = vld [vmem:[#allocation19 + $0x148] sm:$0xff] }
 0x932   : > { %v9487_v8 = vpack.c.bf16 %v5947_v38, %v5946_v31  ;;  %v6262_v11 = vld [vmem:[#allocation19 + $0x238] sm:$0xff] }
 0x937   : > { %v5445_v18 = vld [vmem:[#allocation7 + $0x1] sm:$0xff]  ;;  %v5446_v47 = vld [vmem:[#allocation7 + $0x9] sm:$0xff] }
 0x938   : > { %9146 = vmatmul.mubr.msk.f32.vlgmr.msra.gmra.mrb[0].mxu1 %vm805_vm3, %v5445_v18  ;;  %v5447_v55 = vld [vmem:[#allocation7 + $0x11] sm:$0x3f]  ;;  %v5434_v35 = vld [vmem:[#allocation7] sm:$0xff]  ;;  %v13530_v13 = vld [vmem:[#allocation7 + $0x8] sm:$0xff] }
 0x939   : > { %9440 = vmatpush3.bf16.msra.mxu1 %v9439_v3  ;;  %9148 = vmatprep.mubr.msk.f32.mxu1 %vm10909_vm6, %v10907_v2  ;;  %v5436_v63 = vld [vmem:[#allocation7 + $0x10] sm:$0x3f]  ;;  %v5634_v21 = vld [vmem:[#allocation7 + $0x2] sm:$0xff]  ;;  %v5739_v62 = vld [vmem:[#allocation7 + $0x16] sm:$0x3f] }
 0x93a   : > { %9441 = vmatprep.subr.bf16.mxu1 %v10908_v37  ;;  %v5635_v19 = vld [vmem:[#allocation7 + $0xa] sm:$0xff]  ;;  %v5636_v34 = vld [vmem:[#allocation7 + $0x12] sm:$0x3f]  ;;  %v5949_v3 = vld [vmem:[#allocation19 + $0x158] sm:$0xff] }
 0x93b   : > { %v5737_v44 = vld [vmem:[#allocation7 + $0x6] sm:$0xff]  ;;  %v13559_v41 = vld [vmem:[#allocation7 + $0xe] sm:$0xff]  ;;  %v9490_v6 = vpack.c.bf16 %v5949_v3, %v5948_v14  ;;  %v5842_v30 = vld [vmem:[#allocation7 + $0x17] sm:$0x3f] }
 0x93c   : > { %9149 = vmatmul.mubr.msk.f32.gmra.mrb[2].mxu1 %vm805_vm3, %v5446_v47  ;;  %v5840_v7 = vld [vmem:[#allocation7 + $0x7] sm:$0xff]  ;;  %v5841_v16 = vld [vmem:[#allocation7 + $0xf] sm:$0xff] }
 0x93d   : > { %9443 = vmatpush3.bf16.msra.mxu1 %v9442_v12  ;;  %9151 = vmatprep.mubr.msk.f32.mxu1 %vm10909_vm6, %v10907_v2  ;;  %v5950_v18 = vld [vmem:[#allocation19 + $0x160] sm:$0xff]  ;;  %v5951_v12 = vld [vmem:[#allocation19 + $0x168] sm:$0xff]  ;;  %v5952_v47 = vld [vmem:[#allocation19 + $0x170] sm:$0xff] }
 0x93e   : > { %9444 = vmatprep.subr.bf16.mxu1 %v10908_v37  ;;  %v9493_v39 = vpack.c.bf16 %v5951_v12, %v5950_v18 }
 0x940   : > { %9152 = vmatmul.mubr.msk.f32.gmra.mrb[4].mxu1 %vm805_vm3, %v5447_v55  ;;  %v6049_v55 = vld [vmem:[#allocation19 + $0x180] sm:$0xff] }
 0x941   : > { %9446 = vmatpush3.bf16.msra.mxu1 %v9445_v5  ;;  %9170 = vmatprep.mubr.msk.f32.mxu1 %vm10909_vm6, %v10907_v2  ;;  %v5953_v5 = vld [vmem:[#allocation19 + $0x178] sm:$0xff] }
 0x942   : > { %9447 = vmatprep.subr.bf16.mxu1 %v10908_v37  ;;  %v9496_v61 = vpack.c.bf16 %v5953_v5, %v5952_v47 }
 0x945   : > { %9449 = vmatpush3.bf16.msra.mxu1 %v9448_v43  ;;  %v6050_v43 = vld [vmem:[#allocation19 + $0x188] sm:$0xff] }
 0x946   : > { %9450 = vmatprep.subr.bf16.mxu1 %v10908_v37  ;;  %v9499_v40 = vpack.c.bf16 %v6050_v43, %v6049_v55 }
 0x948   : > { %9171 = vmatmul.mubr.msk.f32.vlgmr.msra.gmra.mrb[6].mxu1 %vm805_vm3, %v5434_v35  ;;  %v6054_v35 = vld [vmem:[#allocation19 + $0x1a8] sm:$0xff] }
 0x949   : > { %9452 = vmatpush3.bf16.msra.mxu1 %v9451_v20  ;;  %9173 = vmatprep.mubr.msk.f32.mxu1 %vm10909_vm6, %v10907_v2  ;;  %v6052_v20 = vld [vmem:[#allocation19 + $0x198] sm:$0xff]  ;;  %v9505_v28 = vpack.c.bf16 %v6054_v35, %v6053_v36 }
 0x94a   : > { %9453 = vmatprep.subr.bf16.mxu1 %v10908_v37  ;;  %v9502_v59 = vpack.c.bf16 %v6052_v20, %v6051_v54 }
 0x94c   : > { %9174 = vmatmul.mubr.msk.f32.gmra.mrb[8].mxu1 %vm805_vm3, %v13530_v13 }
 0x94d   : > { %9455 = vmatpush3.bf16.msra.mxu1 %v9454_v0  ;;  %9176 = vmatprep.mubr.msk.f32.mxu1 %vm10909_vm6, %v10907_v2  ;;  %v5944_v0 = vld [vmem:[#allocation7 + $0x10] sm:$0xff] }
 0x94e   : > { %9456 = vmatprep.subr.bf16.mxu1 %v10908_v37 }
 0x950   : > { %9177 = vmatmul.mubr.msk.f32.gmra.mrb[10].mxu1 %vm805_vm3, %v5436_v63  ;;  %v6153_v63 = vld [vmem:[#allocation19 + $0x1c8] sm:$0xff] }
 0x951   : > { %9458 = vmatpush3.bf16.msra.mxu1 %v9457_v4  ;;  %9195 = vmatprep.mubr.msk.f32.mxu1 %vm10909_vm6, %v10907_v2  ;;  %v5945_v4 = vld [vmem:[#allocation7 + $0x18] sm:$0x3f] }
 0x952   : > { %9459 = vmatprep.subr.bf16.mxu1 %v10908_v37 }
 0x955   : > { %9461 = vmatpush3.bf16.msra.mxu1 %v9460_v49  ;;  %v9511_v49 = vpack.c.bf16 %v6153_v63, %v6152_v9 }
 0x956   : > { %9462 = vmatprep.subr.bf16.mxu1 %v10908_v37 }
 0x958   : > { %9196 = vmatmul.mubr.msk.f32.vlgmr.msra.gmra.mrb[12].mxu1 %vm805_vm3, %v5634_v21  ;;  %v6157_v21 = vld [vmem:[#allocation19 + $0x1e8] sm:$0xff] }
 0x959   : > { %9464 = vmatpush3.bf16.msra.mxu1 %v9463_v29  ;;  %9198 = vmatprep.mubr.msk.f32.mxu1 %vm10909_vm6, %v10907_v2  ;;  %v6046_v29 = vld [vmem:[#allocation7 + $0xc] sm:$0xff]  ;;  %v9517_v10 = vpack.c.bf16 %v6157_v21, %v6156_v25 }
 0x95a   : > { %9465 = vmatprep.subr.bf16.mxu1 %v10908_v37 }
 0x95c   : > { %9199 = vmatmul.mubr.msk.f32.gmra.mrb[14].mxu1 %vm805_vm3, %v5635_v19  ;;  %v6159_v19 = vld [vmem:[#allocation19 + $0x1f8] sm:$0xff] }
 0x95d   : > { %9467 = vmatpush3.bf16.msra.mxu1 %v9466_v45  ;;  %9201 = vmatprep.mubr.msk.f32.mxu1 %vm10909_vm6, %v10907_v2  ;;  %v6047_v45 = vld [vmem:[#allocation7 + $0x14] sm:$0xff]  ;;  %v9520_v46 = vpack.c.bf16 %v6159_v19, %v6158_v50 }
 0x95e   : > { %9468 = vmatprep.subr.bf16.mxu1 %v10908_v37 }
 0x960   : > { %9202 = vmatmul.mubr.msk.f32.gmra.mrb[16].mxu1 %vm805_vm3, %v5636_v34  ;;  %v6256_v34 = vld [vmem:[#allocation19 + $0x208] sm:$0xff] }
 0x961   : > { %9470 = vmatpush3.bf16.msra.mxu1 %v9469_v27  ;;  %9220 = vmatprep.mubr.msk.f32.mxu1 %vm10909_vm6, %v10907_v2  ;;  %v6048_v27 = vld [vmem:[#allocation7 + $0x1c] sm:$0x3f] }
 0x962   : > { %9471 = vmatprep.subr.bf16.mxu1 %v10908_v37 }
 0x965   : > { %9473 = vmatpush3.bf16.msra.mxu1 %v9472_v42  ;;  %v9523_v42 = vpack.c.bf16 %v6256_v34, %v6255_v58 }
 0x966   : > { %9474 = vmatprep.subr.bf16.mxu1 %v10908_v37 }
 0x968   : > { %9221 = vmatmul.mubr.msk.f32.vlgmr.msra.gmra.mrb[18].mxu1 %vm805_vm3, %v5737_v44  ;;  %v6260_v44 = vld [vmem:[#allocation19 + $0x228] sm:$0xff] }
 0x969   : > { %9476 = vmatpush3.bf16.msra.mxu1 %v9475_v60  ;;  %9223 = vmatprep.mubr.msk.f32.mxu1 %vm10909_vm6, %v10907_v2  ;;  %v6149_v60 = vld [vmem:[#allocation7 + $0xd] sm:$0xff]  ;;  %v9529_v15 = vpack.c.bf16 %v6260_v44, %v6259_v1 }
 0x96a   : > { %9477 = vmatprep.subr.bf16.mxu1 %v10908_v37 }
 0x96c   : > { %9224 = vmatmul.mubr.msk.f32.gmra.mrb[20].mxu1 %vm805_vm3, %v13559_v41 }
 0x96d   : > { %9479 = vmatpush3.bf16.msra.mxu1 %v9478_v57  ;;  %9226 = vmatprep.mubr.msk.f32.mxu1 %vm10909_vm6, %v10907_v2  ;;  %v6150_v57 = vld [vmem:[#allocation7 + $0x15] sm:$0xff] }
 0x96e   : > { %9480 = vmatprep.subr.bf16.mxu1 %v10908_v37 }
 0x970   : > { %9227 = vmatmul.mubr.msk.f32.gmra.mrb[22].mxu1 %vm805_vm3, %v5739_v62  ;;  %v6253_v62 = vld [vmem:[#allocation7 + $0x16] sm:$0xff] }
 0x971   : > { %9482 = vmatpush3.bf16.msra.mxu1 %v9481_v17  ;;  %9245 = vmatprep.mubr.msk.f32.mxu1 %vm10909_vm6, %v10907_v2  ;;  %v6261_v17 = vld [vmem:[#allocation19 + $0x230] sm:$0xff] }
 0x972   : > { %9483 = vmatprep.subr.bf16.mxu1 %v10908_v37  ;;  %v9532_v23 = vpack.c.bf16 %v6262_v11, %v6261_v17 }
 0x975   : > { %9485 = vmatpush3.bf16.msra.mxu1 %v9484_v51  ;;  %v6254_v51 = vld [vmem:[#allocation7 + $0x1e] sm:$0x3f] }
 0x976   : > { %9486 = vmatprep.subr.bf16.mxu1 %v10908_v37 }
 0x978   : > { %9246 = vmatmul.mubr.msk.f32.vlgmr.msra.gmra.mrb[24].mxu1 %vm805_vm3, %v5840_v7 }
 0x979   : > { %9488 = vmatpush3.bf16.msra.mxu1 %v9487_v8  ;;  %9248 = vmatprep.mubr.msk.f32.mxu1 %vm10909_vm6, %v10907_v2 }
 0x97a   : > { %9489 = vmatprep.subr.bf16.mxu1 %v10908_v37 }
 0x97c   : > { %9249 = vmatmul.mubr.msk.f32.gmra.mrb[26].mxu1 %vm805_vm3, %v5841_v16 }
 0x97d   : > { %9491 = vmatpush3.bf16.msra.mxu1 %v9490_v6  ;;  %9251 = vmatprep.mubr.msk.f32.mxu1 %vm10909_vm6, %v10907_v2 }
 0x97e   : > { %9492 = vmatprep.subr.bf16.mxu1 %v10908_v37 }
 0x980   : > { %9252 = vmatmul.mubr.msk.f32.gmra.mrb[28].mxu1 %vm805_vm3, %v5842_v30 }
 0x981   : > { %9494 = vmatpush3.bf16.msra.mxu1 %v9493_v39  ;;  %9270 = vmatprep.mubr.msk.f32.mxu1 %vm10909_vm6, %v10907_v2 }
 0x982   : > { %9495 = vmatprep.subr.bf16.mxu1 %v10908_v37 }
 0x985   : > { %9497 = vmatpush3.bf16.msra.mxu1 %v9496_v61 }
 0x986   : > { %9498 = vmatprep.subr.bf16.mxu1 %v10908_v37 }
 0x988   : > { %9271 = vmatmul.mubr.msk.f32.vlgmr.msra.gmra.mrb[30].mxu1 %vm805_vm3, %v13530_v13  ;;  %v6056_v13 = vld [vmem:[#allocation19 + $0x1b8] sm:$0xff] }
 0x989   : > { %9500 = vmatpush3.bf16.msra.mxu1 %v9499_v40  ;;  %9273 = vmatprep.mubr.msk.f32.mxu1 %vm10909_vm6, %v10907_v2  ;;  %v9508_v56 = vpack.c.bf16 %v6056_v13, %v6055_v53 }
 0x98a   : > { %9501 = vmatprep.subr.bf16.mxu1 %v10908_v37 }
 0x98c   : > { %9274 = vmatmul.mubr.msk.f32.gmra.mrb[32].mxu1 %vm805_vm3, %v5944_v0 }
 0x98d   : > { %9503 = vmatpush3.bf16.msra.mxu1 %v9502_v59  ;;  %9276 = vmatprep.mubr.msk.f32.mxu1 %vm10909_vm6, %v10907_v2 }
 0x98e   : > { %9504 = vmatprep.subr.bf16.mxu1 %v10908_v37 }
 0x990   : > { %9277 = vmatmul.mubr.msk.f32.gmra.mrb[34].mxu1 %vm805_vm3, %v5945_v4 }
 0x991   : > { %9506 = vmatpush3.bf16.msra.mxu1 %v9505_v28  ;;  %9295 = vmatprep.mubr.msk.f32.mxu1 %vm10909_vm6, %v10907_v2 }
 0x992   : > { %9507 = vmatprep.subr.bf16.mxu1 %v10908_v37 }
 0x995   : > { %9509 = vmatpush3.bf16.msra.mxu1 %v9508_v56 }
 0x996   : > { %9510 = vmatprep.subr.bf16.mxu1 %v10908_v37 }
 0x998   : > { %9296 = vmatmul.mubr.msk.f32.vlgmr.msra.gmra.mrb[36].mxu1 %vm805_vm3, %v6046_v29 }
 0x999   : > { %9512 = vmatpush3.bf16.msra.mxu1 %v9511_v49  ;;  %9298 = vmatprep.mubr.msk.f32.mxu1 %vm10909_vm6, %v10907_v2 }
 0x99a   : > { %9513 = vmatprep.subr.bf16.mxu1 %v10908_v37 }
 0x99c   : > { %9299 = vmatmul.mubr.msk.f32.gmra.mrb[38].mxu1 %vm805_vm3, %v6047_v45 }
 0x99d   : > { %9515 = vmatpush3.bf16.msra.mxu1 %v9514_v48  ;;  %9301 = vmatprep.mubr.msk.f32.mxu1 %vm10909_vm6, %v10907_v2 }
 0x99e   : > { %9516 = vmatprep.subr.bf16.mxu1 %v10908_v37 }
 0x9a0   : > { %9302 = vmatmul.mubr.msk.f32.gmra.mrb[40].mxu1 %vm805_vm3, %v6048_v27 }
 0x9a1   : > { %9518 = vmatpush3.bf16.msra.mxu1 %v9517_v10  ;;  %9320 = vmatprep.mubr.msk.f32.mxu1 %vm10909_vm6, %v10907_v2 }
 0x9a2   : > { %9519 = vmatprep.subr.bf16.mxu1 %v10908_v37 }
 0x9a5   : > { %9521 = vmatpush3.bf16.msra.mxu1 %v9520_v46 }
 0x9a6   : > { %9522 = vmatprep.subr.bf16.mxu1 %v10908_v37 }
 0x9a8   : > { %9321 = vmatmul.mubr.msk.f32.vlgmr.msra.gmra.mrb[42].mxu1 %vm805_vm3, %v6149_v60 }
 0x9a9   : > { %9524 = vmatpush3.bf16.msra.mxu1 %v9523_v42  ;;  %9323 = vmatprep.mubr.msk.f32.mxu1 %vm10909_vm6, %v10907_v2 }
 0x9aa   : > { %9525 = vmatprep.subr.bf16.mxu1 %v10908_v37 }
 0x9ac   : > { %9324 = vmatmul.mubr.msk.f32.gmra.mrb[44].mxu1 %vm805_vm3, %v6150_v57 }
 0x9ad   : > { %9527 = vmatpush3.bf16.msra.mxu1 %v9526_v52  ;;  %9326 = vmatprep.mubr.msk.f32.mxu1 %vm10909_vm6, %v10907_v2 }
 0x9ae   : > { %9528 = vmatprep.subr.bf16.mxu1 %v10908_v37 }
 0x9b0   : > { %9327 = vmatmul.mubr.msk.f32.gmra.mrb[46].mxu1 %vm805_vm3, %v6151_v33 }
 0x9b1   : > { %9530 = vmatpush3.bf16.msra.mxu1 %v9529_v15  ;;  %9345 = vmatprep.mubr.msk.f32.mxu1 %vm10909_vm6, %v10907_v2 }
 0x9b2   : > { %9531 = vmatprep.subr.bf16.mxu1 %v10908_v37 }
 0x9b5   : > { %9533 = vmatpush3.bf16.msra.mxu1 %v9532_v23 }
 0x9b8   : > { %9346 = vmatmul.mubr.msk.f32.vlgmr.msra.gmra.mrb[48].mxu1 %vm805_vm3, %v13559_v41 }
 0x9b9   : > { %9348 = vmatprep.mubr.msk.f32.mxu1 %vm10909_vm6, %v10907_v2 }
 0x9bc   : > { %9349 = vmatmul.mubr.msk.f32.gmra.mrb[50].mxu1 %vm805_vm3, %v6253_v62 }
 0x9bd   : > { %9351 = vmatprep.mubr.msk.f32.mxu1 %vm10909_vm6, %v10907_v2 }
 0x9c0   : > { %9352 = vmatmul.mubr.msk.f32.gmra.mrb[52].mxu1 %vm805_vm3, %v6254_v51 }
 0x9c1   : > { %7258 = vmatprep.mubr.f32.mxu1 %v10907_v2 }
 0xa0b   : > { %v5531_v31 = vpop.f32.mrb[0].mxu1 }
 0xa0c   : > { %v9147_v37 = vpop.f32.mrb[1].mxu1 }
 0xa0f   : > { %v5536_v38 = vpop.f32.mrb[2].mxu1 }
 0xa10   : > { %v9150_v8 = vpop.f32.mrb[3].mxu1 }
 0xa13   : > { %v5541_v14 = vpop.f32.mrb[4].mxu1 }
 0xa14   : > { %v9153_v41 = vpop.f32.mrb[5].mxu1 }
 0xa1b   : > { %v5620_v3 = vpop.f32.mrb[6].mxu1 }
 0xa1c   : > { %v5621_v7 = vadd.f32 %v5620_v3, %v5531_v31  ;;  %v9172_v6 = vpop.f32.mrb[7].mxu1 }
 0xa1f   : > { %v5625_v18 = vpop.f32.mrb[8].mxu1 }
 0xa20   : > { %v5626_v12 = vadd.f32 %v5625_v18, %v5536_v38  ;;  %v9175_v16 = vpop.f32.mrb[9].mxu1 }
 0xa23   : > { %v5630_v39 = vpop.f32.mrb[10].mxu1 }
 0xa24   : > { %v5631_v47 = vadd.f32 %v5630_v39, %v5541_v14  ;;  %v9178_v5 = vpop.f32.mrb[11].mxu1 }
 0xa2b   : > { %v5720_v30 = vpop.f32.mrb[12].mxu1 }
 0xa2c   : > { %v5734_v61 = vadd.f32 %v5720_v30, %v5621_v7  ;;  %v9197_v55 = vpop.f32.mrb[13].mxu1  ;;  %v8658_v7 = vld [vmem:[#allocation21] ss:$0 sm:$0xff] }
 0xa2f   : > { %v5725_v43 = vpop.f32.mrb[14].mxu1 }
 0xa30   : > { %v5735_v40 = vadd.f32 %v5725_v43, %v5626_v12  ;;  %v9200_v54 = vpop.f32.mrb[15].mxu1 }
 0xa33   : > { %v5730_v20 = vpop.f32.mrb[16].mxu1 }
 0xa34   : > { %v5736_v59 = vadd.f32 %v5730_v20, %v5631_v47  ;;  %v9203_v36 = vpop.f32.mrb[17].mxu1 }
 0xa3b   : > { %v5823_v35 = vpop.f32.mrb[18].mxu1 }
 0xa3c   : > { %v5837_v0 = vadd.f32 %v5823_v35, %v5734_v61  ;;  %v9222_v28 = vpop.f32.mrb[19].mxu1 }
 0xa3f   : > { %v5828_v53 = vpop.f32.mrb[20].mxu1 }
 0xa40   : > { %v5838_v13 = vadd.f32 %v5828_v53, %v5735_v40  ;;  %v9225_v4 = vpop.f32.mrb[21].mxu1 }
 0xa43   : > { %v5833_v56 = vpop.f32.mrb[22].mxu1 }
 0xa44   : > { %v5839_v9 = vadd.f32 %v5833_v56, %v5736_v59  ;;  %v9228_v63 = vpop.f32.mrb[23].mxu1 }
 0xa4b   : > { %v5926_v49 = vpop.f32.mrb[24].mxu1 }
 0xa4c   : > { %v5940_v26 = vadd.f32 %v5926_v49, %v5837_v0  ;;  %v9247_v22 = vpop.f32.mrb[25].mxu1 }
 0xa4f   : > { %v5931_v29 = vpop.f32.mrb[26].mxu1 }
 0xa50   : > { %v5941_v48 = vadd.f32 %v5931_v29, %v5838_v13  ;;  %v9250_v25 = vpop.f32.mrb[27].mxu1 }
 0xa53   : > { %v5936_v21 = vpop.f32.mrb[28].mxu1 }
 0xa54   : > { %v5942_v45 = vadd.f32 %v5936_v21, %v5839_v9  ;;  %v9253_v10 = vpop.f32.mrb[29].mxu1 }
 0xa5b   : > { %v6029_v50 = vpop.f32.mrb[30].mxu1 }
 0xa5c   : > { %v6043_v19 = vadd.f32 %v6029_v50, %v5940_v26  ;;  %v9272_v27 = vpop.f32.mrb[31].mxu1  ;;  %v6458_v50 = vld [vmem:[#allocation25 + $0x108] sm:$0xff] }
 0xa5d   : > { %v7163_v27 = vld [vmem:[#allocation25 + $0x708] sm:$0xff] }
 0xa5f   : > { %v6034_v46 = vpop.f32.mrb[32].mxu1 }
 0xa60   : > { %v6044_v58 = vadd.f32 %v6034_v46, %v5941_v48  ;;  %v9275_v34 = vpop.f32.mrb[33].mxu1 }
 0xa61   : > { %v6457_v34 = vld [vmem:[#allocation25 + $0x100] sm:$0xff] }
 0xa63   : > { %v6039_v42 = vpop.f32.mrb[34].mxu1 }
 0xa64   : > { %v6045_v24 = vadd.f32 %v6039_v42, %v5942_v45  ;;  %v9278_v32 = vpop.f32.mrb[35].mxu1  ;;  %v6459_v42 = vld [vmem:[#allocation25 + $0x110] sm:$0xff] }
 0xa65   : > { %v9536_v32 = vpack.c.bf16 %v6459_v42, %v6457_v34  ;;  %v6479_v34 = vld [vmem:[#allocation25 + $0x1b0] sm:$0xff] }
 0xa6b   : > { %v6132_v60 = vpop.f32.mrb[36].mxu1 }
 0xa6c   : > { %v6146_v52 = vadd.f32 %v6132_v60, %v6043_v19  ;;  %v9297_v1 = vpop.f32.mrb[37].mxu1  ;;  %v6460_v19 = vld [vmem:[#allocation25 + $0x118] sm:$0xff]  ;;  %v7162_v60 = vld [vmem:[#allocation25 + $0x700] sm:$0xff] }
 0xa6d   : > { %v9534_v46 = vpack.c.bf16 %v6460_v19, %v6458_v50  ;;  %v7183_v50 = vld [vmem:[#allocation25 + $0x7a8] sm:$0xff] }
 0xa6f   : > { %v6137_v44 = vpop.f32.mrb[38].mxu1  ;;  %9535 = vmatprep.subr.bf16.mxu0 %v9534_v46  ;;  %v7185_v46 = vld [vmem:[#allocation25 + $0x7b8] sm:$0xff] }
 0xa70   : > { %v6147_v57 = vadd.f32 %v6137_v44, %v6044_v58  ;;  %v9300_v33 = vpop.f32.mrb[39].mxu1  ;;  %v7165_v58 = vld [vmem:[#allocation25 + $0x718] sm:$0xff]  ;;  %9537 = vmatpush1.bf16.msra.mxu0 %v9536_v32  ;;  %v6462_v44 = vld [vmem:[#allocation25 + $0x128] sm:$0xff]  ;;  %v9778_v42 = vpack.c.bf16 %v7185_v46, %v7183_v50  ;;  %v7184_v32 = vld [vmem:[#allocation25 + $0x7b0] sm:$0xff] }
 0xa71   : > { %v7167_v33 = vld [vmem:[#allocation25 + $0x728] sm:$0xff]  ;;  %v6426_v46 = vld [vmem:[#allocation25 + $0x10] sm:$0xff] }
 0xa73   : > { %v6142_v15 = vpop.f32.mrb[40].mxu1 }
 0xa74   : > { %v6148_v17 = vadd.f32 %v6142_v15, %v6045_v24  ;;  %v9303_v11 = vpop.f32.mrb[41].mxu1  ;;  %v9758_v24 = vpack.c.bf16 %v7165_v58, %v7163_v27  ;;  %v6477_v58 = vld [vmem:[#allocation25 + $0x1a0] sm:$0xff] }
 0xa75   : > { %v6461_v11 = vld [vmem:[#allocation25 + $0x120] sm:$0xff] }
 0xa76   : > { %9759 = vmatprep.subr.bf16.mxu1 %v9758_v24  ;;  %v7182_v24 = vld [vmem:[#allocation25 + $0x7a0] sm:$0xff] }
 0xa7b   : > { %v6235_v23 = vpop.f32.mrb[42].mxu1 }
 0xa7c   : > { %v6249_v62 = vadd.f32 %v6235_v23, %v6146_v52  ;;  %v9322_v51 = vpop.f32.mrb[43].mxu1  ;;  %v7164_v52 = vld [vmem:[#allocation25 + $0x710] sm:$0xff] }
 0xa7d   : > { %v9760_v1 = vpack.c.bf16 %v7164_v52, %v7162_v60  ;;  %v6463_v23 = vld [vmem:[#allocation25 + $0x130] sm:$0xff]  ;;  %v6482_v60 = vld [vmem:[#allocation25 + $0x1c8] sm:$0xff]  ;;  %v6484_v52 = vld [vmem:[#allocation25 + $0x1d8] sm:$0xff] }
 0xa7e   : > { %v9540_v51 = vpack.c.bf16 %v6463_v23, %v6461_v11  ;;  %v6483_v11 = vld [vmem:[#allocation25 + $0x1d0] sm:$0xff]  ;;  %v7186_v23 = vld [vmem:[#allocation25 + $0x7c0] sm:$0xff] }
 0xa7f   : > { %v6240_v31 = vpop.f32.mrb[44].mxu1  ;;  %9761 = vmatpush1.bf16.msra.mxu1 %v9760_v1  ;;  %v7187_v1 = vld [vmem:[#allocation25 + $0x7c8] sm:$0xff] }
 0xa80   : > { %v6250_v37 = vadd.f32 %v6240_v31, %v6147_v57  ;;  %v9325_v38 = vpop.f32.mrb[45].mxu1  ;;  %v6464_v57 = vld [vmem:[#allocation25 + $0x138] sm:$0xff]  ;;  %v7166_v31 = vld [vmem:[#allocation25 + $0x720] sm:$0xff] }
 0xa81   : > { %v9538_v15 = vpack.c.bf16 %v6464_v57, %v6462_v44  ;;  %v7189_v44 = vld [vmem:[#allocation25 + $0x7d8] sm:$0xff]  ;;  %v9556_v57 = vpack.c.bf16 %v6479_v34, %v6477_v58  ;;  %v7268_v58 = vld [vmem:[#allocation25 + $0x800] sm:$0xff]  ;;  %v7270_v34 = vld [vmem:[#allocation25 + $0x810] sm:$0xff] }
 0xa83   : > { %v6245_v8 = vpop.f32.mrb[46].mxu1  ;;  %9539 = vmatprep.subr.bf16.mxu0 %v9538_v15  ;;  %v9558_v15 = vpack.c.bf16 %v6484_v52, %v6482_v60  ;;  %v7275_v60 = vld [vmem:[#allocation25 + $0x838] sm:$0xff]  ;;  %v6428_v52 = vld [vmem:[#allocation25 + $0x20] sm:$0xff] }
 0xa84   : > { %v6251_v14 = vadd.f32 %v6245_v8, %v6148_v17  ;;  %v9328_v41 = vpop.f32.mrb[47].mxu1  ;;  %v7169_v17 = vld [vmem:[#allocation25 + $0x738] sm:$0xff]  ;;  %9541 = vmatpush1.bf16.msra.mxu0 %v9540_v51  ;;  %v6466_v8 = vld [vmem:[#allocation25 + $0x148] sm:$0xff]  ;;  %v7188_v51 = vld [vmem:[#allocation25 + $0x7d0] sm:$0xff] }
 0xa85   : > { %v7171_v41 = vld [vmem:[#allocation25 + $0x748] sm:$0xff] }
 0xa8b   : > { %v6338_v3 = vpop.f32.mrb[48].mxu1 }
 0xa8c   : > { %v6352_v6 = vadd.f32 %v6338_v3, %v6249_v62  ;;  %v9347_v18 = vpop.f32.mrb[49].mxu1  ;;  %v9762_v62 = vpack.c.bf16 %v7169_v17, %v7167_v33  ;;  %v9780_v33 = vpack.c.bf16 %v7184_v32, %v7182_v24  ;;  %v6481_v17 = vld [vmem:[#allocation25 + $0x1c0] sm:$0xff]  ;;  %v6431_v24 = vld [vmem:[#allocation25 + $0x38] sm:$0xff]  ;;  %v7273_v32 = vld [vmem:[#allocation25 + $0x828] sm:$0xff] }
 0xa8d   : > { %v6467_v18 = vld [vmem:[#allocation25 + $0x150] sm:$0xff] }
 0xa8e   : > { %v6362_v12 = vadd.f32 %v8658_v7, %v6352_v6  ;;  %9763 = vmatprep.subr.bf16.mxu1 %v9762_v62  ;;  %v6465_v6 = vld [vmem:[#allocation25 + $0x140] sm:$0xff]  ;;  %v9782_v62 = vpack.c.bf16 %v7189_v44, %v7187_v1  ;;  %v9792_v1 = vpack.c.bf16 %v7270_v34, %v7268_v58  ;;  %v7290_v58 = vld [vmem:[#allocation25 + $0x8b0] sm:$0xff]  ;;  %v6449_v34 = vld [vmem:[#allocation25 + $0xc8] sm:$0xff] }
 0xa8f   : > { %v6343_v16 = vpop.f32.mrb[50].mxu1  ;;  %v7272_v44 = vld [vmem:[#allocation25 + $0x820] sm:$0xff] }
 0xa90   : > { %v6365_v39 = vmax.f32 %v6362_v12, 0.0  ;;  %v6353_v47 = vadd.f32 %v6343_v16, %v6250_v37  ;;  %v9350_v5 = vpop.f32.mrb[51].mxu1  ;;  %v7168_v37 = vld [vmem:[#allocation25 + $0x730] sm:$0xff]  ;;  %v9544_v16 = vpack.c.bf16 %v6467_v18, %v6465_v6  ;;  %v7190_v18 = vld [vmem:[#allocation25 + $0x7e0] sm:$0xff] }
 0xa91   : > { %v9764_v38 = vpack.c.bf16 %v7168_v37, %v7166_v31  ;;  %v6470_v5 = vld [vmem:[#allocation25 + $0x168] sm:$0xff]  ;;  %v6488_v37 = vld [vmem:[#allocation25 + $0x1f8] sm:$0xff]  ;;  %v6487_v6 = vld [vmem:[#allocation25 + $0x1f0] sm:$0xff] }
 0xa92   : > { %6368 = vst [vmem:[#allocation8] sm:$0xff] %v6365_v39  ;;  %v6363_v30 = vadd.f32 %v8658_v7, %v6353_v47  ;;  %v7170_v39 = vld [vmem:[#allocation25 + $0x740] sm:$0xff]  ;;  %v7172_v47 = vld [vmem:[#allocation25 + $0x750] sm:$0xff]  ;;  %v6486_v31 = vld [vmem:[#allocation25 + $0x1e8] sm:$0xff] }
 0xa93   : > { %v6348_v61 = vpop.f32.mrb[52].mxu1  ;;  %9765 = vmatpush1.bf16.msra.mxu1 %v9764_v38  ;;  %v7191_v38 = vld [vmem:[#allocation25 + $0x7e8] sm:$0xff] }
 0xa94   : > { %v6366_v55 = vmax.f32 %v6363_v30, 0.0  ;;  %v6354_v43 = vadd.f32 %v6348_v61, %v6251_v14  ;;  %v9353_v40 = vpop.f32.mrb[53].mxu1  ;;  %v6468_v14 = vld [vmem:[#allocation25 + $0x158] sm:$0xff]  ;;  %v9768_v30 = vpack.c.bf16 %v7172_v47, %v7170_v39  ;;  %v6425_v39 = vld [vmem:[#allocation25 + $0x8] sm:$0xff] }
 0xa95   : > { %v9542_v3 = vpack.c.bf16 %v6468_v14, %v6466_v8  ;;  %v6472_v61 = vld [vmem:[#allocation25 + $0x178] sm:$0xff]  ;;  %v9560_v14 = vpack.c.bf16 %v6483_v11, %v6481_v17  ;;  %v6433_v17 = vld [vmem:[#allocation25 + $0x48] sm:$0xff] }
 0xa96   : > { %6369 = vst [vmem:[#allocation8 + $0x8] sm:$0xff] %v6366_v55  ;;  %v6364_v54 = vadd.f32 %v8658_v7, %v6354_v43  ;;  %v7173_v7 = vld [vmem:[#allocation25 + $0x758] sm:$0xff]  ;;  %v7175_v55 = vld [vmem:[#allocation25 + $0x768] sm:$0xff]  ;;  %v9546_v40 = vpack.c.bf16 %v6472_v61, %v6470_v5 }
 0xa97   : > { %v9766_v12 = vpack.c.bf16 %v7173_v7, %v7171_v41  ;;  %9543 = vmatprep.subr.bf16.mxu0 %v9542_v3  ;;  %v7177_v43 = vld [vmem:[#allocation25 + $0x778] sm:$0xff]  ;;  %v9784_v41 = vpack.c.bf16 %v7188_v51, %v7186_v23  ;;  %v9562_v3 = vpack.c.bf16 %v6488_v37, %v6486_v31  ;;  %v6485_v7 = vld [vmem:[#allocation25 + $0x1e0] sm:$0xff]  ;;  %v7269_v5 = vld [vmem:[#allocation25 + $0x808] sm:$0xff] }
 0xa98   : > { %v6367_v20 = vmax.f32 %v6364_v54, 0.0  ;;  %9545 = vmatpush1.bf16.msra.mxu0 %v9544_v16  ;;  %v9770_v54 = vpack.c.bf16 %v7177_v43, %v7175_v55  ;;  %v7193_v8 = vld [vmem:[#allocation25 + $0x7f8] sm:$0xff]  ;;  %v7192_v16 = vld [vmem:[#allocation25 + $0x7f0] sm:$0xff]  ;;  %v9564_v61 = vpack.c.bf16 %v6487_v6, %v6485_v7  ;;  %v7277_v23 = vld [vmem:[#allocation25 + $0x848] sm:$0xff] }
 0xa99   : > { %v6371_v59 = vld [vmem:[#allocation8] sm:$0xf]  ;;  %9767 = vmatprep.subr.bf16.mxu1 %v9766_v12  ;;  %9547 = vmatprep.subr.bf16.mxu0 %v9546_v40  ;;  %v9786_v12 = vpack.c.bf16 %v7193_v8, %v7191_v38  ;;  %v6427_v47 = vld [vmem:[#allocation25 + $0x18] sm:$0xff]  ;;  %v9788_v55 = vpack.c.bf16 %v7192_v16, %v7190_v18  ;;  %v7278_v6 = vld [vmem:[#allocation25 + $0x850] sm:$0xff] }
 0xa9a   : > { %6370 = vst [vmem:[#allocation8 + $0x10] sm:$0x3f] %v6367_v20  ;;  %6372 = vst [vmem:[#allocation9] sm:$0xf] %v6371_v59  ;;  %v6469_v20 = vld [vmem:[#allocation25 + $0x160] sm:$0xff]  ;;  %v6471_v59 = vld [vmem:[#allocation25 + $0x170] sm:$0xff]  ;;  %9769 = vmatpush1.bf16.msra.mxu1 %v9768_v30  ;;  %v9566_v43 = vpack.c.bf16 %v6427_v47, %v6425_v39 }
 0xa9b   : > { %9771 = vmatprep.subr.bf16.mxu1 %v9770_v54  ;;  %v7271_v30 = vld [vmem:[#allocation25 + $0x818] sm:$0xff]  ;;  %v6432_v8 = vld [vmem:[#allocation25 + $0x40] sm:$0xff]  ;;  %v6437_v18 = vld [vmem:[#allocation25 + $0x68] sm:$0xff] }
 0xa9c   : > { %v9790_v40 = vpack.c.bf16 %v7271_v30, %v7269_v5  ;;  %v6435_v11 = vld [vmem:[#allocation25 + $0x58] sm:$0xff]  ;;  %v7276_v7 = vld [vmem:[#allocation25 + $0x840] sm:$0xff]  ;;  %v7281_v16 = vld [vmem:[#allocation25 + $0x868] sm:$0xff] }
 0xa9d   : > { %v6373_v36 = vld [vmem:[#allocation8 + $0x6] sm:$0xf]  ;;  %v6375_v35 = vld [vmem:[#allocation8 + $0xc] sm:$0xf]  ;;  %v7279_v31 = vld [vmem:[#allocation25 + $0x858] sm:$0xff]  ;;  %v9800_v5 = vpack.c.bf16 %v7278_v6, %v7276_v7 }
 0xa9e   : > { %6374 = vst [vmem:[#allocation9 + $0x4] sm:$0xf] %v6373_v36  ;;  %6376 = vst [vmem:[#allocation9 + $0x8] sm:$0xf] %v6375_v35  ;;  %v7174_v36 = vld [vmem:[#allocation25 + $0x760] sm:$0xff]  ;;  %v9548_v35 = vpack.c.bf16 %v6471_v59, %v6469_v20  ;;  %v7283_v39 = vld [vmem:[#allocation25 + $0x878] sm:$0xff] }
 0xa9f   : > { %v6436_v30 = vld [vmem:[#allocation25 + $0x60] sm:$0xff]  ;;  %v6635_v7 = vld [vmem:[#allocation25 + $0x218] sm:$0xff]  ;;  %v7375_v6 = vld [vmem:[#allocation25 + $0x908] sm:$0xff] }
 0xaa0   : > { %9549 = vmatpush1.bf16.msra.mxu0 %v9548_v35 }
 0xaa1   : > { %v6377_v0 = vld [vmem:[#allocation8 + $0x12] sm:$0xf] }
 0xaa2   : > { %6378 = vst [vmem:[#allocation9 + $0xc] sm:$0xf] %v6377_v0  ;;  %v7176_v0 = vld [vmem:[#allocation25 + $0x770] sm:$0xff] }
 0xaa5   : > { %v6379_v28 = vld [vmem:[#allocation9] sm:$0xff] }
 0xaa6   : > { %6385 = vadd.xlane.f32.xlu1 %v6379_v28 }
 0xaa9   : > { %v6380_v53 = vld [vmem:[#allocation9 + $0x8] sm:$0xff] }
 0xaaa   : > { %6387 = vadd.xlane.f32.xlu0 %v6380_v53 }
 0xb33   : > { %v6386_v13 = vpop.xlane.xlu1 %6385 }
 0xb37   : > { %v6388_v4 = vpop.xlane.xlu0 %6387 }
 0xb38   : > { %v6389_v56 = vadd.f32 %v6388_v4, %v6386_v13  ;;  %v9772_v13 = vpack.c.bf16 %v7176_v0, %v7174_v36 }
 0xb3a   : > { %v6390_v9 = vrot.slane %v6389_v56, 4  ;;  %9773 = vmatpush1.bf16.msra.mxu1 %v9772_v13 }
 0xb3c   : > { %v6391_v63 = vadd.f32 %v6390_v9, %v6389_v56  ;;  %v7179_v56 = vld [vmem:[#allocation25 + $0x788] sm:$0xff]  ;;  %v7181_v9 = vld [vmem:[#allocation25 + $0x798] sm:$0xff] }
 0xb3e   : > { %v6392_v49 = vrot.slane %v6391_v63, 2 }
 0xb40   : > { %v6393_v26 = vadd.f32 %v6392_v49, %v6391_v63  ;;  %v6473_v63 = vld [vmem:[#allocation25 + $0x180] sm:$0xff]  ;;  %v9774_v49 = vpack.c.bf16 %v7181_v9, %v7179_v56 }
 0xb42   : > { %v6394_v22 = vrot.slane %v6393_v26, 1  ;;  %9775 = vmatprep.subr.bf16.mxu1 %v9774_v49  ;;  %v6382_v49 = vld [vmem:[#allocation22 + $0x8] sm:$0xff] }
 0xb44   : > { %v6395_v29 = vadd.f32 %v6394_v22, %v6393_v26  ;;  %v6475_v26 = vld [vmem:[#allocation25 + $0x190] sm:$0xff]  ;;  %v7178_v22 = vld [vmem:[#allocation25 + $0x780] sm:$0xff] }
 0xb46   : > { %v6396_v48 = vmul.f32 0.00048828125, %v6395_v29  ;;  %v7180_v29 = vld [vmem:[#allocation25 + $0x790] sm:$0xff] }
 0xb47   : > { %v9776_v19 = vpack.c.bf16 %v7180_v29, %v7178_v22  ;;  %v6383_v29 = vld [vmem:[#allocation24] sm:$0xff] }
 0xb48   : > { %v13632_v25 = vsub.f32 %v6380_v53, %v6396_v48  ;;  %v13634_v21 = vsub.f32 %v6379_v28, %v6396_v48  ;;  %v6474_v28 = vld [vmem:[#allocation25 + $0x188] sm:$0xff]  ;;  %v6476_v53 = vld [vmem:[#allocation25 + $0x198] sm:$0xff]  ;;  %v9552_v48 = vpack.c.bf16 %v6475_v26, %v6473_v63  ;;  %v6381_v63 = vld [vmem:[#allocation22] sm:$0xff] }
 0xb49   : > { %v9550_v4 = vpack.c.bf16 %v6476_v53, %v6474_v28  ;;  %9777 = vmatpush1.bf16.msra.mxu1 %v9776_v19 }
 0xb4a   : > { %v6400_v45 = vmul.f32 %v13632_v25, %v13632_v25  ;;  %v6399_v10 = vmul.f32 %v13634_v21, %v13634_v21  ;;  %9779 = vmatprep.subr.bf16.mxu1 %v9778_v42  ;;  %v6429_v42 = vld [vmem:[#allocation25 + $0x28] sm:$0xff] }
 0xb4b   : > { %9551 = vmatprep.subr.bf16.mxu0 %v9550_v4 }
 0xb4c   : > { %6403 = vadd.xlane.f32.xlu0 %v6400_v45  ;;  %6401 = vadd.xlane.f32.xlu1 %v6399_v10  ;;  %v6478_v45 = vld [vmem:[#allocation25 + $0x1a8] sm:$0xff]  ;;  %v6480_v10 = vld [vmem:[#allocation25 + $0x1b8] sm:$0xff] }
 0xb4d   : > { %v9554_v27 = vpack.c.bf16 %v6480_v10, %v6478_v45  ;;  %9553 = vmatpush1.bf16.msra.mxu0 %v9552_v48  ;;  %9781 = vmatpush1.bf16.msra.mxu1 %v9780_v33  ;;  %v6384_v48 = vld [vmem:[#allocation24 + $0x8] sm:$0xff]  ;;  %v9570_v33 = vpack.c.bf16 %v6431_v24, %v6429_v42  ;;  %v7293_v24 = vld [vmem:[#allocation25 + $0x8c8] sm:$0xff] }
 0xb4e   : > { %9783 = vmatprep.subr.bf16.mxu1 %v9782_v62  ;;  %v6451_v42 = vld [vmem:[#allocation25 + $0xd8] sm:$0xff] }
 0xb4f   : > { %9555 = vmatprep.subr.bf16.mxu0 %v9554_v27  ;;  %v6424_v27 = vld [vmem:[#allocation25] sm:$0xff] }
 0xb51   : > { %9557 = vmatpush1.bf16.msra.mxu0 %v9556_v57  ;;  %9785 = vmatpush1.bf16.msra.mxu1 %v9784_v41  ;;  %v7274_v57 = vld [vmem:[#allocation25 + $0x830] sm:$0xff]  ;;  %v9574_v41 = vpack.c.bf16 %v6435_v11, %v6433_v17  ;;  %v6455_v17 = vld [vmem:[#allocation25 + $0xf8] sm:$0xff]  ;;  %v7297_v11 = vld [vmem:[#allocation25 + $0x8e8] sm:$0xff] }
 0xb52   : > { %9559 = vmatprep.subr.bf16.mxu0 %v9558_v15  ;;  %9787 = vmatprep.subr.bf16.mxu1 %v9786_v12  ;;  %v9794_v15 = vpack.c.bf16 %v7275_v60, %v7273_v32  ;;  %v9796_v38 = vpack.c.bf16 %v7274_v57, %v7272_v44  ;;  %v6439_v12 = vld [vmem:[#allocation25 + $0x78] sm:$0xff]  ;;  %v7292_v57 = vld [vmem:[#allocation25 + $0x8c0] sm:$0xff] }
 0xb53   : > { %v7295_v32 = vld [vmem:[#allocation25 + $0x8d8] sm:$0xff] }
 0xb54   : > { %v9814_v44 = vpack.c.bf16 %v7295_v32, %v7293_v24  ;;  %v7389_v24 = vld [vmem:[#allocation25 + $0x978] sm:$0xff] }
 0xb55   : > { %9561 = vmatpush1.bf16.msra.mxu0 %v9560_v14  ;;  %9789 = vmatpush1.bf16.msra.mxu1 %v9788_v55  ;;  %v6434_v14 = vld [vmem:[#allocation25 + $0x50] sm:$0xff]  ;;  %v9578_v55 = vpack.c.bf16 %v6439_v12, %v6437_v18  ;;  %v7377_v18 = vld [vmem:[#allocation25 + $0x918] sm:$0xff] }
 0xb56   : > { %9563 = vmatprep.subr.bf16.mxu0 %v9562_v3  ;;  %9791 = vmatprep.subr.bf16.mxu1 %v9790_v40  ;;  %v9798_v3 = vpack.c.bf16 %v7279_v31, %v7277_v23  ;;  %v9576_v47 = vpack.c.bf16 %v6434_v14, %v6432_v8  ;;  %v7280_v40 = vld [vmem:[#allocation25 + $0x860] sm:$0xff]  ;;  %v7299_v23 = vld [vmem:[#allocation25 + $0x8f8] sm:$0xff] }
 0xb57   : > { %v6452_v31 = vld [vmem:[#allocation25 + $0xe0] sm:$0xff]  ;;  %v9818_v8 = vpack.c.bf16 %v7299_v23, %v7297_v11  ;;  %v7393_v11 = vld [vmem:[#allocation25 + $0x998] sm:$0xff] }
 0xb58   : > { %v7296_v14 = vld [vmem:[#allocation25 + $0x8e0] sm:$0xff] }
 0xb59   : > { %9565 = vmatpush1.bf16.msra.mxu0 %v9564_v61  ;;  %v6438_v61 = vld [vmem:[#allocation25 + $0x70] sm:$0xff] }
 0xb5a   : > { %9567 = vmatprep.subr.bf16.mxu0 %v9566_v43  ;;  %v9802_v43 = vpack.c.bf16 %v7283_v39, %v7281_v16  ;;  %v6632_v39 = vld [vmem:[#allocation25 + $0x200] sm:$0xff] }
 0xbd9   : > { %v6404_v54 = vpop.xlane.xlu0 %6403  ;;  %v6402_v20 = vpop.xlane.xlu1 %6401 }
 0xbda   : > { %v6405_v59 = vadd.f32 %v6404_v54, %v6402_v20  ;;  %v7282_v54 = vld [vmem:[#allocation25 + $0x870] sm:$0xff]  ;;  %v6441_v20 = vld [vmem:[#allocation25 + $0x88] sm:$0xff] }
 0xbdc   : > { %v6406_v36 = vrot.slane %v6405_v59, 4 }
 0xbde   : > { %v6407_v35 = vadd.f32 %v6406_v36, %v6405_v59  ;;  %v6443_v59 = vld [vmem:[#allocation25 + $0x98] sm:$0xff]  ;;  %v7285_v36 = vld [vmem:[#allocation25 + $0x888] sm:$0xff] }
 0xbe0   : > { %v6408_v0 = vrot.slane %v6407_v35, 2 }
 0xbe2   : > { %v6409_v28 = vadd.f32 %v6408_v0, %v6407_v35  ;;  %v7287_v35 = vld [vmem:[#allocation25 + $0x898] sm:$0xff]  ;;  %v9580_v0 = vpack.c.bf16 %v6438_v61, %v6436_v30  ;;  %v9822_v30 = vpack.c.bf16 %v7377_v18, %v7375_v6  ;;  %v7374_v61 = vld [vmem:[#allocation25 + $0x900] sm:$0xff] }
 0xbe3   : > { %v7397_v6 = vld [vmem:[#allocation25 + $0x9b8] sm:$0xff] }
 0xbe4   : > { %v6410_v53 = vrot.slane %v6409_v28, 1 }
 0xbe6   : > { %v6411_v13 = vadd.f32 %v6410_v53, %v6409_v28  ;;  %v9804_v28 = vpack.c.bf16 %v7282_v54, %v7280_v40  ;;  %v6440_v53 = vld [vmem:[#allocation25 + $0x80] sm:$0xff]  ;;  %v6639_v40 = vld [vmem:[#allocation25 + $0x238] sm:$0xff]  ;;  %v7379_v54 = vld [vmem:[#allocation25 + $0x928] sm:$0xff] }
 0xbe8   : > { %v6412_v4 = vmul.f32 0.00048828125, %v6411_v13  ;;  %v6442_v13 = vld [vmem:[#allocation25 + $0x90] sm:$0xff] }
 0xbea   : > { %v6413_v56 = vadd.f32 1e-16, %v6412_v4  ;;  %v9582_v4 = vpack.c.bf16 %v6443_v59, %v6441_v20  ;;  %v7381_v20 = vld [vmem:[#allocation25 + $0x938] sm:$0xff]  ;;  %v6636_v59 = vld [vmem:[#allocation25 + $0x220] sm:$0xff] }
 0xbec   : > { %10384 = vrsqrt.f32 %v6413_v56  ;;  %v9806_v56 = vpack.c.bf16 %v7287_v35, %v7285_v36 }
 0xbf6   : > { %v10385_v9 = vpop.eup %10384 }
 0xbf7   : > { %v6415_v26 = vmul.f32 %v10385_v9, %v13634_v21  ;;  %v6416_v22 = vmul.f32 %v10385_v9, %v13632_v25  ;;  %v9568_v21 = vpack.c.bf16 %v6426_v46, %v6424_v27  ;;  %v6430_v25 = vld [vmem:[#allocation25 + $0x30] sm:$0xff]  ;;  %v7284_v9 = vld [vmem:[#allocation25 + $0x880] sm:$0xff] }
 0xbf8   : > { %v9572_v37 = vpack.c.bf16 %v6430_v25, %v6428_v52  ;;  %v7288_v46 = vld [vmem:[#allocation25 + $0x8a0] sm:$0xff]  ;;  %v9590_v25 = vpack.c.bf16 %v6451_v42, %v6449_v34  ;;  %v6647_v34 = vld [vmem:[#allocation25 + $0x278] sm:$0xff]  ;;  %v7387_v42 = vld [vmem:[#allocation25 + $0x968] sm:$0xff] }
 0xbf9   : > { %v6417_v45 = vmul.f32 %v6415_v26, %v6381_v63  ;;  %v6418_v10 = vmul.f32 %v6416_v22, %v6382_v49  ;;  %v7286_v63 = vld [vmem:[#allocation25 + $0x890] sm:$0xff]  ;;  %v6445_v49 = vld [vmem:[#allocation25 + $0xa8] sm:$0xff]  ;;  %v6447_v26 = vld [vmem:[#allocation25 + $0xb8] sm:$0xff]  ;;  %v9812_v52 = vpack.c.bf16 %v7290_v58, %v7288_v46 }
 0xbfa   : > { %v7289_v22 = vld [vmem:[#allocation25 + $0x8a8] sm:$0xff]  ;;  %v7384_v46 = vld [vmem:[#allocation25 + $0x950] sm:$0xff] }
 0xbfb   : > { %v6419_v50 = vadd.f32 %v6417_v45, %v6383_v29  ;;  %v6420_v19 = vadd.f32 %v6418_v10, %v6384_v48  ;;  %v7291_v29 = vld [vmem:[#allocation25 + $0x8b8] sm:$0xff]  ;;  %v9584_v48 = vpack.c.bf16 %v6442_v13, %v6440_v53  ;;  %v9808_v45 = vpack.c.bf16 %v7286_v63, %v7284_v9  ;;  %v6444_v10 = vld [vmem:[#allocation25 + $0xa0] sm:$0xff]  ;;  %v7380_v53 = vld [vmem:[#allocation25 + $0x930] sm:$0xff] }
 0xbfc   : > { %v9810_v27 = vpack.c.bf16 %v7291_v29, %v7289_v22  ;;  %v6643_v9 = vld [vmem:[#allocation25 + $0x258] sm:$0xff]  ;;  %v7383_v63 = vld [vmem:[#allocation25 + $0x948] sm:$0xff] }
 0xbfd   : > { %6421 = vst [vmem:[#allocation9] sm:$0xff] %v6419_v50  ;;  %6422 = vst [vmem:[#allocation9 + $0x8] sm:$0xff] %v6420_v19  ;;  %v6446_v50 = vld [vmem:[#allocation25 + $0xb0] sm:$0xff]  ;;  %v9586_v19 = vpack.c.bf16 %v6447_v26, %v6445_v49  ;;  %v7385_v22 = vld [vmem:[#allocation25 + $0x958] sm:$0xff] }
 0xbfe   : > { %v9588_v60 = vpack.c.bf16 %v6446_v50, %v6444_v10  ;;  %v6642_v10 = vld [vmem:[#allocation25 + $0x250] sm:$0xff]  ;;  %v6645_v58 = vld [vmem:[#allocation25 + $0x268] sm:$0xff] }
 0xc04   : > { %v6456_v62 = vld [vmem:[#allocation9 + $0x1] sm:$0x1]  ;;  %v7161_v51 = vld [vmem:[#allocation9 + $0x7] sm:$0x1]  ;;  %v6423_v49 = vld [vmem:[#allocation9] sm:$0x1] }
 0xc05   : > { %6554 = vmatmul.mubr.f32.vlgmr.msra.gmra.mrb[10].mxu0 %v6456_v62  ;;  %7259 = vmatmul.mubr.f32.vlgmr.msra.gmra.mrb[54].mxu1 %v7161_v51  ;;  %v7267_v26 = vld [vmem:[#allocation9 + $0x8] sm:$0x1] }
 0xc06   : > { %9569 = vmatpush1.bf16.msra.mxu0 %v9568_v21  ;;  %9793 = vmatpush1.bf16.msra.mxu1 %v9792_v1  ;;  %v6448_v21 = vld [vmem:[#allocation25 + $0xc0] sm:$0xff]  ;;  %v6450_v1 = vld [vmem:[#allocation25 + $0xd0] sm:$0xff] }
 0xc07   : > { %9571 = vmatprep.subr.bf16.mxu0 %v9570_v33  ;;  %9795 = vmatprep.subr.bf16.mxu1 %v9794_v15  ;;  %v7294_v33 = vld [vmem:[#allocation25 + $0x8d0] sm:$0xff]  ;;  %v6453_v15 = vld [vmem:[#allocation25 + $0xe8] sm:$0xff]  ;;  %v9592_v62 = vpack.c.bf16 %v6450_v1, %v6448_v21  ;;  %v9610_v1 = vpack.c.bf16 %v6647_v34, %v6645_v58  ;;  %v7483_v58 = vld [vmem:[#allocation25 + $0xa18] sm:$0xff] }
 0xc08   : > { %6624 = vmatprep.mubr.f32.mxu0 %v10907_v2  ;;  %7364 = vmatprep.mubr.f32.mxu1 %v10907_v2  ;;  %v9816_v51 = vpack.c.bf16 %v7294_v33, %v7292_v57  ;;  %v6646_v21 = vld [vmem:[#allocation25 + $0x270] sm:$0xff]  ;;  %v6649_v33 = vld [vmem:[#allocation25 + $0x288] sm:$0xff] }
 0xc09   : > { %v7388_v57 = vld [vmem:[#allocation25 + $0x970] sm:$0xff] }
 0xc0a   : > { %9573 = vmatpush1.bf16.msra.mxu0 %v9572_v37  ;;  %9797 = vmatpush1.bf16.msra.mxu1 %v9796_v38  ;;  %v6454_v37 = vld [vmem:[#allocation25 + $0xf0] sm:$0xff]  ;;  %v9594_v38 = vpack.c.bf16 %v6455_v17, %v6453_v15  ;;  %v6651_v15 = vld [vmem:[#allocation25 + $0x298] sm:$0xff]  ;;  %v7391_v17 = vld [vmem:[#allocation25 + $0x988] sm:$0xff] }
 0xc0b   : > { %9575 = vmatprep.subr.bf16.mxu0 %v9574_v41  ;;  %9799 = vmatprep.subr.bf16.mxu1 %v9798_v3  ;;  %v7298_v41 = vld [vmem:[#allocation25 + $0x8f0] sm:$0xff]  ;;  %v6633_v3 = vld [vmem:[#allocation25 + $0x208] sm:$0xff]  ;;  %v9596_v12 = vpack.c.bf16 %v6454_v37, %v6452_v31  ;;  %v9614_v37 = vpack.c.bf16 %v6651_v15, %v6649_v33  ;;  %v7487_v33 = vld [vmem:[#allocation25 + $0xa38] sm:$0xff] }
 0xc0c   : > { %v9820_v16 = vpack.c.bf16 %v7298_v41, %v7296_v14  ;;  %v6650_v31 = vld [vmem:[#allocation25 + $0x290] sm:$0xff]  ;;  %v6653_v41 = vld [vmem:[#allocation25 + $0x2a8] sm:$0xff]  ;;  %v6742_v15 = vld [vmem:[#allocation25 + $0x320] sm:$0xff] }
 0xc0d   : > { %v7392_v14 = vld [vmem:[#allocation25 + $0x990] sm:$0xff] }
 0xc0e   : > { %9577 = vmatpush1.bf16.msra.mxu0 %v9576_v47  ;;  %9801 = vmatpush1.bf16.msra.mxu1 %v9800_v5  ;;  %v6634_v47 = vld [vmem:[#allocation25 + $0x210] sm:$0xff]  ;;  %v9598_v5 = vpack.c.bf16 %v6635_v7, %v6633_v3  ;;  %v6655_v3 = vld [vmem:[#allocation25 + $0x2b8] sm:$0xff]  ;;  %v7395_v7 = vld [vmem:[#allocation25 + $0x9a8] sm:$0xff] }
 0xc0f   : > { %9579 = vmatprep.subr.bf16.mxu0 %v9578_v55  ;;  %9803 = vmatprep.subr.bf16.mxu1 %v9802_v43  ;;  %v7376_v55 = vld [vmem:[#allocation25 + $0x910] sm:$0xff]  ;;  %v6637_v43 = vld [vmem:[#allocation25 + $0x228] sm:$0xff]  ;;  %v9600_v36 = vpack.c.bf16 %v6634_v47, %v6632_v39  ;;  %v9618_v47 = vpack.c.bf16 %v6655_v3, %v6653_v41  ;;  %v6631_v41 = vld [vmem:[#allocation9 + $0x2] sm:$0x1] }
 0xc10   : > { %v9824_v35 = vpack.c.bf16 %v7376_v55, %v7374_v61  ;;  %v9602_v13 = vpack.c.bf16 %v6639_v40, %v6637_v43  ;;  %v6654_v39 = vld [vmem:[#allocation25 + $0x2b0] sm:$0xff]  ;;  %v6657_v55 = vld [vmem:[#allocation25 + $0x2c8] sm:$0xff]  ;;  %v6659_v43 = vld [vmem:[#allocation25 + $0x2d8] sm:$0xff] }
 0xc11   : > { %v7396_v61 = vld [vmem:[#allocation25 + $0x9b0] sm:$0xff]  ;;  %v7399_v40 = vld [vmem:[#allocation25 + $0x9c8] sm:$0xff]  ;;  %v7373_v3 = vld [vmem:[#allocation9 + $0x9] sm:$0x1] }
 0xc12   : > { %9581 = vmatpush1.bf16.msra.mxu0 %v9580_v0  ;;  %9805 = vmatpush1.bf16.msra.mxu1 %v9804_v28  ;;  %v6638_v0 = vld [vmem:[#allocation25 + $0x230] sm:$0xff]  ;;  %v7378_v28 = vld [vmem:[#allocation25 + $0x920] sm:$0xff] }
 0xc13   : > { %9583 = vmatprep.subr.bf16.mxu0 %v9582_v4  ;;  %9807 = vmatprep.subr.bf16.mxu1 %v9806_v56  ;;  %v9826_v4 = vpack.c.bf16 %v7381_v20, %v7379_v54  ;;  %v6641_v56 = vld [vmem:[#allocation25 + $0x248] sm:$0xff]  ;;  %v9604_v29 = vpack.c.bf16 %v6638_v0, %v6636_v59  ;;  %v7401_v54 = vld [vmem:[#allocation25 + $0x9d8] sm:$0xff]  ;;  %v9622_v0 = vpack.c.bf16 %v6659_v43, %v6657_v55 }
 0xc14   : > { %v9606_v50 = vpack.c.bf16 %v6643_v9, %v6641_v56  ;;  %v6663_v56 = vld [vmem:[#allocation25 + $0x2f8] sm:$0xff]  ;;  %v7403_v9 = vld [vmem:[#allocation25 + $0x9e8] sm:$0xff] }
 0xc15   : > { %v6753_v55 = vld [vmem:[#allocation25 + $0x378] sm:$0xff]  ;;  %v7493_v43 = vld [vmem:[#allocation25 + $0xa68] sm:$0xff] }
 0xc16   : > { %9585 = vmatpush1.bf16.msra.mxu0 %v9584_v48  ;;  %9809 = vmatpush1.bf16.msra.mxu1 %v9808_v45  ;;  %v9828_v48 = vpack.c.bf16 %v7380_v53, %v7378_v28  ;;  %v6640_v45 = vld [vmem:[#allocation25 + $0x240] sm:$0xff]  ;;  %v9846_v28 = vpack.c.bf16 %v7401_v54, %v7399_v40  ;;  %v7495_v40 = vld [vmem:[#allocation25 + $0xa78] sm:$0xff] }
 0xc17   : > { %9587 = vmatprep.subr.bf16.mxu0 %v9586_v19  ;;  %9811 = vmatprep.subr.bf16.mxu1 %v9810_v27  ;;  %v9830_v19 = vpack.c.bf16 %v7385_v22, %v7383_v63  ;;  %v7382_v27 = vld [vmem:[#allocation25 + $0x940] sm:$0xff]  ;;  %v9608_v32 = vpack.c.bf16 %v6642_v10, %v6640_v45  ;;  %v7405_v63 = vld [vmem:[#allocation25 + $0x9f8] sm:$0xff] }
 0xc18   : > { %v7398_v53 = vld [vmem:[#allocation25 + $0x9c0] sm:$0xff]  ;;  %v9850_v45 = vpack.c.bf16 %v7405_v63, %v7403_v9  ;;  %v7499_v9 = vld [vmem:[#allocation25 + $0xa98] sm:$0xff] }
 0xc19   : > { %v6660_v22 = vld [vmem:[#allocation25 + $0x2e0] sm:$0xff] }
 0xc1a   : > { %9589 = vmatpush1.bf16.msra.mxu0 %v9588_v60  ;;  %9813 = vmatpush1.bf16.msra.mxu1 %v9812_v52  ;;  %v9832_v60 = vpack.c.bf16 %v7384_v46, %v7382_v27  ;;  %v6644_v52 = vld [vmem:[#allocation25 + $0x260] sm:$0xff]  ;;  %v6741_v27 = vld [vmem:[#allocation25 + $0x318] sm:$0xff]  ;;  %v7481_v46 = vld [vmem:[#allocation25 + $0xa08] sm:$0xff] }
 0xc1b   : > { %9591 = vmatprep.subr.bf16.mxu0 %v9590_v25  ;;  %9815 = vmatprep.subr.bf16.mxu1 %v9814_v44  ;;  %v9834_v25 = vpack.c.bf16 %v7389_v24, %v7387_v42  ;;  %v7386_v44 = vld [vmem:[#allocation25 + $0x960] sm:$0xff]  ;;  %v9612_v23 = vpack.c.bf16 %v6646_v21, %v6644_v52  ;;  %v9854_v52 = vpack.c.bf16 %v7483_v58, %v7481_v46  ;;  %v7503_v46 = vld [vmem:[#allocation25 + $0xab8] sm:$0xff] }
 0xc1c   : > { %v7402_v10 = vld [vmem:[#allocation25 + $0x9e0] sm:$0xff] }
 0xc1d   : > { %v6738_v24 = vld [vmem:[#allocation25 + $0x300] sm:$0xff] }
 0xc1e   : > { %9593 = vmatpush1.bf16.msra.mxu0 %v9592_v62  ;;  %9817 = vmatpush1.bf16.msra.mxu1 %v9816_v51  ;;  %v9836_v62 = vpack.c.bf16 %v7388_v57, %v7386_v44  ;;  %v6648_v51 = vld [vmem:[#allocation25 + $0x280] sm:$0xff]  ;;  %v6745_v44 = vld [vmem:[#allocation25 + $0x338] sm:$0xff]  ;;  %v7485_v57 = vld [vmem:[#allocation25 + $0xa28] sm:$0xff] }
 0xc1f   : > { %9595 = vmatprep.subr.bf16.mxu0 %v9594_v38  ;;  %9819 = vmatprep.subr.bf16.mxu1 %v9818_v8  ;;  %v9838_v38 = vpack.c.bf16 %v7393_v11, %v7391_v17  ;;  %v7390_v8 = vld [vmem:[#allocation25 + $0x980] sm:$0xff]  ;;  %v9616_v18 = vpack.c.bf16 %v6650_v31, %v6648_v51  ;;  %v7486_v51 = vld [vmem:[#allocation25 + $0xa30] sm:$0xff] }
 0xc20   : > { %v7480_v21 = vld [vmem:[#allocation25 + $0xa00] sm:$0xff] }
 0xc22   : > { %9597 = vmatpush1.bf16.msra.mxu0 %v9596_v12  ;;  %9821 = vmatpush1.bf16.msra.mxu1 %v9820_v16  ;;  %v9840_v12 = vpack.c.bf16 %v7392_v14, %v7390_v8  ;;  %v6652_v16 = vld [vmem:[#allocation25 + $0x2a0] sm:$0xff]  ;;  %v6749_v8 = vld [vmem:[#allocation25 + $0x358] sm:$0xff]  ;;  %v7489_v14 = vld [vmem:[#allocation25 + $0xa48] sm:$0xff] }
 0xc23   : > { %9599 = vmatprep.subr.bf16.mxu0 %v9598_v5  ;;  %9823 = vmatprep.subr.bf16.mxu1 %v9822_v30  ;;  %v9842_v5 = vpack.c.bf16 %v7397_v6, %v7395_v7  ;;  %v7394_v30 = vld [vmem:[#allocation25 + $0x9a0] sm:$0xff]  ;;  %v9620_v20 = vpack.c.bf16 %v6654_v39, %v6652_v16  ;;  %v7491_v7 = vld [vmem:[#allocation25 + $0xa58] sm:$0xff]  ;;  %v6748_v16 = vld [vmem:[#allocation25 + $0x350] sm:$0xff] }
 0xc24   : > { %v9844_v59 = vpack.c.bf16 %v7396_v61, %v7394_v30  ;;  %v7490_v30 = vld [vmem:[#allocation25 + $0xa50] sm:$0xff]  ;;  %v6751_v61 = vld [vmem:[#allocation25 + $0x368] sm:$0xff] }
 0xc25   : > { %6625 = vmatmul.mubr.f32.vlgmr.msra.gmra.mrb[10].mxu0 %v6423_v49  ;;  %7365 = vmatmul.mubr.f32.vlgmr.msra.gmra.mrb[54].mxu1 %v7267_v26 }
 0xc26   : > { %9601 = vmatpush1.bf16.msra.mxu0 %v9600_v36  ;;  %9825 = vmatpush1.bf16.msra.mxu1 %v9824_v35  ;;  %v6656_v36 = vld [vmem:[#allocation25 + $0x2c0] sm:$0xff]  ;;  %v6658_v35 = vld [vmem:[#allocation25 + $0x2d0] sm:$0xff] }
 0xc27   : > { %9603 = vmatprep.subr.bf16.mxu0 %v9602_v13  ;;  %9827 = vmatprep.subr.bf16.mxu1 %v9826_v4  ;;  %v7400_v13 = vld [vmem:[#allocation25 + $0x9d0] sm:$0xff]  ;;  %v6661_v4 = vld [vmem:[#allocation25 + $0x2e8] sm:$0xff]  ;;  %v9624_v49 = vpack.c.bf16 %v6658_v35, %v6656_v36  ;;  %v9642_v35 = vpack.c.bf16 %v6753_v55, %v6751_v61  ;;  %v7589_v61 = vld [vmem:[#allocation25 + $0xb18] sm:$0xff] }
 0xc28   : > { %6728 = vmatprep.mubr.f32.mxu0 %v10907_v2  ;;  %7470 = vmatprep.mubr.f32.mxu1 %v10907_v2  ;;  %v9848_v26 = vpack.c.bf16 %v7400_v13, %v7398_v53  ;;  %v6752_v36 = vld [vmem:[#allocation25 + $0x370] sm:$0xff]  ;;  %v6755_v13 = vld [vmem:[#allocation25 + $0x388] sm:$0xff] }
 0xc29   : > { %v7494_v53 = vld [vmem:[#allocation25 + $0xa70] sm:$0xff] }
 0xc2a   : > { %9605 = vmatpush1.bf16.msra.mxu0 %v9604_v29  ;;  %9829 = vmatpush1.bf16.msra.mxu1 %v9828_v48  ;;  %v6662_v29 = vld [vmem:[#allocation25 + $0x2f0] sm:$0xff]  ;;  %v9626_v48 = vpack.c.bf16 %v6663_v56, %v6661_v4  ;;  %v6757_v4 = vld [vmem:[#allocation25 + $0x398] sm:$0xff]  ;;  %v7497_v56 = vld [vmem:[#allocation25 + $0xa88] sm:$0xff] }
 0xc2b   : > { %9607 = vmatprep.subr.bf16.mxu0 %v9606_v50  ;;  %9831 = vmatprep.subr.bf16.mxu1 %v9830_v19  ;;  %v7404_v50 = vld [vmem:[#allocation25 + $0x9f0] sm:$0xff]  ;;  %v6739_v19 = vld [vmem:[#allocation25 + $0x308] sm:$0xff]  ;;  %v9628_v34 = vpack.c.bf16 %v6662_v29, %v6660_v22  ;;  %v9646_v29 = vpack.c.bf16 %v6757_v4, %v6755_v13  ;;  %v7593_v13 = vld [vmem:[#allocation25 + $0xb38] sm:$0xff] }
 0xc2c   : > { %v9852_v42 = vpack.c.bf16 %v7404_v50, %v7402_v10  ;;  %v6756_v22 = vld [vmem:[#allocation25 + $0x390] sm:$0xff]  ;;  %v6759_v50 = vld [vmem:[#allocation25 + $0x3a8] sm:$0xff]  ;;  %v6848_v4 = vld [vmem:[#allocation25 + $0x420] sm:$0xff] }
 0xc2d   : > { %v7498_v10 = vld [vmem:[#allocation25 + $0xa90] sm:$0xff] }
 0xc2e   : > { %9609 = vmatpush1.bf16.msra.mxu0 %v9608_v32  ;;  %9833 = vmatpush1.bf16.msra.mxu1 %v9832_v60  ;;  %v6740_v32 = vld [vmem:[#allocation25 + $0x310] sm:$0xff]  ;;  %v9630_v60 = vpack.c.bf16 %v6741_v27, %v6739_v19  ;;  %v6761_v19 = vld [vmem:[#allocation25 + $0x3b8] sm:$0xff]  ;;  %v7501_v27 = vld [vmem:[#allocation25 + $0xaa8] sm:$0xff] }
 0xc2f   : > { %9611 = vmatprep.subr.bf16.mxu0 %v9610_v1  ;;  %9835 = vmatprep.subr.bf16.mxu1 %v9834_v25  ;;  %v7482_v1 = vld [vmem:[#allocation25 + $0xa10] sm:$0xff]  ;;  %v6743_v25 = vld [vmem:[#allocation25 + $0x328] sm:$0xff]  ;;  %v9632_v17 = vpack.c.bf16 %v6740_v32, %v6738_v24  ;;  %v9650_v32 = vpack.c.bf16 %v6761_v19, %v6759_v50  ;;  %v6737_v50 = vld [vmem:[#allocation9 + $0x3] sm:$0x1] }
 0xc30   : > { %v9856_v11 = vpack.c.bf16 %v7482_v1, %v7480_v21  ;;  %v9634_v31 = vpack.c.bf16 %v6745_v44, %v6743_v25  ;;  %v6760_v24 = vld [vmem:[#allocation25 + $0x3b0] sm:$0xff]  ;;  %v6763_v1 = vld [vmem:[#allocation25 + $0x3c8] sm:$0xff]  ;;  %v6765_v25 = vld [vmem:[#allocation25 + $0x3d8] sm:$0xff] }
 0xc31   : > { %v7502_v21 = vld [vmem:[#allocation25 + $0xab0] sm:$0xff]  ;;  %v7505_v44 = vld [vmem:[#allocation25 + $0xac8] sm:$0xff]  ;;  %v7479_v19 = vld [vmem:[#allocation9 + $0xa] sm:$0x1] }
 0xc32   : > { %9613 = vmatpush1.bf16.msra.mxu0 %v9612_v23  ;;  %9837 = vmatpush1.bf16.msra.mxu1 %v9836_v62  ;;  %v6744_v23 = vld [vmem:[#allocation25 + $0x330] sm:$0xff]  ;;  %v7484_v62 = vld [vmem:[#allocation25 + $0xa20] sm:$0xff] }
 0xc33   : > { %9615 = vmatprep.subr.bf16.mxu0 %v9614_v37  ;;  %9839 = vmatprep.subr.bf16.mxu1 %v9838_v38  ;;  %v9858_v37 = vpack.c.bf16 %v7487_v33, %v7485_v57  ;;  %v6747_v38 = vld [vmem:[#allocation25 + $0x348] sm:$0xff]  ;;  %v9636_v6 = vpack.c.bf16 %v6744_v23, %v6742_v15  ;;  %v7507_v57 = vld [vmem:[#allocation25 + $0xad8] sm:$0xff]  ;;  %v9654_v23 = vpack.c.bf16 %v6765_v25, %v6763_v1 }
 0xc34   : > { %v9638_v39 = vpack.c.bf16 %v6749_v8, %v6747_v38  ;;  %v6769_v38 = vld [vmem:[#allocation25 + $0x3f8] sm:$0xff]  ;;  %v7509_v8 = vld [vmem:[#allocation25 + $0xae8] sm:$0xff] }
 0xc35   : > { %v6859_v1 = vld [vmem:[#allocation25 + $0x478] sm:$0xff]  ;;  %v7599_v25 = vld [vmem:[#allocation25 + $0xb68] sm:$0xff] }
 0xc36   : > { %9617 = vmatpush1.bf16.msra.mxu0 %v9616_v18  ;;  %9841 = vmatpush1.bf16.msra.mxu1 %v9840_v12  ;;  %v9860_v18 = vpack.c.bf16 %v7486_v51, %v7484_v62  ;;  %v6746_v12 = vld [vmem:[#allocation25 + $0x340] sm:$0xff]  ;;  %v9878_v62 = vpack.c.bf16 %v7507_v57, %v7505_v44  ;;  %v7601_v44 = vld [vmem:[#allocation25 + $0xb78] sm:$0xff] }
 0xc37   : > { %9619 = vmatprep.subr.bf16.mxu0 %v9618_v47  ;;  %9843 = vmatprep.subr.bf16.mxu1 %v9842_v5  ;;  %v9862_v47 = vpack.c.bf16 %v7491_v7, %v7489_v14  ;;  %v7488_v5 = vld [vmem:[#allocation25 + $0xa40] sm:$0xff]  ;;  %v9640_v54 = vpack.c.bf16 %v6748_v16, %v6746_v12  ;;  %v7511_v14 = vld [vmem:[#allocation25 + $0xaf8] sm:$0xff] }
 0xc38   : > { %v7504_v51 = vld [vmem:[#allocation25 + $0xac0] sm:$0xff]  ;;  %v9882_v12 = vpack.c.bf16 %v7511_v14, %v7509_v8  ;;  %v7605_v8 = vld [vmem:[#allocation25 + $0xb98] sm:$0xff] }
 0xc39   : > { %v6766_v7 = vld [vmem:[#allocation25 + $0x3e0] sm:$0xff] }
 0xc3a   : > { %9621 = vmatpush1.bf16.msra.mxu0 %v9620_v20  ;;  %9845 = vmatpush1.bf16.msra.mxu1 %v9844_v59  ;;  %v9864_v20 = vpack.c.bf16 %v7490_v30, %v7488_v5  ;;  %v6750_v59 = vld [vmem:[#allocation25 + $0x360] sm:$0xff]  ;;  %v6847_v5 = vld [vmem:[#allocation25 + $0x418] sm:$0xff]  ;;  %v7587_v30 = vld [vmem:[#allocation25 + $0xb08] sm:$0xff] }
 0xc3b   : > { %9623 = vmatprep.subr.bf16.mxu0 %v9622_v0  ;;  %9847 = vmatprep.subr.bf16.mxu1 %v9846_v28  ;;  %v9866_v0 = vpack.c.bf16 %v7495_v40, %v7493_v43  ;;  %v7492_v28 = vld [vmem:[#allocation25 + $0xa60] sm:$0xff]  ;;  %v9644_v63 = vpack.c.bf16 %v6752_v36, %v6750_v59  ;;  %v9886_v59 = vpack.c.bf16 %v7589_v61, %v7587_v30  ;;  %v7609_v30 = vld [vmem:[#allocation25 + $0xbb8] sm:$0xff] }
 0xc3c   : > { %v7508_v16 = vld [vmem:[#allocation25 + $0xae0] sm:$0xff] }
 0xc3d   : > { %v6844_v40 = vld [vmem:[#allocation25 + $0x400] sm:$0xff] }
 0xc3e   : > { %9625 = vmatpush1.bf16.msra.mxu0 %v9624_v49  ;;  %9849 = vmatpush1.bf16.msra.mxu1 %v9848_v26  ;;  %v9868_v49 = vpack.c.bf16 %v7494_v53, %v7492_v28  ;;  %v6754_v26 = vld [vmem:[#allocation25 + $0x380] sm:$0xff]  ;;  %v6851_v28 = vld [vmem:[#allocation25 + $0x438] sm:$0xff]  ;;  %v7591_v53 = vld [vmem:[#allocation25 + $0xb28] sm:$0xff] }
 0xc3f   : > { %9627 = vmatprep.subr.bf16.mxu0 %v9626_v48  ;;  %9851 = vmatprep.subr.bf16.mxu1 %v9850_v45  ;;  %v9870_v48 = vpack.c.bf16 %v7499_v9, %v7497_v56  ;;  %v7496_v45 = vld [vmem:[#allocation25 + $0xa80] sm:$0xff]  ;;  %v9648_v58 = vpack.c.bf16 %v6756_v22, %v6754_v26  ;;  %v7592_v26 = vld [vmem:[#allocation25 + $0xb30] sm:$0xff] }
 0xc40   : > { %v7586_v36 = vld [vmem:[#allocation25 + $0xb00] sm:$0xff] }
 0xc42   : > { %9629 = vmatpush1.bf16.msra.mxu0 %v9628_v34  ;;  %9853 = vmatpush1.bf16.msra.mxu1 %v9852_v42  ;;  %v9872_v34 = vpack.c.bf16 %v7498_v10, %v7496_v45  ;;  %v6758_v42 = vld [vmem:[#allocation25 + $0x3a0] sm:$0xff]  ;;  %v6855_v45 = vld [vmem:[#allocation25 + $0x458] sm:$0xff]  ;;  %v7595_v10 = vld [vmem:[#allocation25 + $0xb48] sm:$0xff] }
 0xc43   : > { %9631 = vmatprep.subr.bf16.mxu0 %v9630_v60  ;;  %9855 = vmatprep.subr.bf16.mxu1 %v9854_v52  ;;  %v9874_v60 = vpack.c.bf16 %v7503_v46, %v7501_v27  ;;  %v7500_v52 = vld [vmem:[#allocation25 + $0xaa0] sm:$0xff]  ;;  %v9652_v33 = vpack.c.bf16 %v6760_v24, %v6758_v42  ;;  %v7597_v27 = vld [vmem:[#allocation25 + $0xb58] sm:$0xff]  ;;  %v6854_v42 = vld [vmem:[#allocation25 + $0x450] sm:$0xff] }
 0xc44   : > { %v9876_v15 = vpack.c.bf16 %v7502_v21, %v7500_v52  ;;  %v7596_v52 = vld [vmem:[#allocation25 + $0xb50] sm:$0xff]  ;;  %v6857_v21 = vld [vmem:[#allocation25 + $0x468] sm:$0xff] }
 0xc45   : > { %6729 = vmatmul.mubr.f32.vlgmr.msra.gmra.mrb[10].mxu0 %v6631_v41  ;;  %7471 = vmatmul.mubr.f32.vlgmr.msra.gmra.mrb[54].mxu1 %v7373_v3 }
 0xc46   : > { %9633 = vmatpush1.bf16.msra.mxu0 %v9632_v17  ;;  %9857 = vmatpush1.bf16.msra.mxu1 %v9856_v11  ;;  %v6762_v17 = vld [vmem:[#allocation25 + $0x3c0] sm:$0xff]  ;;  %v6764_v11 = vld [vmem:[#allocation25 + $0x3d0] sm:$0xff] }
 0xc47   : > { %9635 = vmatprep.subr.bf16.mxu0 %v9634_v31  ;;  %9859 = vmatprep.subr.bf16.mxu1 %v9858_v37  ;;  %v7506_v31 = vld [vmem:[#allocation25 + $0xad0] sm:$0xff]  ;;  %v6767_v37 = vld [vmem:[#allocation25 + $0x3e8] sm:$0xff]  ;;  %v9656_v41 = vpack.c.bf16 %v6764_v11, %v6762_v17  ;;  %v9674_v11 = vpack.c.bf16 %v6859_v1, %v6857_v21  ;;  %v7695_v21 = vld [vmem:[#allocation25 + $0xc18] sm:$0xff] }
 0xc48   : > { %6834 = vmatprep.mubr.f32.mxu0 %v10907_v2  ;;  %7576 = vmatprep.mubr.f32.mxu1 %v10907_v2  ;;  %v9880_v3 = vpack.c.bf16 %v7506_v31, %v7504_v51  ;;  %v6858_v17 = vld [vmem:[#allocation25 + $0x470] sm:$0xff]  ;;  %v6861_v31 = vld [vmem:[#allocation25 + $0x488] sm:$0xff] }
 0xc49   : > { %v7600_v51 = vld [vmem:[#allocation25 + $0xb70] sm:$0xff] }
 0xc4a   : > { %9637 = vmatpush1.bf16.msra.mxu0 %v9636_v6  ;;  %9861 = vmatpush1.bf16.msra.mxu1 %v9860_v18  ;;  %v6768_v6 = vld [vmem:[#allocation25 + $0x3f0] sm:$0xff]  ;;  %v9658_v18 = vpack.c.bf16 %v6769_v38, %v6767_v37  ;;  %v6863_v37 = vld [vmem:[#allocation25 + $0x498] sm:$0xff]  ;;  %v7603_v38 = vld [vmem:[#allocation25 + $0xb88] sm:$0xff] }
 0xc4b   : > { %9639 = vmatprep.subr.bf16.mxu0 %v9638_v39  ;;  %9863 = vmatprep.subr.bf16.mxu1 %v9862_v47  ;;  %v7510_v39 = vld [vmem:[#allocation25 + $0xaf0] sm:$0xff]  ;;  %v6845_v47 = vld [vmem:[#allocation25 + $0x408] sm:$0xff]  ;;  %v9660_v55 = vpack.c.bf16 %v6768_v6, %v6766_v7  ;;  %v9678_v6 = vpack.c.bf16 %v6863_v37, %v6861_v31  ;;  %v7699_v31 = vld [vmem:[#allocation25 + $0xc38] sm:$0xff] }
 0xc4c   : > { %v9884_v43 = vpack.c.bf16 %v7510_v39, %v7508_v16  ;;  %v6862_v7 = vld [vmem:[#allocation25 + $0x490] sm:$0xff]  ;;  %v6865_v39 = vld [vmem:[#allocation25 + $0x4a8] sm:$0xff]  ;;  %v6843_v37 = vld [vmem:[#allocation9 + $0x4] sm:$0x1] }
 0xc4d   : > { %v7604_v16 = vld [vmem:[#allocation25 + $0xb90] sm:$0xff] }
 0xc4e   : > { %9641 = vmatpush1.bf16.msra.mxu0 %v9640_v54  ;;  %9865 = vmatpush1.bf16.msra.mxu1 %v9864_v20  ;;  %v6846_v54 = vld [vmem:[#allocation25 + $0x410] sm:$0xff]  ;;  %v9662_v20 = vpack.c.bf16 %v6847_v5, %v6845_v47  ;;  %v6867_v47 = vld [vmem:[#allocation25 + $0x4b8] sm:$0xff]  ;;  %v7607_v5 = vld [vmem:[#allocation25 + $0xba8] sm:$0xff] }
 0xc4f   : > { %9643 = vmatprep.subr.bf16.mxu0 %v9642_v35  ;;  %9867 = vmatprep.subr.bf16.mxu1 %v9866_v0  ;;  %v7588_v35 = vld [vmem:[#allocation25 + $0xb10] sm:$0xff]  ;;  %v6849_v0 = vld [vmem:[#allocation25 + $0x428] sm:$0xff]  ;;  %v9664_v56 = vpack.c.bf16 %v6846_v54, %v6844_v40  ;;  %v9682_v54 = vpack.c.bf16 %v6867_v47, %v6865_v39  ;;  %v6961_v39 = vld [vmem:[#allocation25 + $0x558] sm:$0xff] }
 0xc50   : > { %v9888_v9 = vpack.c.bf16 %v7588_v35, %v7586_v36  ;;  %v9666_v22 = vpack.c.bf16 %v6851_v28, %v6849_v0  ;;  %v6866_v40 = vld [vmem:[#allocation25 + $0x4b0] sm:$0xff]  ;;  %v6869_v35 = vld [vmem:[#allocation25 + $0x4c8] sm:$0xff]  ;;  %v6871_v0 = vld [vmem:[#allocation25 + $0x4d8] sm:$0xff] }
 0xc51   : > { %v7608_v36 = vld [vmem:[#allocation25 + $0xbb0] sm:$0xff]  ;;  %v7611_v28 = vld [vmem:[#allocation25 + $0xbc8] sm:$0xff] }
 0xc52   : > { %9645 = vmatpush1.bf16.msra.mxu0 %v9644_v63  ;;  %9869 = vmatpush1.bf16.msra.mxu1 %v9868_v49  ;;  %v6850_v63 = vld [vmem:[#allocation25 + $0x430] sm:$0xff]  ;;  %v7590_v49 = vld [vmem:[#allocation25 + $0xb20] sm:$0xff]  ;;  %v7701_v47 = vld [vmem:[#allocation25 + $0xc48] sm:$0xff] }
 0xc53   : > { %9647 = vmatprep.subr.bf16.mxu0 %v9646_v29  ;;  %9871 = vmatprep.subr.bf16.mxu1 %v9870_v48  ;;  %v9890_v29 = vpack.c.bf16 %v7593_v13, %v7591_v53  ;;  %v6853_v48 = vld [vmem:[#allocation25 + $0x448] sm:$0xff]  ;;  %v9668_v46 = vpack.c.bf16 %v6850_v63, %v6848_v4  ;;  %v7613_v53 = vld [vmem:[#allocation25 + $0xbd8] sm:$0xff]  ;;  %v9686_v63 = vpack.c.bf16 %v6871_v0, %v6869_v35 }
 0xc54   : > { %v9670_v24 = vpack.c.bf16 %v6855_v45, %v6853_v48  ;;  %v6875_v48 = vld [vmem:[#allocation25 + $0x4f8] sm:$0xff]  ;;  %v7615_v45 = vld [vmem:[#allocation25 + $0xbe8] sm:$0xff] }
 0xc55   : > { %v6965_v35 = vld [vmem:[#allocation25 + $0x578] sm:$0xff]  ;;  %v7705_v0 = vld [vmem:[#allocation25 + $0xc68] sm:$0xff] }
 0xc56   : > { %9649 = vmatpush1.bf16.msra.mxu0 %v9648_v58  ;;  %9873 = vmatpush1.bf16.msra.mxu1 %v9872_v34  ;;  %v9892_v58 = vpack.c.bf16 %v7592_v26, %v7590_v49  ;;  %v6852_v34 = vld [vmem:[#allocation25 + $0x440] sm:$0xff]  ;;  %v9910_v49 = vpack.c.bf16 %v7613_v53, %v7611_v28  ;;  %v7707_v28 = vld [vmem:[#allocation25 + $0xc78] sm:$0xff] }
 0xc57   : > { %9651 = vmatprep.subr.bf16.mxu0 %v9650_v32  ;;  %9875 = vmatprep.subr.bf16.mxu1 %v9874_v60  ;;  %v9894_v32 = vpack.c.bf16 %v7597_v27, %v7595_v10  ;;  %v7594_v60 = vld [vmem:[#allocation25 + $0xb40] sm:$0xff]  ;;  %v9672_v57 = vpack.c.bf16 %v6854_v42, %v6852_v34  ;;  %v7617_v10 = vld [vmem:[#allocation25 + $0xbf8] sm:$0xff] }
 0xc58   : > { %v7610_v26 = vld [vmem:[#allocation25 + $0xbc0] sm:$0xff]  ;;  %v9914_v34 = vpack.c.bf16 %v7617_v10, %v7615_v45  ;;  %v7711_v45 = vld [vmem:[#allocation25 + $0xc98] sm:$0xff] }
 0xc59   : > { %v6872_v27 = vld [vmem:[#allocation25 + $0x4e0] sm:$0xff] }
 0xc5a   : > { %9653 = vmatpush1.bf16.msra.mxu0 %v9652_v33  ;;  %9877 = vmatpush1.bf16.msra.mxu1 %v9876_v15  ;;  %v9896_v33 = vpack.c.bf16 %v7596_v52, %v7594_v60  ;;  %v6856_v15 = vld [vmem:[#allocation25 + $0x460] sm:$0xff]  ;;  %v6953_v60 = vld [vmem:[#allocation25 + $0x518] sm:$0xff]  ;;  %v7693_v52 = vld [vmem:[#allocation25 + $0xc08] sm:$0xff] }
 0xc5b   : > { %9655 = vmatprep.subr.bf16.mxu0 %v9654_v23  ;;  %9879 = vmatprep.subr.bf16.mxu1 %v9878_v62  ;;  %v9898_v23 = vpack.c.bf16 %v7601_v44, %v7599_v25  ;;  %v7598_v62 = vld [vmem:[#allocation25 + $0xb60] sm:$0xff]  ;;  %v9676_v14 = vpack.c.bf16 %v6858_v17, %v6856_v15  ;;  %v9918_v15 = vpack.c.bf16 %v7695_v21, %v7693_v52  ;;  %v7715_v52 = vld [vmem:[#allocation25 + $0xcb8] sm:$0xff] }
 0xc5c   : > { %v7614_v42 = vld [vmem:[#allocation25 + $0xbe0] sm:$0xff] }
 0xc5d   : > { %v6950_v44 = vld [vmem:[#allocation25 + $0x500] sm:$0xff] }
 0xc5e   : > { %9657 = vmatpush1.bf16.msra.mxu0 %v9656_v41  ;;  %9881 = vmatpush1.bf16.msra.mxu1 %v9880_v3  ;;  %v9900_v41 = vpack.c.bf16 %v7600_v51, %v7598_v62  ;;  %v6860_v3 = vld [vmem:[#allocation25 + $0x480] sm:$0xff]  ;;  %v6957_v62 = vld [vmem:[#allocation25 + $0x538] sm:$0xff]  ;;  %v7697_v51 = vld [vmem:[#allocation25 + $0xc28] sm:$0xff] }
 0xc5f   : > { %9659 = vmatprep.subr.bf16.mxu0 %v9658_v18  ;;  %9883 = vmatprep.subr.bf16.mxu1 %v9882_v12  ;;  %v9902_v18 = vpack.c.bf16 %v7605_v8, %v7603_v38  ;;  %v7602_v12 = vld [vmem:[#allocation25 + $0xb80] sm:$0xff]  ;;  %v9680_v61 = vpack.c.bf16 %v6862_v7, %v6860_v3  ;;  %v6956_v3 = vld [vmem:[#allocation25 + $0x530] sm:$0xff] }
 0xc60   : > { %v7692_v17 = vld [vmem:[#allocation25 + $0xc00] sm:$0xff] }
 0xc61   : > { %v7585_v38 = vld [vmem:[#allocation9 + $0xb] sm:$0x1] }
 0xc62   : > { %9661 = vmatpush1.bf16.msra.mxu0 %v9660_v55  ;;  %9885 = vmatpush1.bf16.msra.mxu1 %v9884_v43  ;;  %v9904_v55 = vpack.c.bf16 %v7604_v16, %v7602_v12  ;;  %v6864_v43 = vld [vmem:[#allocation25 + $0x4a0] sm:$0xff]  ;;  %v7698_v12 = vld [vmem:[#allocation25 + $0xc30] sm:$0xff]  ;;  %v6959_v16 = vld [vmem:[#allocation25 + $0x548] sm:$0xff] }
 0xc63   : > { %9663 = vmatprep.subr.bf16.mxu0 %v9662_v20  ;;  %9887 = vmatprep.subr.bf16.mxu1 %v9886_v59  ;;  %v9906_v20 = vpack.c.bf16 %v7609_v30, %v7607_v5  ;;  %v7606_v59 = vld [vmem:[#allocation25 + $0xba0] sm:$0xff]  ;;  %v9684_v13 = vpack.c.bf16 %v6866_v40, %v6864_v43  ;;  %v7703_v5 = vld [vmem:[#allocation25 + $0xc58] sm:$0xff]  ;;  %v6960_v43 = vld [vmem:[#allocation25 + $0x550] sm:$0xff]  ;;  %v9702_v40 = vpack.c.bf16 %v6961_v39, %v6959_v16 }
 0xc64   : > { %v9908_v4 = vpack.c.bf16 %v7608_v36, %v7606_v59  ;;  %v7702_v59 = vld [vmem:[#allocation25 + $0xc50] sm:$0xff]  ;;  %v6963_v36 = vld [vmem:[#allocation25 + $0x568] sm:$0xff]  ;;  %v7723_v16 = vld [vmem:[#allocation25 + $0xcf8] sm:$0xff] }
 0xc65   : > { %6835 = vmatmul.mubr.f32.vlgmr.msra.gmra.mrb[10].mxu0 %v6737_v50  ;;  %7577 = vmatmul.mubr.f32.vlgmr.msra.gmra.mrb[54].mxu1 %v7479_v19 }
 0xc66   : > { %9665 = vmatpush1.bf16.msra.mxu0 %v9664_v56  ;;  %9889 = vmatpush1.bf16.msra.mxu1 %v9888_v9  ;;  %v6868_v56 = vld [vmem:[#allocation25 + $0x4c0] sm:$0xff]  ;;  %v6870_v9 = vld [vmem:[#allocation25 + $0x4d0] sm:$0xff] }
 0xc67   : > { %9667 = vmatprep.subr.bf16.mxu0 %v9666_v22  ;;  %9891 = vmatprep.subr.bf16.mxu1 %v9890_v29  ;;  %v7612_v22 = vld [vmem:[#allocation25 + $0xbd0] sm:$0xff]  ;;  %v6873_v29 = vld [vmem:[#allocation25 + $0x4e8] sm:$0xff]  ;;  %v9688_v50 = vpack.c.bf16 %v6870_v9, %v6868_v56  ;;  %v9706_v9 = vpack.c.bf16 %v6965_v35, %v6963_v36  ;;  %v7801_v36 = vld [vmem:[#allocation25 + $0xd18] sm:$0xff] }
 0xc68   : > { %6940 = vmatprep.mubr.f32.mxu0 %v10907_v2  ;;  %7682 = vmatprep.mubr.f32.mxu1 %v10907_v2  ;;  %v9912_v19 = vpack.c.bf16 %v7612_v22, %v7610_v26  ;;  %v6964_v56 = vld [vmem:[#allocation25 + $0x570] sm:$0xff]  ;;  %v6967_v22 = vld [vmem:[#allocation25 + $0x588] sm:$0xff] }
 0xc69   : > { %v7706_v26 = vld [vmem:[#allocation25 + $0xc70] sm:$0xff] }
 0xc6a   : > { %9669 = vmatpush1.bf16.msra.mxu0 %v9668_v46  ;;  %9893 = vmatpush1.bf16.msra.mxu1 %v9892_v58  ;;  %v6874_v46 = vld [vmem:[#allocation25 + $0x4f0] sm:$0xff]  ;;  %v9690_v58 = vpack.c.bf16 %v6875_v48, %v6873_v29  ;;  %v6969_v29 = vld [vmem:[#allocation25 + $0x598] sm:$0xff]  ;;  %v7709_v48 = vld [vmem:[#allocation25 + $0xc88] sm:$0xff] }
 0xc6b   : > { %9671 = vmatprep.subr.bf16.mxu0 %v9670_v24  ;;  %9895 = vmatprep.subr.bf16.mxu1 %v9894_v32  ;;  %v7616_v24 = vld [vmem:[#allocation25 + $0xbf0] sm:$0xff]  ;;  %v6951_v32 = vld [vmem:[#allocation25 + $0x508] sm:$0xff]  ;;  %v9692_v1 = vpack.c.bf16 %v6874_v46, %v6872_v27  ;;  %v9710_v46 = vpack.c.bf16 %v6969_v29, %v6967_v22  ;;  %v7805_v22 = vld [vmem:[#allocation25 + $0xd38] sm:$0xff] }
 0xc6c   : > { %v9916_v25 = vpack.c.bf16 %v7616_v24, %v7614_v42  ;;  %v6968_v27 = vld [vmem:[#allocation25 + $0x590] sm:$0xff]  ;;  %v6971_v24 = vld [vmem:[#allocation25 + $0x5a8] sm:$0xff]  ;;  %v6949_v29 = vld [vmem:[#allocation9 + $0x5] sm:$0x1] }
 0xc6d   : > { %v7710_v42 = vld [vmem:[#allocation25 + $0xc90] sm:$0xff] }
 0xc6e   : > { %9673 = vmatpush1.bf16.msra.mxu0 %v9672_v57  ;;  %9897 = vmatpush1.bf16.msra.mxu1 %v9896_v33  ;;  %v6952_v57 = vld [vmem:[#allocation25 + $0x510] sm:$0xff]  ;;  %v9694_v33 = vpack.c.bf16 %v6953_v60, %v6951_v32  ;;  %v6973_v32 = vld [vmem:[#allocation25 + $0x5b8] sm:$0xff]  ;;  %v7713_v60 = vld [vmem:[#allocation25 + $0xca8] sm:$0xff] }
 0xc6f   : > { %9675 = vmatprep.subr.bf16.mxu0 %v9674_v11  ;;  %9899 = vmatprep.subr.bf16.mxu1 %v9898_v23  ;;  %v7694_v11 = vld [vmem:[#allocation25 + $0xc10] sm:$0xff]  ;;  %v6955_v23 = vld [vmem:[#allocation25 + $0x528] sm:$0xff]  ;;  %v9696_v8 = vpack.c.bf16 %v6952_v57, %v6950_v44  ;;  %v9714_v57 = vpack.c.bf16 %v6973_v32, %v6971_v24  ;;  %v7067_v24 = vld [vmem:[#allocation25 + $0x658] sm:$0xff] }
 0xc70   : > { %v9698_v7 = vpack.c.bf16 %v6957_v62, %v6955_v23  ;;  %v6972_v44 = vld [vmem:[#allocation25 + $0x5b0] sm:$0xff]  ;;  %v6977_v23 = vld [vmem:[#allocation25 + $0x5d8] sm:$0xff]  ;;  %v7717_v62 = vld [vmem:[#allocation25 + $0xcc8] sm:$0xff] }
 0xc71   : > { %v7807_v32 = vld [vmem:[#allocation25 + $0xd48] sm:$0xff] }
 0xc72   : > { %9677 = vmatpush1.bf16.msra.mxu0 %v9676_v14  ;;  %9901 = vmatpush1.bf16.msra.mxu1 %v9900_v41  ;;  %v9920_v14 = vpack.c.bf16 %v7694_v11, %v7692_v17  ;;  %v6954_v41 = vld [vmem:[#allocation25 + $0x520] sm:$0xff]  ;;  %v7714_v17 = vld [vmem:[#allocation25 + $0xcb0] sm:$0xff]  ;;  %v6975_v11 = vld [vmem:[#allocation25 + $0x5c8] sm:$0xff] }
 0xc73   : > { %9679 = vmatprep.subr.bf16.mxu0 %v9678_v6  ;;  %9903 = vmatprep.subr.bf16.mxu1 %v9902_v18  ;;  %v9922_v6 = vpack.c.bf16 %v7699_v31, %v7697_v51  ;;  %v7696_v18 = vld [vmem:[#allocation25 + $0xc20] sm:$0xff]  ;;  %v9700_v30 = vpack.c.bf16 %v6956_v3, %v6954_v41  ;;  %v7719_v51 = vld [vmem:[#allocation25 + $0xcd8] sm:$0xff] }
 0xc74   : > { %v9942_v41 = vpack.c.bf16 %v7719_v51, %v7717_v62  ;;  %v7716_v3 = vld [vmem:[#allocation25 + $0xcc0] sm:$0xff]  ;;  %v7813_v62 = vld [vmem:[#allocation25 + $0xd78] sm:$0xff] }
 0xc76   : > { %9681 = vmatpush1.bf16.msra.mxu0 %v9680_v61  ;;  %9905 = vmatpush1.bf16.msra.mxu1 %v9904_v55  ;;  %v9924_v61 = vpack.c.bf16 %v7698_v12, %v7696_v18  ;;  %v6958_v55 = vld [vmem:[#allocation25 + $0x540] sm:$0xff]  ;;  %v6981_v18 = vld [vmem:[#allocation25 + $0x5f8] sm:$0xff]  ;;  %v7721_v12 = vld [vmem:[#allocation25 + $0xce8] sm:$0xff] }
 0xc77   : > { %9683 = vmatprep.subr.bf16.mxu0 %v9682_v54  ;;  %9907 = vmatprep.subr.bf16.mxu1 %v9906_v20  ;;  %v9926_v54 = vpack.c.bf16 %v7703_v5, %v7701_v47  ;;  %v7700_v20 = vld [vmem:[#allocation25 + $0xc40] sm:$0xff]  ;;  %v9704_v53 = vpack.c.bf16 %v6960_v43, %v6958_v55  ;;  %v9946_v55 = vpack.c.bf16 %v7723_v16, %v7721_v12  ;;  %v7817_v12 = vld [vmem:[#allocation25 + $0xd98] sm:$0xff] }
 0xc78   : > { %v6978_v5 = vld [vmem:[#allocation25 + $0x5e0] sm:$0xff] }
 0xc79   : > { %v7720_v43 = vld [vmem:[#allocation25 + $0xce0] sm:$0xff] }
 0xc7a   : > { %9685 = vmatpush1.bf16.msra.mxu0 %v9684_v13  ;;  %9909 = vmatpush1.bf16.msra.mxu1 %v9908_v4  ;;  %v9928_v13 = vpack.c.bf16 %v7702_v59, %v7700_v20  ;;  %v6962_v4 = vld [vmem:[#allocation25 + $0x560] sm:$0xff]  ;;  %v7059_v20 = vld [vmem:[#allocation25 + $0x618] sm:$0xff]  ;;  %v7799_v59 = vld [vmem:[#allocation25 + $0xd08] sm:$0xff] }
 0xc7b   : > { %9687 = vmatprep.subr.bf16.mxu0 %v9686_v63  ;;  %9911 = vmatprep.subr.bf16.mxu1 %v9910_v49  ;;  %v9930_v63 = vpack.c.bf16 %v7707_v28, %v7705_v0  ;;  %v7704_v49 = vld [vmem:[#allocation25 + $0xc60] sm:$0xff]  ;;  %v9708_v10 = vpack.c.bf16 %v6964_v56, %v6962_v4  ;;  %v9950_v4 = vpack.c.bf16 %v7801_v36, %v7799_v59  ;;  %v7821_v59 = vld [vmem:[#allocation25 + $0xdb8] sm:$0xff] }
 0xc7c   : > { %v7056_v28 = vld [vmem:[#allocation25 + $0x600] sm:$0xff] }
 0xc7d   : > { %v7798_v56 = vld [vmem:[#allocation25 + $0xd00] sm:$0xff] }
 0xc7e   : > { %9689 = vmatpush1.bf16.msra.mxu0 %v9688_v50  ;;  %9913 = vmatpush1.bf16.msra.mxu1 %v9912_v19  ;;  %v9932_v50 = vpack.c.bf16 %v7706_v26, %v7704_v49  ;;  %v6966_v19 = vld [vmem:[#allocation25 + $0x580] sm:$0xff]  ;;  %v7063_v49 = vld [vmem:[#allocation25 + $0x638] sm:$0xff]  ;;  %v7803_v26 = vld [vmem:[#allocation25 + $0xd28] sm:$0xff] }
 0xc7f   : > { %9691 = vmatprep.subr.bf16.mxu0 %v9690_v58  ;;  %9915 = vmatprep.subr.bf16.mxu1 %v9914_v34  ;;  %v9934_v58 = vpack.c.bf16 %v7711_v45, %v7709_v48  ;;  %v7708_v34 = vld [vmem:[#allocation25 + $0xc80] sm:$0xff]  ;;  %v9712_v21 = vpack.c.bf16 %v6968_v27, %v6966_v19  ;;  %v7062_v19 = vld [vmem:[#allocation25 + $0x630] sm:$0xff] }
 0xc80   : > { %v7691_v48 = vld [vmem:[#allocation9 + $0xc] sm:$0x1] }
 0xc82   : > { %9693 = vmatpush1.bf16.msra.mxu0 %v9692_v1  ;;  %9917 = vmatpush1.bf16.msra.mxu1 %v9916_v25  ;;  %v9936_v1 = vpack.c.bf16 %v7710_v42, %v7708_v34  ;;  %v6970_v25 = vld [vmem:[#allocation25 + $0x5a0] sm:$0xff]  ;;  %v7804_v34 = vld [vmem:[#allocation25 + $0xd30] sm:$0xff]  ;;  %v7065_v42 = vld [vmem:[#allocation25 + $0x648] sm:$0xff] }
 0xc83   : > { %9695 = vmatprep.subr.bf16.mxu0 %v9694_v33  ;;  %9919 = vmatprep.subr.bf16.mxu1 %v9918_v15  ;;  %v9938_v33 = vpack.c.bf16 %v7715_v52, %v7713_v60  ;;  %v7712_v15 = vld [vmem:[#allocation25 + $0xca0] sm:$0xff]  ;;  %v9716_v31 = vpack.c.bf16 %v6972_v44, %v6970_v25  ;;  %v7809_v60 = vld [vmem:[#allocation25 + $0xd58] sm:$0xff]  ;;  %v7066_v25 = vld [vmem:[#allocation25 + $0x650] sm:$0xff]  ;;  %v9734_v44 = vpack.c.bf16 %v7067_v24, %v7065_v42 }
 0xc84   : > { %v7829_v42 = vld [vmem:[#allocation25 + $0xdf8] sm:$0xff] }
 0xc85   : > { %6941 = vmatmul.mubr.f32.vlgmr.msra.gmra.mrb[10].mxu0 %v6843_v37  ;;  %7683 = vmatmul.mubr.f32.vlgmr.msra.gmra.mrb[54].mxu1 %v7585_v38  ;;  %v9940_v37 = vpack.c.bf16 %v7714_v17, %v7712_v15  ;;  %v6974_v38 = vld [vmem:[#allocation25 + $0x5c0] sm:$0xff]  ;;  %v7808_v15 = vld [vmem:[#allocation25 + $0xd50] sm:$0xff]  ;;  %v7069_v17 = vld [vmem:[#allocation25 + $0x668] sm:$0xff] }
 0xc86   : > { %9697 = vmatpush1.bf16.msra.mxu0 %v9696_v8  ;;  %9921 = vmatpush1.bf16.msra.mxu1 %v9920_v14  ;;  %v6976_v8 = vld [vmem:[#allocation25 + $0x5d0] sm:$0xff]  ;;  %v9718_v14 = vpack.c.bf16 %v6977_v23, %v6975_v11  ;;  %v7071_v11 = vld [vmem:[#allocation25 + $0x678] sm:$0xff]  ;;  %v7811_v23 = vld [vmem:[#allocation25 + $0xd68] sm:$0xff] }
 0xc87   : > { %9699 = vmatprep.subr.bf16.mxu0 %v9698_v7  ;;  %9923 = vmatprep.subr.bf16.mxu1 %v9922_v6  ;;  %v7718_v7 = vld [vmem:[#allocation25 + $0xcd0] sm:$0xff]  ;;  %v6979_v6 = vld [vmem:[#allocation25 + $0x5e8] sm:$0xff]  ;;  %v9720_v39 = vpack.c.bf16 %v6976_v8, %v6974_v38  ;;  %v9738_v8 = vpack.c.bf16 %v7071_v11, %v7069_v17 }
 0xc88   : > { %7046 = vmatprep.mubr.f32.mxu0 %v10907_v2  ;;  %7788 = vmatprep.mubr.f32.mxu1 %v10907_v2  ;;  %v9944_v47 = vpack.c.bf16 %v7718_v7, %v7716_v3  ;;  %v7070_v38 = vld [vmem:[#allocation25 + $0x670] sm:$0xff]  ;;  %v7073_v7 = vld [vmem:[#allocation25 + $0x688] sm:$0xff] }
 0xc89   : > { %v7812_v3 = vld [vmem:[#allocation25 + $0xd70] sm:$0xff] }
 0xc8a   : > { %9701 = vmatpush1.bf16.msra.mxu0 %v9700_v30  ;;  %9925 = vmatpush1.bf16.msra.mxu1 %v9924_v61  ;;  %v6980_v30 = vld [vmem:[#allocation25 + $0x5f0] sm:$0xff]  ;;  %v9722_v61 = vpack.c.bf16 %v6981_v18, %v6979_v6  ;;  %v7075_v6 = vld [vmem:[#allocation25 + $0x698] sm:$0xff]  ;;  %v7815_v18 = vld [vmem:[#allocation25 + $0xd88] sm:$0xff] }
 0xc8b   : > { %9703 = vmatprep.subr.bf16.mxu0 %v9702_v40  ;;  %9927 = vmatprep.subr.bf16.mxu1 %v9926_v54  ;;  %v7722_v40 = vld [vmem:[#allocation25 + $0xcf0] sm:$0xff]  ;;  %v7057_v54 = vld [vmem:[#allocation25 + $0x608] sm:$0xff]  ;;  %v9724_v35 = vpack.c.bf16 %v6980_v30, %v6978_v5  ;;  %v9742_v30 = vpack.c.bf16 %v7075_v6, %v7073_v7  ;;  %v7915_v6 = vld [vmem:[#allocation25 + $0xe58] sm:$0xff] }
 0xc8c   : > { %v9948_v0 = vpack.c.bf16 %v7722_v40, %v7720_v43  ;;  %v7074_v5 = vld [vmem:[#allocation25 + $0x690] sm:$0xff]  ;;  %v7077_v40 = vld [vmem:[#allocation25 + $0x6a8] sm:$0xff] }
 0xc8d   : > { %v7816_v43 = vld [vmem:[#allocation25 + $0xd90] sm:$0xff]  ;;  %v7913_v7 = vld [vmem:[#allocation25 + $0xe48] sm:$0xff] }
 0xc8e   : > { %9705 = vmatpush1.bf16.msra.mxu0 %v9704_v53  ;;  %9929 = vmatpush1.bf16.msra.mxu1 %v9928_v13  ;;  %v7058_v53 = vld [vmem:[#allocation25 + $0x610] sm:$0xff]  ;;  %v9726_v13 = vpack.c.bf16 %v7059_v20, %v7057_v54  ;;  %v7079_v54 = vld [vmem:[#allocation25 + $0x6b8] sm:$0xff]  ;;  %v7819_v20 = vld [vmem:[#allocation25 + $0xda8] sm:$0xff] }
 0xc8f   : > { %9707 = vmatprep.subr.bf16.mxu0 %v9706_v9  ;;  %9931 = vmatprep.subr.bf16.mxu1 %v9930_v63  ;;  %v7800_v9 = vld [vmem:[#allocation25 + $0xd10] sm:$0xff]  ;;  %v7061_v63 = vld [vmem:[#allocation25 + $0x628] sm:$0xff]  ;;  %v9728_v45 = vpack.c.bf16 %v7058_v53, %v7056_v28  ;;  %v9746_v53 = vpack.c.bf16 %v7079_v54, %v7077_v40  ;;  %v7923_v54 = vld [vmem:[#allocation25 + $0xe98] sm:$0xff] }
 0xc90   : > { %v9730_v27 = vpack.c.bf16 %v7063_v49, %v7061_v63  ;;  %v7078_v28 = vld [vmem:[#allocation25 + $0x6b0] sm:$0xff]  ;;  %v7083_v63 = vld [vmem:[#allocation25 + $0x6d8] sm:$0xff]  ;;  %v7823_v49 = vld [vmem:[#allocation25 + $0xdc8] sm:$0xff] }
 0xc91   : > { %v7921_v40 = vld [vmem:[#allocation25 + $0xe88] sm:$0xff] }
 0xc92   : > { %9709 = vmatpush1.bf16.msra.mxu0 %v9708_v10  ;;  %9933 = vmatpush1.bf16.msra.mxu1 %v9932_v50  ;;  %v9952_v10 = vpack.c.bf16 %v7800_v9, %v7798_v56  ;;  %v7060_v50 = vld [vmem:[#allocation25 + $0x620] sm:$0xff]  ;;  %v7820_v56 = vld [vmem:[#allocation25 + $0xdb0] sm:$0xff]  ;;  %v7081_v9 = vld [vmem:[#allocation25 + $0x6c8] sm:$0xff] }
 0xc93   : > { %9711 = vmatprep.subr.bf16.mxu0 %v9710_v46  ;;  %9935 = vmatprep.subr.bf16.mxu1 %v9934_v58  ;;  %v9954_v46 = vpack.c.bf16 %v7805_v22, %v7803_v26  ;;  %v7802_v58 = vld [vmem:[#allocation25 + $0xd20] sm:$0xff]  ;;  %v9732_v52 = vpack.c.bf16 %v7062_v19, %v7060_v50  ;;  %v7825_v26 = vld [vmem:[#allocation25 + $0xdd8] sm:$0xff] }
 0xc94   : > { %v9974_v50 = vpack.c.bf16 %v7825_v26, %v7823_v49  ;;  %v7822_v19 = vld [vmem:[#allocation25 + $0xdc0] sm:$0xff] }
 0xc96   : > { %9713 = vmatpush1.bf16.msra.mxu0 %v9712_v21  ;;  %9937 = vmatpush1.bf16.msra.mxu1 %v9936_v1  ;;  %v9956_v21 = vpack.c.bf16 %v7804_v34, %v7802_v58  ;;  %v7064_v1 = vld [vmem:[#allocation25 + $0x640] sm:$0xff]  ;;  %v7087_v58 = vld [vmem:[#allocation25 + $0x6f8] sm:$0xff]  ;;  %v7827_v34 = vld [vmem:[#allocation25 + $0xde8] sm:$0xff] }
 0xc97   : > { %9715 = vmatprep.subr.bf16.mxu0 %v9714_v57  ;;  %9939 = vmatprep.subr.bf16.mxu1 %v9938_v33  ;;  %v9958_v57 = vpack.c.bf16 %v7809_v60, %v7807_v32  ;;  %v7806_v33 = vld [vmem:[#allocation25 + $0xd40] sm:$0xff]  ;;  %v9736_v51 = vpack.c.bf16 %v7066_v25, %v7064_v1  ;;  %v7086_v1 = vld [vmem:[#allocation25 + $0x6f0] sm:$0xff] }
 0xc98   : > { %v7084_v60 = vld [vmem:[#allocation25 + $0x6e0] sm:$0xff] }
 0xc99   : > { %v7826_v25 = vld [vmem:[#allocation25 + $0xde0] sm:$0xff] }
 0xc9a   : > { %9717 = vmatpush1.bf16.msra.mxu0 %v9716_v31  ;;  %9941 = vmatpush1.bf16.msra.mxu1 %v9940_v37  ;;  %v9960_v31 = vpack.c.bf16 %v7808_v15, %v7806_v33  ;;  %v7068_v37 = vld [vmem:[#allocation25 + $0x660] sm:$0xff]  ;;  %v7907_v33 = vld [vmem:[#allocation25 + $0xe18] sm:$0xff]  ;;  %v9756_v15 = vpack.c.bf16 %v7086_v1, %v7084_v60  ;;  %v8015_v60 = vld [vmem:[#allocation25 + $0xf28] sm:$0xff] }
 0xc9b   : > { %9719 = vmatprep.subr.bf16.mxu0 %v9718_v14  ;;  %9943 = vmatprep.subr.bf16.mxu1 %v9942_v41  ;;  %v9962_v14 = vpack.c.bf16 %v7813_v62, %v7811_v23  ;;  %v7810_v41 = vld [vmem:[#allocation25 + $0xd60] sm:$0xff]  ;;  %v9740_v16 = vpack.c.bf16 %v7070_v38, %v7068_v37  ;;  %v7906_v62 = vld [vmem:[#allocation25 + $0xe10] sm:$0xff] }
 0xc9c   : > { %v7904_v23 = vld [vmem:[#allocation25 + $0xe00] sm:$0xff] }
 0xc9d   : > { %v9984_v37 = vpack.c.bf16 %v7906_v62, %v7904_v23  ;;  %v7055_v38 = vld [vmem:[#allocation9 + $0x6] sm:$0x1]  ;;  %v8020_v62 = vld [vmem:[#allocation25 + $0xf50] sm:$0xff] }
 0xc9e   : > { %9721 = vmatpush1.bf16.msra.mxu0 %v9720_v39  ;;  %9945 = vmatpush1.bf16.msra.mxu1 %v9944_v47  ;;  %v9964_v39 = vpack.c.bf16 %v7812_v3, %v7810_v41  ;;  %v7072_v47 = vld [vmem:[#allocation25 + $0x680] sm:$0xff]  ;;  %v7910_v41 = vld [vmem:[#allocation25 + $0xe30] sm:$0xff] }
 0xc9f   : > { %9723 = vmatprep.subr.bf16.mxu0 %v9722_v61  ;;  %9947 = vmatprep.subr.bf16.mxu1 %v9946_v55  ;;  %v9966_v61 = vpack.c.bf16 %v7817_v12, %v7815_v18  ;;  %v7814_v55 = vld [vmem:[#allocation25 + $0xd80] sm:$0xff]  ;;  %v9744_v36 = vpack.c.bf16 %v7074_v5, %v7072_v47  ;;  %v9990_v12 = vpack.c.bf16 %v7915_v6, %v7913_v7  ;;  %v7917_v47 = vld [vmem:[#allocation25 + $0xe68] sm:$0xff]  ;;  %v7919_v5 = vld [vmem:[#allocation25 + $0xe78] sm:$0xff] }
 0xca0   : > { %v7797_v3 = vld [vmem:[#allocation9 + $0xd] sm:$0x1] }
 0xca1   : > { %v8018_v23 = vld [vmem:[#allocation25 + $0xf40] sm:$0xff] }
 0xca2   : > { %9725 = vmatpush1.bf16.msra.mxu0 %v9724_v35  ;;  %9949 = vmatpush1.bf16.msra.mxu1 %v9948_v0  ;;  %v9968_v35 = vpack.c.bf16 %v7816_v43, %v7814_v55  ;;  %v7076_v0 = vld [vmem:[#allocation25 + $0x6a0] sm:$0xff]  ;;  %v7918_v43 = vld [vmem:[#allocation25 + $0xe70] sm:$0xff] }
 0xca3   : > { %9727 = vmatprep.subr.bf16.mxu0 %v9726_v13  ;;  %9951 = vmatprep.subr.bf16.mxu1 %v9950_v4  ;;  %v9970_v13 = vpack.c.bf16 %v7821_v59, %v7819_v20  ;;  %v7818_v4 = vld [vmem:[#allocation25 + $0xda0] sm:$0xff]  ;;  %v9748_v22 = vpack.c.bf16 %v7078_v28, %v7076_v0  ;;  %v9998_v59 = vpack.c.bf16 %v7923_v54, %v7921_v40  ;;  %v7925_v0 = vld [vmem:[#allocation25 + $0xea8] sm:$0xff]  ;;  %v7927_v28 = vld [vmem:[#allocation25 + $0xeb8] sm:$0xff] }
 0xca4   : > { %v7916_v55 = vld [vmem:[#allocation25 + $0xe60] sm:$0xff] }
 0xca5   : > { %7047 = vmatmul.mubr.f32.vlgmr.msra.gmra.mrb[10].mxu0 %v6949_v29  ;;  %7789 = vmatmul.mubr.f32.vlgmr.msra.gmra.mrb[54].mxu1 %v7691_v48  ;;  %v9972_v29 = vpack.c.bf16 %v7820_v56, %v7818_v4  ;;  %v7080_v48 = vld [vmem:[#allocation25 + $0x6c0] sm:$0xff]  ;;  %v9996_v20 = vpack.c.bf16 %v7918_v43, %v7916_v55  ;;  %v7926_v56 = vld [vmem:[#allocation25 + $0xeb0] sm:$0xff]  ;;  %v8037_v55 = vld [vmem:[#allocation25 + $0xfd8] sm:$0xff] }
 0xca6   : > { %9729 = vmatpush1.bf16.msra.mxu0 %v9728_v45  ;;  %9953 = vmatpush1.bf16.msra.mxu1 %v9952_v10  ;;  %v7082_v45 = vld [vmem:[#allocation25 + $0x6d0] sm:$0xff]  ;;  %v9750_v10 = vpack.c.bf16 %v7083_v63, %v7081_v9  ;;  %v7924_v4 = vld [vmem:[#allocation25 + $0xea0] sm:$0xff]  ;;  %v7929_v9 = vld [vmem:[#allocation25 + $0xec8] sm:$0xff] }
 0xca7   : > { %9731 = vmatprep.subr.bf16.mxu0 %v9730_v27  ;;  %9955 = vmatprep.subr.bf16.mxu1 %v9954_v46  ;;  %v7824_v27 = vld [vmem:[#allocation25 + $0xdd0] sm:$0xff]  ;;  %v7085_v46 = vld [vmem:[#allocation25 + $0x6e8] sm:$0xff]  ;;  %v9752_v24 = vpack.c.bf16 %v7082_v45, %v7080_v48  ;;  %v7931_v63 = vld [vmem:[#allocation25 + $0xed8] sm:$0xff]  ;;  %v10004_v49 = vpack.c.bf16 %v7926_v56, %v7924_v4 }
 0xca8   : > { %7152 = vmatprep.mubr.f32.mxu0 %v10907_v2  ;;  %7894 = vmatprep.mubr.f32.mxu1 %v10907_v2  ;;  %v9976_v32 = vpack.c.bf16 %v7824_v27, %v7822_v19  ;;  %v10006_v26 = vpack.c.bf16 %v7931_v63, %v7929_v9  ;;  %v7933_v48 = vld [vmem:[#allocation25 + $0xee8] sm:$0xff]  ;;  %v7935_v45 = vld [vmem:[#allocation25 + $0xef8] sm:$0xff]  ;;  %v7932_v19 = vld [vmem:[#allocation25 + $0xee0] sm:$0xff]  ;;  %v8117_v63 = vlaneseq }
 0xca9   : > { %v7934_v27 = vld [vmem:[#allocation25 + $0xef0] sm:$0xff]  ;;  %v8034_v54 = vld [vmem:[#allocation25 + $0xfc0] sm:$0xff]  ;;  %v8009_v4 = vld [vmem:[#allocation9 + $0xf] sm:$0x1] }
 0xcaa   : > { %9733 = vmatpush1.bf16.msra.mxu0 %v9732_v52  ;;  %9957 = vmatpush1.bf16.msra.mxu1 %v9956_v21  ;;  %v9754_v52 = vpack.c.bf16 %v7087_v58, %v7085_v46  ;;  %v9978_v21 = vpack.c.bf16 %v7829_v42, %v7827_v34  ;;  %v8011_v46 = vld [vmem:[#allocation25 + $0xf08] sm:$0xff]  ;;  %v8013_v58 = vld [vmem:[#allocation25 + $0xf18] sm:$0xff]  ;;  %v10012_v34 = vpack.c.bf16 %v7934_v27, %v7932_v19 }
 0xcab   : > { %9735 = vmatprep.subr.bf16.mxu0 %v9734_v44  ;;  %9959 = vmatprep.subr.bf16.mxu1 %v9958_v57  ;;  %v7828_v44 = vld [vmem:[#allocation25 + $0xdf0] sm:$0xff]  ;;  %v7905_v57 = vld [vmem:[#allocation25 + $0xe08] sm:$0xff]  ;;  %v10014_v42 = vpack.c.bf16 %v8013_v58, %v8011_v46 }
 0xcac   : > { %v9980_v17 = vpack.c.bf16 %v7828_v44, %v7826_v25  ;;  %v9982_v11 = vpack.c.bf16 %v7907_v33, %v7905_v57  ;;  %v8014_v25 = vld [vmem:[#allocation25 + $0xf20] sm:$0xff]  ;;  %v8016_v44 = vld [vmem:[#allocation25 + $0xf30] sm:$0xff]  ;;  %v7903_v57 = vld [vmem:[#allocation9 + $0xe] sm:$0x1] }
 0xcad   : > { %v8019_v33 = vld [vmem:[#allocation25 + $0xf48] sm:$0xff] }
 0xcae   : > { %9737 = vmatpush1.bf16.msra.mxu0 %v9736_v51  ;;  %9961 = vmatpush1.bf16.msra.mxu1 %v9960_v31  ;;  %v7909_v51 = vld [vmem:[#allocation25 + $0xe28] sm:$0xff]  ;;  %v7911_v31 = vld [vmem:[#allocation25 + $0xe38] sm:$0xff] }
 0xcaf   : > { %9739 = vmatprep.subr.bf16.mxu0 %v9738_v8  ;;  %9963 = vmatprep.subr.bf16.mxu1 %v9962_v14  ;;  %v9986_v8 = vpack.c.bf16 %v7911_v31, %v7909_v51  ;;  %v7908_v14 = vld [vmem:[#allocation25 + $0xe20] sm:$0xff]  ;;  %v8023_v51 = vld [vmem:[#allocation25 + $0xf68] sm:$0xff]  ;;  %v8025_v31 = vld [vmem:[#allocation25 + $0xf78] sm:$0xff] }
 0xcb0   : > { %v9988_v18 = vpack.c.bf16 %v7910_v41, %v7908_v14  ;;  %v8024_v14 = vld [vmem:[#allocation25 + $0xf70] sm:$0xff]  ;;  %v8027_v41 = vld [vmem:[#allocation25 + $0xf88] sm:$0xff] }
 0xcb2   : > { %9741 = vmatpush1.bf16.msra.mxu0 %v9740_v16  ;;  %9965 = vmatpush1.bf16.msra.mxu1 %v9964_v39  ;;  %v7912_v16 = vld [vmem:[#allocation25 + $0xe40] sm:$0xff]  ;;  %v7914_v39 = vld [vmem:[#allocation25 + $0xe50] sm:$0xff] }
 0xcb3   : > { %9743 = vmatprep.subr.bf16.mxu0 %v9742_v30  ;;  %9967 = vmatprep.subr.bf16.mxu1 %v9966_v61  ;;  %v9992_v30 = vpack.c.bf16 %v7914_v39, %v7912_v16  ;;  %v9994_v61 = vpack.c.bf16 %v7919_v5, %v7917_v47  ;;  %v8033_v16 = vld [vmem:[#allocation25 + $0xfb8] sm:$0xff]  ;;  %v8030_v5 = vld [vmem:[#allocation25 + $0xfa0] sm:$0xff] }
 0xcb6   : > { %9745 = vmatpush1.bf16.msra.mxu0 %v9744_v36  ;;  %9969 = vmatpush1.bf16.msra.mxu1 %v9968_v35  ;;  %v7920_v36 = vld [vmem:[#allocation25 + $0xe80] sm:$0xff]  ;;  %v7922_v35 = vld [vmem:[#allocation25 + $0xe90] sm:$0xff] }
 0xcb7   : > { %9747 = vmatprep.subr.bf16.mxu0 %v9746_v53  ;;  %9971 = vmatprep.subr.bf16.mxu1 %v9970_v13  ;;  %v10000_v53 = vpack.c.bf16 %v7922_v35, %v7920_v36  ;;  %v10002_v13 = vpack.c.bf16 %v7927_v28, %v7925_v0  ;;  %v8041_v36 = vld [vmem:[#allocation25 + $0xff8] sm:$0xff]  ;;  %v8038_v28 = vld [vmem:[#allocation25 + $0xfe0] sm:$0xff] }
 0xcba   : > { %9749 = vmatpush1.bf16.msra.mxu0 %v9748_v22  ;;  %9973 = vmatpush1.bf16.msra.mxu1 %v9972_v29  ;;  %v7928_v22 = vld [vmem:[#allocation25 + $0xec0] sm:$0xff]  ;;  %v7930_v29 = vld [vmem:[#allocation25 + $0xed0] sm:$0xff] }
 0xcbb   : > { %9751 = vmatprep.subr.bf16.mxu0 %v9750_v10  ;;  %9975 = vmatprep.subr.bf16.mxu1 %v9974_v50  ;;  %v10008_v10 = vpack.c.bf16 %v7930_v29, %v7928_v22  ;;  %v10010_v50 = vpack.c.bf16 %v7935_v45, %v7933_v48  ;;  %v8115_v22 = vld [vmem:[#allocation27] sm:$0x3] }
 0xcbe   : > { %9753 = vmatpush1.bf16.msra.mxu0 %v9752_v24  ;;  %9977 = vmatpush1.bf16.msra.mxu1 %v9976_v32  ;;  %v8010_v24 = vld [vmem:[#allocation25 + $0xf00] sm:$0xff]  ;;  %v8012_v32 = vld [vmem:[#allocation25 + $0xf10] sm:$0xff] }
 0xcbf   : > { %9755 = vmatprep.subr.bf16.mxu0 %v9754_v52  ;;  %9979 = vmatprep.subr.bf16.mxu1 %v9978_v21  ;;  %v8017_v52 = vld [vmem:[#allocation25 + $0xf38] sm:$0xff]  ;;  %v10016_v21 = vpack.c.bf16 %v8012_v32, %v8010_v24 }
 0xcc0   : > { %v10018_v1 = vpack.c.bf16 %v8017_v52, %v8015_v60  ;;  %v8193_v52 = vld [vmem:[%s14301_s0 + $0x80] sm:$0xff]  ;;  %s10796_s0 = sshll.u32 %s10911_s1, 4  ;;  %s10797_s0 = int_to_ptr.vmem [resolvable:$false] %s10796_s0 }
 0xcc1   : > { %s10798_s30 = scalar_lea.vmem %s10797_s0, 32  ;;  %p10799_p2 = scmp.lt.s32.totalorder %s13786_s24, %s10797_s0 }
 0xcc2   : > { %9757 = vmatpush1.bf16.msra.mxu0 %v9756_v15  ;;  %9981 = vmatpush1.bf16.msra.mxu1 %v9980_v17  ;;  %v8021_v15 = vld [vmem:[#allocation25 + $0xf58] sm:$0xff]  ;;  %v10020_v17 = vpack.c.bf16 %v8016_v44, %v8014_v25  ;;  %p10800_p3 = scmp.lt.s32.totalorder %s10798_s30, %s10792_s25 }
 0xcc3   : > { %9983 = vmatprep.subr.bf16.mxu1 %v9982_v11  ;;  %v10022_v11 = vpack.c.bf16 %v8021_v15, %v8019_v33  ;;  %v8178_v44 = vld [vmem:[%s14302_s9 + $0x8] sm:$0xff] }
 0xcc4   : > { %p10801_p4 = por %p10800_p3, %p10799_p2 }
 0xcc5   : > { %7153 = vmatmul.mubr.f32.vlgmr.msra.gmra.mrb[10].mxu0 %v7055_v38  ;;  %7895 = vmatmul.mubr.f32.vlgmr.msra.gmra.mrb[54].mxu1 %v7797_v3  ;;  %v10026_v38 = vpack.c.bf16 %v8025_v31, %v8023_v51  ;;  %v8029_v3 = vld [vmem:[#allocation25 + $0xf98] sm:$0xff] }
 0xcc6   : > { %9985 = vmatpush1.bf16.msra.mxu1 %v9984_v37  ;;  %8000 = vmatprep.mubr.f32.mxu1 %v10907_v2  ;;  %v10024_v37 = vpack.c.bf16 %v8020_v62, %v8018_v23  ;;  %v10030_v6 = vpack.c.bf16 %v8029_v3, %v8027_v41  ;;  %v8180_v3 = vld [vmem:[%s14302_s9 + $0x18] sm:$0xff]  ;;  %p10802_p7 = pnand %p10801_p4, %p10795_p10 }
 0xcc7   : > { %9987 = vmatprep.subr.bf16.mxu1 %v9986_v8  ;;  %v8022_v8 = vld [vmem:[#allocation25 + $0xf60] sm:$0xff] }
 0xcc8   : > { %v10028_v7 = vpack.c.bf16 %v8024_v14, %v8022_v8  ;;  %v8196_v8 = vld [vmem:[%s14302_s9 + $0x98] sm:$0xff]  ;;  %v8179_v14 = vld [vmem:[%s14302_s9 + $0x10] sm:$0xff] }
 0xcca   : > { %9989 = vmatpush1.bf16.msra.mxu1 %v9988_v18  ;;  %v8026_v18 = vld [vmem:[#allocation25 + $0xf80] sm:$0xff] }
 0xccb   : > { %9991 = vmatprep.subr.bf16.mxu1 %v9990_v12  ;;  %v8031_v12 = vld [vmem:[#allocation25 + $0xfa8] sm:$0xff] }
 0xccc   : > { %v10034_v47 = vpack.c.bf16 %v8033_v16, %v8031_v12  ;;  %v8181_v12 = vld [vmem:[%s14302_s9 + $0x20] sm:$0xff]  ;;  %v8182_v16 = vld [vmem:[%s14302_s9 + $0x28] sm:$0xff] }
 0xcce   : > { %9993 = vmatpush1.bf16.msra.mxu1 %v9992_v30  ;;  %v8032_v30 = vld [vmem:[#allocation25 + $0xfb0] sm:$0xff] }
 0xccf   : > { %9995 = vmatprep.subr.bf16.mxu1 %v9994_v61  ;;  %v8035_v61 = vld [vmem:[#allocation25 + $0xfc8] sm:$0xff]  ;;  %v10036_v43 = vpack.c.bf16 %v8032_v30, %v8030_v5  ;;  %v10056_v5 = vpack.c.bf16 %v8182_v16, %v8181_v12 }
 0xcd0   : > { %v10038_v40 = vpack.c.bf16 %v8037_v55, %v8035_v61  ;;  %v8183_v61 = vld [vmem:[%s14302_s9 + $0x30] sm:$0xff]  ;;  %v8184_v55 = vld [vmem:[%s14302_s9 + $0x38] sm:$0xff] }
 0xcd2   : > { %9997 = vmatpush1.bf16.msra.mxu1 %v9996_v20  ;;  %v8036_v20 = vld [vmem:[#allocation25 + $0xfd0] sm:$0xff] }
 0xcd3   : > { %9999 = vmatprep.subr.bf16.mxu1 %v9998_v59  ;;  %v8039_v59 = vld [vmem:[#allocation25 + $0xfe8] sm:$0xff]  ;;  %v10040_v35 = vpack.c.bf16 %v8036_v20, %v8034_v54  ;;  %v10060_v54 = vpack.c.bf16 %v8184_v55, %v8183_v61 }
 0xcd4   : > { %v10042_v0 = vpack.c.bf16 %v8041_v36, %v8039_v59  ;;  %v8185_v59 = vld [vmem:[%s14302_s9 + $0x40] sm:$0xff]  ;;  %v8186_v36 = vld [vmem:[%s14302_s9 + $0x48] sm:$0xff] }
 0xcd6   : > { %10001 = vmatpush1.bf16.msra.mxu1 %v10000_v53  ;;  %v8040_v53 = vld [vmem:[#allocation25 + $0xff0] sm:$0xff] }
 0xcd7   : > { %10003 = vmatprep.subr.bf16.mxu1 %v10002_v13  ;;  %v10044_v13 = vpack.c.bf16 %v8040_v53, %v8038_v28  ;;  %v10064_v28 = vpack.c.bf16 %v8186_v36, %v8185_v59 }
 0xcda   : > { %10005 = vmatpush1.bf16.msra.mxu1 %v10004_v49  ;;  %v13656_v49 = vshrl.u32 %v8117_v63, 7 }
 0xcdb   : > { %10007 = vmatprep.subr.bf16.mxu1 %v10006_v26 }
 0xcdc   : > { %v8119_v26 = vsub.s32 0, %v13656_v49  ;;  %v8123_v29 = vsub.s32 1, %v13656_v49 }
 0xcde   : > { %10009 = vmatpush1.bf16.msra.mxu1 %v10008_v10  ;;  %v8120_v48 = vrot.slane %v8115_v22, %v8119_v26  ;;  %v8124_v10 = vrot.slane %v8115_v22, %v8123_v29 }
 0xcdf   : > { %10011 = vmatprep.subr.bf16.mxu1 %v10010_v50 }
 0xce2   : > { %10013 = vmatpush1.bf16.msra.mxu1 %v10012_v34 }
 0xce3   : > { %10015 = vmatprep.subr.bf16.mxu1 %v10014_v42 }
 0xce5   : > { %8001 = vmatmul.mubr.f32.vlgmr.msra.gmra.mrb[54].mxu1 %v7903_v57 }
 0xce6   : > { %10017 = vmatpush1.bf16.msra.mxu1 %v10016_v21  ;;  %8106 = vmatprep.mubr.f32.mxu1 %v10907_v2  ;;  %v8028_v2 = vld [vmem:[#allocation25 + $0xf90] sm:$0xff]  ;;  %v8194_v21 = vld [vmem:[%s14302_s9 + $0x88] sm:$0xff] }
 0xce7   : > { %10019 = vmatprep.subr.bf16.mxu1 %v10018_v1  ;;  %v10032_v39 = vpack.c.bf16 %v8028_v2, %v8026_v18  ;;  %v8177_v1 = vld [vmem:[%s14302_s9] sm:$0xff]  ;;  %v10046_v25 = vpack.c.bf16 %v8194_v21, %v8193_v52  ;;  %v10052_v18 = vpack.c.bf16 %v8180_v3, %v8179_v14 }
 0xce8   : > { %v10048_v57 = vpack.c.bf16 %v8178_v44, %v8177_v1 }
 0xce9   : > { %10047 = vmatprep.subr.bf16.mxu0 %v10046_v25 }
 0xcea   : > { %10021 = vmatpush1.bf16.msra.mxu1 %v10020_v17  ;;  %10049 = vmatpush3.bf16.msra.mxu0 %v10048_v57 }
 0xceb   : > { %10023 = vmatprep.subr.bf16.mxu1 %v10022_v11 }
 0xcee   : > { %10025 = vmatpush1.bf16.msra.mxu1 %v10024_v37 }
 0xcef   : > { %10027 = vmatprep.subr.bf16.mxu1 %v10026_v38  ;;  %v8195_v38 = vld [vmem:[%s14302_s9 + $0x90] sm:$0xff] }
 0xcf0   : > { %v10050_v41 = vpack.c.bf16 %v8196_v8, %v8195_v38 }
 0xcf2   : > { %10029 = vmatpush1.bf16.msra.mxu1 %v10028_v7  ;;  %v8197_v7 = vld [vmem:[%s14302_s9 + $0xa0] sm:$0xff]  ;;  %10051 = vmatprep.subr.bf16.mxu0 %v10050_v41 }
 0xcf3   : > { %10031 = vmatprep.subr.bf16.mxu1 %v10030_v6  ;;  %v8198_v6 = vld [vmem:[%s14302_s9 + $0xa8] sm:$0xff]  ;;  %10053 = vmatpush3.bf16.msra.mxu0 %v10052_v18 }
 0xcf4   : > { %v10054_v2 = vpack.c.bf16 %v8198_v6, %v8197_v7 }
 0xcf6   : > { %10033 = vmatpush1.bf16.msra.mxu1 %v10032_v39  ;;  %v8199_v39 = vld [vmem:[%s14302_s9 + $0xb0] sm:$0xff]  ;;  %10055 = vmatprep.subr.bf16.mxu0 %v10054_v2 }
 0xcf7   : > { %10035 = vmatprep.subr.bf16.mxu1 %v10034_v47  ;;  %v8200_v47 = vld [vmem:[%s14302_s9 + $0xb8] sm:$0xff]  ;;  %10057 = vmatpush3.bf16.msra.mxu0 %v10056_v5 }
 0xcf8   : > { %v10058_v30 = vpack.c.bf16 %v8200_v47, %v8199_v39 }
 0xcfa   : > { %10037 = vmatpush1.bf16.msra.mxu1 %v10036_v43  ;;  %v8201_v43 = vld [vmem:[%s14302_s9 + $0xc0] sm:$0xff]  ;;  %10059 = vmatprep.subr.bf16.mxu0 %v10058_v30 }
 0xcfb   : > { %10039 = vmatprep.subr.bf16.mxu1 %v10038_v40  ;;  %v8202_v40 = vld [vmem:[%s14302_s9 + $0xc8] sm:$0xff]  ;;  %10061 = vmatpush3.bf16.msra.mxu0 %v10060_v54 }
 0xcfc   : > { %v10062_v20 = vpack.c.bf16 %v8202_v40, %v8201_v43 }
 0xcfe   : > { %10041 = vmatpush1.bf16.msra.mxu1 %v10040_v35  ;;  %v8203_v35 = vld [vmem:[%s14302_s9 + $0xd0] sm:$0xff]  ;;  %10063 = vmatprep.subr.bf16.mxu0 %v10062_v20 }
 0xcff   : > { %10043 = vmatprep.subr.bf16.mxu1 %v10042_v0  ;;  %v8204_v0 = vld [vmem:[%s14302_s9 + $0xd8] sm:$0xff]  ;;  %10065 = vmatpush3.bf16.msra.mxu0 %v10064_v28 }
 0xd00   : > { %v10066_v53 = vpack.c.bf16 %v8204_v0, %v8203_v35 }
 0xd02   : > { %10045 = vmatpush1.bf16.msra.mxu1 %v10044_v13  ;;  %v8187_v13 = vld [vmem:[%s14302_s9 + $0x50] sm:$0xff]  ;;  %10067 = vmatprep.subr.bf16.mxu0 %v10066_v53 }
 0xd05   : > { %8107 = vmatmul.mubr.f32.vlgmr.msra.gmra.mrb[54].mxu1 %v8009_v4  ;;  %v8188_v4 = vld [vmem:[%s14302_s9 + $0x58] sm:$0xff] }
 0xd06   : > { %v10068_v63 = vpack.c.bf16 %v8188_v4, %v8187_v13 }
 0xd08   : > { %10069 = vmatpush3.bf16.msra.mxu0 %v10068_v63 }
 0xd98   : > { %v7154_v56 = vpop.f32.mrb[10].mxu0 }
 0xd99   : > { %v7156_v9 = vpop.f32.mrb[11].mxu0 }
 0xdd8   : > { %v8108_v45 = vpop.f32.mrb[54].mxu1 }
 0xdd9   : > { %v10078_v50 = vadd.f32 %v8108_v45, %v7154_v56  ;;  %v8110_v19 = vpop.f32.mrb[55].mxu1  ;;  %v8205_v56 = vld [vmem:[%s14302_s9 + $0xe0] sm:$0xff]  ;;  %v8190_v45 = vld [vmem:[%s14302_s9 + $0x68] sm:$0xff] }
 0xdda   : > { %v10079_v27 = vadd.f32 %v8110_v19, %v7156_v9  ;;  %v8206_v9 = vld [vmem:[%s14302_s9 + $0xe8] sm:$0xff] }
 0xddb   : > { %v8127_v46 = vadd.f32 %v10078_v50, %v8120_v48  ;;  %v10070_v22 = vpack.c.bf16 %v8206_v9, %v8205_v56  ;;  %v8189_v48 = vld [vmem:[%s14302_s9 + $0x60] sm:$0xff]  ;;  %v8208_v50 = vld [vmem:[%s14302_s9 + $0xf8] sm:$0xff] }
 0xddc   : > { %v8128_v58 = vadd.f32 %v10079_v27, %v8124_v10  ;;  %v8207_v10 = vld [vmem:[%s14302_s9 + $0xf0] sm:$0xff]  ;;  %v10072_v19 = vpack.c.bf16 %v8190_v45, %v8189_v48 }
 0xddd   : > { %v8129_v34 = vmax.f32 %v8127_v46, 0.0  ;;  %10071 = vmatprep.subr.bf16.mxu0 %v10070_v22  ;;  %v10074_v27 = vpack.c.bf16 %v8208_v50, %v8207_v10  ;;  %v8191_v46 = vld [vmem:[%s14302_s9 + $0x70] sm:$0xff] }
 0xdde   : > { %v8130_v42 = vmax.f32 %v8128_v58, 0.0  ;;  %v8192_v58 = vld [vmem:[%s14302_s9 + $0x78] sm:$0xff]  ;;  %10073 = vmatpush3.bf16.msra.mxu0 %v10072_v19 }
 0xddf   : > { %v8134_v24 = vsel %vm8133_vm7, %v8129_v34, 0.0  ;;  %10075 = vmatprep.subr.bf16.mxu0 %v10074_v27 }
 0xde0   : > { %v8135_v32 = vsel %vm8133_vm7, %v8130_v42, 0.0 }
 0xde1   : > { %v8136_v60 = vadd.f32 %v8135_v32, %v8134_v24 }
 0xde3   : > { %8137 = vadd.xlane.f32.xlu1 %v8136_v60  ;;  %v10910_v60 = vmov 1966171168  }
 0xde4   : > { %v8161_v52 = vunpack.c.l.s4 %v10910_v60 }
 0xde6   : > { %v8162_v21 = vunpack.c.0.s8 %v8161_v52 }
 0xde8   : > { %v8165_v57 = vsub.s32 %v8162_v21, %v13656_v49 }
 0xe70   : > { %v8138_v33 = vpop.xlane.xlu1 %8137 }
 0xe71   : > { %v8141_v15 = vmul.f32 0.00390625, %v8138_v33 }
 0xe73   : > { %v13678_v17 = vsub.f32 %v8129_v34, %v8141_v15  ;;  %v13680_v11 = vsub.f32 %v8130_v42, %v8141_v15  ;;  %v10076_v34 = vpack.c.bf16 %v8192_v58, %v8191_v46 }
 0xe75   : > { %v8144_v23 = vmul.f32 %v13678_v17, %v13678_v17  ;;  %v8145_v62 = vmul.f32 %v13680_v11, %v13680_v11  ;;  %10077 = vmatpush3.bf16.msra.mxu0 %v10076_v34 }
 0xe77   : > { %v8146_v51 = vsel %vm8133_vm7, %v8144_v23, 0.0  ;;  %v8147_v31 = vsel %vm8133_vm7, %v8145_v62, 0.0  ;;  %v8131_v23 = vld [vmem:[#allocation28] sm:$0x3] }
 0xe78   : > { %v8148_v37 = vadd.f32 %v8147_v31, %v8146_v51  ;;  %v8132_v51 = vld [vmem:[#allocation30] sm:$0x3] }
 0xe7a   : > { %8149 = vadd.xlane.f32.xlu0 %v8148_v37 }
 0xf07   : > { %v8150_v42 = vpop.xlane.xlu0 %8149 }
 0xf08   : > { %v8152_v24 = vmul.f32 0.00390625, %v8150_v42 }
 0xf0a   : > { %v8153_v32 = vadd.f32 1e-16, %v8152_v24 }
 0xf0c   : > { %10386 = vrsqrt.f32 %v8153_v32 }
 0xf16   : > { %v10387_v1 = vpop.eup %10386 }
 0xf17   : > { %v8155_v25 = vmul.f32 %v10387_v1, %v13678_v17  ;;  %v8156_v44 = vmul.f32 %v10387_v1, %v13680_v11  ;;  %v8209_v11 = vld [vmem:[#allocation31] sm:$0x1] }
 0xf19   : > { %v8159_v33 = vcombine.low %v8155_v25, %v8156_v44 }
 0xf1b   : > { %v8166_v15 = vrot.slane %v8159_v33, %v8165_v57 }
 0xf1d   : > { %v8173_v62 = vrot.slane %v8166_v15, %v8165_v57 }
 0xf1f   : > { %v8175_v31 = vmul.f32 %v8173_v62, %v8131_v23 }
 0xf21   : > { %v8176_v37 = vadd.f32 %v8175_v31, %v8132_v51 }
 0xf23   : > { %v8218_v38 = vrot.slane %v8176_v37, %v8123_v29  ;;  %v8214_v8 = vrot.slane %v8176_v37, %v8119_v26 }
 0xf25   : > { %8285 = vmatprep.mubr.f32.mxu0 %v8218_v38 }
 0xf26   : > { %8286 = vmatmul.mubr.f32.vlgmr.msra.gmra.mrb[12].mxu0 %v8214_v8 }
 0xff9   : > { %v8919_v17 = vpop.f32.mrb[12].mxu0 }
 0xffa   : > { %v8920_v14 = vpop.f32.mrb[13].mxu0 }
 0xffb   : > { %v8921_v41 = vadd.f32 %v8920_v14, %v8919_v17 }
 0xffd   : > { %v8288_v3 = vadd.f32 %v8921_v41, %v8209_v11 }
 0xfff   : > { %8292 = vst.msk [vmem:[%s784_s19] sm:$0x1] %vm8291_vm8, %v8288_v3 }
0x1000   : > { %10805 = shalt.err (!%p10802_p7)
}
0x1001   : > { %s10806_s27 = scalar_lea.hbm %s13784_s3, 16  ;;  %s10810_s26 = scalar_lea.hbm %s14305_s29, 32 }
0x1002   : > { %p10807_p8 = scmp.ne.s32.totalorder %s13784_s3, %s10806_s27  ;;  %p10811_p1 = scmp.lt.u32.totalorder %s13784_s3, %s14305_s29 }
0x1003   : > { %p10812_p0 = scmp.lt.u32.totalorder %s10810_s26, %s10806_s27  ;;  %p10814_p5 = scmp.lt.u32.totalorder %s10806_s27, %s13784_s3 }
0x1004   : > { %p10808_p11 = pnand %p10807_p8, %p14306_p9 }
0x1005   : > { %p10813_p6 = por %p10812_p0, %p10811_p1 }
0x1006   : > { %p10809_p13 = pneg %p10808_p11 }
0x1007   : > { %p10815_p12 = por %p10814_p5, %p10813_p6 }
0x1009   : > { %p10816_p10 = pnand %p10815_p12, %p10809_p13 }
0x100b   : > { %10819 = shalt.err (!%p10816_p10)
}
0x100c   : > { %10245 = dma.vmem_to_hbm [thread:$0]  (%p14306_p9), %s13786_s24, 16, %s13784_s3, %s8294_s21  }
0x100d PF: > { %s14307_s23 = sld [smem:[#allocation46_spill]]  ;;  %s14308_s25 = sld [smem:[#allocation43_spill]] }
0x100e   : > { %s14309_s1 = sld [smem:[#allocation50_spill]] }
0x1013   : > { %p10322_p2 = scmp.ge.s32.totalorder %s14307_s23, 2  ;;  %s8318_s0 = sand.u32 1, %s14308_s25  }
0x1014   : > { %p14310_p3 = scmp.ne.s32.totalorder %s14309_s1, 0  ;;  %s8319_s30 = scalar_lea.sflag [#allocation12], %s8318_s0 }
0x1016   : > { %p10291_p4 = pnand %p10322_p2, %p14310_p3 }
0x1018   : > { %10869 = dma.done.wait (!%p10291_p4), %s8319_s30, 16  }
0x1019   : > { %10871 = vsyncadd (!%p10291_p4), %s8319_s30, 4294967280  ;;  %s14311_s21 = sld [smem:[#allocation47_spill]]  ;;  %s14312_s0 = sld [smem:[#allocation44_spill]] }
0x101a   : > { %s14313_s30 = sld [smem:[#allocation45_spill]]  ;;  %s14314_s20 = sld [smem:[#allocation48_spill]] }
0x101f   : > { %p37_p7 = scmp.ge.s32.totalorder %s14311_s21, 4  }
0x1021   :  { %39 = sbr.rel (!%p37_p7) target bundleno = 21 (0x15), region = 234 }
0x1028   :  { %8323 = vsyncpa [#allocation11], 1 }
0x1029   :  { %8325 = vsyncpa [#allocation11 + $0x1], 1 }
0x102a   :  { %8326 = vsyncpa [#allocation14], 1 }
0x102b   :  { %8327 = vsyncpa [#allocation17], 1 }
0x102c   :  { %8328 = vsyncpa [#allocation20], 1 }
0x102d   :  { %8329 = vsyncpa [#allocation23], 1 }
0x102e   :  { %8330 = vsyncpa [#allocation26], 1 }
0x102f   :  { %8331 = vsyncpa [#allocation29], 1 }
0x1030   :  { %8332 = vsyncpa [#allocation32], 1 }
0x1031   :  { %8333 = vsyncpa [#allocation12], 1 }
0x1032   :  { %8335 = vsyncpa [#allocation12 + $0x1], 1 }

</bundles_post_ra>
